<compile_context>
chip_gen: v7x
topology: tpu7x:2x2x1
jax: 0.10.0
libtpu: 0.0.40
codegen_flags: <defaults>
</compile_context>

<pallas_src>
import functools

import jax
import jax.numpy as jnp
from jax.experimental import pallas as pl
from jax.experimental.pallas import tpu as pltpu


def _round_up(x, m):
    return (x + m - 1) // m * m


# ---------------------------------------------------------------------------
# Pallas kernels
# ---------------------------------------------------------------------------
def conv1_kernel(cols_ref, w_ref, b_ref, o_ref):
    """Paired-row conv1 GEMM: (tm1,64)x(64,128) -> bias -> LeakyReLU(0.2).

    Two horizontally adjacent output pixels are packed per row via a
    block-diagonal weight, so the output tile is lane-dense (last dim 128).
    """
    acc = jnp.dot(cols_ref[...], w_ref[...], preferred_element_type=jnp.float32)
    acc = acc + b_ref[...]
    acc = jnp.where(acc > 0, acc, 0.2 * acc)
    o_ref[...] = acc.astype(o_ref.dtype)


def conv2_head_kernel(y_ref, w2_ref, b2_ref, w3_ref, b3_ref, o_ref, acc_ref, *, tb):
    """Implicit-GEMM conv2 + bias + LeakyReLU + Linear(6272,1) + Sigmoid.

    y_ref:   (tb, 10, 10, 256) bf16  parity-split zero-padded conv1 activations
    w2_ref:  (9, 256, 128)     bf16  conv2 weight grouped per (dh, dw) tap block
    b2_ref:  (1, 128)  f32
    w3_ref:  (tb*64, 128) f32        head weight, (h,w,c) order, 8x8 zero-padded, tiled
    b3_ref:  (1, 1)    f32
    o_ref:   (tb, 1)   f32
    acc_ref: (tb*64, 128) f32 scratch
    """
    # Implicit GEMM: 9 tap-block matmuls, K=256 each (MXU-friendly), accumulated
    # in f32 VMEM.  Row index of acc = b*64 + oh*8 + ow (oh/ow==7 rows are
    # padding; they are zeroed by w3 in the head).
    for t in range(9):
        dh, dw = t // 3, t % 3
        lhs = y_ref[:, dh:dh + 8, dw:dw + 8, :].reshape(tb * 64, 256)
        part = jnp.dot(lhs, w2_ref[t], preferred_element_type=jnp.float32)
        if t == 0:
            acc_ref[...] = part
        else:
            acc_ref[...] += part
    z = acc_ref[...] + b2_ref[...]
    z = jnp.where(z > 0, z, 0.2 * z)
    # TODO(synk): training-mode Dropout(0.3) (pltpu.prng_*) not implemented; eval = identity.
    prod = z * w3_ref[...]                                  # fold Linear weight (VPU)
    s = jnp.sum(prod.reshape(tb, 64, 128), axis=2)          # (tb, 64) lane reduce
    s = jnp.sum(s, axis=1, keepdims=True)                   # (tb, 1)
    o_ref[...] = jax.nn.sigmoid(s + b3_ref[...]).astype(o_ref.dtype)


# ---------------------------------------------------------------------------
# XLA glue: conv1 im2col (C=1, tiny), patch order (kh, kw)
# ---------------------------------------------------------------------------
def im2col_c1(x, k, stride, pad):
    """x: (N, H, W, 1) -> (N*OH*OW, k*k)."""
    x = jnp.pad(x, ((0, 0), (pad, pad), (pad, pad), (0, 0)))
    n, h, w, _ = x.shape
    oh = (h - k) // stride + 1
    ow = (w - k) // stride + 1
    patches = []
    for i in range(k):
        for j in range(k):
            patches.append(x[:, i:i + stride * oh:stride, j:j + stride * ow:stride, 0])
    cols = jnp.stack(patches, axis=-1).reshape(n * oh * ow, k * k)
    return cols, oh, ow


# ---------------------------------------------------------------------------
# Forward pass
# ---------------------------------------------------------------------------
def discriminator_forward(x, prep):
    w1p, b1r, w2r, b2r, w3s, b3r = prep
    n = x.shape[0]

    # Batch block for the fused conv2+head kernel: adaptive so tiny batches do
    # not pay 16x padding waste, large batches amortize per-grid-step overhead.
    # (For v7x megacore, realistic batches give npad//tb >= 2 grid steps.)
    tb = int(min(32, _round_up(n, 8)))
    npad = _round_up(n, tb)

    x = jnp.transpose(x, (0, 2, 3, 1)).astype(jnp.bfloat16)        # NCHW -> NHWC

    # --- Conv2d(1,64,k5,s2,p2) + LeakyReLU(0.2); Dropout = identity (eval) ---
    cols1, oh1, ow1 = im2col_c1(x, 5, 2, 2)                        # (n*196, 25)
    cols1 = jnp.pad(cols1, ((0, 0), (0, 7)))                       # K 25 -> 32
    cols1 = cols1.reshape(n * oh1 * ow1 // 2, 64)                  # pair even/odd ow
    m1 = cols1.shape[0]                                            # n*98
    tm1 = int(min(1024, _round_up(m1, 8)))                         # big, adaptive row tile
    m1p = _round_up(m1, tm1)
    cols1 = jnp.pad(cols1, ((0, m1p - m1), (0, 0)))
    y1 = pl.pallas_call(
        conv1_kernel,
        out_shape=jax.ShapeDtypeStruct((m1p, 128), jnp.bfloat16),
        grid=(m1p // tm1,),
        in_specs=[
            pl.BlockSpec((tm1, 64), lambda i: (i, 0)),
            pl.BlockSpec((64, 128), lambda i: (0, 0)),
            pl.BlockSpec((1, 128), lambda i: (0, 0)),
        ],
        out_specs=pl.BlockSpec((tm1, 128), lambda i: (i, 0)),
        compiler_params=pltpu.CompilerParams(
            dimension_semantics=("parallel",),
            vmem_limit_bytes=32 * 1024 * 1024,
        ),
    )(cols1, w1p, b1r)
    y1 = y1[:m1].reshape(n, oh1, ow1, 64)                          # (n, 14, 14, 64)

    # --- Conv2d(64,128,k5,s2,p2)+LReLU + Flatten + Linear(6272,1) + Sigmoid ---
    # Pad batch to npad, pad spatially (conv pad 2 + 1 extra zero row/col for the
    # 8x8 output padding), then split into the 4 stride-2 parity grids so every
    # conv tap is a contiguous (tb,8,8,256) window inside the kernel.
    ypad = jnp.pad(y1, ((0, npad - n), (2, 4), (2, 4), (0, 0)))    # (npad, 20, 20, 64)
    y1p4 = ypad.reshape(npad, 10, 2, 10, 2, 64).transpose(0, 1, 3, 2, 4, 5)
    y1p4 = y1p4.reshape(npad, 10, 10, 256)

    w3t = jnp.tile(w3s, (tb, 1))                                   # (tb*64, 128)

    flops = 2 * npad * 64 * (9 * 256) * 128 + 4 * npad * 64 * 128
    bytes_accessed = (npad * 10 * 10 * 256 * 2 + 9 * 256 * 128 * 2
                      + 128 * 4 + tb * 64 * 128 * 4 + 4 + npad * 4)
    # NOTE: grid-invariant inputs (w2r, b2r, w3t, b3r) are small enough that the
    # default double-buffering fits comfortably in VMEM on all generations.
    out = pl.pallas_call(
        functools.partial(conv2_head_kernel, tb=tb),
        out_shape=jax.ShapeDtypeStruct((npad, 1), jnp.float32),
        grid=(npad // tb,),
        in_specs=[
            pl.BlockSpec((tb, 10, 10, 256), lambda i: (i, 0, 0, 0)),
            pl.BlockSpec((9, 256, 128), lambda i: (0, 0, 0)),
            pl.BlockSpec((1, 128), lambda i: (0, 0)),
            pl.BlockSpec((tb * 64, 128), lambda i: (0, 0)),
            pl.BlockSpec((1, 1), lambda i: (0, 0)),
        ],
        out_specs=pl.BlockSpec((tb, 1), lambda i: (i, 0)),
        scratch_shapes=[pltpu.VMEM((tb * 64, 128), jnp.float32)],
        compiler_params=pltpu.CompilerParams(
            dimension_semantics=("parallel",),
            vmem_limit_bytes=32 * 1024 * 1024,
        ),
        cost_estimate=pl.CostEstimate(
            flops=flops, transcendentals=npad, bytes_accessed=bytes_accessed),
    )(y1p4, w2r, b2r, w3t, b3r)
    return out[:n]


# ---------------------------------------------------------------------------
# Parameters: PyTorch-shaped init + one-time layout preprocessing
# ---------------------------------------------------------------------------
def init_params(key):
    k1, k2, k3, k4, k5, k6 = jax.random.split(key, 6)
    w1 = 0.05 * jax.random.normal(k1, (64, 1, 5, 5), jnp.float32)
    b1 = 0.01 * jax.random.normal(k2, (64,), jnp.float32)
    w2 = 0.02 * jax.random.normal(k3, (128, 64, 5, 5), jnp.float32)
    b2 = 0.01 * jax.random.normal(k4, (128,), jnp.float32)
    w3 = 0.01 * jax.random.normal(k5, (1, 128 * 7 * 7), jnp.float32)
    b3 = 0.01 * jax.random.normal(k6, (1,), jnp.float32)
    return (w1, b1, w2, b2, w3, b3)


def prepare_params(params):
    """One-time weight re-layout (done outside the jitted forward)."""
    w1, b1, w2, b2, w3, b3 = params
    # conv1: (64,1,5,5) -> (25,64) in (kh,kw) order, then block-diagonal (64,128)
    # so two adjacent output pixels come out of one lane-dense GEMM row.
    w1m = jnp.transpose(w1, (2, 3, 1, 0)).reshape(25, 64)
    w1big = jnp.zeros((64, 128), jnp.float32)
    w1big = w1big.at[0:25, 0:64].set(w1m)
    w1big = w1big.at[32:57, 64:128].set(w1m)
    w1p = w1big.astype(jnp.bfloat16)
    b1r = jnp.concatenate([b1, b1]).reshape(1, 128).astype(jnp.float32)
    # conv2: (128,64,5,5) -> 9 (dh,dw) blocks of K=256 in (hp,wp,c) parity order,
    # zero-padded where kh==5 or kw==5.
    w2p = jnp.pad(jnp.transpose(w2, (2, 3, 1, 0)), ((0, 1), (0, 1), (0, 0), (0, 0)))
    w2r = w2p.reshape(3, 2, 3, 2, 64, 128).transpose(0, 2, 1, 3, 4, 5)
    w2r = w2r.reshape(9, 256, 128).astype(jnp.bfloat16)
    b2r = b2.reshape(1, 128).astype(jnp.float32)
    # head: PyTorch flatten is (c,h,w); reorder to (h,w,c), zero-pad 7x7 -> 8x8.
    w3hwc = jnp.transpose(w3.reshape(128, 7, 7), (1, 2, 0))          # (7,7,128)
    w3s = jnp.pad(w3hwc, ((0, 1), (0, 1), (0, 0))).reshape(64, 128).astype(jnp.float32)
    b3r = b3.reshape(1, 1).astype(jnp.float32)
    return (w1p, b1r, w2r, b2r, w3s, b3r)


# ---------------------------------------------------------------------------
# Pure-JAX reference (eval-mode dropout), for a loose correctness check
# ---------------------------------------------------------------------------
def reference_forward(x, params):
    w1, b1, w2, b2, w3, b3 = params

    def conv(h, w, b):
        y = jax.lax.conv_general_dilated(
            h, w, window_strides=(2, 2), padding=((2, 2), (2, 2)),
            dimension_numbers=("NCHW", "OIHW", "NCHW"))
        return y + b.reshape(1, -1, 1, 1)

    h = conv(x, w1, b1)
    h = jnp.where(h > 0, h, 0.2 * h)
    h = conv(h, w2, b2)
    h = jnp.where(h > 0, h, 0.2 * h)
    h = h.reshape(h.shape[0], -1)                    # (c,h,w) flatten, matches PyTorch
    logits = h @ w3.T + b3
    return jax.nn.sigmoid(logits)


if __name__ == "__main__":
    key = jax.random.PRNGKey(0)
    pkey, xkey = jax.random.split(key)
    params = init_params(pkey)
    prep = prepare_params(params)          # weight layout work done exactly once
    # MNIST-like input: batch=2, 1 channel, 28x28 (required by Linear(128*7*7, 1))
    x = jax.random.normal(xkey, (2, 1, 28, 28), jnp.float32)

    fwd = jax.jit(discriminator_forward)
    out = jax.block_until_ready(fwd(x, prep))
    ref = jax.block_until_ready(jax.jit(reference_forward)(x, params))

    assert out.shape == (2, 1)
    assert bool(jnp.all(jnp.isfinite(out)))
    assert bool(jnp.all((out >= 0.0) & (out <= 1.0)))
    assert float(jnp.max(jnp.abs(out - ref))) < 2e-2   # bf16 GEMMs vs f32 reference
    print("KERNEL_OK")
</pallas_src>

<mosaic_0001>
module attributes {stable_mosaic.version = 11 : i64} {
  func.func @conv1_kernel(%arg0: i32, %arg1: memref<200x64xbf16, #tpu.memory_space<vmem>>, %arg2: memref<64x128xbf16, #tpu.memory_space<vmem>>, %arg3: memref<1x128xf32, #tpu.memory_space<vmem>>, %arg4: memref<200x128xbf16, #tpu.memory_space<vmem>>) attributes {dimension_semantics = [#tpu.dimension_semantics<parallel>], iteration_bounds = array<i64: 1>, scalar_prefetch = 0 : i64, scratch_operands = 0 : i64, tpu.core_type = #tpu.core_type<tc>, window_params = [{transform_indices = @transform_0, window_bounds = array<i64: 200, 64>}, {pipeline_mode = #tpu.pipeline_mode<synchronous>, transform_indices = @transform_1, window_bounds = array<i64: 64, 128>}, {pipeline_mode = #tpu.pipeline_mode<synchronous>, transform_indices = @transform_2, window_bounds = array<i64: 1, 128>}, {transform_indices = @transform_3, window_bounds = array<i64: 200, 128>}]} {
    %c0 = arith.constant 0 : index
    %c0_0 = arith.constant 0 : index
    %0 = vector.load %arg1[%c0, %c0_0] : memref<200x64xbf16, #tpu.memory_space<vmem>>, vector<200x64xbf16>
    %c0_1 = arith.constant 0 : index
    %c0_2 = arith.constant 0 : index
    %1 = vector.load %arg2[%c0_1, %c0_2] : memref<64x128xbf16, #tpu.memory_space<vmem>>, vector<64x128xbf16>
    %cst = arith.constant dense<0.000000e+00> : vector<200x128xf32>
    %2 = tpu.matmul %0, %1, %cst {dimension_numbers = #tpu.dot_dimension_numbers<[1], [0], [0], [1], [0, 0, 1, 1], [], []>} : vector<200x64xbf16>, vector<64x128xbf16>, vector<200x128xf32> -> vector<200x128xf32>
    %c0_3 = arith.constant 0 : index
    %c0_4 = arith.constant 0 : index
    %3 = vector.load %arg3[%c0_3, %c0_4] : memref<1x128xf32, #tpu.memory_space<vmem>>, vector<1x128xf32>
    %4 = vector.broadcast %3 : vector<1x128xf32> to vector<200x128xf32>
    %5 = arith.addf %2, %4 : vector<200x128xf32>
    %cst_5 = arith.constant 0.000000e+00 : f32
    %6 = vector.broadcast %cst_5 : f32 to vector<200x128xf32>
    %7 = arith.cmpf ogt, %5, %6 : vector<200x128xf32>
    %cst_6 = arith.constant 2.000000e-01 : f32
    %8 = vector.broadcast %cst_6 : f32 to vector<200x128xf32>
    %9 = arith.mulf %8, %5 : vector<200x128xf32>
    %10 = arith.select %7, %5, %9 : vector<200x128xi1>, vector<200x128xf32>
    %11 = arith.truncf %10 : vector<200x128xf32> to vector<200x128xbf16>
    %c0_7 = arith.constant 0 : index
    %c0_8 = arith.constant 0 : index
    %12 = vector.load %arg4[%c0_7, %c0_8] : memref<200x128xbf16, #tpu.memory_space<vmem>>, vector<200x128xbf16>
    tpu.vector_store %arg4[%c0_7, %c0_8], %11 {strides = array<i32>} : memref<200x128xbf16, #tpu.memory_space<vmem>>, vector<200x128xbf16>,
    return
  }
  func.func @transform_0(%arg0: i32) -> (i32, i32) {
    %c0_i32 = arith.constant 0 : i32
    %c0_i32_0 = arith.constant 0 : i32
    return %arg0, %c0_i32 : i32, i32
  }
  func.func @transform_1(%arg0: i32) -> (i32, i32) {
    %c0_i32 = arith.constant 0 : i32
    %c0_i32_0 = arith.constant 0 : i32
    %c0_i32_1 = arith.constant 0 : i32
    return %c0_i32, %c0_i32_0 : i32, i32
  }
  func.func @transform_2(%arg0: i32) -> (i32, i32) {
    %c0_i32 = arith.constant 0 : i32
    %c0_i32_0 = arith.constant 0 : i32
    %c0_i32_1 = arith.constant 0 : i32
    return %c0_i32, %c0_i32_0 : i32, i32
  }
  func.func @transform_3(%arg0: i32) -> (i32, i32) {
    %c0_i32 = arith.constant 0 : i32
    %c0_i32_0 = arith.constant 0 : i32
    return %arg0, %c0_i32 : i32, i32
  }
}

module attributes {stable_mosaic.version = 11 : i64} {
  func.func @conv2_head_kernel(%arg0: i32, %arg1: memref<8x10x10x256xbf16, #tpu.memory_space<vmem>>, %arg2: memref<9x256x128xbf16, #tpu.memory_space<vmem>>, %arg3: memref<1x128xf32, #tpu.memory_space<vmem>>, %arg4: memref<512x128xf32, #tpu.memory_space<vmem>>, %arg5: memref<1x1xf32, #tpu.memory_space<vmem>>, %arg6: memref<8x1xf32, #tpu.memory_space<vmem>>, %arg7: memref<512x128xf32, #tpu.memory_space<vmem>>) attributes {dimension_semantics = [#tpu.dimension_semantics<parallel>], iteration_bounds = array<i64: 1>, scalar_prefetch = 0 : i64, scratch_operands = 1 : i64, tpu.core_type = #tpu.core_type<tc>, window_params = [{transform_indices = @transform_0, window_bounds = array<i64: 8, 10, 10, 256>}, {pipeline_mode = #tpu.pipeline_mode<synchronous>, transform_indices = @transform_1, window_bounds = array<i64: 9, 256, 128>}, {pipeline_mode = #tpu.pipeline_mode<synchronous>, transform_indices = @transform_2, window_bounds = array<i64: 1, 128>}, {pipeline_mode = #tpu.pipeline_mode<synchronous>, transform_indices = @transform_3, window_bounds = array<i64: 512, 128>}, {pipeline_mode = #tpu.pipeline_mode<synchronous>, transform_indices = @transform_4, window_bounds = array<i64: 1, 1>}, {transform_indices = @transform_5, window_bounds = array<i64: 8, 1>}]} {
    %c0 = arith.constant 0 : index
    %c0_0 = arith.constant 0 : index
    %c0_1 = arith.constant 0 : index
    %c0_2 = arith.constant 0 : index
    %0 = vector.load %arg1[%c0, %c0_0, %c0_1, %c0_2] : memref<8x10x10x256xbf16, #tpu.memory_space<vmem>>, vector<8x8x8x256xbf16>
    %1 = vector.shape_cast %0 : vector<8x8x8x256xbf16> to vector<512x256xbf16>
    %c0_3 = arith.constant 0 : index
    %c0_4 = arith.constant 0 : index
    %c0_5 = arith.constant 0 : index
    %2 = vector.load %arg2[%c0_3, %c0_4, %c0_5] : memref<9x256x128xbf16, #tpu.memory_space<vmem>>, vector<1x256x128xbf16>
    %3 = vector.shape_cast %2 : vector<1x256x128xbf16> to vector<256x128xbf16>
    %cst = arith.constant dense<0.000000e+00> : vector<512x128xf32>
    %4 = tpu.matmul %1, %3, %cst {dimension_numbers = #tpu.dot_dimension_numbers<[1], [0], [0], [1], [0, 0, 1, 1], [], []>} : vector<512x256xbf16>, vector<256x128xbf16>, vector<512x128xf32> -> vector<512x128xf32>
    %c0_6 = arith.constant 0 : index
    %c0_7 = arith.constant 0 : index
    %5 = vector.load %arg7[%c0_6, %c0_7] : memref<512x128xf32, #tpu.memory_space<vmem>>, vector<512x128xf32>
    tpu.vector_store %arg7[%c0_6, %c0_7], %4 {strides = array<i32>} : memref<512x128xf32, #tpu.memory_space<vmem>>, vector<512x128xf32>,
    %c0_8 = arith.constant 0 : index
    %c0_9 = arith.constant 0 : index
    %c1 = arith.constant 1 : index
    %c0_10 = arith.constant 0 : index
    %6 = vector.load %arg1[%c0_8, %c0_9, %c1, %c0_10] : memref<8x10x10x256xbf16, #tpu.memory_space<vmem>>, vector<8x8x8x256xbf16>
    %7 = vector.shape_cast %6 : vector<8x8x8x256xbf16> to vector<512x256xbf16>
    %c1_11 = arith.constant 1 : index
    %c0_12 = arith.constant 0 : index
    %c0_13 = arith.constant 0 : index
    %8 = vector.load %arg2[%c1_11, %c0_12, %c0_13] : memref<9x256x128xbf16, #tpu.memory_space<vmem>>, vector<1x256x128xbf16>
    %9 = vector.shape_cast %8 : vector<1x256x128xbf16> to vector<256x128xbf16>
    %cst_14 = arith.constant dense<0.000000e+00> : vector<512x128xf32>
    %10 = tpu.matmul %7, %9, %cst_14 {dimension_numbers = #tpu.dot_dimension_numbers<[1], [0], [0], [1], [0, 0, 1, 1], [], []>} : vector<512x256xbf16>, vector<256x128xbf16>, vector<512x128xf32> -> vector<512x128xf32>
    %c0_15 = arith.constant 0 : index
    %c0_16 = arith.constant 0 : index
    %11 = vector.load %arg7[%c0_15, %c0_16] : memref<512x128xf32, #tpu.memory_space<vmem>>, vector<512x128xf32>
    %12 = arith.addf %11, %10 : vector<512x128xf32>
    %c0_17 = arith.constant 0 : index
    %c0_18 = arith.constant 0 : index
    %13 = vector.load %arg7[%c0_17, %c0_18] : memref<512x128xf32, #tpu.memory_space<vmem>>, vector<512x128xf32>
    tpu.vector_store %arg7[%c0_17, %c0_18], %12 {strides = array<i32>} : memref<512x128xf32, #tpu.memory_space<vmem>>, vector<512x128xf32>,
    %c0_19 = arith.constant 0 : index
    %c0_20 = arith.constant 0 : index
    %c2 = arith.constant 2 : index
    %c0_21 = arith.constant 0 : index
    %14 = vector.load %arg1[%c0_19, %c0_20, %c2, %c0_21] : memref<8x10x10x256xbf16, #tpu.memory_space<vmem>>, vector<8x8x8x256xbf16>
    %15 = vector.shape_cast %14 : vector<8x8x8x256xbf16> to vector<512x256xbf16>
    %c2_22 = arith.constant 2 : index
    %c0_23 = arith.constant 0 : index
    %c0_24 = arith.constant 0 : index
    %16 = vector.load %arg2[%c2_22, %c0_23, %c0_24] : memref<9x256x128xbf16, #tpu.memory_space<vmem>>, vector<1x256x128xbf16>
    %17 = vector.shape_cast %16 : vector<1x256x128xbf16> to vector<256x128xbf16>
    %cst_25 = arith.constant dense<0.000000e+00> : vector<512x128xf32>
    %18 = tpu.matmul %15, %17, %cst_25 {dimension_numbers = #tpu.dot_dimension_numbers<[1], [0], [0], [1], [0, 0, 1, 1], [], []>} : vector<512x256xbf16>, vector<256x128xbf16>, vector<512x128xf32> -> vector<512x128xf32>
    %c0_26 = arith.constant 0 : index
    %c0_27 = arith.constant 0 : index
    %19 = vector.load %arg7[%c0_26, %c0_27] : memref<512x128xf32, #tpu.memory_space<vmem>>, vector<512x128xf32>
    %20 = arith.addf %19, %18 : vector<512x128xf32>
    %c0_28 = arith.constant 0 : index
    %c0_29 = arith.constant 0 : index
    %21 = vector.load %arg7[%c0_28, %c0_29] : memref<512x128xf32, #tpu.memory_space<vmem>>, vector<512x128xf32>
    tpu.vector_store %arg7[%c0_28, %c0_29], %20 {strides = array<i32>} : memref<512x128xf32, #tpu.memory_space<vmem>>, vector<512x128xf32>,
    %c0_30 = arith.constant 0 : index
    %c1_31 = arith.constant 1 : index
    %c0_32 = arith.constant 0 : index
    %c0_33 = arith.constant 0 : index
    %22 = vector.load %arg1[%c0_30, %c1_31, %c0_32, %c0_33] : memref<8x10x10x256xbf16, #tpu.memory_space<vmem>>, vector<8x8x8x256xbf16>
    %23 = vector.shape_cast %22 : vector<8x8x8x256xbf16> to vector<512x256xbf16>
    %c3 = arith.constant 3 : index
    %c0_34 = arith.constant 0 : index
    %c0_35 = arith.constant 0 : index
    %24 = vector.load %arg2[%c3, %c0_34, %c0_35] : memref<9x256x128xbf16, #tpu.memory_space<vmem>>, vector<1x256x128xbf16>
    %25 = vector.shape_cast %24 : vector<1x256x128xbf16> to vector<256x128xbf16>
    %cst_36 = arith.constant dense<0.000000e+00> : vector<512x128xf32>
    %26 = tpu.matmul %23, %25, %cst_36 {dimension_numbers = #tpu.dot_dimension_numbers<[1], [0], [0], [1], [0, 0, 1, 1], [], []>} : vector<512x256xbf16>, vector<256x128xbf16>, vector<512x128xf32> -> vector<512x128xf32>
    %c0_37 = arith.constant 0 : index
    %c0_38 = arith.constant 0 : index
    %27 = vector.load %arg7[%c0_37, %c0_38] : memref<512x128xf32, #tpu.memory_space<vmem>>, vector<512x128xf32>
    %28 = arith.addf %27, %26 : vector<512x128xf32>
    %c0_39 = arith.constant 0 : index
    %c0_40 = arith.constant 0 : index
    %29 = vector.load %arg7[%c0_39, %c0_40] : memref<512x128xf32, #tpu.memory_space<vmem>>, vector<512x128xf32>
    tpu.vector_store %arg7[%c0_39, %c0_40], %28 {strides = array<i32>} : memref<512x128xf32, #tpu.memory_space<vmem>>, vector<512x128xf32>,
    %c0_41 = arith.constant 0 : index
    %c1_42 = arith.constant 1 : index
    %c1_43 = arith.constant 1 : index
    %c0_44 = arith.constant 0 : index
    %30 = vector.load %arg1[%c0_41, %c1_42, %c1_43, %c0_44] : memref<8x10x10x256xbf16, #tpu.memory_space<vmem>>, vector<8x8x8x256xbf16>
    %31 = vector.shape_cast %30 : vector<8x8x8x256xbf16> to vector<512x256xbf16>
    %c4 = arith.constant 4 : index
    %c0_45 = arith.constant 0 : index
    %c0_46 = arith.constant 0 : index
    %32 = vector.load %arg2[%c4, %c0_45, %c0_46] : memref<9x256x128xbf16, #tpu.memory_space<vmem>>, vector<1x256x128xbf16>
    %33 = vector.shape_cast %32 : vector<1x256x128xbf16> to vector<256x128xbf16>
    %cst_47 = arith.constant dense<0.000000e+00> : vector<512x128xf32>
    %34 = tpu.matmul %31, %33, %cst_47 {dimension_numbers = #tpu.dot_dimension_numbers<[1], [0], [0], [1], [0, 0, 1, 1], [], []>} : vector<512x256xbf16>, vector<256x128xbf16>, vector<512x128xf32> -> vector<512x128xf32>
    %c0_48 = arith.constant 0 : index
    %c0_49 = arith.constant 0 : index
    %35 = vector.load %arg7[%c0_48, %c0_49] : memref<512x128xf32, #tpu.memory_space<vmem>>, vector<512x128xf32>
    %36 = arith.addf %35, %34 : vector<512x128xf32>
    %c0_50 = arith.constant 0 : index
    %c0_51 = arith.constant 0 : index
    %37 = vector.load %arg7[%c0_50, %c0_51] : memref<512x128xf32, #tpu.memory_space<vmem>>, vector<512x128xf32>
    tpu.vector_store %arg7[%c0_50, %c0_51], %36 {strides = array<i32>} : memref<512x128xf32, #tpu.memory_space<vmem>>, vector<512x128xf32>,
    %c0_52 = arith.constant 0 : index
    %c1_53 = arith.constant 1 : index
    %c2_54 = arith.constant 2 : index
    %c0_55 = arith.constant 0 : index
    %38 = vector.load %arg1[%c0_52, %c1_53, %c2_54, %c0_55] : memref<8x10x10x256xbf16, #tpu.memory_space<vmem>>, vector<8x8x8x256xbf16>
    %39 = vector.shape_cast %38 : vector<8x8x8x256xbf16> to vector<512x256xbf16>
    %c5 = arith.constant 5 : index
    %c0_56 = arith.constant 0 : index
    %c0_57 = arith.constant 0 : index
    %40 = vector.load %arg2[%c5, %c0_56, %c0_57] : memref<9x256x128xbf16, #tpu.memory_space<vmem>>, vector<1x256x128xbf16>
    %41 = vector.shape_cast %40 : vector<1x256x128xbf16> to vector<256x128xbf16>
    %cst_58 = arith.constant dense<0.000000e+00> : vector<512x128xf32>
    %42 = tpu.matmul %39, %41, %cst_58 {dimension_numbers = #tpu.dot_dimension_numbers<[1], [0], [0], [1], [0, 0, 1, 1], [], []>} : vector<512x256xbf16>, vector<256x128xbf16>, vector<512x128xf32> -> vector<512x128xf32>
    %c0_59 = arith.constant 0 : index
    %c0_60 = arith.constant 0 : index
    %43 = vector.load %arg7[%c0_59, %c0_60] : memref<512x128xf32, #tpu.memory_space<vmem>>, vector<512x128xf32>
    %44 = arith.addf %43, %42 : vector<512x128xf32>
    %c0_61 = arith.constant 0 : index
    %c0_62 = arith.constant 0 : index
    %45 = vector.load %arg7[%c0_61, %c0_62] : memref<512x128xf32, #tpu.memory_space<vmem>>, vector<512x128xf32>
    tpu.vector_store %arg7[%c0_61, %c0_62], %44 {strides = array<i32>} : memref<512x128xf32, #tpu.memory_space<vmem>>, vector<512x128xf32>,
    %c0_63 = arith.constant 0 : index
    %c2_64 = arith.constant 2 : index
    %c0_65 = arith.constant 0 : index
    %c0_66 = arith.constant 0 : index
    %46 = vector.load %arg1[%c0_63, %c2_64, %c0_65, %c0_66] : memref<8x10x10x256xbf16, #tpu.memory_space<vmem>>, vector<8x8x8x256xbf16>
    %47 = vector.shape_cast %46 : vector<8x8x8x256xbf16> to vector<512x256xbf16>
    %c6 = arith.constant 6 : index
    %c0_67 = arith.constant 0 : index
    %c0_68 = arith.constant 0 : index
    %48 = vector.load %arg2[%c6, %c0_67, %c0_68] : memref<9x256x128xbf16, #tpu.memory_space<vmem>>, vector<1x256x128xbf16>
    %49 = vector.shape_cast %48 : vector<1x256x128xbf16> to vector<256x128xbf16>
    %cst_69 = arith.constant dense<0.000000e+00> : vector<512x128xf32>
    %50 = tpu.matmul %47, %49, %cst_69 {dimension_numbers = #tpu.dot_dimension_numbers<[1], [0], [0], [1], [0, 0, 1, 1], [], []>} : vector<512x256xbf16>, vector<256x128xbf16>, vector<512x128xf32> -> vector<512x128xf32>
    %c0_70 = arith.constant 0 : index
    %c0_71 = arith.constant 0 : index
    %51 = vector.load %arg7[%c0_70, %c0_71] : memref<512x128xf32, #tpu.memory_space<vmem>>, vector<512x128xf32>
    %52 = arith.addf %51, %50 : vector<512x128xf32>
    %c0_72 = arith.constant 0 : index
    %c0_73 = arith.constant 0 : index
    %53 = vector.load %arg7[%c0_72, %c0_73] : memref<512x128xf32, #tpu.memory_space<vmem>>, vector<512x128xf32>
    tpu.vector_store %arg7[%c0_72, %c0_73], %52 {strides = array<i32>} : memref<512x128xf32, #tpu.memory_space<vmem>>, vector<512x128xf32>,
    %c0_74 = arith.constant 0 : index
    %c2_75 = arith.constant 2 : index
    %c1_76 = arith.constant 1 : index
    %c0_77 = arith.constant 0 : index
    %54 = vector.load %arg1[%c0_74, %c2_75, %c1_76, %c0_77] : memref<8x10x10x256xbf16, #tpu.memory_space<vmem>>, vector<8x8x8x256xbf16>
    %55 = vector.shape_cast %54 : vector<8x8x8x256xbf16> to vector<512x256xbf16>
    %c7 = arith.constant 7 : index
    %c0_78 = arith.constant 0 : index
    %c0_79 = arith.constant 0 : index
    %56 = vector.load %arg2[%c7, %c0_78, %c0_79] : memref<9x256x128xbf16, #tpu.memory_space<vmem>>, vector<1x256x128xbf16>
    %57 = vector.shape_cast %56 : vector<1x256x128xbf16> to vector<256x128xbf16>
    %cst_80 = arith.constant dense<0.000000e+00> : vector<512x128xf32>
    %58 = tpu.matmul %55, %57, %cst_80 {dimension_numbers = #tpu.dot_dimension_numbers<[1], [0], [0], [1], [0, 0, 1, 1], [], []>} : vector<512x256xbf16>, vector<256x128xbf16>, vector<512x128xf32> -> vector<512x128xf32>
    %c0_81 = arith.constant 0 : index
    %c0_82 = arith.constant 0 : index
    %59 = vector.load %arg7[%c0_81, %c0_82] : memref<512x128xf32, #tpu.memory_space<vmem>>, vector<512x128xf32>
    %60 = arith.addf %59, %58 : vector<512x128xf32>
    %c0_83 = arith.constant 0 : index
    %c0_84 = arith.constant 0 : index
    %61 = vector.load %arg7[%c0_83, %c0_84] : memref<512x128xf32, #tpu.memory_space<vmem>>, vector<512x128xf32>
    tpu.vector_store %arg7[%c0_83, %c0_84], %60 {strides = array<i32>} : memref<512x128xf32, #tpu.memory_space<vmem>>, vector<512x128xf32>,
    %c0_85 = arith.constant 0 : index
    %c2_86 = arith.constant 2 : index
    %c2_87 = arith.constant 2 : index
    %c0_88 = arith.constant 0 : index
    %62 = vector.load %arg1[%c0_85, %c2_86, %c2_87, %c0_88] : memref<8x10x10x256xbf16, #tpu.memory_space<vmem>>, vector<8x8x8x256xbf16>
    %63 = vector.shape_cast %62 : vector<8x8x8x256xbf16> to vector<512x256xbf16>
    %c8 = arith.constant 8 : index
    %c0_89 = arith.constant 0 : index
    %c0_90 = arith.constant 0 : index
    %64 = vector.load %arg2[%c8, %c0_89, %c0_90] : memref<9x256x128xbf16, #tpu.memory_space<vmem>>, vector<1x256x128xbf16>
    %65 = vector.shape_cast %64 : vector<1x256x128xbf16> to vector<256x128xbf16>
    %cst_91 = arith.constant dense<0.000000e+00> : vector<512x128xf32>
    %66 = tpu.matmul %63, %65, %cst_91 {dimension_numbers = #tpu.dot_dimension_numbers<[1], [0], [0], [1], [0, 0, 1, 1], [], []>} : vector<512x256xbf16>, vector<256x128xbf16>, vector<512x128xf32> -> vector<512x128xf32>
    %c0_92 = arith.constant 0 : index
    %c0_93 = arith.constant 0 : index
    %67 = vector.load %arg7[%c0_92, %c0_93] : memref<512x128xf32, #tpu.memory_space<vmem>>, vector<512x128xf32>
    %68 = arith.addf %67, %66 : vector<512x128xf32>
    %c0_94 = arith.constant 0 : index
    %c0_95 = arith.constant 0 : index
    %69 = vector.load %arg7[%c0_94, %c0_95] : memref<512x128xf32, #tpu.memory_space<vmem>>, vector<512x128xf32>
    tpu.vector_store %arg7[%c0_94, %c0_95], %68 {strides = array<i32>} : memref<512x128xf32, #tpu.memory_space<vmem>>, vector<512x128xf32>,
    %c0_96 = arith.constant 0 : index
    %c0_97 = arith.constant 0 : index
    %70 = vector.load %arg7[%c0_96, %c0_97] : memref<512x128xf32, #tpu.memory_space<vmem>>, vector<512x128xf32>
    %c0_98 = arith.constant 0 : index
    %c0_99 = arith.constant 0 : index
    %71 = vector.load %arg3[%c0_98, %c0_99] : memref<1x128xf32, #tpu.memory_space<vmem>>, vector<1x128xf32>
    %72 = vector.broadcast %71 : vector<1x128xf32> to vector<512x128xf32>
    %73 = arith.addf %70, %72 : vector<512x128xf32>
    %cst_100 = arith.constant 0.000000e+00 : f32
    %74 = vector.broadcast %cst_100 : f32 to vector<512x128xf32>
    %75 = arith.cmpf ogt, %73, %74 : vector<512x128xf32>
    %cst_101 = arith.constant 2.000000e-01 : f32
    %76 = vector.broadcast %cst_101 : f32 to vector<512x128xf32>
    %77 = arith.mulf %76, %73 : vector<512x128xf32>
    %78 = arith.select %75, %73, %77 : vector<512x128xi1>, vector<512x128xf32>
    %c0_102 = arith.constant 0 : index
    %c0_103 = arith.constant 0 : index
    %79 = vector.load %arg4[%c0_102, %c0_103] : memref<512x128xf32, #tpu.memory_space<vmem>>, vector<512x128xf32>
    %80 = arith.mulf %78, %79 : vector<512x128xf32>
    %81 = vector.shape_cast %80 : vector<512x128xf32> to vector<8x64x128xf32>
    %cst_104 = arith.constant dense<0.000000e+00> : vector<8x64xf32>
    %82 = vector.multi_reduction <add>, %81, %cst_104 [2] : vector<8x64x128xf32> to vector<8x64xf32>
    %cst_105 = arith.constant dense<0.000000e+00> : vector<8xf32>
    %83 = vector.multi_reduction <add>, %82, %cst_105 [1] : vector<8x64xf32> to vector<8xf32>
    %84 = vector.shape_cast %83 : vector<8xf32> to vector<8x1xf32>
    %c0_106 = arith.constant 0 : index
    %c0_107 = arith.constant 0 : index
    %85 = vector.load %arg5[%c0_106, %c0_107] : memref<1x1xf32, #tpu.memory_space<vmem>>, vector<1x1xf32>
    %86 = vector.broadcast %85 : vector<1x1xf32> to vector<8x1xf32>
    %87 = arith.addf %84, %86 : vector<8x1xf32>
    %88 = arith.negf %87 : vector<8x1xf32>
    %89 = math.exp %88 : vector<8x1xf32>
    %cst_108 = arith.constant 1.000000e+00 : f32
    %90 = vector.broadcast %cst_108 : f32 to vector<8x1xf32>
    %91 = arith.addf %90, %89 : vector<8x1xf32>
    %92 = arith.divf %90, %91 : vector<8x1xf32>
    %c0_109 = arith.constant 0 : index
    %c0_110 = arith.constant 0 : index
    %93 = vector.load %arg6[%c0_109, %c0_110] : memref<8x1xf32, #tpu.memory_space<vmem>>, vector<8x1xf32>
    tpu.vector_store %arg6[%c0_109, %c0_110], %92 {strides = array<i32>} : memref<8x1xf32, #tpu.memory_space<vmem>>, vector<8x1xf32>,
    return
  }
  func.func @transform_0(%arg0: i32) -> (i32, i32, i32, i32) {
    %c0_i32 = arith.constant 0 : i32
    %c0_i32_0 = arith.constant 0 : i32
    %c0_i32_1 = arith.constant 0 : i32
    %c0_i32_2 = arith.constant 0 : i32
    return %arg0, %c0_i32, %c0_i32_0, %c0_i32_1 : i32, i32, i32, i32
  }
  func.func @transform_1(%arg0: i32) -> (i32, i32, i32) {
    %c0_i32 = arith.constant 0 : i32
    %c0_i32_0 = arith.constant 0 : i32
    %c0_i32_1 = arith.constant 0 : i32
    %c0_i32_2 = arith.constant 0 : i32
    return %c0_i32, %c0_i32_0, %c0_i32_1 : i32, i32, i32
  }
  func.func @transform_2(%arg0: i32) -> (i32, i32) {
    %c0_i32 = arith.constant 0 : i32
    %c0_i32_0 = arith.constant 0 : i32
    %c0_i32_1 = arith.constant 0 : i32
    return %c0_i32, %c0_i32_0 : i32, i32
  }
  func.func @transform_3(%arg0: i32) -> (i32, i32) {
    %c0_i32 = arith.constant 0 : i32
    %c0_i32_0 = arith.constant 0 : i32
    %c0_i32_1 = arith.constant 0 : i32
    return %c0_i32, %c0_i32_0 : i32, i32
  }
  func.func @transform_4(%arg0: i32) -> (i32, i32) {
    %c0_i32 = arith.constant 0 : i32
    %c0_i32_0 = arith.constant 0 : i32
    %c0_i32_1 = arith.constant 0 : i32
    return %c0_i32, %c0_i32_0 : i32, i32
  }
  func.func @transform_5(%arg0: i32) -> (i32, i32) {
    %c0_i32 = arith.constant 0 : i32
    %c0_i32_0 = arith.constant 0 : i32
    return %arg0, %c0_i32 : i32, i32
  }
}

</mosaic_0001>

<bundles_post_ra>
// kernel: discriminator_forward.2
= control target key start
LH: loop header
LB: loop body
LE: loop exit
PB: predicated region body
PF: predicated region fallthrough
CT: control target
= control target key end

     0   :  { %v779_v0 = vmov 0.0   ;;  %vm780_vm0 = vmmov 0   ;;  %vm142_vm1 = vcmask 523264   ;;  %s947_s1 = inlined_call_operand.vmem [shape: bf16[64,128], index: 1, kind: input, shape index: {}]   ;;  %s948_s0 = inlined_call_operand.vmem [shape: bf16[200,64], index: 0, kind: input, shape index: {}]   ;;  %s949_s2 = inlined_call_operand.vmem [shape: f32[1,128], index: 2, kind: input, shape index: {}]   ;;  %s950_s3 = inlined_call_operand.vmem [shape: bf16[200,128], index: 3, kind: output, shape index: {}]  }
   0x1   :  { %692 = vmatprep.subr.bf16.mxu0 %v779_v0  ;;  %v762_v1 = vld [vmem:[%s947_s1] sm:$0xff]   ;;  %752 = vmatprep.subr.bf16.mxu1 %v779_v0  ;;  %v763_v2 = vld [vmem:[%s947_s1 + $0x8] sm:$0xff]   ;;  %v764_v3 = vld [vmem:[%s947_s1 + $0x10] sm:$0xff]  }
   0x2   :  { %700 = vmatprep.mubr.msk.bf16.mxu0 %vm780_vm0, %v779_v0  ;;  %728 = vmatprep.mubr.msk.bf16.mxu1 %vm780_vm0, %v779_v0  ;;  %v765_v4 = vld [vmem:[%s947_s1 + $0x18] sm:$0xff]   ;;  %v766_v5 = vld [vmem:[%s948_s0] sm:$0xff]   ;;  %v768_v7 = vld [vmem:[%s948_s0 + $0x8] sm:$0xff]  }
   0x3   :  { %693 = vmatpush3.bf16.msra.mxu0 %v762_v1  ;;  %756 = vmatpush3.bf16.msra.mxu1 %v762_v1  ;;  %v767_v6 = vld [vmem:[%s948_s0 + $0x38] sm:$0xff]   ;;  %v769_v8 = vld [vmem:[%s948_s0 + $0x40] sm:$0xff]   ;;  %v770_v9 = vld [vmem:[%s948_s0 + $0x10] sm:$0xff]  }
   0x4   :  { %694 = vmatprep.subr.bf16.mxu0 %v779_v0  ;;  %753 = vmatprep.subr.bf16.mxu1 %v779_v0  ;;  %v771_v10 = vld [vmem:[%s948_s0 + $0x48] sm:$0xff]   ;;  %v772_v11 = vld [vmem:[%s948_s0 + $0x18] sm:$0xff]   ;;  %v773_v12 = vld [vmem:[%s948_s0 + $0x50] sm:$0xff]  }
   0x5   :  { %v774_v13 = vld [vmem:[%s948_s0 + $0x20] sm:$0xff]   ;;  %v775_v14 = vld [vmem:[%s948_s0 + $0x58] sm:$0xff]   ;;  %v776_v15 = vld [vmem:[%s948_s0 + $0x28] sm:$0xff]  }
   0x6   :  { %v777_v16 = vld [vmem:[%s948_s0 + $0x60] ss:$0 sps:$4 sm:$0xff]   ;;  %v778_v17 = vld [vmem:[%s948_s0 + $0x30] sm:$0xff]  }
   0x7   :  { %695 = vmatpush3.bf16.msra.mxu0 %v763_v2  ;;  %757 = vmatpush3.bf16.msra.mxu1 %v763_v2  ;;  %v881_v18 = vld [vmem:[%s949_s2] ss:$0 sm:$0xff] }
   0x8   :  { %696 = vmatprep.subr.bf16.mxu0 %v779_v0  ;;  %754 = vmatprep.subr.bf16.mxu1 %v779_v0 }
   0xb   :  { %697 = vmatpush3.bf16.msra.mxu0 %v764_v3  ;;  %758 = vmatpush3.bf16.msra.mxu1 %v764_v3 }
   0xc   :  { %698 = vmatprep.subr.bf16.mxu0 %v779_v0  ;;  %755 = vmatprep.subr.bf16.mxu1 %v779_v0 }
   0xf   :  { %699 = vmatpush3.bf16.msra.mxu0 %v765_v4  ;;  %759 = vmatpush3.bf16.msra.mxu1 %v765_v4 }
  0x12   :  { %701 = vmatmul.mubr.msk.bf16.vlgmr.msra.gmra.mrb[0].mxu0 %vm142_vm1, %v766_v5  ;;  %729 = vmatmul.mubr.msk.bf16.vlgmr.msra.gmra.mrb[0].mxu1 %vm142_vm1, %v767_v6 }
  0x13   :  { %704 = vmatprep.mubr.msk.bf16.mxu0 %vm780_vm0, %v779_v0  ;;  %732 = vmatprep.mubr.msk.bf16.mxu1 %vm780_vm0, %v779_v0 }
  0x1a   :  { %705 = vmatmul.mubr.msk.bf16.gmra.mrb[4].mxu0 %vm142_vm1, %v768_v7  ;;  %733 = vmatmul.mubr.msk.bf16.gmra.mrb[4].mxu1 %vm142_vm1, %v769_v8 }
  0x1b   :  { %708 = vmatprep.mubr.msk.bf16.mxu0 %vm780_vm0, %v779_v0  ;;  %736 = vmatprep.mubr.msk.bf16.mxu1 %vm780_vm0, %v779_v0 }
  0x22   :  { %709 = vmatmul.mubr.msk.bf16.gmra.mrb[8].mxu0 %vm142_vm1, %v770_v9  ;;  %737 = vmatmul.mubr.msk.bf16.gmra.mrb[8].mxu1 %vm142_vm1, %v771_v10 }
  0x23   :  { %712 = vmatprep.mubr.msk.bf16.mxu0 %vm780_vm0, %v779_v0  ;;  %740 = vmatprep.mubr.msk.bf16.mxu1 %vm780_vm0, %v779_v0 }
  0x2a   :  { %713 = vmatmul.mubr.msk.bf16.gmra.mrb[12].mxu0 %vm142_vm1, %v772_v11  ;;  %741 = vmatmul.mubr.msk.bf16.gmra.mrb[12].mxu1 %vm142_vm1, %v773_v12 }
  0x2b   :  { %716 = vmatprep.mubr.msk.bf16.mxu0 %vm780_vm0, %v779_v0  ;;  %744 = vmatprep.mubr.msk.bf16.mxu1 %vm780_vm0, %v779_v0 }
  0x32   :  { %717 = vmatmul.mubr.msk.bf16.gmra.mrb[16].mxu0 %vm142_vm1, %v774_v13  ;;  %745 = vmatmul.mubr.msk.bf16.gmra.mrb[16].mxu1 %vm142_vm1, %v775_v14 }
  0x33   :  { %720 = vmatprep.mubr.msk.bf16.mxu0 %vm780_vm0, %v779_v0  ;;  %748 = vmatprep.mubr.msk.bf16.mxu1 %vm780_vm0, %v779_v0 }
  0x3a   :  { %721 = vmatmul.mubr.msk.bf16.gmra.mrb[20].mxu0 %vm142_vm1, %v776_v15  ;;  %749 = vmatmul.mubr.msk.bf16.gmra.mrb[20].mxu1 %vm142_vm1, %v777_v16 }
  0x3b   :  { %724 = vmatprep.mubr.msk.bf16.mxu0 %vm780_vm0, %v779_v0 }
  0x42   :  { %725 = vmatmul.mubr.msk.bf16.gmra.mrb[24].mxu0 %vm142_vm1, %v778_v17 }
  0xe5   :  { %v216_v19 = vpop.f32.mrb[0].mxu0  ;;  %v272_v20 = vpop.f32.mrb[0].mxu1 }
  0xe6   :  { %v217_v21 = vadd.f32 %v881_v18, %v216_v19  ;;  %v702_v22 = vpop.f32.mrb[1].mxu0  ;;  %v273_v23 = vadd.f32 %v881_v18, %v272_v20  ;;  %v730_v24 = vpop.f32.mrb[1].mxu1 }
  0xe7   :  { %v219_v25 = vpop.f32.mrb[2].mxu0  ;;  %v275_v26 = vpop.f32.mrb[2].mxu1 }
  0xe8   :  { %v343_v27 = vmul.f32 0.2, %v217_v21  ;;  %v220_v28 = vadd.f32 %v881_v18, %v219_v25  ;;  %v703_v29 = vpop.f32.mrb[3].mxu0  ;;  %vm332_vm2 = vcmp.gt.f32.partialorder %v273_v23, 0.0  ;;  %v731_v30 = vpop.f32.mrb[3].mxu1  ;;  %vm318_vm3 = vcmp.gt.f32.partialorder %v217_v21, 0.0 }
  0xe9   :  { %v357_v31 = vmul.f32 0.2, %v273_v23  ;;  %v276_v32 = vadd.f32 %v881_v18, %v275_v26 }
  0xea   :  { %vm319_vm4 = vcmp.gt.f32.partialorder %v220_v28, 0.0  ;;  %v344_v33 = vmul.f32 0.2, %v220_v28  ;;  %v368_v36 = vsel %vm318_vm3, %v217_v21, %v343_v27 }
  0xeb   :  { %v382_v34 = vsel %vm332_vm2, %v273_v23, %v357_v31  ;;  %vm333_vm5 = vcmp.gt.f32.partialorder %v276_v32, 0.0  ;;  %v358_v35 = vmul.f32 0.2, %v276_v32 }
  0xec   :  { %v369_v37 = vsel %vm319_vm4, %v220_v28, %v344_v33 }
  0xed   :  { %v607_v38 = vpack.c.bf16 %v369_v37, %v368_v36  ;;  %v224_v39 = vpop.f32.mrb[4].mxu0  ;;  %v383_v40 = vsel %vm333_vm5, %v276_v32, %v358_v35  ;;  %v280_v41 = vpop.f32.mrb[4].mxu1 }
  0xee   :  { %v225_v42 = vadd.f32 %v881_v18, %v224_v39  ;;  %v642_v43 = vpack.c.bf16 %v383_v40, %v382_v34  ;;  %v706_v44 = vpop.f32.mrb[5].mxu0  ;;  %v281_v45 = vadd.f32 %v881_v18, %v280_v41  ;;  %v734_v46 = vpop.f32.mrb[5].mxu1 }
  0xef   :  { %608 = vst [vmem:[%s950_s3] sm:$0xff] %v607_v38   ;;  %v227_v47 = vpop.f32.mrb[6].mxu0  ;;  %v283_v48 = vpop.f32.mrb[6].mxu1 }
  0xf0   :  { %v345_v49 = vmul.f32 0.2, %v225_v42  ;;  %670 = vst [vmem:[%s950_s3 + $0x38] sm:$0xff] %v642_v43   ;;  %v228_v50 = vadd.f32 %v881_v18, %v227_v47  ;;  %v707_v51 = vpop.f32.mrb[7].mxu0  ;;  %vm334_vm6 = vcmp.gt.f32.partialorder %v281_v45, 0.0  ;;  %v735_v52 = vpop.f32.mrb[7].mxu1  ;;  %v284_v54 = vadd.f32 %v881_v18, %v283_v48 }
  0xf1   :  { %vm320_vm7 = vcmp.gt.f32.partialorder %v225_v42, 0.0  ;;  %v359_v53 = vmul.f32 0.2, %v281_v45 }
  0xf2   :  { %vm321_vm8 = vcmp.gt.f32.partialorder %v228_v50, 0.0  ;;  %v346_v55 = vmul.f32 0.2, %v228_v50  ;;  %vm335_vm9 = vcmp.gt.f32.partialorder %v284_v54, 0.0  ;;  %v360_v57 = vmul.f32 0.2, %v284_v54 }
  0xf3   :  { %v384_v56 = vsel %vm334_vm6, %v281_v45, %v359_v53  ;;  %v370_v58 = vsel %vm320_vm7, %v225_v42, %v345_v49 }
  0xf4   :  { %v371_v59 = vsel %vm321_vm8, %v228_v50, %v346_v55  ;;  %v385_v62 = vsel %vm335_vm9, %v284_v54, %v360_v57 }
  0xf5   :  { %v612_v60 = vpack.c.bf16 %v371_v59, %v370_v58  ;;  %v232_v61 = vpop.f32.mrb[8].mxu0  ;;  %v288_v63 = vpop.f32.mrb[8].mxu1  ;;  %v647_v1 = vpack.c.bf16 %v385_v62, %v384_v56 }
  0xf6   :  { %v233_v0 = vadd.f32 %v881_v18, %v232_v61  ;;  %v710_v2 = vpop.f32.mrb[9].mxu0  ;;  %v289_v3 = vadd.f32 %v881_v18, %v288_v63  ;;  %v738_v4 = vpop.f32.mrb[9].mxu1 }
  0xf7   :  { %664 = vst [vmem:[%s950_s3 + $0x8] sm:$0xff] %v612_v60   ;;  %v235_v5 = vpop.f32.mrb[10].mxu0  ;;  %v291_v6 = vpop.f32.mrb[10].mxu1  ;;  %671 = vst [vmem:[%s950_s3 + $0x40] sm:$0xff] %v647_v1  }
  0xf8   :  { %v347_v7 = vmul.f32 0.2, %v233_v0  ;;  %v236_v8 = vadd.f32 %v881_v18, %v235_v5  ;;  %v711_v9 = vpop.f32.mrb[11].mxu0  ;;  %vm336_vm10 = vcmp.gt.f32.partialorder %v289_v3, 0.0  ;;  %v739_v10 = vpop.f32.mrb[11].mxu1  ;;  %vm322_vm11 = vcmp.gt.f32.partialorder %v233_v0, 0.0 }
  0xf9   :  { %v361_v11 = vmul.f32 0.2, %v289_v3  ;;  %v292_v12 = vadd.f32 %v881_v18, %v291_v6 }
  0xfa   :  { %vm323_vm12 = vcmp.gt.f32.partialorder %v236_v8, 0.0  ;;  %v348_v13 = vmul.f32 0.2, %v236_v8  ;;  %v372_v16 = vsel %vm322_vm11, %v233_v0, %v347_v7 }
  0xfb   :  { %v386_v14 = vsel %vm336_vm10, %v289_v3, %v361_v11  ;;  %vm337_vm13 = vcmp.gt.f32.partialorder %v292_v12, 0.0  ;;  %v362_v15 = vmul.f32 0.2, %v292_v12 }
  0xfc   :  { %v373_v17 = vsel %vm323_vm12, %v236_v8, %v348_v13 }
  0xfd   :  { %v617_v19 = vpack.c.bf16 %v373_v17, %v372_v16  ;;  %v240_v20 = vpop.f32.mrb[12].mxu0  ;;  %v387_v21 = vsel %vm337_vm13, %v292_v12, %v362_v15  ;;  %v296_v22 = vpop.f32.mrb[12].mxu1 }
  0xfe   :  { %v241_v23 = vadd.f32 %v881_v18, %v240_v20  ;;  %v652_v24 = vpack.c.bf16 %v387_v21, %v386_v14  ;;  %v714_v25 = vpop.f32.mrb[13].mxu0  ;;  %v297_v26 = vadd.f32 %v881_v18, %v296_v22  ;;  %v742_v27 = vpop.f32.mrb[13].mxu1 }
  0xff   :  { %665 = vst [vmem:[%s950_s3 + $0x10] sm:$0xff] %v617_v19   ;;  %v243_v28 = vpop.f32.mrb[14].mxu0  ;;  %v299_v29 = vpop.f32.mrb[14].mxu1 }
 0x100   :  { %v349_v30 = vmul.f32 0.2, %v241_v23  ;;  %672 = vst [vmem:[%s950_s3 + $0x48] sm:$0xff] %v652_v24   ;;  %v244_v31 = vadd.f32 %v881_v18, %v243_v28  ;;  %v715_v32 = vpop.f32.mrb[15].mxu0  ;;  %vm338_vm14 = vcmp.gt.f32.partialorder %v297_v26, 0.0  ;;  %v743_v33 = vpop.f32.mrb[15].mxu1  ;;  %v300_v35 = vadd.f32 %v881_v18, %v299_v29 }
 0x101   :  { %vm324_vm15 = vcmp.gt.f32.partialorder %v241_v23, 0.0  ;;  %v363_v34 = vmul.f32 0.2, %v297_v26 }
 0x102   :  { %vm325_vm0 = vcmp.gt.f32.partialorder %v244_v31, 0.0  ;;  %v350_v36 = vmul.f32 0.2, %v244_v31  ;;  %vm339_vm1 = vcmp.gt.f32.partialorder %v300_v35, 0.0  ;;  %v364_v38 = vmul.f32 0.2, %v300_v35 }
 0x103   :  { %v388_v37 = vsel %vm338_vm14, %v297_v26, %v363_v34  ;;  %v374_v39 = vsel %vm324_vm15, %v241_v23, %v349_v30 }
 0x104   :  { %v375_v40 = vsel %vm325_vm0, %v244_v31, %v350_v36  ;;  %v389_v43 = vsel %vm339_vm1, %v300_v35, %v364_v38 }
 0x105   :  { %v622_v41 = vpack.c.bf16 %v375_v40, %v374_v39  ;;  %v248_v42 = vpop.f32.mrb[16].mxu0  ;;  %v304_v44 = vpop.f32.mrb[16].mxu1  ;;  %v657_v46 = vpack.c.bf16 %v389_v43, %v388_v37 }
 0x106   :  { %v249_v45 = vadd.f32 %v881_v18, %v248_v42  ;;  %v718_v47 = vpop.f32.mrb[17].mxu0  ;;  %v305_v48 = vadd.f32 %v881_v18, %v304_v44  ;;  %v746_v49 = vpop.f32.mrb[17].mxu1 }
 0x107   :  { %666 = vst [vmem:[%s950_s3 + $0x18] sm:$0xff] %v622_v41   ;;  %v251_v50 = vpop.f32.mrb[18].mxu0  ;;  %v307_v51 = vpop.f32.mrb[18].mxu1  ;;  %673 = vst [vmem:[%s950_s3 + $0x50] sm:$0xff] %v657_v46  }
 0x108   :  { %v351_v52 = vmul.f32 0.2, %v249_v45  ;;  %v252_v53 = vadd.f32 %v881_v18, %v251_v50  ;;  %v719_v54 = vpop.f32.mrb[19].mxu0  ;;  %vm340_vm2 = vcmp.gt.f32.partialorder %v305_v48, 0.0  ;;  %v747_v55 = vpop.f32.mrb[19].mxu1  ;;  %vm326_vm3 = vcmp.gt.f32.partialorder %v249_v45, 0.0 }
 0x109   :  { %v365_v56 = vmul.f32 0.2, %v305_v48  ;;  %v308_v57 = vadd.f32 %v881_v18, %v307_v51 }
 0x10a   :  { %vm327_vm4 = vcmp.gt.f32.partialorder %v252_v53, 0.0  ;;  %v352_v58 = vmul.f32 0.2, %v252_v53  ;;  %v376_v61 = vsel %vm326_vm3, %v249_v45, %v351_v52 }
 0x10b   :  { %v390_v59 = vsel %vm340_vm2, %v305_v48, %v365_v56  ;;  %vm341_vm5 = vcmp.gt.f32.partialorder %v308_v57, 0.0  ;;  %v366_v60 = vmul.f32 0.2, %v308_v57 }
 0x10c   :  { %v377_v62 = vsel %vm327_vm4, %v252_v53, %v352_v58 }
 0x10d   :  { %v627_v63 = vpack.c.bf16 %v377_v62, %v376_v61  ;;  %v256_v0 = vpop.f32.mrb[20].mxu0  ;;  %v391_v1 = vsel %vm341_vm5, %v308_v57, %v366_v60  ;;  %v312_v2 = vpop.f32.mrb[20].mxu1 }
 0x10e   :  { %v257_v3 = vadd.f32 %v881_v18, %v256_v0  ;;  %v662_v4 = vpack.c.bf16 %v391_v1, %v390_v59  ;;  %v722_v5 = vpop.f32.mrb[21].mxu0  ;;  %v313_v6 = vadd.f32 %v881_v18, %v312_v2  ;;  %v750_v7 = vpop.f32.mrb[21].mxu1 }
 0x10f   :  { %667 = vst [vmem:[%s950_s3 + $0x20] sm:$0xff] %v627_v63   ;;  %v259_v8 = vpop.f32.mrb[22].mxu0  ;;  %v315_v9 = vpop.f32.mrb[22].mxu1 }
 0x110   :  { %v353_v10 = vmul.f32 0.2, %v257_v3  ;;  %674 = vst [vmem:[%s950_s3 + $0x58] sm:$0xff] %v662_v4   ;;  %v260_v11 = vadd.f32 %v881_v18, %v259_v8  ;;  %v723_v12 = vpop.f32.mrb[23].mxu0  ;;  %vm342_vm6 = vcmp.gt.f32.partialorder %v313_v6, 0.0  ;;  %v751_v13 = vpop.f32.mrb[23].mxu1 }
 0x111   :  { %vm328_vm7 = vcmp.gt.f32.partialorder %v257_v3, 0.0  ;;  %v367_v14 = vmul.f32 0.2, %v313_v6 }
 0x112   :  { %vm329_vm8 = vcmp.gt.f32.partialorder %v260_v11, 0.0  ;;  %v354_v15 = vmul.f32 0.2, %v260_v11  ;;  %v378_v17 = vsel %vm328_vm7, %v257_v3, %v353_v10 }
 0x113   :  { %v392_v16 = vsel %vm342_vm6, %v313_v6, %v367_v14 }
 0x114   :  { %v379_v19 = vsel %vm329_vm8, %v260_v11, %v354_v15  ;;  %v603_v20 = vpack.c.bf16 %v392_v16, %v392_v16 }
 0x115   :  { %v632_v21 = vpack.c.bf16 %v379_v19, %v378_v17  ;;  %v264_v22 = vpop.f32.mrb[24].mxu0 }
 0x116   :  { %518 = vst [vmem:[%s950_s3 + $0x60] sm:$0xf] %v603_v20  ;;  %v265_v23 = vadd.f32 %v881_v18, %v264_v22  ;;  %v726_v24 = vpop.f32.mrb[25].mxu0 }
 0x117   :  { %668 = vst [vmem:[%s950_s3 + $0x28] sm:$0xff] %v632_v21   ;;  %v267_v25 = vpop.f32.mrb[26].mxu0 }
 0x118   :  { %v355_v26 = vmul.f32 0.2, %v265_v23  ;;  %v268_v27 = vadd.f32 %v881_v18, %v267_v25  ;;  %v727_v28 = vpop.f32.mrb[27].mxu0  ;;  %vm330_vm9 = vcmp.gt.f32.partialorder %v265_v23, 0.0 }
 0x11a   :  { %vm331_vm10 = vcmp.gt.f32.partialorder %v268_v27, 0.0  ;;  %v356_v29 = vmul.f32 0.2, %v268_v27  ;;  %v380_v30 = vsel %vm330_vm9, %v265_v23, %v355_v26 }
 0x11c   :  { %v381_v31 = vsel %vm331_vm10, %v268_v27, %v356_v29 }
 0x11d   :  { %v637_v32 = vpack.c.bf16 %v381_v31, %v380_v30 }
 0x11f   :  { %669 = vst [vmem:[%s950_s3 + $0x30] sm:$0xff] %v637_v32  }

// kernel: discriminator_forward.3
= control target key start
LH: loop header
LB: loop body
LE: loop exit
PB: predicated region body
PF: predicated region fallthrough
CT: control target
= control target key end

     0   :  { %v23719_v0 = vmov 0   ;;  %vm1016_vm0 = vsmask.f32 3328  ;;  %vm1017_vm1 = vsmask.f32 7440  ;;  %vm3037_vm3 = vcmask 1042432   ;;  %s23713_s1 = inlined_call_operand.vmem [shape: bf16[9,256,128], index: 1, kind: input, shape index: {}]   ;;  %s23714_s0 = inlined_call_operand.vmem [shape: bf16[8,10,10,256], index: 0, kind: input, shape index: {}]   ;;  %s23715_s2 = inlined_call_operand.vmem [shape: f32[1,128], index: 2, kind: input, shape index: {}]   ;;  %s23716_s3 = inlined_call_operand.vmem [shape: f32[512,128], index: 3, kind: input, shape index: {}]   ;;  %s23717_s4 = inlined_call_operand.<no memory space> [shape: f32[1,1], index: 4, kind: input, shape index: {}]   ;;  %s23718_s5 = inlined_call_operand.vmem [shape: f32[8,1], index: 5, kind: output, shape index: {}]  }
   0x1   :  { %535 = vmatprep.subr.bf16.mxu0 %v23719_v0  ;;  %15513 = vmatprep.subr.bf16.mxu1 %v23719_v0  ;;  %v15546_v1 = vld [vmem:[%s23713_s1] sm:$0xff]   ;;  %v15547_v2 = vld [vmem:[%s23713_s1 + $0x8] sm:$0xff]   ;;  %v15548_v3 = vld [vmem:[%s23713_s1 + $0x10] sm:$0xff]   ;;  %vm3038_vm4 = vcmask 1046532  }
   0x2   :  { %536 = vmatpush1.bf16.msra.mxu0 %v15546_v1  ;;  %15529 = vmatpush1.bf16.msra.mxu1 %v15546_v1  ;;  %v15549_v4 = vld [vmem:[%s23713_s1 + $0x18] sm:$0xff]   ;;  %v15550_v5 = vld [vmem:[%s23713_s1 + $0x20] sm:$0xff]   ;;  %v16008_v7 = vld [vmem:[%s23714_s0 + $0x10] sm:$0xff] }
   0x3   :  { %537 = vmatprep.subr.bf16.mxu0 %v23719_v0  ;;  %15514 = vmatprep.subr.bf16.mxu1 %v23719_v0  ;;  %v16003_v6 = vld [vmem:[%s23714_s0] sm:$0xff]  ;;  %v15551_v10 = vld [vmem:[%s23713_s1 + $0x28] sm:$0xff]   ;;  %v15552_v11 = vld [vmem:[%s23713_s1 + $0x30] sm:$0xff]   ;;  %v1034_v42 = vshrl.u32 %v16008_v7, 16  ;;  %v1037_v43 = vshll.u32 %v16008_v7, 16 }
   0x4   :  { %v13703_v8 = vcombine.high %v16003_v6, %v16008_v7  ;;  %v15566_v9 = vld [vmem:[%s23714_s0 + $0x284] ss:$16 sps:$4 sm:$0xff]   ;;  %v15553_v12 = vld [vmem:[%s23713_s1 + $0x38] sm:$0xff]   ;;  %v15555_v14 = vld [vmem:[%s23713_s1 + $0x48] sm:$0xff]   ;;  %v13702_v24 = vcombine.low %v16003_v6, %v16008_v7  ;;  %v1020_v39 = vshrl.u32 %v16003_v6, 16  ;;  %v1023_v41 = vshll.u32 %v16003_v6, 16 }
   0x5   :  { %695 = vmatprep.mubr.bf16.mxu1 %v15566_v9  ;;  %v15554_v13 = vld [vmem:[%s23713_s1 + $0x40] sm:$0xff]   ;;  %v15556_v15 = vld [vmem:[%s23713_s1 + $0x50] sm:$0xff]   ;;  %v15557_v16 = vld [vmem:[%s23713_s1 + $0x58] sm:$0xff]   ;;  %v1036_v52 = vrot.slane %v1034_v42, 4  ;;  %v1039_v53 = vrot.slane %v1037_v43, 5 }
   0x6   :  { %538 = vmatpush1.bf16.msra.mxu0 %v15547_v2  ;;  %15530 = vmatpush1.bf16.msra.mxu1 %v15547_v2  ;;  %v15558_v17 = vld [vmem:[%s23713_s1 + $0x60] sm:$0xff]   ;;  %v15559_v18 = vld [vmem:[%s23713_s1 + $0x68] sm:$0xff]   ;;  %v15560_v19 = vld [vmem:[%s23713_s1 + $0x70] sm:$0xff]   ;;  %v1022_v50 = vrot.slane %v1020_v39, 4  ;;  %v1025_v51 = vrot.slane %v1023_v41, 5 }
   0x7   :  { %539 = vmatprep.subr.bf16.mxu0 %v23719_v0  ;;  %15515 = vmatprep.subr.bf16.mxu1 %v23719_v0  ;;  %v15561_v20 = vld [vmem:[%s23713_s1 + $0x78] sm:$0xff]   ;;  %v15564_v21 = vld [vmem:[%s23714_s0 + $0x280] ss:$16 sps:$4 sm:$0xff]   ;;  %v15570_v28 = vld [vmem:[%s23714_s0 + $0x2a4] ss:$16 sps:$4 sm:$0xff]   ;;  %v1040_v2 = vor.u32 %v1039_v53, %v1036_v52 }
   0x8   :  { %567 = vmatprep.mubr.bf16.mxu0 %v13703_v8  ;;  %v16076_v22 = vld [vmem:[%s23714_s0 + $0x20] sm:$0xff]  ;;  %v16081_v23 = vld [vmem:[%s23714_s0 + $0x30] sm:$0xff]  ;;  %v15574_v29 = vld [vmem:[%s23713_s1 + $0x88] sm:$0xff]   ;;  %v1026_v1 = vor.u32 %v1025_v51, %v1022_v50 }
   0x9   :  { %v15567_v25 = vld [vmem:[%s23713_s1 + $0x80] sm:$0xff]   ;;  %v13705_v27 = vcombine.high %v16076_v22, %v16081_v23  ;;  %v15575_v30 = vld [vmem:[%s23713_s1 + $0x108] sm:$0xff]   ;;  %v16112_v32 = vld [vmem:[%s23714_s0 + $0x50] sm:$0xff]  ;;  %v13704_v33 = vcombine.low %v16076_v22, %v16081_v23  ;;  %v1048_v54 = vshrl.u32 %v16076_v22, 16  ;;  %v1051_v57 = vshll.u32 %v16076_v22, 16 }
   0xa   :  { %540 = vmatpush1.bf16.msra.mxu0 %v15548_v3  ;;  %15531 = vmatpush1.bf16.msra.mxu1 %v15548_v3  ;;  %v15568_v26 = vld [vmem:[%s23713_s1 + $0x100] sm:$0xff]   ;;  %v15581_v37 = vld [vmem:[%s23713_s1 + $0x90] sm:$0xff]   ;;  %v15588_v45 = vld [vmem:[%s23713_s1 + $0x98] sm:$0xff]   ;;  %v1062_v58 = vshrl.u32 %v16081_v23, 16  ;;  %v1065_v59 = vshll.u32 %v16081_v23, 16 }
   0xb   :  { %541 = vmatprep.subr.bf16.mxu0 %v23719_v0  ;;  %15516 = vmatprep.subr.bf16.mxu1 %v23719_v0  ;;  %v16107_v31 = vld [vmem:[%s23714_s0 + $0x40] sm:$0xff]  ;;  %v15582_v38 = vld [vmem:[%s23713_s1 + $0x110] sm:$0xff]   ;;  %v15589_v47 = vld [vmem:[%s23713_s1 + $0x118] sm:$0xff]   ;;  %v1050_v3 = vrot.slane %v1048_v54, 4 }
   0xc   :  { %v15573_v34 = vld [vmem:[%s23714_s0 + $0x2a0] ss:$16 sps:$4 sm:$0xff]   ;;  %v15577_v35 = vld [vmem:[%s23714_s0 + $0x2c4] ss:$16 sps:$4 sm:$0xff]   ;;  %v13707_v36 = vcombine.high %v16107_v31, %v16112_v32  ;;  %v13706_v48 = vcombine.low %v16107_v31, %v16112_v32  ;;  %v15602_v63 = vld [vmem:[%s23713_s1 + $0xa8] sm:$0xff]   ;;  %v1067_v6 = vrot.slane %v1065_v59, 5 }
   0xd   :  { %v16138_v40 = vld [vmem:[%s23714_s0 + $0x60] sm:$0xff]  ;;  %v16146_v44 = vld [vmem:[%s23714_s0 + $0x70] sm:$0xff]  ;;  %v1076_v7 = vshrl.u32 %v16107_v31, 16  ;;  %v15603_v9 = vld [vmem:[%s23713_s1 + $0x128] sm:$0xff]  }
   0xe   :  { %542 = vmatpush1.bf16.msra.mxu0 %v15549_v4  ;;  %15532 = vmatpush1.bf16.msra.mxu1 %v15549_v4  ;;  %v15580_v46 = vld [vmem:[%s23714_s0 + $0x2c0] ss:$16 sps:$4 sm:$0xff]   ;;  %v15584_v49 = vld [vmem:[%s23714_s0 + $0x2e4] ss:$16 sps:$4 sm:$0xff]   ;;  %v13709_v55 = vcombine.high %v16138_v40, %v16146_v44  ;;  %v1053_v4 = vrot.slane %v1051_v57, 5  ;;  %vm16227_vm2 = vmor %vm1016_vm0, %vm1017_vm1  ;;  %v1121_v39 = vshll.u32 %v16146_v44, 16 }
   0xf   :  { %543 = vmatprep.subr.bf16.mxu0 %v23719_v0  ;;  %15517 = vmatprep.subr.bf16.mxu1 %v23719_v0  ;;  %v15595_v56 = vld [vmem:[%s23713_s1 + $0xa0] sm:$0xff]   ;;  %v16184_v62 = vld [vmem:[%s23714_s0 + $0xb0] sm:$0xff]  ;;  %v1078_v22 = vrot.slane %v1076_v7, 4  ;;  %v15618_v43 = vld [vmem:[%s23713_s1 + $0x138] sm:$0xff]  }
  0x10   :  { %v15596_v60 = vld [vmem:[%s23713_s1 + $0x120] sm:$0xff]   ;;  %v15609_v23 = vld [vmem:[%s23713_s1 + $0xb0] sm:$0xff]   ;;  %v895_v51 = vld [vmem:[%s23714_s0 + $0x38] sm:$0x11] }
  0x11   :  { %v16179_v61 = vld [vmem:[%s23714_s0 + $0xa0] sm:$0xff]  ;;  %vm16533_vm5 = vmor %vm3037_vm3, %vm3038_vm4 }
  0x12   :  { %544 = vmatpush1.bf16.msra.mxu0 %v15550_v5  ;;  %15533 = vmatpush1.bf16.msra.mxu1 %v15550_v5  ;;  %v1064_v5 = vrot.slane %v1062_v58, 4  ;;  %v15587_v8 = vld [vmem:[%s23714_s0 + $0x2e0] ss:$16 sps:$4 sm:$0xff]   ;;  %v1123_v58 = vrot.slane %v1121_v39, 5 }
  0x13   :  { %545 = vmatprep.subr.bf16.mxu0 %v23719_v0  ;;  %15518 = vmatprep.subr.bf16.mxu1 %v23719_v0  ;;  %v15594_v54 = vld [vmem:[%s23714_s0 + $0x320] ss:$16 sps:$4 sm:$0xff]  }
  0x14   :  { %v15641_v39 = vld [vmem:[%s23713_s1 + $0xd0] sm:$0xff]  }
  0x16   :  { %546 = vmatpush1.bf16.msra.mxu0 %v15551_v10  ;;  %15534 = vmatpush1.bf16.msra.mxu1 %v15551_v10  ;;  %v1079_v10 = vshll.u32 %v16107_v31, 16 }
  0x17   :  { %547 = vmatprep.subr.bf16.mxu0 %v23719_v0  ;;  %15519 = vmatprep.subr.bf16.mxu1 %v23719_v0 }
  0x1a   :  { %548 = vmatpush1.bf16.msra.mxu0 %v15552_v11  ;;  %15535 = vmatpush1.bf16.msra.mxu1 %v15552_v11  ;;  %v15591_v11 = vld [vmem:[%s23714_s0 + $0x324] ss:$16 sps:$4 sm:$0xff]  }
  0x1b   :  { %549 = vmatprep.subr.bf16.mxu0 %v23719_v0  ;;  %15520 = vmatprep.subr.bf16.mxu1 %v23719_v0 }
  0x1e   :  { %550 = vmatpush1.bf16.msra.mxu0 %v15553_v12  ;;  %15536 = vmatpush1.bf16.msra.mxu1 %v15553_v12  ;;  %v1090_v12 = vshrl.u32 %v16112_v32, 16 }
  0x1f   :  { %551 = vmatprep.subr.bf16.mxu0 %v23719_v0  ;;  %15521 = vmatprep.subr.bf16.mxu1 %v23719_v0 }
  0x22   :  { %552 = vmatpush1.bf16.msra.mxu0 %v15554_v13  ;;  %15537 = vmatpush1.bf16.msra.mxu1 %v15554_v13  ;;  %v1093_v13 = vshll.u32 %v16112_v32, 16  ;;  %v1107_v32 = vshll.u32 %v16138_v40, 16 }
  0x23   :  { %553 = vmatprep.subr.bf16.mxu0 %v23719_v0  ;;  %15522 = vmatprep.subr.bf16.mxu1 %v23719_v0 }
  0x24   :  { %v1095_v31 = vrot.slane %v1093_v13, 5  ;;  %v1109_v53 = vrot.slane %v1107_v32, 5 }
  0x26   :  { %554 = vmatpush1.bf16.msra.mxu0 %v15555_v14  ;;  %15538 = vmatpush1.bf16.msra.mxu1 %v15555_v14  ;;  %v13708_v14 = vcombine.low %v16138_v40, %v16146_v44 }
  0x27   :  { %555 = vmatprep.subr.bf16.mxu0 %v23719_v0  ;;  %15523 = vmatprep.subr.bf16.mxu1 %v23719_v0 }
  0x2a   :  { %556 = vmatpush1.bf16.msra.mxu0 %v15556_v15  ;;  %15539 = vmatpush1.bf16.msra.mxu1 %v15556_v15  ;;  %v13711_v15 = vcombine.high %v16179_v61, %v16184_v62 }
  0x2b   :  { %557 = vmatprep.subr.bf16.mxu0 %v23719_v0  ;;  %15524 = vmatprep.subr.bf16.mxu1 %v23719_v0 }
  0x2e   :  { %558 = vmatpush1.bf16.msra.mxu0 %v15557_v16  ;;  %15540 = vmatpush1.bf16.msra.mxu1 %v15557_v16  ;;  %v1027_v16 = vrot.slane %v1026_v1, 4  ;;  %v15626_v1 = vld [vmem:[%s23713_s1 + $0x140] sm:$0xff]  }
  0x2f   :  { %559 = vmatprep.subr.bf16.mxu0 %v23719_v0  ;;  %15525 = vmatprep.subr.bf16.mxu1 %v23719_v0 }
  0x32   :  { %560 = vmatpush1.bf16.msra.mxu0 %v15558_v17  ;;  %15541 = vmatpush1.bf16.msra.mxu1 %v15558_v17  ;;  %v889_v17 = vld [vmem:[%s23714_s0 + $0x8] sm:$0x11] }
  0x33   :  { %561 = vmatprep.subr.bf16.mxu0 %v23719_v0  ;;  %15526 = vmatprep.subr.bf16.mxu1 %v23719_v0 }
  0x36   :  { %562 = vmatpush1.bf16.msra.mxu0 %v15559_v18  ;;  %15542 = vmatpush1.bf16.msra.mxu1 %v15559_v18  ;;  %v891_v18 = vld [vmem:[%s23714_s0 + $0x18] sm:$0x11] }
  0x37   :  { %563 = vmatprep.subr.bf16.mxu0 %v23719_v0  ;;  %15527 = vmatprep.subr.bf16.mxu1 %v23719_v0 }
  0x3a   :  { %564 = vmatpush1.bf16.msra.mxu0 %v15560_v19  ;;  %15543 = vmatpush1.bf16.msra.mxu1 %v15560_v19  ;;  %v1041_v19 = vrot.slane %v1040_v2, 4 }
  0x3b   :  { %565 = vmatprep.subr.bf16.mxu0 %v23719_v0  ;;  %15528 = vmatprep.subr.bf16.mxu1 %v23719_v0 }
  0x3e   :  { %566 = vmatpush1.bf16.msra.mxu0 %v15561_v20  ;;  %15544 = vmatpush1.bf16.msra.mxu1 %v15561_v20  ;;  %v1054_v20 = vor.u32 %v1053_v4, %v1050_v3  ;;  %v897_v4 = vld [vmem:[%s23714_s0 + $0x48] sm:$0x11] }
  0x3f   :  { %2300 = vmatprep.subr.bf16.mxu1 %v23719_v0  ;;  %3681 = vmatprep.subr.bf16.mxu0 %v23719_v0 }
  0x40   :  { %v1055_v41 = vrot.slane %v1054_v20, 4  ;;  %v15634_v20 = vld [vmem:[%s23713_s1 + $0x148] sm:$0xff]  }
  0x41   :  { %568 = vmatmul.mubr.bf16.vlgmr.msra.gmra.mrb[0].mxu0 %v13702_v24  ;;  %696 = vmatmul.mubr.bf16.vlgmr.msra.gmra.mrb[0].mxu1 %v15564_v21  ;;  %v1068_v21 = vor.u32 %v1067_v6, %v1064_v5  ;;  %v15610_v24 = vld [vmem:[%s23713_s1 + $0x130] sm:$0xff]   ;;  %v899_v5 = vld [vmem:[%s23714_s0 + $0x58] sm:$0x11] }
  0x42   :  { %2301 = vmatpush1.bf16.msra.mxu1 %v15567_v25  ;;  %3682 = vmatpush1.bf16.msra.mxu0 %v15568_v26  ;;  %v1029_v25 = vshll.u32 %v889_v17, 16  ;;  %v1043_v26 = vshll.u32 %v891_v18, 16 }
  0x43   :  { %575 = vmatprep.mubr.bf16.mxu0 %v13705_v27  ;;  %703 = vmatprep.mubr.bf16.mxu1 %v15570_v28  ;;  %v1081_v27 = vrot.slane %v1079_v10, 5  ;;  %v1104_v28 = vshrl.u32 %v16138_v40, 16  ;;  %v13710_v40 = vcombine.low %v16179_v61, %v16184_v62  ;;  %v1069_v42 = vrot.slane %v1068_v21, 4 }
  0x44   :  { %2302 = vmatprep.subr.bf16.mxu1 %v23719_v0  ;;  %3683 = vmatprep.subr.bf16.mxu0 %v23719_v0 }
  0x46   :  { %2303 = vmatpush1.bf16.msra.mxu1 %v15574_v29  ;;  %3684 = vmatpush1.bf16.msra.mxu0 %v15575_v30  ;;  %v1092_v30 = vrot.slane %v1090_v12, 4  ;;  %v16306_v12 = vld [vmem:[%s23714_s0 + $0xf0] sm:$0xff] }
  0x47   :  { %2304 = vmatprep.subr.bf16.mxu1 %v23719_v0  ;;  %3685 = vmatprep.subr.bf16.mxu0 %v23719_v0 }
  0x49   :  { %576 = vmatmul.mubr.bf16.gmra.mrb[4].mxu0 %v13704_v33  ;;  %704 = vmatmul.mubr.bf16.gmra.mrb[4].mxu1 %v15573_v34  ;;  %v16235_v33 = vld [vmem:[%s23714_s0 + $0xc0] sm:$0xff]  ;;  %v16240_v34 = vld [vmem:[%s23714_s0 + $0xd0] sm:$0xff] }
  0x4a   :  { %583 = vmatprep.mubr.bf16.mxu0 %v13707_v36  ;;  %711 = vmatprep.mubr.bf16.mxu1 %v15577_v35  ;;  %v15617_v35 = vld [vmem:[%s23713_s1 + $0xb8] sm:$0xff]   ;;  %v1031_v36 = vrot.slane %v1029_v25, 5  ;;  %v13713_v59 = vcombine.high %v16235_v33, %v16240_v34 }
  0x4b   :  { %2305 = vmatpush1.bf16.msra.mxu1 %v15581_v37  ;;  %3686 = vmatpush1.bf16.msra.mxu0 %v15582_v38  ;;  %v1045_v37 = vrot.slane %v1043_v26, 5  ;;  %v1118_v38 = vshrl.u32 %v16146_v44, 16  ;;  %v903_v25 = vld [vmem:[%s23714_s0 + $0x78] sm:$0x11] }
  0x4c   :  { %2306 = vmatprep.subr.bf16.mxu1 %v23719_v0  ;;  %3687 = vmatprep.subr.bf16.mxu0 %v23719_v0  ;;  %v1127_v32 = vshll.u32 %v903_v25, 16  ;;  %v15643_v25 = vld [vmem:[%s23714_s0 + $0x1a4] ss:$16 sps:$4 sm:$0xff]  }
  0x4d   :  { %v16258_v44 = vsel %vm16227_vm2, %v1041_v19, %v1045_v37  ;;  %v1120_v57 = vrot.slane %v1118_v38, 4 }
  0x4f   :  { %2307 = vmatpush1.bf16.msra.mxu1 %v15588_v45  ;;  %3688 = vmatpush1.bf16.msra.mxu0 %v15589_v47  ;;  %v16254_v45 = vsel %vm16227_vm2, %v1027_v16, %v1031_v36  ;;  %v1082_v47 = vor.u32 %v1081_v27, %v1078_v22  ;;  %v15633_v16 = vld [vmem:[%s23713_s1 + $0xc8] sm:$0xff]   ;;  %v13712_v22 = vcombine.low %v16235_v33, %v16240_v34  ;;  %v15601_v27 = vld [vmem:[%s23714_s0 + $0x340] ss:$16 sps:$4 sm:$0xff]   ;;  %v15605_v36 = vld [vmem:[%s23714_s0 + $0x364] ss:$16 sps:$4 sm:$0xff]  }
  0x50   :  { %2308 = vmatprep.subr.bf16.mxu1 %v23719_v0  ;;  %3689 = vmatprep.subr.bf16.mxu0 %v23719_v0  ;;  %v13815_v50 = vcombine.high %v16254_v45, %v16258_v44 }
  0x51   :  { %584 = vmatmul.mubr.bf16.gmra.mrb[8].mxu0 %v13706_v48  ;;  %712 = vmatmul.mubr.bf16.gmra.mrb[8].mxu1 %v15580_v46  ;;  %v893_v46 = vld [vmem:[%s23714_s0 + $0x28] sm:$0x11]  ;;  %v1106_v48 = vrot.slane %v1104_v28, 4  ;;  %v1083_v6 = vrot.slane %v1082_v47, 4 }
  0x52   :  { %591 = vmatprep.mubr.bf16.mxu0 %v13709_v55  ;;  %719 = vmatprep.mubr.bf16.mxu1 %v15584_v49  ;;  %v13814_v49 = vcombine.low %v16254_v45, %v16258_v44  ;;  %v1057_v52 = vshll.u32 %v893_v46, 16  ;;  %v1071_v55 = vshll.u32 %v895_v51, 16 }
  0x53   :  { %2309 = vmatpush1.bf16.msra.mxu1 %v15595_v56  ;;  %3690 = vmatpush1.bf16.msra.mxu0 %v15596_v60  ;;  %v1096_v56 = vor.u32 %v1095_v31, %v1092_v30  ;;  %v15598_v60 = vld [vmem:[%s23714_s0 + $0x344] ss:$16 sps:$4 sm:$0xff]   ;;  %v1110_v10 = vor.u32 %v1109_v53, %v1106_v48  ;;  %v15650_v48 = vld [vmem:[%s23713_s1 + $0x158] sm:$0xff]  }
  0x54   :  { %2310 = vmatprep.subr.bf16.mxu1 %v23719_v0  ;;  %3691 = vmatprep.subr.bf16.mxu0 %v23719_v0  ;;  %v1059_v2 = vrot.slane %v1057_v52, 5  ;;  %v1073_v3 = vrot.slane %v1071_v55, 5  ;;  %v15611_v55 = vld [vmem:[%s23714_s0 + $0x104] ss:$16 sps:$4 sm:$0xff]  }
  0x55   :  { %v1111_v26 = vrot.slane %v1110_v10, 4  ;;  %v15624_v10 = vld [vmem:[%s23714_s0 + $0x3c0] ss:$16 sps:$4 sm:$0xff]  }
  0x56   :  { %v16296_v7 = vsel %vm16227_vm2, %v1055_v41, %v1059_v2  ;;  %v16310_v13 = vsel %vm16227_vm2, %v1069_v42, %v1073_v3  ;;  %v1129_v42 = vrot.slane %v1127_v32, 5  ;;  %v15619_v2 = vld [vmem:[%s23714_s0 + $0x144] ss:$16 sps:$4 sm:$0xff]  }
  0x57   :  { %2311 = vmatpush1.bf16.msra.mxu1 %v15602_v63  ;;  %3692 = vmatpush1.bf16.msra.mxu0 %v15603_v9  ;;  %v15625_v63 = vld [vmem:[%s23713_s1 + $0xc0] sm:$0xff]   ;;  %v1099_v9 = vshll.u32 %v899_v5, 16  ;;  %v13817_v17 = vcombine.high %v16296_v7, %v16310_v13  ;;  %v13816_v18 = vcombine.low %v16296_v7, %v16310_v13  ;;  %v15674_v5 = vld [vmem:[%s23713_s1 + $0x170] sm:$0xff]  }
  0x58   :  { %2312 = vmatprep.subr.bf16.mxu1 %v23719_v0  ;;  %3693 = vmatprep.subr.bf16.mxu0 %v23719_v0  ;;  %v15621_v3 = vld [vmem:[%s23714_s0 + $0x3c4] ss:$16 sps:$4 sm:$0xff]  }
  0x59   :  { %592 = vmatmul.mubr.bf16.gmra.mrb[12].mxu0 %v13708_v14  ;;  %720 = vmatmul.mubr.bf16.gmra.mrb[12].mxu1 %v15587_v8  ;;  %v1085_v8 = vshll.u32 %v897_v4, 16  ;;  %v1097_v14 = vrot.slane %v1096_v56, 4  ;;  %v1101_v21 = vrot.slane %v1099_v9, 5  ;;  %v15613_v56 = vld [vmem:[%s23714_s0 + $0x384] ss:$16 sps:$4 sm:$0xff]  }
  0x5a   :  { %599 = vmatprep.mubr.bf16.mxu0 %v13711_v15  ;;  %727 = vmatprep.mubr.bf16.mxu1 %v15591_v11  ;;  %v16301_v11 = vld [vmem:[%s23714_s0 + $0xe0] sm:$0xff]  ;;  %v1124_v15 = vor.u32 %v1123_v58, %v1120_v57  ;;  %v15673_v4 = vld [vmem:[%s23713_s1 + $0xf0] sm:$0xff]  }
  0x5b   :  { %2313 = vmatpush1.bf16.msra.mxu1 %v15609_v23  ;;  %3694 = vmatpush1.bf16.msra.mxu0 %v15610_v24  ;;  %v1087_v19 = vrot.slane %v1085_v8, 5  ;;  %v901_v24 = vld [vmem:[%s23714_s0 + $0x68] sm:$0x11]  ;;  %v16341_v28 = vsel %vm16227_vm2, %v1097_v14, %v1101_v21  ;;  %v13714_v53 = vcombine.low %v16301_v11, %v16306_v12  ;;  %v15657_v57 = vld [vmem:[%s23713_s1 + $0xe0] sm:$0xff]   ;;  %v15682_v8 = vld [vmem:[%s23713_s1 + $0x178] sm:$0xff]  }
  0x5c   :  { %2314 = vmatprep.subr.bf16.mxu1 %v23719_v0  ;;  %3695 = vmatprep.subr.bf16.mxu0 %v23719_v0  ;;  %v1113_v30 = vshll.u32 %v901_v24, 16  ;;  %v1125_v31 = vrot.slane %v1124_v15, 4  ;;  %v15658_v58 = vld [vmem:[%s23713_s1 + $0x160] sm:$0xff]  }
  0x5d   :  { %v16328_v23 = vsel %vm16227_vm2, %v1083_v6, %v1087_v19  ;;  %v15681_v6 = vld [vmem:[%s23713_s1 + $0xf8] sm:$0xff]   ;;  %v15623_v9 = vld [vmem:[%s23714_s0 + $0x140] ss:$16 sps:$4 sm:$0xff]   ;;  %v15627_v14 = vld [vmem:[%s23714_s0 + $0x164] ss:$16 sps:$4 sm:$0xff]  }
  0x5e   :  { %v13819_v37 = vcombine.high %v16328_v23, %v16341_v28  ;;  %v13818_v38 = vcombine.low %v16328_v23, %v16341_v28  ;;  %v1115_v41 = vrot.slane %v1113_v30, 5  ;;  %v16369_v47 = vsel %vm16227_vm2, %v1125_v31, %v1129_v42  ;;  %v15629_v15 = vld [vmem:[%s23714_s0 + $0x3e4] ss:$16 sps:$4 sm:$0xff]   ;;  %v15632_v19 = vld [vmem:[%s23714_s0 + $0x3e0] ss:$16 sps:$4 sm:$0xff]  }
  0x5f   :  { %2315 = vmatpush1.bf16.msra.mxu1 %v15617_v35  ;;  %3696 = vmatpush1.bf16.msra.mxu0 %v15618_v43  ;;  %v13715_v35 = vcombine.high %v16301_v11, %v16306_v12  ;;  %v15649_v43 = vld [vmem:[%s23713_s1 + $0xd8] sm:$0xff]   ;;  %v15637_v21 = vld [vmem:[%s23714_s0 + $0x404] ss:$16 sps:$4 sm:$0xff]   ;;  %v15640_v24 = vld [vmem:[%s23714_s0 + $0x400] ss:$16 sps:$4 sm:$0xff]  }
  0x60   :  { %2316 = vmatprep.subr.bf16.mxu1 %v23719_v0  ;;  %3697 = vmatprep.subr.bf16.mxu0 %v23719_v0  ;;  %v16365_v46 = vsel %vm16227_vm2, %v1111_v26, %v1115_v41  ;;  %v15645_v26 = vld [vmem:[%s23714_s0 + $0x424] ss:$16 sps:$4 sm:$0xff]   ;;  %v15648_v30 = vld [vmem:[%s23714_s0 + $0x420] ss:$16 sps:$4 sm:$0xff]  }
  0x61   :  { %600 = vmatmul.mubr.bf16.gmra.mrb[16].mxu0 %v13710_v40  ;;  %728 = vmatmul.mubr.bf16.gmra.mrb[16].mxu1 %v15594_v54  ;;  %v15642_v40 = vld [vmem:[%s23713_s1 + $0x150] sm:$0xff]   ;;  %v13821_v51 = vcombine.high %v16365_v46, %v16369_v47  ;;  %v13820_v52 = vcombine.low %v16365_v46, %v16369_v47 }
  0x62   :  { %607 = vmatprep.mubr.bf16.mxu0 %v13713_v59  ;;  %735 = vmatprep.mubr.bf16.mxu1 %v15598_v60  ;;  %v15608_v54 = vld [vmem:[%s23714_s0 + $0x360] ss:$16 sps:$4 sm:$0xff]   ;;  %v15665_v59 = vld [vmem:[%s23713_s1 + $0xe8] sm:$0xff]   ;;  %v15651_v31 = vld [vmem:[%s23714_s0 + $0x1e4] ss:$16 sps:$4 sm:$0xff]  }
  0x63   :  { %2317 = vmatpush1.bf16.msra.mxu1 %v15625_v63  ;;  %3698 = vmatpush1.bf16.msra.mxu0 %v15626_v1  ;;  %v15666_v60 = vld [vmem:[%s23713_s1 + $0x168] sm:$0xff]   ;;  %v15615_v63 = vld [vmem:[%s23714_s0 + $0x100] ss:$16 sps:$4 sm:$0xff]   ;;  %v15653_v32 = vld [vmem:[%s23714_s0 + $0x464] ss:$16 sps:$4 sm:$0xff]  }
  0x64   :  { %2318 = vmatprep.subr.bf16.mxu1 %v23719_v0  ;;  %3699 = vmatprep.subr.bf16.mxu0 %v23719_v0  ;;  %v15616_v1 = vld [vmem:[%s23714_s0 + $0x380] ss:$16 sps:$4 sm:$0xff]  }
  0x65   :  { %v15663_v41 = vld [vmem:[%s23714_s0 + $0x200] ss:$16 sps:$4 sm:$0xff]  }
  0x66   :  { %v15664_v42 = vld [vmem:[%s23714_s0 + $0x480] ss:$16 sps:$4 sm:$0xff]  }
  0x67   :  { %2319 = vmatpush1.bf16.msra.mxu1 %v15633_v16  ;;  %3700 = vmatpush1.bf16.msra.mxu0 %v15634_v20  ;;  %v15631_v16 = vld [vmem:[%s23714_s0 + $0x160] ss:$16 sps:$4 sm:$0xff]   ;;  %v15635_v20 = vld [vmem:[%s23714_s0 + $0x184] ss:$16 sps:$4 sm:$0xff]  }
  0x68   :  { %2320 = vmatprep.subr.bf16.mxu1 %v23719_v0  ;;  %3701 = vmatprep.subr.bf16.mxu0 %v23719_v0 }
  0x69   :  { %608 = vmatmul.mubr.bf16.gmra.mrb[20].mxu0 %v13712_v22  ;;  %736 = vmatmul.mubr.bf16.gmra.mrb[20].mxu1 %v15601_v27  ;;  %v15639_v22 = vld [vmem:[%s23714_s0 + $0x180] ss:$16 sps:$4 sm:$0xff]  }
  0x6a   :  { %615 = vmatprep.mubr.bf16.mxu0 %v13715_v35  ;;  %743 = vmatprep.mubr.bf16.mxu1 %v15605_v36  ;;  %v15647_v27 = vld [vmem:[%s23714_s0 + $0x1a0] ss:$16 sps:$4 sm:$0xff]  }
  0x6b   :  { %2321 = vmatpush1.bf16.msra.mxu1 %v15641_v39  ;;  %3702 = vmatpush1.bf16.msra.mxu0 %v15642_v40  ;;  %v15655_v35 = vld [vmem:[%s23714_s0 + $0x1e0] ss:$16 sps:$4 sm:$0xff]   ;;  %v15659_v39 = vld [vmem:[%s23714_s0 + $0x204] ss:$16 sps:$4 sm:$0xff]  }
  0x6c   :  { %2322 = vmatprep.subr.bf16.mxu1 %v23719_v0  ;;  %3703 = vmatprep.subr.bf16.mxu0 %v23719_v0  ;;  %v15656_v36 = vld [vmem:[%s23714_s0 + $0x460] ss:$16 sps:$4 sm:$0xff]   ;;  %v15661_v40 = vld [vmem:[%s23714_s0 + $0x484] ss:$16 sps:$4 sm:$0xff]  }
  0x6f   :  { %2323 = vmatpush1.bf16.msra.mxu1 %v15649_v43  ;;  %3704 = vmatpush1.bf16.msra.mxu0 %v15650_v48  ;;  %v15667_v43 = vld [vmem:[%s23714_s0 + $0x224] ss:$16 sps:$4 sm:$0xff]  }
  0x70   :  { %2324 = vmatprep.subr.bf16.mxu1 %v23719_v0  ;;  %3705 = vmatprep.subr.bf16.mxu0 %v23719_v0  ;;  %v15669_v48 = vld [vmem:[%s23714_s0 + $0x4a4] ss:$16 sps:$4 sm:$0xff]  }
  0x71   :  { %616 = vmatmul.mubr.bf16.gmra.mrb[24].mxu0 %v13714_v53  ;;  %744 = vmatmul.mubr.bf16.gmra.mrb[24].mxu1 %v15608_v54  ;;  %v15671_v53 = vld [vmem:[%s23714_s0 + $0x220] ss:$16 sps:$4 sm:$0xff]  }
  0x72   :  { %623 = vmatprep.mubr.bf16.mxu0 %v15611_v55  ;;  %751 = vmatprep.mubr.bf16.mxu1 %v15613_v56  ;;  %v2781_v54 = vld [vmem:[%s23714_s0] sm:$0xee]  ;;  %v2782_v55 = vld [vmem:[%s23714_s0 + $0x8] sm:$0x11]  ;;  %v2783_v56 = vld [vmem:[%s23714_s0 + $0x10] sm:$0xee] }
  0x73   :  { %2325 = vmatpush1.bf16.msra.mxu1 %v15657_v57  ;;  %3706 = vmatpush1.bf16.msra.mxu0 %v15658_v58  ;;  %v2784_v57 = vld [vmem:[%s23714_s0 + $0x18] sm:$0x11]  ;;  %v15672_v58 = vld [vmem:[%s23714_s0 + $0x4a0] ss:$16 sps:$4 sm:$0xff]  }
  0x74   :  { %2326 = vmatprep.subr.bf16.mxu1 %v23719_v0  ;;  %3707 = vmatprep.subr.bf16.mxu0 %v23719_v0 }
  0x77   :  { %2327 = vmatpush1.bf16.msra.mxu1 %v15665_v59  ;;  %3708 = vmatpush1.bf16.msra.mxu0 %v15666_v60  ;;  %v15675_v59 = vld [vmem:[%s23714_s0 + $0x244] ss:$16 sps:$4 sm:$0xff]  }
  0x78   :  { %2328 = vmatprep.subr.bf16.mxu1 %v23719_v0  ;;  %3709 = vmatprep.subr.bf16.mxu0 %v23719_v0  ;;  %v15677_v60 = vld [vmem:[%s23714_s0 + $0x4c4] ss:$16 sps:$4 sm:$0xff]  }
  0x79   :  { %624 = vmatmul.mubr.bf16.gmra.mrb[28].mxu0 %v15615_v63  ;;  %752 = vmatmul.mubr.bf16.gmra.mrb[28].mxu1 %v15616_v1  ;;  %v13894_v63 = vrot.slane %v2781_v54, 9  ;;  %v3042_v1 = vrot.slane %v2782_v55, 5  ;;  %v1132_v54 = vshrl.u32 %v16179_v61, 16  ;;  %v1135_v55 = vshll.u32 %v16179_v61, 16  ;;  %v2796_v61 = vld [vmem:[%s23714_s0 + $0x78] sm:$0x11] }
  0x7a   :  { %631 = vmatprep.mubr.bf16.mxu0 %v15619_v2  ;;  %759 = vmatprep.mubr.bf16.mxu1 %v15621_v3  ;;  %v13895_v2 = vrot.slane %v2783_v56, 9  ;;  %v3046_v3 = vrot.slane %v2784_v57, 5  ;;  %v2793_v56 = vld [vmem:[%s23714_s0 + $0x60] sm:$0xee]  ;;  %v2794_v57 = vld [vmem:[%s23714_s0 + $0x68] sm:$0x11] }
  0x7b   :  { %2329 = vmatpush1.bf16.msra.mxu1 %v15673_v4  ;;  %3710 = vmatpush1.bf16.msra.mxu0 %v15674_v5  ;;  %v15679_v5 = vld [vmem:[%s23714_s0 + $0x240] ss:$16 sps:$4 sm:$0xff]  }
  0x7c   :  { %2330 = vmatprep.subr.bf16.mxu1 %v23719_v0  ;;  %3711 = vmatprep.subr.bf16.mxu0 %v23719_v0 }
  0x7f   :  { %2331 = vmatpush1.bf16.msra.mxu1 %v15681_v6  ;;  %3712 = vmatpush1.bf16.msra.mxu0 %v15682_v8  ;;  %v3043_v6 = vsel %vm16533_vm5, %v13894_v63, %v3042_v1  ;;  %v3047_v8 = vsel %vm16533_vm5, %v13895_v2, %v3046_v3  ;;  %v1134_v63 = vrot.slane %v1132_v54, 4  ;;  %v1137_v1 = vrot.slane %v1135_v55, 5  ;;  %v16687_v55 = vld [vmem:[%s23714_s0 + $0xc0] sm:$0xee] }
  0x80   :  { %4676 = vmatprep.subr.bf16.mxu1 %v23719_v0  ;;  %6566 = vmatprep.subr.bf16.mxu0 %v23719_v0  ;;  %v13900_v2 = vrot.slane %v2793_v56, 9  ;;  %v3066_v3 = vrot.slane %v2794_v57, 5  ;;  %v16692_v56 = vld [vmem:[%s23714_s0 + $0xc8] sm:$0x11] }
  0x81   :  { %632 = vmatmul.mubr.bf16.gmra.mrb[32].mxu0 %v15623_v9  ;;  %760 = vmatmul.mubr.bf16.gmra.mrb[32].mxu1 %v15624_v10  ;;  %v15680_v9 = vld [vmem:[%s23714_s0 + $0x4c0] ss:$16 sps:$4 sm:$0xff]  }
  0x82   :  { %639 = vmatprep.mubr.bf16.mxu0 %v15627_v14  ;;  %767 = vmatprep.mubr.bf16.mxu1 %v15629_v15  ;;  %v2785_v10 = vld [vmem:[%s23714_s0 + $0x20] sm:$0xee]  ;;  %v2786_v14 = vld [vmem:[%s23714_s0 + $0x28] sm:$0x11]  ;;  %v2787_v15 = vld [vmem:[%s23714_s0 + $0x30] sm:$0xee] }
  0x89   :  { %640 = vmatmul.mubr.bf16.gmra.mrb[36].mxu0 %v15631_v16  ;;  %768 = vmatmul.mubr.bf16.gmra.mrb[36].mxu1 %v15632_v19  ;;  %v2788_v16 = vld [vmem:[%s23714_s0 + $0x38] sm:$0x11]  ;;  %v13991_v19 = vcombine.high %v3043_v6, %v3047_v8 }
  0x8a   :  { %647 = vmatprep.mubr.bf16.mxu0 %v15635_v20  ;;  %775 = vmatprep.mubr.bf16.mxu1 %v15637_v21  ;;  %v13896_v20 = vrot.slane %v2785_v10, 9  ;;  %v3050_v21 = vrot.slane %v2786_v14, 5  ;;  %v907_v10 = vld [vmem:[%s23714_s0 + $0xb8] sm:$0x11]  ;;  %v2797_v14 = vld [vmem:[%s23714_s0 + $0xa0] sm:$0xee] }
  0x91   :  { %648 = vmatmul.mubr.bf16.gmra.mrb[40].mxu0 %v15639_v22  ;;  %776 = vmatmul.mubr.bf16.gmra.mrb[40].mxu1 %v15640_v24  ;;  %v13897_v22 = vrot.slane %v2787_v15, 9  ;;  %v3054_v24 = vrot.slane %v2788_v16, 5 }
  0x92   :  { %655 = vmatprep.mubr.bf16.mxu0 %v15643_v25  ;;  %783 = vmatprep.mubr.bf16.mxu1 %v15645_v26  ;;  %v2789_v25 = vld [vmem:[%s23714_s0 + $0x40] sm:$0xee]  ;;  %v3051_v26 = vsel %vm16533_vm5, %v13896_v20, %v3050_v21  ;;  %v2798_v20 = vld [vmem:[%s23714_s0 + $0xa8] sm:$0x11]  ;;  %v1138_v21 = vor.u32 %v1137_v1, %v1134_v63  ;;  %v1188_v63 = vshrl.u32 %v16301_v11, 16  ;;  %v1191_v1 = vshll.u32 %v16301_v11, 16 }
  0x93   :  { %v913_v11 = vld [vmem:[%s23714_s0 + $0xe8] sm:$0x11] }
  0x99   :  { %656 = vmatmul.mubr.bf16.gmra.mrb[44].mxu0 %v15647_v27  ;;  %784 = vmatmul.mubr.bf16.gmra.mrb[44].mxu1 %v15648_v30  ;;  %v3055_v27 = vsel %vm16533_vm5, %v13897_v22, %v3054_v24  ;;  %v2790_v30 = vld [vmem:[%s23714_s0 + $0x48] sm:$0x11]  ;;  %v2799_v22 = vld [vmem:[%s23714_s0 + $0xb0] sm:$0xee]  ;;  %v2800_v24 = vld [vmem:[%s23714_s0 + $0xb8] sm:$0x11] }
  0x9a   :  { %663 = vmatprep.mubr.bf16.mxu0 %v15651_v31  ;;  %791 = vmatprep.mubr.bf16.mxu1 %v15653_v32  ;;  %v2791_v31 = vld [vmem:[%s23714_s0 + $0x50] sm:$0xee]  ;;  %v13990_v32 = vcombine.low %v3043_v6, %v3047_v8  ;;  %v3070_v6 = vrot.slane %v2796_v61, 5  ;;  %v15691_v61 = vld [vmem:[%s23713_s1 + $0x1a0] sm:$0xff]  }
  0x9b   :  { %v15687_v8 = vld [vmem:[%s23713_s1 + $0x190] sm:$0xff]  }
  0xa1   :  { %664 = vmatmul.mubr.bf16.gmra.mrb[48].mxu0 %v15655_v35  ;;  %792 = vmatmul.mubr.bf16.gmra.mrb[48].mxu1 %v15656_v36  ;;  %v15683_v35 = vld [vmem:[%s23713_s1 + $0x180] sm:$0xff]  }
  0xa2   :  { %671 = vmatprep.mubr.bf16.mxu0 %v15659_v39  ;;  %799 = vmatprep.mubr.bf16.mxu1 %v15661_v40  ;;  %v15684_v36 = vld [vmem:[%s23713_s1 + $0x200] sm:$0xff]   ;;  %v13898_v39 = vrot.slane %v2789_v25, 9  ;;  %v13993_v40 = vcombine.high %v3051_v26, %v3055_v27  ;;  %v1160_v25 = vshrl.u32 %v16235_v33, 16 }
  0xa9   :  { %672 = vmatmul.mubr.bf16.gmra.mrb[52].mxu0 %v15663_v41  ;;  %800 = vmatmul.mubr.bf16.gmra.mrb[52].mxu1 %v15664_v42  ;;  %v3058_v41 = vrot.slane %v2790_v30, 5  ;;  %v13899_v42 = vrot.slane %v2791_v31, 9  ;;  %v1177_v30 = vshll.u32 %v16240_v34, 16 }
  0xaa   :  { %679 = vmatprep.mubr.bf16.mxu0 %v15667_v43  ;;  %807 = vmatprep.mubr.bf16.mxu1 %v15669_v48  ;;  %v15685_v48 = vld [vmem:[%s23713_s1 + $0x188] sm:$0xff]  }
  0xab   :  { %v16612_v45 = vsel %vm16533_vm5, %v13898_v39, %v3058_v41  ;;  %v3074_v39 = vrot.slane %v2798_v20, 5  ;;  %v3078_v41 = vrot.slane %v2800_v24, 5  ;;  %v1179_v54 = vrot.slane %v1177_v30, 5  ;;  %v916_v24 = vld [vmem:[%s23714_s0 + $0x100] sm:$0xff] }
  0xac   :  { %v1197_v30 = vshll.u32 %v913_v11, 16 }
  0xb1   :  { %680 = vmatmul.mubr.bf16.gmra.mrb[56].mxu0 %v15671_v53  ;;  %808 = vmatmul.mubr.bf16.gmra.mrb[56].mxu1 %v15672_v58  ;;  %v15686_v53 = vld [vmem:[%s23713_s1 + $0x208] sm:$0xff]   ;;  %v2795_v58 = vld [vmem:[%s23714_s0 + $0x70] sm:$0xee] }
  0xb2   :  { %687 = vmatprep.mubr.bf16.mxu0 %v15675_v59  ;;  %815 = vmatprep.mubr.bf16.mxu1 %v15677_v60  ;;  %v1149_v59 = vshll.u32 %v16184_v62, 16  ;;  %v13992_v60 = vcombine.low %v3051_v26, %v3055_v27  ;;  %v1163_v26 = vshll.u32 %v16235_v33, 16  ;;  %v1174_v27 = vshrl.u32 %v16240_v34, 16  ;;  %v909_v33 = vld [vmem:[%s23714_s0 + $0xc8] sm:$0x11] }
  0xb9   :  { %688 = vmatmul.mubr.bf16.gmra.mrb[60].mxu0 %v15679_v5  ;;  %816 = vmatmul.mubr.bf16.gmra.mrb[60].mxu1 %v15680_v9  ;;  %v13901_v5 = vrot.slane %v2795_v58, 9  ;;  %v1169_v58 = vshll.u32 %v909_v33, 16  ;;  %v16768_v33 = vld [vmem:[%s23714_s0 + $0xe8] sm:$0x11] }
  0xba   :  { %2332 = vmatprep.mubr.bf16.mxu1 %v13815_v50  ;;  %3713 = vmatprep.mubr.bf16.mxu0 %v13991_v19  ;;  %v2792_v50 = vld [vmem:[%s23714_s0 + $0x58] sm:$0x11]  ;;  %v1151_v19 = vrot.slane %v1149_v59, 5  ;;  %v3090_v47 = vrot.slane %v16768_v33, 5 }
  0xbb   :  { %v3062_v43 = vrot.slane %v2792_v50, 5  ;;  %v16664_v50 = vsel %vm16533_vm5, %v13900_v2, %v3066_v3  ;;  %v16668_v7 = vsel %vm16533_vm5, %v13901_v5, %v3070_v6  ;;  %v2804_v6 = vld [vmem:[%s23714_s0 + $0xd8] sm:$0x11]  ;;  %v1171_v28 = vrot.slane %v1169_v58, 5 }
  0xbc   :  { %v13997_v57 = vcombine.high %v16664_v50, %v16668_v7  ;;  %v3086_v20 = vrot.slane %v2804_v6, 5 }
  0xbd   :  { %v16616_v44 = vsel %vm16533_vm5, %v13899_v42, %v3062_v43  ;;  %v911_v42 = vld [vmem:[%s23714_s0 + $0xd8] sm:$0x11]  ;;  %v1162_v43 = vrot.slane %v1160_v25, 4  ;;  %v13996_v25 = vcombine.low %v16664_v50, %v16668_v7 }
  0xbe   :  { %v13995_v9 = vcombine.high %v16612_v45, %v16616_v44  ;;  %v13994_v31 = vcombine.low %v16612_v45, %v16616_v44 }
  0xc1   :  { %2333 = vmatmul.mubr.bf16.vlgmr.msra.gmra.mrb[64].mxu1 %v13814_v49  ;;  %3714 = vmatmul.mubr.bf16.vlgmr.msra.gmra.mrb[64].mxu0 %v13990_v32  ;;  %v1146_v49 = vshrl.u32 %v16184_v62, 16  ;;  %v15688_v62 = vld [vmem:[%s23713_s1 + $0x210] sm:$0xff]   ;;  %v15689_v32 = vld [vmem:[%s23713_s1 + $0x198] sm:$0xff]  }
  0xc2   :  { %4677 = vmatpush1.bf16.msra.mxu1 %v15683_v35  ;;  %6567 = vmatpush1.bf16.msra.mxu0 %v15684_v36  ;;  %v15690_v35 = vld [vmem:[%s23713_s1 + $0x218] sm:$0xff]   ;;  %v1139_v36 = vrot.slane %v1138_v21, 4  ;;  %v1190_v21 = vrot.slane %v1188_v63, 4 }
  0xc3   :  { %2340 = vmatprep.mubr.bf16.mxu1 %v13817_v17  ;;  %3721 = vmatprep.mubr.bf16.mxu0 %v13993_v40  ;;  %v905_v17 = vld [vmem:[%s23714_s0 + $0xa8] sm:$0x11]  ;;  %v1148_v16 = vrot.slane %v1146_v49, 4  ;;  %v13903_v40 = vrot.slane %v2799_v22, 9  ;;  %v15692_v49 = vld [vmem:[%s23713_s1 + $0x220] sm:$0xff]   ;;  %v1193_v22 = vrot.slane %v1191_v1, 5 }
  0xc4   :  { %4678 = vmatprep.subr.bf16.mxu1 %v23719_v0  ;;  %6568 = vmatprep.subr.bf16.mxu0 %v23719_v0  ;;  %v1141_v15 = vshll.u32 %v905_v17, 16  ;;  %v2803_v17 = vld [vmem:[%s23714_s0 + $0xd0] sm:$0xee] }
  0xc5   :  { %v1152_v13 = vor.u32 %v1151_v19, %v1148_v16  ;;  %v16718_v2 = vsel %vm16533_vm5, %v13903_v40, %v3078_v41  ;;  %v15694_v16 = vld [vmem:[%s23713_s1 + $0x228] sm:$0xff]   ;;  %v1216_v40 = vshrl.u32 %v916_v24, 16  ;;  %v1219_v41 = vshll.u32 %v916_v24, 16  ;;  %v2811_v24 = vld [vmem:[%s23714_s0 + $0x110] sm:$0xee] }
  0xc6   :  { %4679 = vmatpush1.bf16.msra.mxu1 %v15685_v48  ;;  %6569 = vmatpush1.bf16.msra.mxu0 %v15686_v53  ;;  %v1143_v34 = vrot.slane %v1141_v15, 5  ;;  %v1165_v48 = vrot.slane %v1163_v26, 5  ;;  %v1176_v53 = vrot.slane %v1174_v27, 4  ;;  %v15693_v15 = vld [vmem:[%s23713_s1 + $0x1a8] sm:$0xff]  }
  0xc7   :  { %4680 = vmatprep.subr.bf16.mxu1 %v23719_v0  ;;  %6570 = vmatprep.subr.bf16.mxu0 %v23719_v0  ;;  %v1153_v45 = vrot.slane %v1152_v13, 4  ;;  %v1218_v63 = vrot.slane %v1216_v40, 4  ;;  %v1221_v1 = vrot.slane %v1219_v41, 5  ;;  %v13909_v41 = vrot.slane %v2811_v24, 9 }
  0xc8   :  { %v1166_v3 = vor.u32 %v1165_v48, %v1162_v43  ;;  %v1180_v5 = vor.u32 %v1179_v54, %v1176_v53  ;;  %v16731_v23 = vsel %vm16227_vm2, %v1139_v36, %v1143_v34  ;;  %v15695_v34 = vld [vmem:[%s23713_s1 + $0x1b0] sm:$0xff]  }
  0xc9   :  { %2341 = vmatmul.mubr.bf16.gmra.mrb[68].mxu1 %v13816_v18  ;;  %3722 = vmatmul.mubr.bf16.gmra.mrb[68].mxu0 %v13992_v60  ;;  %v1155_v18 = vshll.u32 %v907_v10, 16  ;;  %v1183_v60 = vshll.u32 %v911_v42, 16  ;;  %v13905_v10 = vrot.slane %v2803_v17, 9  ;;  %v16783_v36 = vld [vmem:[%s23714_s0 + $0xf0] sm:$0xee] }
  0xca   :  { %2348 = vmatprep.mubr.bf16.mxu1 %v13819_v37  ;;  %3729 = vmatprep.mubr.bf16.mxu0 %v13995_v9  ;;  %v13902_v37 = vrot.slane %v2797_v14, 9  ;;  %v1205_v14 = vshll.u32 %v16306_v12, 16  ;;  %v1167_v26 = vrot.slane %v1166_v3, 4  ;;  %v1181_v27 = vrot.slane %v1180_v5, 4  ;;  %v920_v3 = vld [vmem:[%s23714_s0 + $0x140] sm:$0xff] }
  0xcb   :  { %4681 = vmatpush1.bf16.msra.mxu1 %v15687_v8  ;;  %6571 = vmatpush1.bf16.msra.mxu0 %v15688_v62  ;;  %v1157_v44 = vrot.slane %v1155_v18, 5  ;;  %v3082_v8 = vrot.slane %v16692_v56, 5  ;;  %v915_v62 = vld [vmem:[%s23714_s0 + $0xf8] sm:$0x11]  ;;  %v1185_v19 = vrot.slane %v1183_v60, 5  ;;  %v16801_v43 = vsel %vm16533_vm5, %v13905_v10, %v3086_v20 }
  0xcc   :  { %4682 = vmatprep.subr.bf16.mxu1 %v23719_v0  ;;  %6572 = vmatprep.subr.bf16.mxu0 %v23719_v0  ;;  %v16704_v59 = vsel %vm16533_vm5, %v13902_v37, %v3074_v39  ;;  %v1211_v13 = vshll.u32 %v915_v62, 16  ;;  %v1207_v37 = vrot.slane %v1205_v14, 5  ;;  %v16788_v39 = vld [vmem:[%s23714_s0 + $0xf8] sm:$0x11]  ;;  %v16805_v54 = vsel %vm16227_vm2, %v1167_v26, %v1171_v28  ;;  %v922_v14 = vld [vmem:[%s23714_s0 + $0x150] sm:$0xff] }
  0xcd   :  { %v16740_v9 = vsel %vm16227_vm2, %v1153_v45, %v1157_v44  ;;  %v13999_v7 = vcombine.high %v16704_v59, %v16718_v2  ;;  %v16814_v56 = vsel %vm16227_vm2, %v1181_v27, %v1185_v19  ;;  %v919_v45 = vld [vmem:[%s23714_s0 + $0x118] sm:$0x11]  ;;  %v3094_v17 = vrot.slane %v16788_v39, 5 }
  0xce   :  { %v13823_v50 = vcombine.high %v16731_v23, %v16740_v9  ;;  %v1213_v58 = vrot.slane %v1211_v13, 5  ;;  %v15697_v44 = vld [vmem:[%s23713_s1 + $0x1b8] sm:$0xff]   ;;  %v13822_v5 = vcombine.low %v16731_v23, %v16740_v9  ;;  %v13998_v6 = vcombine.low %v16704_v59, %v16718_v2  ;;  %v15700_v59 = vld [vmem:[%s23713_s1 + $0x240] sm:$0xff]   ;;  %v15702_v13 = vld [vmem:[%s23713_s1 + $0x248] sm:$0xff]  }
  0xcf   :  { %4683 = vmatpush1.bf16.msra.mxu1 %v15689_v32  ;;  %6573 = vmatpush1.bf16.msra.mxu0 %v15690_v35  ;;  %v15696_v32 = vld [vmem:[%s23713_s1 + $0x230] sm:$0xff]   ;;  %v1194_v35 = vor.u32 %v1193_v22, %v1190_v21  ;;  %v1239_v23 = vshll.u32 %v919_v45, 16  ;;  %v2809_v9 = vld [vmem:[%s23714_s0 + $0x100] sm:$0xee]  ;;  %v13824_v19 = vcombine.low %v16805_v54, %v16814_v56  ;;  %v1222_v21 = vor.u32 %v1221_v1, %v1218_v63  ;;  %v2810_v22 = vld [vmem:[%s23714_s0 + $0x108] sm:$0x11] }
  0xd0   :  { %4684 = vmatprep.subr.bf16.mxu1 %v23719_v0  ;;  %6574 = vmatprep.subr.bf16.mxu0 %v23719_v0  ;;  %v2812_v27 = vld [vmem:[%s23714_s0 + $0x118] sm:$0x11]  ;;  %v3098_v40 = vrot.slane %v2810_v22, 5  ;;  %v2814_v45 = vld [vmem:[%s23714_s0 + $0x148] sm:$0x11] }
  0xd1   :  { %2349 = vmatmul.mubr.bf16.gmra.mrb[72].mxu1 %v13818_v38  ;;  %3730 = vmatmul.mubr.bf16.gmra.mrb[72].mxu0 %v13994_v31  ;;  %v13904_v38 = vrot.slane %v16687_v55, 9  ;;  %v16763_v31 = vld [vmem:[%s23714_s0 + $0xe0] sm:$0xee]  ;;  %v1199_v55 = vrot.slane %v1197_v30, 5  ;;  %v1195_v60 = vrot.slane %v1194_v35, 4  ;;  %v1223_v39 = vrot.slane %v1222_v21, 4 }
  0xd2   :  { %2356 = vmatprep.mubr.bf16.mxu1 %v13821_v51  ;;  %3737 = vmatprep.mubr.bf16.mxu0 %v13997_v57  ;;  %v1202_v51 = vshrl.u32 %v16306_v12, 16  ;;  %v918_v12 = vld [vmem:[%s23714_s0 + $0x110] sm:$0xff]  ;;  %v13906_v46 = vrot.slane %v16763_v31, 9  ;;  %v921_v30 = vld [vmem:[%s23714_s0 + $0x148] sm:$0x11] }
  0xd3   :  { %4685 = vmatpush1.bf16.msra.mxu1 %v15691_v61  ;;  %6575 = vmatpush1.bf16.msra.mxu0 %v15692_v49  ;;  %v16797_v42 = vsel %vm16533_vm5, %v13904_v38, %v3082_v8  ;;  %v1230_v48 = vshrl.u32 %v918_v12, 16  ;;  %v1233_v53 = vshll.u32 %v918_v12, 16  ;;  %v13907_v61 = vrot.slane %v16783_v36, 9  ;;  %v15698_v49 = vld [vmem:[%s23713_s1 + $0x238] sm:$0xff]   ;;  %v15699_v38 = vld [vmem:[%s23713_s1 + $0x1c0] sm:$0xff]  }
  0xd4   :  { %4686 = vmatprep.subr.bf16.mxu1 %v23719_v0  ;;  %6576 = vmatprep.subr.bf16.mxu0 %v23719_v0  ;;  %v1204_v18 = vrot.slane %v1202_v51, 4  ;;  %v13825_v8 = vcombine.high %v16805_v54, %v16814_v56  ;;  %v14001_v62 = vcombine.high %v16797_v42, %v16801_v43  ;;  %v14000_v2 = vcombine.low %v16797_v42, %v16801_v43  ;;  %v924_v36 = vld [vmem:[%s23714_s0 + $0x160] sm:$0xff]  ;;  %v926_v43 = vld [vmem:[%s23714_s0 + $0x170] sm:$0xff] }
  0xd5   :  { %v1232_v11 = vrot.slane %v1230_v48, 4  ;;  %v1235_v28 = vrot.slane %v1233_v53, 5  ;;  %v16860_v20 = vsel %vm16533_vm5, %v13906_v46, %v3090_v47  ;;  %v16870_v12 = vsel %vm16227_vm2, %v1195_v60, %v1199_v55  ;;  %v923_v55 = vld [vmem:[%s23714_s0 + $0x158] sm:$0x11]  ;;  %v15703_v47 = vld [vmem:[%s23713_s1 + $0x1d0] sm:$0xff]  }
  0xd6   :  { %v1208_v57 = vor.u32 %v1207_v37, %v1204_v18  ;;  %v1241_v18 = vrot.slane %v1239_v23, 5  ;;  %v13908_v37 = vrot.slane %v2809_v9, 9  ;;  %v3102_v42 = vrot.slane %v2812_v27, 5  ;;  %v928_v9 = vld [vmem:[%s23714_s0 + $0x180] sm:$0xff] }
  0xd7   :  { %4687 = vmatpush1.bf16.msra.mxu1 %v15693_v15  ;;  %6577 = vmatpush1.bf16.msra.mxu0 %v15694_v16  ;;  %v1244_v15 = vshrl.u32 %v920_v3, 16  ;;  %v1247_v16 = vshll.u32 %v920_v3, 16  ;;  %v1236_v26 = vor.u32 %v1235_v28, %v1232_v11  ;;  %v1253_v46 = vshll.u32 %v921_v30, 16  ;;  %v2817_v22 = vld [vmem:[%s23714_s0 + $0x160] sm:$0xee] }
  0xd8   :  { %4688 = vmatprep.subr.bf16.mxu1 %v23719_v0  ;;  %6578 = vmatprep.subr.bf16.mxu0 %v23719_v0  ;;  %v1209_v10 = vrot.slane %v1208_v57, 4  ;;  %v15704_v57 = vld [vmem:[%s23713_s1 + $0x250] sm:$0xff]   ;;  %v16928_v60 = vsel %vm16533_vm5, %v13908_v37, %v3098_v40  ;;  %v1275_v63 = vshll.u32 %v924_v36, 16  ;;  %v16936_v3 = vsel %vm16533_vm5, %v13909_v41, %v3102_v42  ;;  %v15705_v40 = vld [vmem:[%s23713_s1 + $0x1d8] sm:$0xff]  }
  0xd9   :  { %2357 = vmatmul.mubr.bf16.gmra.mrb[76].mxu1 %v13820_v52  ;;  %3738 = vmatmul.mubr.bf16.gmra.mrb[76].mxu0 %v13996_v25  ;;  %v917_v52 = vld [vmem:[%s23714_s0 + $0x108] sm:$0x11]  ;;  %v16874_v25 = vsel %vm16533_vm5, %v13907_v61, %v3094_v17  ;;  %v1249_v35 = vrot.slane %v1247_v16, 5  ;;  %v1237_v54 = vrot.slane %v1236_v26, 4  ;;  %v2813_v61 = vld [vmem:[%s23714_s0 + $0x140] sm:$0xee] }
  0xda   :  { %2364 = vmatprep.mubr.bf16.mxu1 %v13823_v50  ;;  %3745 = vmatprep.mubr.bf16.mxu0 %v13999_v7  ;;  %v1225_v51 = vshll.u32 %v917_v52, 16  ;;  %v16884_v31 = vsel %vm16227_vm2, %v1209_v10, %v1213_v58  ;;  %v1261_v50 = vshll.u32 %v922_v14, 16  ;;  %v15701_v7 = vld [vmem:[%s23713_s1 + $0x1c8] sm:$0xff]   ;;  %v14003_v53 = vcombine.high %v16860_v20, %v16874_v25  ;;  %v2819_v30 = vld [vmem:[%s23714_s0 + $0x170] sm:$0xee] }
  0xdb   :  { %4689 = vmatpush1.bf16.msra.mxu1 %v15695_v34  ;;  %6579 = vmatpush1.bf16.msra.mxu0 %v15696_v32  ;;  %v1258_v34 = vshrl.u32 %v922_v14, 16  ;;  %v1246_v32 = vrot.slane %v1244_v15, 4  ;;  %v13827_v48 = vcombine.high %v16870_v12, %v16884_v31  ;;  %v1272_v17 = vshrl.u32 %v924_v36, 16  ;;  %v925_v10 = vld [vmem:[%s23714_s0 + $0x168] sm:$0x11]  ;;  %v930_v14 = vld [vmem:[%s23714_s0 + $0x190] sm:$0xff] }
  0xdc   :  { %4690 = vmatprep.subr.bf16.mxu1 %v23719_v0  ;;  %6580 = vmatprep.subr.bf16.mxu0 %v23719_v0  ;;  %v1227_v33 = vrot.slane %v1225_v51, 5  ;;  %v1263_v56 = vrot.slane %v1261_v50, 5  ;;  %v1289_v11 = vshll.u32 %v926_v43, 16  ;;  %v16943_v28 = vsel %vm16227_vm2, %v1237_v54, %v1241_v18 }
  0xdd   :  { %v1260_v52 = vrot.slane %v1258_v34, 4  ;;  %v1250_v58 = vor.u32 %v1249_v35, %v1246_v32  ;;  %v13826_v15 = vcombine.low %v16870_v12, %v16884_v31  ;;  %v1277_v21 = vrot.slane %v1275_v63, 5  ;;  %v2818_v12 = vld [vmem:[%s23714_s0 + $0x168] sm:$0x11] }
  0xde   :  { %v16932_v1 = vsel %vm16227_vm2, %v1223_v39, %v1227_v33  ;;  %v1291_v27 = vrot.slane %v1289_v11, 5  ;;  %v14004_v31 = vcombine.low %v16928_v60, %v16936_v3  ;;  %v1300_v18 = vshrl.u32 %v928_v9, 16 }
  0xdf   :  { %4691 = vmatpush1.bf16.msra.mxu1 %v15697_v44  ;;  %6581 = vmatpush1.bf16.msra.mxu0 %v15698_v49  ;;  %v2815_v44 = vld [vmem:[%s23714_s0 + $0x150] sm:$0xee]  ;;  %v14002_v49 = vcombine.low %v16860_v20, %v16874_v25  ;;  %v1251_v51 = vrot.slane %v1250_v58, 4  ;;  %v1274_v20 = vrot.slane %v1272_v17, 4  ;;  %v13829_v24 = vcombine.high %v16932_v1, %v16943_v28 }
  0xe0   :  { %4692 = vmatprep.subr.bf16.mxu1 %v23719_v0  ;;  %6582 = vmatprep.subr.bf16.mxu0 %v23719_v0  ;;  %v13911_v23 = vrot.slane %v2815_v44, 9  ;;  %v14005_v25 = vcombine.high %v16928_v60, %v16936_v3  ;;  %v1303_v37 = vshll.u32 %v928_v9, 16  ;;  %v1314_v36 = vshrl.u32 %v930_v14, 16  ;;  %v15706_v44 = vld [vmem:[%s23713_s1 + $0x258] sm:$0xff]   ;;  %v2822_v3 = vld [vmem:[%s23714_s0 + $0x188] sm:$0x11] }
  0xe1   :  { %2365 = vmatmul.mubr.bf16.gmra.mrb[80].mxu1 %v13822_v5  ;;  %3746 = vmatmul.mubr.bf16.gmra.mrb[80].mxu0 %v13998_v6  ;;  %v2816_v5 = vld [vmem:[%s23714_s0 + $0x158] sm:$0x11]  ;;  %v1286_v6 = vshrl.u32 %v926_v43, 16  ;;  %v1278_v35 = vor.u32 %v1277_v21, %v1274_v20  ;;  %v1317_v39 = vshll.u32 %v930_v14, 16  ;;  %v3114_v54 = vrot.slane %v2818_v12, 5 }
  0xe2   :  { %2372 = vmatprep.mubr.bf16.mxu1 %v13825_v8  ;;  %3753 = vmatprep.mubr.bf16.mxu0 %v14001_v62  ;;  %v1264_v8 = vor.u32 %v1263_v56, %v1260_v52  ;;  %v1267_v62 = vshll.u32 %v923_v55, 16  ;;  %v3110_v16 = vrot.slane %v2816_v5, 5  ;;  %v13913_v55 = vrot.slane %v2819_v30, 9  ;;  %v933_v12 = vld [vmem:[%s23714_s0 + $0x1a8] sm:$0x11] }
  0xe3   :  { %4693 = vmatpush1.bf16.msra.mxu1 %v15699_v38  ;;  %6583 = vmatpush1.bf16.msra.mxu0 %v15700_v59  ;;  %v1255_v38 = vrot.slane %v1253_v46, 5  ;;  %v13910_v59 = vrot.slane %v2813_v61, 9  ;;  %v1288_v26 = vrot.slane %v1286_v6, 4  ;;  %v13828_v52 = vcombine.low %v16932_v1, %v16943_v28  ;;  %v2821_v1 = vld [vmem:[%s23714_s0 + $0x180] sm:$0xee] }
  0xe4   :  { %4694 = vmatprep.subr.bf16.mxu1 %v23719_v0  ;;  %6584 = vmatprep.subr.bf16.mxu0 %v23719_v0  ;;  %v1265_v33 = vrot.slane %v1264_v8, 4  ;;  %v1269_v34 = vrot.slane %v1267_v62, 5  ;;  %v16985_v32 = vsel %vm16533_vm5, %v13911_v23, %v3110_v16  ;;  %v1302_v58 = vrot.slane %v1300_v18, 4  ;;  %v934_v8 = vld [vmem:[%s23714_s0 + $0x1b0] sm:$0xff]  ;;  %v936_v16 = vld [vmem:[%s23714_s0 + $0x1e0] sm:$0xff] }
  0xe5   :  { %v16992_v41 = vsel %vm16227_vm2, %v1251_v51, %v1255_v38  ;;  %v1292_v42 = vor.u32 %v1291_v27, %v1288_v26  ;;  %v1305_v61 = vrot.slane %v1303_v37, 5  ;;  %v1316_v17 = vrot.slane %v1314_v36, 4  ;;  %v2823_v38 = vld [vmem:[%s23714_s0 + $0x190] sm:$0xee] }
  0xe6   :  { %v1319_v63 = vrot.slane %v1317_v39, 5  ;;  %v1342_v21 = vshrl.u32 %v934_v8, 16  ;;  %v13914_v26 = vrot.slane %v2821_v1, 9  ;;  %v3122_v27 = vrot.slane %v2822_v3, 5  ;;  %v15707_v3 = vld [vmem:[%s23713_s1 + $0x1e0] sm:$0xff]  }
  0xe7   :  { %4695 = vmatpush1.bf16.msra.mxu1 %v15701_v7  ;;  %6585 = vmatpush1.bf16.msra.mxu0 %v15702_v13  ;;  %v1281_v7 = vshll.u32 %v925_v10, 16  ;;  %v2820_v13 = vld [vmem:[%s23714_s0 + $0x178] sm:$0x11]  ;;  %v1293_v11 = vrot.slane %v1292_v42, 4  ;;  %v1306_v23 = vor.u32 %v1305_v61, %v1302_v58  ;;  %v13915_v30 = vrot.slane %v2823_v38, 9 }
  0xe8   :  { %4696 = vmatprep.subr.bf16.mxu1 %v23719_v0  ;;  %6586 = vmatprep.subr.bf16.mxu0 %v23719_v0  ;;  %v3118_v46 = vrot.slane %v2820_v13, 5  ;;  %v1320_v20 = vor.u32 %v1319_v63, %v1316_v17  ;;  %v1344_v39 = vrot.slane %v1342_v21, 4  ;;  %v941_v21 = vld [vmem:[%s23714_s0 + $0x208] sm:$0x11] }
  0xe9   :  { %2373 = vmatmul.mubr.bf16.gmra.mrb[84].mxu1 %v13824_v19  ;;  %3754 = vmatmul.mubr.bf16.gmra.mrb[84].mxu0 %v14000_v2  ;;  %v3106_v2 = vrot.slane %v2814_v45, 5  ;;  %v927_v19 = vld [vmem:[%s23714_s0 + $0x178] sm:$0x11]  ;;  %v932_v45 = vld [vmem:[%s23714_s0 + $0x1a0] sm:$0xff]  ;;  %v1283_v60 = vrot.slane %v1281_v7, 5  ;;  %v938_v7 = vld [vmem:[%s23714_s0 + $0x1f0] sm:$0xff] }
  0xea   :  { %2380 = vmatprep.mubr.bf16.mxu1 %v13827_v48  ;;  %3761 = vmatprep.mubr.bf16.mxu0 %v14003_v53  ;;  %v1295_v43 = vshll.u32 %v927_v19, 16  ;;  %v13912_v48 = vrot.slane %v2817_v22, 9  ;;  %v16996_v53 = vsel %vm16227_vm2, %v1265_v33, %v1269_v34  ;;  %v17037_v10 = vsel %vm16533_vm5, %v13913_v55, %v3118_v46  ;;  %v935_v33 = vld [vmem:[%s23714_s0 + $0x1b8] sm:$0x11] }
  0xeb   :  { %4697 = vmatpush1.bf16.msra.mxu1 %v15703_v47  ;;  %6587 = vmatpush1.bf16.msra.mxu0 %v15704_v57  ;;  %v16978_v50 = vsel %vm16533_vm5, %v13910_v59, %v3106_v2  ;;  %v929_v47 = vld [vmem:[%s23714_s0 + $0x188] sm:$0x11]  ;;  %v931_v57 = vld [vmem:[%s23714_s0 + $0x198] sm:$0x11]  ;;  %v13831_v5 = vcombine.high %v16992_v41, %v16996_v53  ;;  %v1328_v51 = vshrl.u32 %v932_v45, 16  ;;  %v1331_v59 = vshll.u32 %v932_v45, 16 }
  0xec   :  { %4698 = vmatprep.subr.bf16.mxu1 %v23719_v0  ;;  %6588 = vmatprep.subr.bf16.mxu0 %v23719_v0  ;;  %v14007_v56 = vcombine.high %v16978_v50, %v16985_v32  ;;  %v14006_v6 = vcombine.low %v16978_v50, %v16985_v32  ;;  %v1297_v28 = vrot.slane %v1295_v43, 5  ;;  %v17033_v62 = vsel %vm16533_vm5, %v13912_v48, %v3114_v54  ;;  %v937_v32 = vld [vmem:[%s23714_s0 + $0x1e8] sm:$0x11]  ;;  %v2825_v48 = vld [vmem:[%s23714_s0 + $0x1a0] sm:$0xee] }
  0xed   :  { %v13830_v2 = vcombine.low %v16992_v41, %v16996_v53  ;;  %v1309_v9 = vshll.u32 %v929_v47, 16  ;;  %v1323_v14 = vshll.u32 %v931_v57, 16  ;;  %v1345_v22 = vshll.u32 %v934_v8, 16  ;;  %v2826_v53 = vld [vmem:[%s23714_s0 + $0x1a8] sm:$0x11] }
  0xee   :  { %v1330_v34 = vrot.slane %v1328_v51, 4  ;;  %v1333_v50 = vrot.slane %v1331_v59, 5  ;;  %v1307_v13 = vrot.slane %v1306_v23, 4  ;;  %v1321_v36 = vrot.slane %v1320_v20, 4  ;;  %v17091_v57 = vld [vmem:[%s23714_s0 + $0x1b0] sm:$0xee] }
  0xef   :  { %4699 = vmatpush1.bf16.msra.mxu1 %v15705_v40  ;;  %6589 = vmatpush1.bf16.msra.mxu0 %v15706_v44  ;;  %v1311_v18 = vrot.slane %v1309_v9, 5  ;;  %v1325_v37 = vrot.slane %v1323_v14, 5  ;;  %v1347_v40 = vrot.slane %v1345_v22, 5  ;;  %v1359_v41 = vshll.u32 %v936_v16, 16  ;;  %v2828_v45 = vld [vmem:[%s23714_s0 + $0x1b8] sm:$0x11] }
  0xf0   :  { %4700 = vmatprep.subr.bf16.mxu1 %v23719_v0  ;;  %6590 = vmatprep.subr.bf16.mxu0 %v23719_v0  ;;  %v1337_v43 = vshll.u32 %v933_v12, 16  ;;  %v1370_v54 = vshrl.u32 %v938_v7, 16  ;;  %v1373_v55 = vshll.u32 %v938_v7, 16  ;;  %v14008_v46 = vcombine.low %v17033_v62, %v17037_v10  ;;  %v2829_v59 = vld [vmem:[%s23714_s0 + $0x1e0] sm:$0xee]  ;;  %v942_v22 = vld [vmem:[%s23714_s0 + $0x210] sm:$0xff] }
  0xf1   :  { %2381 = vmatmul.mubr.bf16.gmra.mrb[88].mxu1 %v13826_v15  ;;  %3762 = vmatmul.mubr.bf16.gmra.mrb[88].mxu0 %v14002_v49  ;;  %v1279_v49 = vrot.slane %v1278_v35, 4  ;;  %v2824_v15 = vld [vmem:[%s23714_s0 + $0x198] sm:$0x11]  ;;  %v1356_v35 = vshrl.u32 %v936_v16, 16  ;;  %v17082_v47 = vsel %vm16533_vm5, %v13914_v26, %v3122_v27  ;;  %v1351_v61 = vshll.u32 %v935_v33, 16  ;;  %v940_v14 = vld [vmem:[%s23714_s0 + $0x200] sm:$0xff] }
  0xf2   :  { %2388 = vmatprep.mubr.bf16.mxu1 %v13829_v24  ;;  %3769 = vmatprep.mubr.bf16.mxu0 %v14005_v25  ;;  %v17054_v24 = vsel %vm16227_vm2, %v1293_v11, %v1297_v28  ;;  %v14009_v25 = vcombine.high %v17033_v62, %v17037_v10  ;;  %v17104_v17 = vsel %vm16227_vm2, %v1321_v36, %v1325_v37  ;;  %v1361_v1 = vrot.slane %v1359_v41, 5  ;;  %v939_v11 = vld [vmem:[%s23714_s0 + $0x1f8] sm:$0x11]  ;;  %v2831_v23 = vld [vmem:[%s23714_s0 + $0x1f0] sm:$0xee] }
  0xf3   :  { %v17050_v19 = vsel %vm16227_vm2, %v1279_v49, %v1283_v60  ;;  %v1358_v44 = vrot.slane %v1356_v35, 4  ;;  %v1365_v49 = vshll.u32 %v937_v32, 16  ;;  %v17100_v60 = vsel %vm16227_vm2, %v1307_v13, %v1311_v18  ;;  %v2832_v9 = vld [vmem:[%s23714_s0 + $0x1f8] sm:$0x11]  ;;  %4701 = vmatpush1.bf16.msra.mxu1 %v15707_v3 }
  0xf4   :  { %v13833_v42 = vcombine.high %v17050_v19, %v17054_v24  ;;  %v13832_v58 = vcombine.low %v17050_v19, %v17054_v24  ;;  %v1348_v63 = vor.u32 %v1347_v40, %v1344_v39  ;;  %v1372_v28 = vrot.slane %v1370_v54, 4  ;;  %v15708_v24 = vld [vmem:[%s23713_s1 + $0x260] sm:$0xff]   ;;  %4702 = vmatprep.subr.bf16.mxu1 %v23719_v0  ;;  %v943_v13 = vld [vmem:[%s23714_s0 + $0x218] sm:$0x11] }
  0xf5   :  { %v1375_v38 = vrot.slane %v1373_v55, 5  ;;  %v13916_v10 = vrot.slane %v2825_v48, 9  ;;  %v3130_v51 = vrot.slane %v2826_v53, 5  ;;  %v13834_v16 = vcombine.low %v17100_v60, %v17104_v17  ;;  %6591 = vmatpush1.bf16.msra.mxu0 %v15708_v24  ;;  %v944_v40 = vld [vmem:[%s23714_s0 + $0x220] sm:$0xff] }
  0xf6   :  { %v1353_v19 = vrot.slane %v1351_v61, 5  ;;  %v13917_v20 = vrot.slane %v17091_v57, 9  ;;  %v3134_v26 = vrot.slane %v2828_v45, 5  ;;  %v1362_v27 = vor.u32 %v1361_v1, %v1358_v44  ;;  %6592 = vmatprep.subr.bf16.mxu0 %v23719_v0  ;;  %v946_v61 = vld [vmem:[%s23714_s0 + $0x230] sm:$0xff] }
  0xf7   :  { %v1367_v12 = vrot.slane %v1365_v49, 5  ;;  %v1384_v33 = vshrl.u32 %v940_v14, 16  ;;  %v17152_v7 = vsel %vm16533_vm5, %v13916_v10, %v3130_v51  ;;  %v1398_v18 = vshrl.u32 %v942_v22, 16  ;;  %v945_v10 = vld [vmem:[%s23714_s0 + $0x228] sm:$0x11] }
  0xf8   :  { %v1401_v37 = vshll.u32 %v942_v22, 16  ;;  %v13918_v32 = vrot.slane %v2829_v59, 9  ;;  %v13919_v36 = vrot.slane %v2831_v23, 9  ;;  %v3142_v39 = vrot.slane %v2832_v9, 5  ;;  %v948_v22 = vld [vmem:[%s23714_s0 + $0x240] sm:$0xff] }
  0xf9   :  { %2389 = vmatmul.mubr.bf16.gmra.mrb[92].mxu1 %v13828_v52  ;;  %3770 = vmatmul.mubr.bf16.gmra.mrb[92].mxu0 %v14004_v31  ;;  %v3126_v31 = vrot.slane %v2824_v15, 5  ;;  %v13835_v15 = vcombine.high %v17100_v60, %v17104_v17  ;;  %v1393_v48 = vshll.u32 %v941_v21, 16  ;;  %v1386_v55 = vrot.slane %v1384_v33, 4 }
  0xfa   :  { %2396 = vmatprep.mubr.bf16.mxu1 %v13831_v5  ;;  %3777 = vmatprep.mubr.bf16.mxu0 %v14007_v56  ;;  %v1334_v56 = vor.u32 %v1333_v50, %v1330_v34  ;;  %v1387_v34 = vshll.u32 %v940_v14, 16  ;;  %v1400_v57 = vrot.slane %v1398_v18, 4  ;;  %v1412_v45 = vshrl.u32 %v944_v40, 16 }
  0xfb   :  { %v17086_v52 = vsel %vm16533_vm5, %v13915_v30, %v3126_v31  ;;  %v1376_v30 = vor.u32 %v1375_v38, %v1372_v28  ;;  %v1379_v31 = vshll.u32 %v939_v11, 16  ;;  %v1415_v44 = vshll.u32 %v944_v40, 16  ;;  %v949_v40 = vld [vmem:[%s23714_s0 + $0x248] sm:$0x11] }
  0xfc   :  { %v14011_v5 = vcombine.high %v17082_v47, %v17086_v52  ;;  %v14010_v8 = vcombine.low %v17082_v47, %v17086_v52  ;;  %v1335_v62 = vrot.slane %v1334_v56, 4  ;;  %v1389_v56 = vrot.slane %v1387_v34, 5  ;;  %v17259_v47 = vld [vmem:[%s23714_s0 + $0x230] sm:$0xee] }
  0xfd   :  { %v1377_v53 = vrot.slane %v1376_v30, 4  ;;  %v1381_v54 = vrot.slane %v1379_v31, 5  ;;  %v1407_v3 = vshll.u32 %v943_v13, 16  ;;  %v17195_v28 = vsel %vm16533_vm5, %v13919_v36, %v3142_v39  ;;  %v17236_v30 = vld [vmem:[%s23714_s0 + $0x228] sm:$0x11]  ;;  %v950_v31 = vld [vmem:[%s23714_s0 + $0x250] sm:$0xff] }
  0xfe   :  { %v17197_v38 = vrot.slane %v1393_v48, 5  ;;  %v1426_v23 = vshrl.u32 %v946_v61, 16  ;;  %v1429_v9 = vshll.u32 %v946_v61, 16  ;;  %v1390_v14 = vor.u32 %v1389_v56, %v1386_v55  ;;  %v17265_v39 = vld [vmem:[%s23714_s0 + $0x238] sm:$0x11] }
  0xff   :  { %v17208_v59 = vsel %vm16227_vm2, %v1377_v53, %v1381_v54  ;;  %v1417_v21 = vrot.slane %v1415_v44, 5  ;;  %v1421_v18 = vshll.u32 %v945_v10, 16  ;;  %v1440_v52 = vshrl.u32 %v948_v22, 16 }
 0x100   :  { %v1428_v60 = vrot.slane %v1426_v23, 4  ;;  %v1431_v17 = vrot.slane %v1429_v9, 5  ;;  %v1454_v55 = vshrl.u32 %v950_v31, 16  ;;  %v1457_v56 = vshll.u32 %v950_v31, 16  ;;  %v17304_v9 = vld [vmem:[%s23714_s0 + $0x240] sm:$0xee] }
 0x101   :  { %2397 = vmatmul.mubr.bf16.gmra.mrb[96].mxu1 %v13830_v2  ;;  %3778 = vmatmul.mubr.bf16.gmra.mrb[96].mxu0 %v14006_v6  ;;  %v1339_v6 = vrot.slane %v1337_v43, 5  ;;  %v2830_v2 = vld [vmem:[%s23714_s0 + $0x1e8] sm:$0x11]  ;;  %v1363_v43 = vrot.slane %v1362_v27, 4  ;;  %v17283_v61 = vrot.slane %v1421_v18, 5  ;;  %v3154_v44 = vrot.slane %v17236_v30, 5 }
 0x102   :  { %2404 = vmatprep.mubr.bf16.mxu1 %v13833_v42  ;;  %3785 = vmatprep.mubr.bf16.mxu0 %v14009_v25  ;;  %v1349_v25 = vrot.slane %v1348_v63, 4  ;;  %v3138_v35 = vrot.slane %v2830_v2, 5  ;;  %v17167_v42 = vsel %vm16533_vm5, %v13917_v20, %v3134_v26  ;;  %v17213_v2 = vld [vmem:[%s23714_s0 + $0x218] sm:$0x11]  ;;  %v1414_v20 = vrot.slane %v1412_v45, 4 }
 0x103   :  { %v17148_v50 = vsel %vm16227_vm2, %v1335_v62, %v1339_v6  ;;  %v14013_v63 = vcombine.high %v17152_v7, %v17167_v42  ;;  %v14012_v1 = vcombine.low %v17152_v7, %v17167_v42  ;;  %v17187_v6 = vld [vmem:[%s23714_s0 + $0x210] sm:$0xee]  ;;  %v17204_v51 = vsel %vm16227_vm2, %v1363_v43, %v1367_v12  ;;  %v17231_v12 = vld [vmem:[%s23714_s0 + $0x220] sm:$0xee]  ;;  %v17327_v31 = vld [vmem:[%s23714_s0 + $0x258] sm:$0x11] }
 0x104   :  { %v17163_v41 = vsel %vm16227_vm2, %v1349_v25, %v1353_v19  ;;  %v17191_v11 = vsel %vm16533_vm5, %v13918_v32, %v3138_v35  ;;  %v17218_v19 = vld [vmem:[%s23714_s0 + $0x238] sm:$0x11]  ;;  %v17225_v25 = vrot.slane %v1407_v3, 5  ;;  %v13921_v27 = vrot.slane %v17187_v6, 9 }
 0x105   :  { %v13837_v49 = vcombine.high %v17148_v50, %v17163_v41  ;;  %v13836_v24 = vcombine.low %v17148_v50, %v17163_v41  ;;  %v13839_v33 = vcombine.high %v17204_v51, %v17208_v59  ;;  %v14015_v34 = vcombine.high %v17191_v11, %v17195_v28 }
 0x106   :  { %v14014_v13 = vcombine.low %v17191_v11, %v17195_v28  ;;  %v3150_v35 = vrot.slane %v17213_v2, 5  ;;  %v1418_v36 = vor.u32 %v1417_v21, %v1414_v20  ;;  %v1435_v54 = vshll.u32 %v17218_v19, 16  ;;  %v959_v11 = vld [vmem:[%s23714_s0 + $0x2b8] sm:$0x11] }
 0x107   :  { %v13922_v45 = vrot.slane %v17231_v12, 9  ;;  %v17297_v10 = vrot.slane %v1440_v52, 4  ;;  %v1449_v23 = vshll.u32 %v949_v40, 16  ;;  %v1456_v52 = vrot.slane %v1454_v55, 4  ;;  %v17423_v12 = vld [vmem:[%s23714_s0 + $0x290] sm:$0xee] }
 0x108   :  { %v13924_v6 = vrot.slane %v17304_v9, 9  ;;  %v3166_v55 = vrot.slane %v17327_v31, 5 }
 0x109   :  { %2405 = vmatmul.mubr.bf16.gmra.mrb[100].mxu1 %v13832_v58  ;;  %3786 = vmatmul.mubr.bf16.gmra.mrb[100].mxu0 %v14008_v46  ;;  %v2833_v46 = vld [vmem:[%s23714_s0 + $0x200] sm:$0xee]  ;;  %v1403_v58 = vrot.slane %v1401_v37, 5  ;;  %v15709_v37 = vld [vmem:[%s23713_s1 + $0x1e8] sm:$0xff]   ;;  %v17357_v41 = vrot.slane %v1449_v23, 5 }
 0x10a   :  { %2412 = vmatprep.mubr.bf16.mxu1 %v13835_v15  ;;  %3793 = vmatprep.mubr.bf16.mxu0 %v14011_v5  ;;  %v2834_v5 = vld [vmem:[%s23714_s0 + $0x208] sm:$0x11]  ;;  %v13920_v62 = vrot.slane %v2833_v46, 9  ;;  %v952_v46 = vld [vmem:[%s23714_s0 + $0x280] sm:$0xff] }
 0x10b   :  { %v1404_v15 = vor.u32 %v1403_v58, %v1400_v57  ;;  %v3146_v26 = vrot.slane %v2834_v5, 5  ;;  %4703 = vmatpush1.bf16.msra.mxu1 %v15709_v37  ;;  %v1468_v18 = vshrl.u32 %v952_v46, 16  ;;  %v1471_v37 = vshll.u32 %v952_v46, 16  ;;  %v956_v46 = vld [vmem:[%s23714_s0 + $0x2a0] sm:$0xff] }
 0x10c   :  { %4704 = vmatprep.subr.bf16.mxu1 %v23719_v0  ;;  %v17380_v23 = vld [vmem:[%s23714_s0 + $0x280] sm:$0xee]  ;;  %v1496_v30 = vshrl.u32 %v956_v46, 16 }
 0x10d   :  { %v1405_v32 = vrot.slane %v1404_v15, 4  ;;  %v17276_v53 = vsel %vm16533_vm5, %v13920_v62, %v3146_v26  ;;  %v1432_v62 = vor.u32 %v1431_v17, %v1428_v60  ;;  %v954_v15 = vld [vmem:[%s23714_s0 + $0x290] sm:$0xff]  ;;  %v15710_v60 = vld [vmem:[%s23713_s1 + $0x268] sm:$0xff]   ;;  %v17332_v17 = vrot.slane %v1435_v54, 5 }
 0x10e   :  { %v17322_v26 = vld [vmem:[%s23714_s0 + $0x250] sm:$0xee]  ;;  %v1482_v40 = vshrl.u32 %v954_v15, 16  ;;  %v1485_v54 = vshll.u32 %v954_v15, 16  ;;  %6593 = vmatpush1.bf16.msra.mxu0 %v15710_v60  ;;  %v17385_v15 = vld [vmem:[%s23714_s0 + $0x288] sm:$0x11]  ;;  %v17409_v60 = vsel %vm16533_vm5, %v13922_v45, %v3154_v44 }
 0x10f   :  { %v1433_v50 = vrot.slane %v1432_v62, 4  ;;  %6594 = vmatprep.subr.bf16.mxu0 %v23719_v0  ;;  %v1499_v45 = vshll.u32 %v956_v46, 16 }
 0x110   :  { %v1484_v62 = vrot.slane %v1482_v40, 4 }
 0x111   :  { %2413 = vmatmul.mubr.bf16.gmra.mrb[104].mxu1 %v13834_v16  ;;  %3794 = vmatmul.mubr.bf16.gmra.mrb[104].mxu0 %v14010_v8  ;;  %v1443_v8 = vshll.u32 %v948_v22, 16  ;;  %v1391_v16 = vrot.slane %v1390_v14, 4  ;;  %v17309_v14 = vld [vmem:[%s23714_s0 + $0x248] sm:$0x11]  ;;  %v1419_v22 = vrot.slane %v1418_v36, 4  ;;  %v17347_v36 = vsel %vm16227_vm2, %v1405_v32, %v17225_v25 }
 0x112   :  { %2420 = vmatprep.mubr.bf16.mxu1 %v13837_v49  ;;  %3801 = vmatprep.mubr.bf16.mxu0 %v14013_v63  ;;  %v13923_v49 = vrot.slane %v17259_v47, 9  ;;  %v17291_v63 = vld [vmem:[%s23714_s0 + $0x258] sm:$0x11]  ;;  %v1470_v25 = vrot.slane %v1468_v18, 4  ;;  %v17453_v28 = vsel %vm16227_vm2, %v1433_v50, %v17332_v17 }
 0x113   :  { %v17299_v2 = vrot.slane %v1443_v8, 5  ;;  %v17317_v21 = vsel %vm16227_vm2, %v1391_v16, %v17197_v38  ;;  %v3158_v38 = vrot.slane %v17265_v39, 5  ;;  %v1459_v8 = vrot.slane %v1457_v56, 5  ;;  %v953_v16 = vld [vmem:[%s23714_s0 + $0x288] sm:$0x11] }
 0x114   :  { %v17270_v43 = vpop.f32.mrb[0].mxu0  ;;  %v17272_v48 = vpop.f32.mrb[0].mxu1  ;;  %v17353_v39 = vsel %vm16533_vm5, %v13921_v27, %v3150_v35  ;;  %v1463_v42 = vshll.u32 %v17291_v63, 16  ;;  %v1473_v27 = vrot.slane %v1471_v37, 5  ;;  %v13925_v35 = vrot.slane %v17322_v26, 9 }
 0x115   :  { %23726 = vst [vmem:[#allocation4_spill] sm:$0xff] %v17272_v48  ;;  %v571_v57 = vpop.f32.mrb[1].mxu0  ;;  %v699_v58 = vpop.f32.mrb[1].mxu1  ;;  %v1446_v7 = vor.u32 %v17299_v2, %v17297_v10  ;;  %v1460_v32 = vor.u32 %v1459_v8, %v1456_v52  ;;  %v1477_v56 = vshll.u32 %v953_v16, 16  ;;  %v13838_v63 = vcombine.low %v17204_v51, %v17208_v59  ;;  %v957_v52 = vld [vmem:[%s23714_s0 + $0x2a8] sm:$0x11] }
 0x116   :  { %v17293_v3 = vpop.f32.mrb[2].mxu0  ;;  %v17295_v5 = vpop.f32.mrb[2].mxu1  ;;  %v1487_v10 = vrot.slane %v1485_v54, 5  ;;  %v13841_v59 = vcombine.high %v17317_v21, %v17347_v36  ;;  %v14017_v18 = vcombine.high %v17276_v53, %v17353_v39  ;;  %v17401_v37 = vsel %vm16227_vm2, %v1419_v22, %v17283_v61  ;;  %v17434_v47 = vld [vmem:[%s23714_s0 + $0x298] sm:$0x11] }
 0x117   :  { %23727 = vst [vmem:[#allocation5_spill] sm:$0xff] %v17295_v5  ;;  %v574_v19 = vpop.f32.mrb[3].mxu0  ;;  %v702_v20 = vpop.f32.mrb[3].mxu1  ;;  %v17418_v61 = vsel %vm16533_vm5, %v13923_v49, %v3158_v38  ;;  %v1474_v22 = vor.u32 %v1473_v27, %v1470_v25  ;;  %v1447_v44 = vrot.slane %v1446_v7, 4  ;;  %v17425_v40 = vrot.slane %v1460_v32, 4 }
 0x118   :  { %v958_v19 = vld [vmem:[%s23714_s0 + $0x2b0] sm:$0xff]  ;;  %v17427_v54 = vrot.slane %v1463_v42, 5  ;;  %v1488_v49 = vor.u32 %v1487_v10, %v1484_v62  ;;  %v1505_v38 = vshll.u32 %v957_v52, 16  ;;  %v17465_v62 = vld [vmem:[%s23714_s0 + $0x2a8] sm:$0x11]  ;;  %v960_v10 = vld [vmem:[%s23714_s0 + $0x2c0] sm:$0xff] }
 0x119   :  { %2421 = vmatmul.mubr.bf16.gmra.mrb[108].mxu1 %v13836_v24  ;;  %3802 = vmatmul.mubr.bf16.gmra.mrb[108].mxu0 %v14012_v1  ;;  %v955_v1 = vld [vmem:[%s23714_s0 + $0x298] sm:$0x11]  ;;  %v3162_v24 = vrot.slane %v17309_v14, 5  ;;  %v1510_v25 = vshrl.u32 %v958_v19, 16  ;;  %v1513_v7 = vshll.u32 %v958_v19, 16  ;;  %v15711_v42 = vld [vmem:[%s23713_s1 + $0x1f0] sm:$0xff]   ;;  %v14016_v19 = vcombine.low %v17276_v53, %v17353_v39 }
 0x11a   :  { %2428 = vmatprep.mubr.bf16.mxu1 %v13839_v33  ;;  %3809 = vmatprep.mubr.bf16.mxu0 %v14015_v34  ;;  %v1491_v2 = vshll.u32 %v955_v1, 16  ;;  %v17429_v1 = vrot.slane %v1477_v56, 5  ;;  %v962_v52 = vld [vmem:[%s23714_s0 + $0x2d0] sm:$0xff]  ;;  %v1524_v46 = vshrl.u32 %v960_v10, 16  ;;  %v1519_v32 = vshll.u32 %v959_v11, 16  ;;  %v964_v14 = vld [vmem:[%s23714_s0 + $0x2e0] sm:$0xff] }
 0x11b   :  { %4705 = vmatpush1.bf16.msra.mxu1 %v15711_v42  ;;  %v1512_v53 = vrot.slane %v1510_v25, 4  ;;  %v14019_v42 = vcombine.high %v17409_v60, %v17418_v61  ;;  %v15712_v25 = vld [vmem:[%s23713_s1 + $0x270] sm:$0xff]   ;;  %v17516_v11 = vsel %vm16227_vm2, %v1447_v44, %v17357_v41  ;;  %v963_v41 = vld [vmem:[%s23714_s0 + $0x2d8] sm:$0x11] }
 0x11c   :  { %v17365_v33 = vpop.f32.mrb[4].mxu0  ;;  %v17367_v34 = vpop.f32.mrb[4].mxu1  ;;  %v17442_v27 = vrot.slane %v1491_v2, 5  ;;  %v13840_v2 = vcombine.low %v17317_v21, %v17347_v36  ;;  %4706 = vmatprep.subr.bf16.mxu1 %v23719_v0  ;;  %v17490_v21 = vrot.slane %v1505_v38, 5  ;;  %v1515_v36 = vrot.slane %v1513_v7, 5  ;;  %6595 = vmatpush1.bf16.msra.mxu0 %v15712_v25 }
 0x11d   :  { %23728 = vst [vmem:[#allocation6_spill] sm:$0xff] %v17367_v34  ;;  %v579_v57 = vpop.f32.mrb[5].mxu0  ;;  %v707_v58 = vpop.f32.mrb[5].mxu1  ;;  %v961_v38 = vld [vmem:[%s23714_s0 + $0x2c8] sm:$0x11]  ;;  %v1526_v31 = vrot.slane %v1524_v46, 4  ;;  %6596 = vmatprep.subr.bf16.mxu0 %v23719_v0  ;;  %v14018_v25 = vcombine.low %v17409_v60, %v17418_v61 }
 0x11e   :  { %v17390_v20 = vpop.f32.mrb[6].mxu0  ;;  %v17392_v51 = vpop.f32.mrb[6].mxu1  ;;  %v1498_v57 = vrot.slane %v1496_v30, 4  ;;  %v1501_v58 = vrot.slane %v1499_v45, 5  ;;  %v13843_v45 = vcombine.high %v17401_v37, %v17453_v28  ;;  %v17509_v7 = vld [vmem:[%s23714_s0 + $0x2b8] sm:$0x11]  ;;  %v1516_v9 = vor.u32 %v1515_v36, %v1512_v53 }
 0x11f   :  { %23729 = vst [vmem:[#allocation7_spill] sm:$0xff] %v17392_v51  ;;  %v582_v8 = vpop.f32.mrb[7].mxu0  ;;  %v710_v16 = vpop.f32.mrb[7].mxu1  ;;  %v1533_v26 = vshll.u32 %v961_v38, 16  ;;  %v966_v46 = vld [vmem:[%s23714_s0 + $0x2f0] sm:$0xff]  ;;  %v13842_v38 = vcombine.low %v17401_v37, %v17453_v28  ;;  %v1547_v56 = vshll.u32 %v963_v41, 16 }
 0x120   :  { %v17572_v36 = vld [vmem:[%s23714_s0 + $0x2d0] sm:$0xee]  ;;  %v17595_v60 = vrot.slane %v1516_v9, 4  ;;  %v1566_v0 = vshrl.u32 %v966_v46, 16  ;;  %v23734_v9 = vrot.slane %v17385_v15, 5 }
 0x121   :  { %2429 = vmatmul.mubr.bf16.gmra.mrb[112].mxu1 %v13838_v63  ;;  %3810 = vmatmul.mubr.bf16.gmra.mrb[112].mxu0 %v14014_v13  ;;  %v17455_v13 = vrot.slane %v1474_v22, 4  ;;  %v17460_v63 = vld [vmem:[%s23714_s0 + $0x2a0] sm:$0xee]  ;;  %v17488_v22 = vrot.slane %v1488_v49, 4  ;;  %v1502_v49 = vor.u32 %v1501_v58, %v1498_v57  ;;  %v1541_v57 = vshll.u32 %v962_v52, 16 }
 0x122   :  { %2436 = vmatprep.mubr.bf16.mxu1 %v13841_v59  ;;  %3817 = vmatprep.mubr.bf16.mxu0 %v14017_v18  ;;  %v17482_v18 = vld [vmem:[%s23714_s0 + $0x2b0] sm:$0xee]  ;;  %v1527_v59 = vshll.u32 %v960_v10, 16  ;;  %v17524_v58 = vsel %vm16533_vm5, %v13924_v6, %v3162_v24  ;;  %v17545_v24 = vsel %vm16227_vm2, %v17425_v40, %v17427_v54  ;;  %v17597_v28 = vrot.slane %v1533_v26, 5  ;;  %v15714_v10 = vld [vmem:[%s23713_s1 + $0x278] sm:$0xff]  }
 0x123   :  { %v1543_v53 = vrot.slane %v1541_v57, 5  ;;  %v17584_v57 = vld [vmem:[%s23714_s0 + $0x2d8] sm:$0x11]  ;;  %v13845_v37 = vcombine.high %v17516_v11, %v17545_v24  ;;  %v17627_v15 = vsel %vm16227_vm2, %v17488_v22, %v17442_v27  ;;  %v17647_v27 = vld [vmem:[%s23714_s0 + $0x2e8] sm:$0x11]  ;;  %6597 = vmatpush1.bf16.msra.mxu0 %v15714_v10 }
 0x124   :  { %v17470_v17 = vpop.f32.mrb[8].mxu0  ;;  %v17472_v50 = vpop.f32.mrb[8].mxu1  ;;  %v1529_v6 = vrot.slane %v1527_v59, 5 }
 0x125   :  { %23730 = vst [vmem:[#allocation8_spill] sm:$0xff] %v17472_v50  ;;  %v587_v8 = vpop.f32.mrb[9].mxu0  ;;  %v715_v16 = vpop.f32.mrb[9].mxu1 }
 0x126   :  { %v17492_v39 = vpop.f32.mrb[10].mxu0  ;;  %v17494_v30 = vpop.f32.mrb[10].mxu1  ;;  %v1530_v61 = vor.u32 %v1529_v6, %v1526_v31  ;;  %v17951_v6 = vld [vmem:[%s23714_s0 + $0x378] sm:$0x11] }
 0x127   :  { %23731 = vst [vmem:[#allocation9_spill] sm:$0xff] %v17494_v30  ;;  %v590_v8 = vpop.f32.mrb[11].mxu0  ;;  %v718_v16 = vpop.f32.mrb[11].mxu1 }
 0x128   :  { %v1538_v8 = vshrl.u32 %v962_v52, 16  ;;  %v17555_v52 = vld [vmem:[%s23714_s0 + $0x2c0] sm:$0xee] }
 0x129   :  { %2437 = vmatmul.mubr.bf16.gmra.mrb[116].mxu1 %v13840_v2  ;;  %3818 = vmatmul.mubr.bf16.gmra.mrb[116].mxu0 %v14016_v19  ;;  %v17532_v2 = vsel %vm16533_vm5, %v13925_v35, %v3166_v55  ;;  %v17547_v35 = vrot.slane %v1502_v49, 4  ;;  %v17549_v55 = vrot.slane %v1519_v32, 5  ;;  %v17567_v32 = vld [vmem:[%s23714_s0 + $0x2c8] sm:$0x11] }
 0x12a   :  { %2444 = vmatprep.mubr.bf16.mxu1 %v13843_v45  ;;  %3825 = vmatprep.mubr.bf16.mxu0 %v14019_v42  ;;  %v1540_v54 = vrot.slane %v1538_v8, 4  ;;  %v1552_v45 = vshrl.u32 %v964_v14, 16  ;;  %v1555_v42 = vshll.u32 %v964_v14, 16  ;;  %v14021_v8 = vcombine.high %v17524_v58, %v17532_v2  ;;  %v965_v14 = vld [vmem:[%s23714_s0 + $0x2e8] sm:$0x11] }
 0x12b   :  { %v1561_v34 = vshll.u32 %v965_v14, 16 }
 0x12c   :  { %v17560_v59 = vpop.f32.mrb[12].mxu0  ;;  %v17562_v40 = vpop.f32.mrb[12].mxu1  ;;  %v1544_v30 = vor.u32 %v1543_v53, %v1540_v54  ;;  %v1554_v50 = vrot.slane %v1552_v45, 4  ;;  %v1557_v51 = vrot.slane %v1555_v42, 5  ;;  %v23737_v54 = vrot.slane %v17423_v12, 9  ;;  %v968_v12 = vld [vmem:[%s23714_s0 + $0x320] sm:$0xff] }
 0x12d   :  { %23732 = vst [vmem:[#allocation10_spill] sm:$0xff] %v17562_v40  ;;  %v595_v16 = vpop.f32.mrb[13].mxu0  ;;  %v723_v49 = vpop.f32.mrb[13].mxu1  ;;  %v1569_v40 = vshll.u32 %v966_v46, 16  ;;  %v23736_v46 = vrot.slane %v17434_v47, 5  ;;  %v17637_v45 = vrot.slane %v1530_v61, 4 }
 0x12e   :  { %v17589_v16 = vpop.f32.mrb[14].mxu0  ;;  %v17591_v49 = vpop.f32.mrb[14].mxu1  ;;  %v17652_v47 = vrot.slane %v1547_v56, 5  ;;  %v17663_v14 = vrot.slane %v1544_v30, 4  ;;  %v17665_v61 = vrot.slane %v1561_v34, 5  ;;  %v23739_v56 = vmov 0  }
 0x12f   :  { %23733 = vst [vmem:[#allocation11_spill] sm:$0xff] %v17591_v49  ;;  %v598_v19 = vpop.f32.mrb[15].mxu0  ;;  %v726_v44 = vpop.f32.mrb[15].mxu1  ;;  %v967_v49 = vld [vmem:[%s23714_s0 + $0x2f8] sm:$0x11]  ;;  %v17635_v53 = vsel %vm16533_vm5, %v23737_v54, %v23736_v46  ;;  %v1571_v22 = vrot.slane %v1569_v40, 5  ;;  %8939 = vmatprep.subr.bf16.mxu0 %v23739_v56 }
 0x130   :  { %v23735_v19 = vrot.slane %v17380_v23, 9  ;;  %v15713_v44 = vld [vmem:[%s23713_s1 + $0x1f8] sm:$0xff]   ;;  %v17621_v23 = vsel %vm16227_vm2, %v17455_v13, %v17429_v1  ;;  %v17642_v1 = vld [vmem:[%s23714_s0 + $0x2e0] sm:$0xee]  ;;  %v1568_v13 = vrot.slane %v1566_v0, 4  ;;  %v1575_v42 = vshll.u32 %v967_v49, 16 }
 0x131   :  { %2445 = vmatmul.mubr.bf16.gmra.mrb[120].mxu1 %v13842_v38  ;;  %3826 = vmatmul.mubr.bf16.gmra.mrb[120].mxu0 %v14018_v25  ;;  %v17657_v38 = vld [vmem:[%s23714_s0 + $0x2f0] sm:$0xee]  ;;  %v17670_v0 = vld [vmem:[%s23714_s0 + $0x2f8] sm:$0x11]  ;;  %v969_v34 = vld [vmem:[%s23714_s0 + $0x328] sm:$0x11]  ;;  %v13847_v46 = vcombine.high %v17621_v23, %v17627_v15  ;;  %v13846_v10 = vcombine.low %v17621_v23, %v17627_v15 }
 0x132   :  { %v17609_v41 = vsel %vm16533_vm5, %v23735_v19, %v23734_v9  ;;  %2452 = vmatprep.mubr.bf16.mxu1 %v13845_v37  ;;  %3833 = vmatprep.mubr.bf16.mxu0 %v14021_v8  ;;  %v1558_v37 = vor.u32 %v1557_v51, %v1554_v50  ;;  %v13844_v9 = vcombine.low %v17516_v11, %v17545_v24  ;;  %v970_v51 = vld [vmem:[%s23714_s0 + $0x330] sm:$0xff]  ;;  %v1580_v50 = vshrl.u32 %v968_v12, 16 }
 0x133   :  { %4707 = vmatpush1.bf16.msra.mxu1 %v15713_v44  ;;  %v14020_v19 = vcombine.low %v17524_v58, %v17532_v2  ;;  %v14023_v11 = vcombine.high %v17609_v41, %v17635_v53  ;;  %v1583_v2 = vshll.u32 %v968_v12, 16  ;;  %v971_v58 = vld [vmem:[%s23714_s0 + $0x338] sm:$0x11]  ;;  %v1589_v12 = vshll.u32 %v969_v34, 16 }
 0x134   :  { %v17659_v25 = vpop.f32.mrb[16].mxu0  ;;  %v17661_v8 = vpop.f32.mrb[16].mxu1  ;;  %7944 = vmatprep.subr.bf16.mxu1 %v23739_v56  ;;  %v17699_v31 = vrot.slane %v1558_v37, 4  ;;  %v17713_v37 = vld [vmem:[%s23714_s0 + $0x328] sm:$0x11]  ;;  %v23741_v34 = vrot.slane %v17465_v62, 5  ;;  %v17743_v62 = vsel %vm16227_vm2, %v17547_v35, %v17490_v21  ;;  %v14022_v21 = vcombine.low %v17609_v41, %v17635_v53 }
 0x135   :  { %23738 = vst [vmem:[#allocation12_spill] sm:$0xff] %v17661_v8  ;;  %v603_v40 = vpop.f32.mrb[17].mxu0  ;;  %v731_v49 = vpop.f32.mrb[17].mxu1  ;;  %v17764_v35 = vrot.slane %v1589_v12, 5  ;;  %v973_v41 = vld [vmem:[%s23714_s0 + $0x348] sm:$0x11] }
 0x136   :  { %v17683_v30 = vpop.f32.mrb[18].mxu0  ;;  %v17685_v44 = vpop.f32.mrb[18].mxu1  ;;  %v1572_v40 = vor.u32 %v1571_v22, %v1568_v13  ;;  %v17692_v49 = vrot.slane %v1575_v42, 5  ;;  %v1582_v22 = vrot.slane %v1580_v50, 4  ;;  %v17708_v42 = vld [vmem:[%s23714_s0 + $0x320] sm:$0xee] }
 0x137   :  { %23740 = vst [vmem:[#allocation13_spill] sm:$0xff] %v17685_v44  ;;  %v606_v24 = vpop.f32.mrb[19].mxu0  ;;  %v734_v54 = vpop.f32.mrb[19].mxu1  ;;  %v23744_v50 = vrot.slane %v17482_v18, 9  ;;  %v1585_v13 = vrot.slane %v1583_v2, 5  ;;  %v17749_v18 = vsel %vm16227_vm2, %v17595_v60, %v17549_v55 }
 0x138   :  { %v1594_v24 = vshrl.u32 %v970_v51, 16  ;;  %v1597_v54 = vshll.u32 %v970_v51, 16  ;;  %v23743_v51 = vrot.slane %v17509_v7, 5  ;;  %v17751_v7 = vrot.slane %v1572_v40, 4  ;;  %v17756_v2 = vld [vmem:[%s23714_s0 + $0x338] sm:$0x11] }
 0x139   :  { %2453 = vmatmul.mubr.bf16.gmra.mrb[124].mxu1 %v13844_v9  ;;  %3834 = vmatmul.mubr.bf16.gmra.mrb[124].mxu0 %v14020_v19  ;;  %v23742_v9 = vrot.slane %v17460_v63, 9  ;;  %v972_v63 = vld [vmem:[%s23714_s0 + $0x340] sm:$0xff] }
 0x13a   :  { %2460 = vmatprep.mubr.bf16.mxu1 %v13847_v46  ;;  %3841 = vmatprep.mubr.bf16.mxu0 %v14023_v11  ;;  %v17729_v26 = vsel %vm16533_vm5, %v23744_v50, %v23743_v51  ;;  %v17734_v46 = vld [vmem:[%s23714_s0 + $0x330] sm:$0xee]  ;;  %v1603_v11 = vshll.u32 %v971_v58, 16  ;;  %v1596_v55 = vrot.slane %v1594_v24, 4  ;;  %v1599_v60 = vrot.slane %v1597_v54, 5 }
 0x13b   :  { %v17721_v19 = vsel %vm16533_vm5, %v23742_v9, %v23741_v34  ;;  %v974_v58 = vld [vmem:[%s23714_s0 + $0x350] sm:$0xff]  ;;  %v1608_v53 = vshrl.u32 %v972_v63, 16  ;;  %v1611_v12 = vshll.u32 %v972_v63, 16 }
 0x13c   :  { %v17758_v34 = vpop.f32.mrb[20].mxu0  ;;  %v17760_v9 = vpop.f32.mrb[20].mxu1  ;;  %v14025_v50 = vcombine.high %v17721_v19, %v17729_v26  ;;  %v17785_v44 = vrot.slane %v1603_v11, 5  ;;  %v1622_v5 = vshrl.u32 %v974_v58, 16  ;;  %v1625_v63 = vshll.u32 %v974_v58, 16 }
 0x13d   :  { %23745 = vst [vmem:[#allocation14_spill] sm:$0xff] %v17760_v9  ;;  %v611_v40 = vpop.f32.mrb[21].mxu0  ;;  %v739_v51 = vpop.f32.mrb[21].mxu1  ;;  %v1600_v48 = vor.u32 %v1599_v60, %v1596_v55  ;;  %v1610_v11 = vrot.slane %v1608_v53, 4  ;;  %v23747_v55 = vrot.slane %v17567_v32, 5  ;;  %v23748_v60 = vrot.slane %v17555_v52, 9 }
 0x13e   :  { %v17777_v24 = vpop.f32.mrb[22].mxu0  ;;  %v17779_v54 = vpop.f32.mrb[22].mxu1  ;;  %v13849_v40 = vcombine.high %v17743_v62, %v17749_v18  ;;  %v1586_v51 = vor.u32 %v1585_v13, %v1582_v22  ;;  %v1617_v13 = vshll.u32 %v973_v41, 16  ;;  %v17795_v22 = vld [vmem:[%s23714_s0 + $0x340] sm:$0xee]  ;;  %v23749_v41 = vrot.slane %v17584_v57, 5 }
 0x13f   :  { %23746 = vst [vmem:[#allocation15_spill] sm:$0xff] %v17779_v54  ;;  %v614_v15 = vpop.f32.mrb[23].mxu0  ;;  %v742_v9 = vpop.f32.mrb[23].mxu1  ;;  %v975_v54 = vld [vmem:[%s23714_s0 + $0x358] sm:$0x11]  ;;  %v17803_v58 = vsel %vm16533_vm5, %v23748_v60, %v23747_v55  ;;  %v976_v52 = vld [vmem:[%s23714_s0 + $0x360] sm:$0xff]  ;;  %v17833_v57 = vsel %vm16227_vm2, %v17663_v14, %v17652_v47 }
 0x140   :  { %v1613_v9 = vrot.slane %v1611_v12, 5  ;;  %v23750_v15 = vrot.slane %v17572_v36, 9  ;;  %v17818_v32 = vld [vmem:[%s23714_s0 + $0x348] sm:$0x11]  ;;  %v17827_v36 = vsel %vm16227_vm2, %v17637_v45, %v17597_v28  ;;  %v1627_v53 = vrot.slane %v1625_v63, 5 }
 0x141   :  { %2461 = vmatmul.mubr.bf16.gmra.mrb[128].mxu1 %v13846_v10  ;;  %3842 = vmatmul.mubr.bf16.gmra.mrb[128].mxu0 %v14022_v21  ;;  %v17813_v21 = vrot.slane %v1586_v51, 4  ;;  %v17838_v12 = vld [vmem:[%s23714_s0 + $0x350] sm:$0xee]  ;;  %v13848_v28 = vcombine.low %v17743_v62, %v17749_v18  ;;  %v14024_v45 = vcombine.low %v17721_v19, %v17729_v26  ;;  %v17848_v55 = vrot.slane %v1600_v48, 4 }
 0x142   :  { %2468 = vmatprep.mubr.bf16.mxu1 %v13849_v40  ;;  %3849 = vmatprep.mubr.bf16.mxu0 %v14025_v50  ;;  %v17811_v10 = vsel %vm16533_vm5, %v23750_v15, %v23749_v41  ;;  %v1624_v50 = vrot.slane %v1622_v5, 4  ;;  %v1631_v47 = vshll.u32 %v975_v54, 16  ;;  %v17853_v5 = vld [vmem:[%s23714_s0 + $0x358] sm:$0x11]  ;;  %v1614_v60 = vor.u32 %v1613_v9, %v1610_v11  ;;  %v978_v62 = vld [vmem:[%s23714_s0 + $0x370] sm:$0xff] }
 0x143   :  { %v17855_v41 = vrot.slane %v1617_v13, 5  ;;  %v1636_v26 = vshrl.u32 %v976_v52, 16  ;;  %v13851_v18 = vcombine.high %v17827_v36, %v17833_v57  ;;  %v14027_v54 = vcombine.high %v17803_v58, %v17811_v10  ;;  %v977_v13 = vld [vmem:[%s23714_s0 + $0x368] sm:$0x11] }
 0x144   :  { %v17840_v40 = vpop.f32.mrb[24].mxu0  ;;  %v17842_v51 = vpop.f32.mrb[24].mxu1  ;;  %v1639_v15 = vshll.u32 %v976_v52, 16  ;;  %v17873_v8 = vrot.slane %v1631_v47, 5  ;;  %v1650_v23 = vshrl.u32 %v978_v62, 16  ;;  %v980_v52 = vld [vmem:[%s23714_s0 + $0x380] sm:$0xff] }
 0x145   :  { %23751 = vst [vmem:[#allocation16_spill] sm:$0xff] %v17842_v51  ;;  %v619_v14 = vpop.f32.mrb[25].mxu0  ;;  %v747_v63 = vpop.f32.mrb[25].mxu1 }
 0x146   :  { %v17861_v48 = vpop.f32.mrb[26].mxu0  ;;  %v17863_v19 = vpop.f32.mrb[26].mxu1  ;;  %v1628_v14 = vor.u32 %v1627_v53, %v1624_v50  ;;  %v1645_v50 = vshll.u32 %v977_v13, 16  ;;  %v17889_v53 = vsel %vm16227_vm2, %v17699_v31, %v17665_v61  ;;  %v1652_v13 = vrot.slane %v1650_v23, 4 }
 0x147   :  { %23752 = vst [vmem:[#allocation17_spill] sm:$0xff] %v17863_v19  ;;  %v622_v11 = vpop.f32.mrb[27].mxu0  ;;  %v750_v9 = vpop.f32.mrb[27].mxu1  ;;  %v17877_v19 = vrot.slane %v1614_v60, 4  ;;  %v17903_v60 = vsel %vm16227_vm2, %v17751_v7, %v17692_v49  ;;  %v17922_v49 = vld [vmem:[%s23714_s0 + $0x360] sm:$0xee]  ;;  %v13850_v7 = vcombine.low %v17827_v36, %v17833_v57 }
 0x148   :  { %v979_v11 = vld [vmem:[%s23714_s0 + $0x378] sm:$0x11]  ;;  %v1638_v9 = vrot.slane %v1636_v26, 4  ;;  %v23755_v26 = vrot.slane %v17670_v0, 5  ;;  %v1664_v23 = vshrl.u32 %v980_v52, 16  ;;  %v17941_v57 = vrot.slane %v1645_v50, 5 }
 0x149   :  { %2469 = vmatmul.mubr.bf16.gmra.mrb[132].mxu1 %v13848_v28  ;;  %3850 = vmatmul.mubr.bf16.gmra.mrb[132].mxu0 %v14024_v45  ;;  %v23753_v28 = vrot.slane %v17647_v27, 5  ;;  %v23754_v45 = vrot.slane %v17642_v1, 9  ;;  %v17913_v27 = vrot.slane %v1628_v14, 4  ;;  %v1641_v1 = vrot.slane %v1639_v15, 5  ;;  %v17931_v15 = vld [vmem:[%s23714_s0 + $0x368] sm:$0x11] }
 0x14a   :  { %2476 = vmatprep.mubr.bf16.mxu1 %v13851_v18  ;;  %3857 = vmatprep.mubr.bf16.mxu0 %v14027_v54  ;;  %v23756_v18 = vrot.slane %v17657_v38, 9  ;;  %v14026_v14 = vcombine.low %v17803_v58, %v17811_v10  ;;  %v1659_v58 = vshll.u32 %v979_v11, 16  ;;  %v982_v11 = vld [vmem:[%s23714_s0 + $0x390] sm:$0xff] }
 0x14b   :  { %v17897_v47 = vsel %vm16533_vm5, %v23754_v45, %v23753_v28  ;;  %v1653_v28 = vshll.u32 %v978_v62, 16  ;;  %v1667_v62 = vshll.u32 %v980_v52, 16  ;;  %v17946_v52 = vld [vmem:[%s23714_s0 + $0x370] sm:$0xee] }
 0x14c   :  { %v17911_v31 = vsel %vm16533_vm5, %v23756_v18, %v23755_v26  ;;  %v17915_v61 = vpop.f32.mrb[28].mxu0  ;;  %v17917_v54 = vpop.f32.mrb[28].mxu1  ;;  %v13853_v18 = vcombine.high %v17889_v53, %v17903_v60 }
 0x14d   :  { %23757 = vst [vmem:[#allocation18_spill] sm:$0xff] %v17917_v54  ;;  %v627_v0 = vpop.f32.mrb[29].mxu0  ;;  %v755_v38 = vpop.f32.mrb[29].mxu1  ;;  %v14029_v36 = vcombine.high %v17897_v47, %v17911_v31  ;;  %v1655_v56 = vrot.slane %v1653_v28, 5  ;;  %v1669_v63 = vrot.slane %v1667_v62, 5 }
 0x14e   :  { %v17933_v45 = vpop.f32.mrb[30].mxu0  ;;  %v17935_v26 = vpop.f32.mrb[30].mxu1  ;;  %v1642_v38 = vor.u32 %v1641_v1, %v1638_v9  ;;  %v23759_v9 = vrot.slane %v17713_v37, 5  ;;  %v23760_v1 = vrot.slane %v17708_v42, 9  ;;  %v17979_v42 = vsel %vm16227_vm2, %v17848_v55, %v17785_v44  ;;  %v18110_v54 = vld [vmem:[%s23714_s0 + $0x3c0] sm:$0xee] }
 0x14f   :  { %23758 = vst [vmem:[#allocation19_spill] sm:$0xff] %v17935_v26  ;;  %v630_v10 = vpop.f32.mrb[31].mxu0  ;;  %v758_v0 = vpop.f32.mrb[31].mxu1  ;;  %v23761_v37 = vrot.slane %v17756_v2, 5  ;;  %v1656_v44 = vor.u32 %v1655_v56, %v1652_v13  ;;  %v18009_v56 = vld [vmem:[%s23714_s0 + $0x380] sm:$0xee] }
 0x150   :  { %v17964_v28 = vsel %vm16533_vm5, %v23760_v1, %v23759_v9  ;;  %v981_v10 = vld [vmem:[%s23714_s0 + $0x388] sm:$0x11]  ;;  %v1666_v0 = vrot.slane %v1664_v23, 4  ;;  %v17989_v62 = vrot.slane %v1642_v38, 4  ;;  %v13852_v38 = vcombine.low %v17889_v53, %v17903_v60  ;;  %v18029_v2 = vld [vmem:[%s23714_s0 + $0x390] sm:$0xee] }
 0x151   :  { %2477 = vmatmul.mubr.bf16.gmra.mrb[136].mxu1 %v13850_v7  ;;  %3858 = vmatmul.mubr.bf16.gmra.mrb[136].mxu0 %v14026_v14  ;;  %v17973_v7 = vsel %vm16227_vm2, %v17813_v21, %v17764_v35  ;;  %v23762_v14 = vrot.slane %v17734_v46, 9  ;;  %v1678_v35 = vshrl.u32 %v982_v11, 16  ;;  %v1681_v21 = vshll.u32 %v982_v11, 16  ;;  %v983_v11 = vld [vmem:[%s23714_s0 + $0x398] sm:$0x11] }
 0x152   :  { %2484 = vmatprep.mubr.bf16.mxu1 %v13853_v18  ;;  %3865 = vmatprep.mubr.bf16.mxu0 %v14029_v36  ;;  %v17991_v18 = vrot.slane %v1659_v58, 5  ;;  %v1673_v46 = vshll.u32 %v981_v10, 16  ;;  %v14028_v58 = vcombine.low %v17897_v47, %v17911_v31  ;;  %v13855_v53 = vcombine.high %v17973_v7, %v17979_v42  ;;  %v18022_v60 = vld [vmem:[%s23714_s0 + $0x388] sm:$0x11] }
 0x153   :  { %v17987_v23 = vsel %vm16533_vm5, %v23762_v14, %v23761_v37  ;;  %v1670_v37 = vor.u32 %v1669_v63, %v1666_v0  ;;  %v1683_v0 = vrot.slane %v1681_v21, 5  ;;  %v1657_v14 = vrot.slane %v1656_v44, 4 }
 0x154   :  { %v17993_v36 = vpop.f32.mrb[32].mxu0  ;;  %v17995_v9 = vpop.f32.mrb[32].mxu1  ;;  %v14031_v47 = vcombine.high %v17964_v28, %v17987_v23  ;;  %v1687_v55 = vshll.u32 %v983_v11, 16  ;;  %v23766_v11 = vrot.slane %v17795_v22, 9  ;;  %v13854_v21 = vcombine.low %v17973_v7, %v17979_v42  ;;  %v988_v42 = vld [vmem:[%s23714_s0 + $0x3e0] sm:$0xff] }
 0x155   :  { %23763 = vst [vmem:[#allocation20_spill] sm:$0xff] %v17995_v9  ;;  %v635_v1 = vpop.f32.mrb[33].mxu0  ;;  %v763_v50 = vpop.f32.mrb[33].mxu1  ;;  %v18034_v9 = vrot.slane %v1670_v37, 4 }
 0x156   :  { %v18011_v13 = vpop.f32.mrb[34].mxu0  ;;  %v18013_v10 = vpop.f32.mrb[34].mxu1  ;;  %v1680_v50 = vrot.slane %v1678_v35, 4  ;;  %v18024_v1 = vrot.slane %v1673_v46, 5  ;;  %v18039_v35 = vld [vmem:[%s23714_s0 + $0x398] sm:$0x11] }
 0x157   :  { %23764 = vst [vmem:[#allocation21_spill] sm:$0xff] %v18013_v10  ;;  %v638_v63 = vpop.f32.mrb[35].mxu0  ;;  %v766_v31 = vpop.f32.mrb[35].mxu1  ;;  %v984_v10 = vld [vmem:[%s23714_s0 + $0x3c0] sm:$0xff]  ;;  %v986_v46 = vld [vmem:[%s23714_s0 + $0x3d0] sm:$0xff] }
 0x158   :  { %v23767_v63 = vrot.slane %v17853_v5, 5  ;;  %v23768_v31 = vrot.slane %v17838_v12, 9  ;;  %v1692_v22 = vshrl.u32 %v984_v10, 16  ;;  %v985_v12 = vld [vmem:[%s23714_s0 + $0x3c8] sm:$0x11]  ;;  %v1706_v5 = vshrl.u32 %v986_v46, 16 }
 0x159   :  { %2485 = vmatmul.mubr.bf16.gmra.mrb[140].mxu1 %v13852_v38  ;;  %3866 = vmatmul.mubr.bf16.gmra.mrb[140].mxu0 %v14028_v58  ;;  %v18050_v38 = vsel %vm16227_vm2, %v17877_v19, %v17855_v41  ;;  %v23765_v58 = vrot.slane %v17818_v32, 5  ;;  %v18072_v41 = vsel %vm16227_vm2, %v17913_v27, %v17873_v8  ;;  %v1684_v32 = vor.u32 %v1683_v0, %v1680_v50  ;;  %v987_v50 = vld [vmem:[%s23714_s0 + $0x3d8] sm:$0x11] }
 0x15a   :  { %2492 = vmatprep.mubr.bf16.mxu1 %v13855_v53  ;;  %3873 = vmatprep.mubr.bf16.mxu0 %v14031_v47  ;;  %v18066_v53 = vsel %vm16533_vm5, %v23768_v31, %v23767_v63  ;;  %v1695_v19 = vshll.u32 %v984_v10, 16  ;;  %v14030_v8 = vcombine.low %v17964_v28, %v17987_v23  ;;  %v18085_v27 = vrot.slane %v1687_v55, 5 }
 0x15b   :  { %v18058_v37 = vsel %vm16533_vm5, %v23766_v11, %v23765_v58  ;;  %v1709_v11 = vshll.u32 %v986_v46, 16  ;;  %v13857_v46 = vcombine.high %v18050_v38, %v18072_v41  ;;  %v1694_v10 = vrot.slane %v1692_v22, 4 }
 0x15c   :  { %v18074_v47 = vpop.f32.mrb[36].mxu0  ;;  %v18076_v58 = vpop.f32.mrb[36].mxu1  ;;  %v14033_v7 = vcombine.high %v18058_v37, %v18066_v53  ;;  %v18103_v26 = vrot.slane %v1706_v5, 4  ;;  %v1715_v28 = vshll.u32 %v987_v50, 16  ;;  %v18119_v22 = vsel %vm16227_vm2, %v17989_v62, %v17941_v57  ;;  %v18152_v50 = vld [vmem:[%s23714_s0 + $0x3d0] sm:$0xee] }
 0x15d   :  { %23769 = vst [vmem:[#allocation22_spill] sm:$0xff] %v18074_v47  ;;  %23770 = vst [vmem:[#allocation23_spill] sm:$0xff] %v18076_v58  ;;  %v643_v63 = vpop.f32.mrb[37].mxu0  ;;  %v771_v31 = vpop.f32.mrb[37].mxu1  ;;  %v1697_v58 = vrot.slane %v1695_v19, 5  ;;  %v23773_v19 = vrot.slane %v17931_v15, 5 }
 0x15e   :  { %v18091_v0 = vpop.f32.mrb[38].mxu0  ;;  %v18093_v44 = vpop.f32.mrb[38].mxu1  ;;  %v1685_v63 = vrot.slane %v1684_v32, 4  ;;  %v1701_v31 = vshll.u32 %v985_v12, 16  ;;  %v1720_v32 = vshrl.u32 %v988_v42, 16  ;;  %v1723_v12 = vshll.u32 %v988_v42, 16 }
 0x15f   :  { %23771 = vst [vmem:[#allocation24_spill] sm:$0xff] %v18091_v0  ;;  %23772 = vst [vmem:[#allocation25_spill] sm:$0xff] %v18093_v44  ;;  %v646_v23 = vpop.f32.mrb[39].mxu0  ;;  %v774_v55 = vpop.f32.mrb[39].mxu1  ;;  %v18105_v44 = vrot.slane %v1709_v11, 5  ;;  %v23775_v57 = vrot.slane %v17951_v6, 5  ;;  %v1698_v6 = vor.u32 %v1697_v58, %v1694_v10 }
 0x160   :  { %v990_v23 = vld [vmem:[%s23714_s0 + $0x3f0] sm:$0xff]  ;;  %v18132_v11 = vld [vmem:[%s23714_s0 + $0x3c8] sm:$0x11]  ;;  %v23776_v15 = vrot.slane %v17946_v52, 9  ;;  %v18147_v62 = vrot.slane %v1701_v31, 5  ;;  %v1722_v58 = vrot.slane %v1720_v32, 4 }
 0x161   :  { %2493 = vmatmul.mubr.bf16.gmra.mrb[144].mxu1 %v13854_v21  ;;  %3874 = vmatmul.mubr.bf16.gmra.mrb[144].mxu0 %v14030_v8  ;;  %v23774_v21 = vrot.slane %v17922_v49, 9  ;;  %v18137_v8 = vsel %vm16227_vm2, %v1657_v14, %v17991_v18  ;;  %v18162_v52 = vld [vmem:[%s23714_s0 + $0x3d8] sm:$0x11]  ;;  %v1734_v14 = vshrl.u32 %v990_v23, 16  ;;  %v1737_v42 = vshll.u32 %v990_v23, 16 }
 0x162   :  { %2500 = vmatprep.mubr.bf16.mxu1 %v13857_v46  ;;  %3881 = vmatprep.mubr.bf16.mxu0 %v14033_v7  ;;  %v18145_v49 = vsel %vm16533_vm5, %v23776_v15, %v23775_v57  ;;  %v989_v57 = vld [vmem:[%s23714_s0 + $0x3e8] sm:$0x11]  ;;  %v1725_v10 = vrot.slane %v1723_v12, 5  ;;  %v13859_v23 = vcombine.high %v18119_v22, %v18137_v8  ;;  %v1717_v32 = vrot.slane %v1715_v28, 5 }
 0x163   :  { %v18127_v5 = vsel %vm16533_vm5, %v23774_v21, %v23773_v19  ;;  %v13856_v19 = vcombine.low %v18050_v38, %v18072_v41  ;;  %v14032_v21 = vcombine.low %v18058_v37, %v18066_v53  ;;  %v991_v38 = vld [vmem:[%s23714_s0 + $0x3f8] sm:$0x11]  ;;  %v1712_v41 = vor.u32 %v18105_v44, %v18103_v26 }
 0x164   :  { %v18155_v7 = vpop.f32.mrb[40].mxu0  ;;  %v18157_v18 = vpop.f32.mrb[40].mxu1  ;;  %v3234_v12 = vrot.slane %v18132_v11, 5  ;;  %v1736_v51 = vrot.slane %v1734_v14, 4  ;;  %v1739_v0 = vrot.slane %v1737_v42, 5  ;;  %v1743_v47 = vshll.u32 %v991_v38, 16 }
 0x165   :  { %23777 = vst [vmem:[#allocation26_spill] sm:$0xff] %v18155_v7  ;;  %23778 = vst [vmem:[#allocation27_spill] sm:$0xff] %v18157_v18  ;;  %v651_v55 = vpop.f32.mrb[41].mxu0  ;;  %v779_v31 = vpop.f32.mrb[41].mxu1  ;;  %v3238_v18 = vrot.slane %v18162_v52, 5  ;;  %v1729_v7 = vshll.u32 %v989_v57, 16  ;;  %v18194_v26 = vsel %vm16227_vm2, %v18034_v9, %v18024_v1  ;;  %v18199_v44 = vsel %vm16227_vm2, %v1685_v63, %v18085_v27 }
 0x166   :  { %v18171_v15 = vpop.f32.mrb[42].mxu0  ;;  %v18173_v46 = vpop.f32.mrb[42].mxu1  ;;  %v14035_v55 = vcombine.high %v18127_v5, %v18145_v49  ;;  %v1699_v31 = vrot.slane %v1698_v6, 4  ;;  %v23781_v28 = vrot.slane %v18022_v60, 5  ;;  %v23782_v11 = vrot.slane %v18009_v56, 9 }
 0x167   :  { %23779 = vst [vmem:[#allocation28_spill] sm:$0xff] %v18171_v15  ;;  %23780 = vst [vmem:[#allocation29_spill] sm:$0xff] %v18173_v46  ;;  %v654_v37 = vpop.f32.mrb[43].mxu0  ;;  %v782_v53 = vpop.f32.mrb[43].mxu1  ;;  %v13943_v46 = vrot.slane %v18152_v50, 9  ;;  %v1726_v15 = vor.u32 %v1725_v10, %v1722_v58  ;;  %v23783_v6 = vrot.slane %v18039_v35, 5  ;;  %v14034_v27 = vcombine.low %v18127_v5, %v18145_v49 }
 0x168   :  { %v992_v37 = vld [vmem:[%s23714_s0 + $0x400] sm:$0xff]  ;;  %v18207_v50 = vsel %vm16533_vm5, %v23782_v11, %v23781_v28  ;;  %v23784_v52 = vrot.slane %v18029_v2, 9  ;;  %v18231_v2 = vld [vmem:[%s23714_s0 + $0x3e8] sm:$0x11]  ;;  %v18237_v58 = vrot.slane %v1729_v7, 5  ;;  %v994_v5 = vld [vmem:[%s23714_s0 + $0x410] sm:$0xff] }
 0x169   :  { %2501 = vmatmul.mubr.bf16.gmra.mrb[148].mxu1 %v13856_v19  ;;  %3882 = vmatmul.mubr.bf16.gmra.mrb[148].mxu0 %v14032_v21  ;;  %v18220_v1 = vld [vmem:[%s23714_s0 + $0x3e0] sm:$0xee]  ;;  %v1748_v35 = vshrl.u32 %v992_v37, 16  ;;  %v1751_v63 = vshll.u32 %v992_v37, 16  ;;  %v13858_v19 = vcombine.low %v18119_v22, %v18137_v8  ;;  %v1713_v21 = vrot.slane %v1712_v41, 4 }
 0x16a   :  { %2508 = vmatprep.mubr.bf16.mxu1 %v13859_v23  ;;  %3889 = vmatprep.mubr.bf16.mxu0 %v14035_v55  ;;  %v18215_v9 = vsel %vm16533_vm5, %v23784_v52, %v23783_v6  ;;  %v18235_v57 = vrot.slane %v1726_v15, 4  ;;  %v13861_v23 = vcombine.high %v18194_v26, %v18199_v44  ;;  %v18250_v22 = vrot.slane %v1743_v47, 5  ;;  %v18255_v8 = vld [vmem:[%s23714_s0 + $0x3f0] sm:$0xee]  ;;  %v18260_v7 = vld [vmem:[%s23714_s0 + $0x3f8] sm:$0x11] }
 0x16b   :  { %v14037_v55 = vcombine.high %v18207_v50, %v18215_v9  ;;  %v996_v15 = vld [vmem:[%s23714_s0 + $0x420] sm:$0xff]  ;;  %v1740_v41 = vor.u32 %v1739_v0, %v1736_v51  ;;  %v3242_v37 = vrot.slane %v18231_v2, 5  ;;  %v993_v28 = vld [vmem:[%s23714_s0 + $0x408] sm:$0x11]  ;;  %v1750_v11 = vrot.slane %v1748_v35, 4 }
 0x16c   :  { %v18222_v60 = vpop.f32.mrb[44].mxu0  ;;  %v18224_v56 = vpop.f32.mrb[44].mxu1  ;;  %v1753_v6 = vrot.slane %v1751_v63, 5  ;;  %v1762_v52 = vshrl.u32 %v994_v5, 16  ;;  %v995_v51 = vld [vmem:[%s23714_s0 + $0x418] sm:$0x11]  ;;  %v18282_v35 = vsel %vm16227_vm2, %v1699_v31, %v18147_v62  ;;  %v14036_v62 = vcombine.low %v18207_v50, %v18215_v9 }
 0x16d   :  { %23785 = vst [vmem:[#allocation30_spill] sm:$0xff] %v18224_v56  ;;  %v659_v14 = vpop.f32.mrb[45].mxu0  ;;  %v787_v42 = vpop.f32.mrb[45].mxu1  ;;  %v1776_v0 = vshrl.u32 %v996_v15, 16  ;;  %v1779_v2 = vshll.u32 %v996_v15, 16  ;;  %v13945_v63 = vrot.slane %v18255_v8, 9 }
 0x16e   :  { %v18242_v49 = vpop.f32.mrb[46].mxu0  ;;  %v18244_v10 = vpop.f32.mrb[46].mxu1  ;;  %v1765_v14 = vshll.u32 %v994_v5, 16  ;;  %v23787_v42 = vrot.slane %v18110_v54, 9  ;;  %v18286_v54 = vsel %vm16227_vm2, %v1713_v21, %v1717_v32  ;;  %v1757_v5 = vshll.u32 %v993_v28, 16 }
 0x16f   :  { %23786 = vst [vmem:[#allocation31_spill] sm:$0xff] %v18244_v10  ;;  %v662_v38 = vpop.f32.mrb[47].mxu0  ;;  %v790_v53 = vpop.f32.mrb[47].mxu1  ;;  %v1754_v31 = vor.u32 %v1753_v6, %v1750_v11  ;;  %v1764_v32 = vrot.slane %v1762_v52, 4  ;;  %v1771_v21 = vshll.u32 %v995_v51, 16  ;;  %v1781_v50 = vrot.slane %v1779_v2, 5 }
 0x170   :  { %v18274_v38 = vsel %vm16533_vm5, %v23787_v42, %v3234_v12  ;;  %v18290_v12 = vsel %vm16533_vm5, %v13943_v46, %v3238_v18  ;;  %v18303_v46 = vld [vmem:[%s23714_s0 + $0x400] sm:$0xee]  ;;  %v1767_v15 = vrot.slane %v1765_v14, 5  ;;  %v998_v53 = vld [vmem:[%s23714_s0 + $0x430] sm:$0xff]  ;;  %v13863_v11 = vcombine.high %v18282_v35, %v18286_v54  ;;  %v997_v52 = vld [vmem:[%s23714_s0 + $0x428] sm:$0x11] }
 0x171   :  { %2509 = vmatmul.mubr.bf16.gmra.mrb[152].mxu1 %v13858_v19  ;;  %3890 = vmatmul.mubr.bf16.gmra.mrb[152].mxu0 %v14034_v27  ;;  %v1741_v27 = vrot.slane %v1740_v41, 4  ;;  %v3246_v19 = vrot.slane %v18260_v7, 5  ;;  %v13860_v7 = vcombine.low %v18194_v26, %v18199_v44  ;;  %v1778_v41 = vrot.slane %v1776_v0, 4  ;;  %v18321_v26 = vld [vmem:[%s23714_s0 + $0x408] sm:$0x11] }
 0x172   :  { %2516 = vmatprep.mubr.bf16.mxu1 %v13861_v23  ;;  %3897 = vmatprep.mubr.bf16.mxu0 %v14037_v55  ;;  %v14039_v6 = vcombine.high %v18274_v38, %v18290_v12  ;;  %v18326_v44 = vld [vmem:[%s23714_s0 + $0x410] sm:$0xee]  ;;  %v1759_v51 = vrot.slane %v1757_v5, 5  ;;  %v13946_v0 = vrot.slane %v18303_v46, 9  ;;  %v1755_v2 = vrot.slane %v1754_v31, 4  ;;  %v1000_v31 = vld [vmem:[%s23714_s0 + $0x460] sm:$0xff] }
 0x173   :  { %v1790_v47 = vshrl.u32 %v998_v53, 16  ;;  %v1768_v10 = vor.u32 %v1767_v15, %v1764_v32  ;;  %v999_v5 = vld [vmem:[%s23714_s0 + $0x438] sm:$0x11]  ;;  %v1782_v32 = vor.u32 %v1781_v50, %v1778_v41  ;;  %v18362_v46 = vsel %vm16533_vm5, %v13945_v63, %v3246_v19  ;;  %v1002_v19 = vld [vmem:[%s23714_s0 + $0x470] sm:$0xff] }
 0x174   :  { %v18294_v23 = vpop.f32.mrb[48].mxu0  ;;  %v18296_v55 = vpop.f32.mrb[48].mxu1  ;;  %v1804_v41 = vshrl.u32 %v1000_v31, 16  ;;  %v1799_v63 = vshll.u32 %v999_v5, 16  ;;  %v2891_v5 = vld [vmem:[%s23714_s0 + $0x430] sm:$0xee] }
 0x175   :  { %23788 = vst [vmem:[#allocation32_spill] sm:$0xff] %v18296_v55  ;;  %v667_v18 = vpop.f32.mrb[49].mxu0  ;;  %v795_v8 = vpop.f32.mrb[49].mxu1  ;;  %v14038_v55 = vcombine.low %v18274_v38, %v18290_v12  ;;  %v23790_v38 = vrot.slane %v18220_v1, 9  ;;  %v1792_v15 = vrot.slane %v1790_v47, 4 }
 0x176   :  { %v18310_v9 = vpop.f32.mrb[50].mxu0  ;;  %v18312_v28 = vpop.f32.mrb[50].mxu1  ;;  %v1773_v18 = vrot.slane %v1771_v21, 5  ;;  %v2888_v8 = vld [vmem:[%s23714_s0 + $0x418] sm:$0x11]  ;;  %v18358_v21 = vsel %vm16227_vm2, %v1741_v27, %v18250_v22  ;;  %v13862_v22 = vcombine.low %v18282_v35, %v18286_v54  ;;  %v1769_v27 = vrot.slane %v1768_v10, 4 }
 0x177   :  { %23789 = vst [vmem:[#allocation33_spill] sm:$0xff] %v18312_v28  ;;  %v670_v14 = vpop.f32.mrb[51].mxu0  ;;  %v798_v42 = vpop.f32.mrb[51].mxu1  ;;  %v1793_v28 = vshll.u32 %v998_v53, 16  ;;  %v18353_v12 = vsel %vm16533_vm5, %v23790_v38, %v3242_v37  ;;  %v3254_v37 = vrot.slane %v2888_v8, 5 }
 0x178   :  { %v1785_v14 = vshll.u32 %v997_v52, 16  ;;  %v18383_v52 = vrot.slane %v1782_v32, 4  ;;  %v18390_v10 = vld [vmem:[%s23714_s0 + $0x420] sm:$0xee]  ;;  %v18395_v54 = vld [vmem:[%s23714_s0 + $0x428] sm:$0x11] }
 0x179   :  { %2517 = vmatmul.mubr.bf16.gmra.mrb[156].mxu1 %v13860_v7  ;;  %3898 = vmatmul.mubr.bf16.gmra.mrb[156].mxu0 %v14036_v62  ;;  %v18347_v62 = vsel %vm16227_vm2, %v18235_v57, %v18237_v58  ;;  %v3250_v7 = vrot.slane %v18321_v26, 5  ;;  %v13947_v57 = vrot.slane %v18326_v44, 9  ;;  %v1795_v53 = vrot.slane %v1793_v28, 5  ;;  %v1001_v38 = vld [vmem:[%s23714_s0 + $0x468] sm:$0x11] }
 0x17a   :  { %2524 = vmatprep.mubr.bf16.mxu1 %v13863_v11  ;;  %3905 = vmatprep.mubr.bf16.mxu0 %v14039_v6  ;;  %v1807_v6 = vshll.u32 %v1000_v31, 16  ;;  %v13865_v47 = vcombine.high %v18347_v62, %v18358_v21  ;;  %v14041_v28 = vcombine.high %v18353_v12, %v18362_v46  ;;  %v18385_v35 = vrot.slane %v1785_v14, 5  ;;  %v2892_v14 = vld [vmem:[%s23714_s0 + $0x438] sm:$0x11] }
 0x17b   :  { %v1796_v31 = vor.u32 %v1795_v53, %v1792_v15  ;;  %v1806_v32 = vrot.slane %v1804_v41, 4  ;;  %v1003_v15 = vld [vmem:[%s23714_s0 + $0x478] sm:$0x11]  ;;  %v18419_v41 = vsel %vm16533_vm5, %v13946_v0, %v3250_v7  ;;  %v13949_v0 = vrot.slane %v2891_v5, 9 }
 0x17c   :  { %v18366_v58 = vpop.f32.mrb[52].mxu0  ;;  %v18368_v1 = vpop.f32.mrb[52].mxu1  ;;  %v1809_v53 = vrot.slane %v1807_v6, 5  ;;  %v3262_v7 = vrot.slane %v2892_v14, 5 }
 0x17d   :  { %23791 = vst [vmem:[#allocation34_spill] sm:$0xff] %v18368_v1  ;;  %v675_v50 = vpop.f32.mrb[53].mxu0  ;;  %v803_v11 = vpop.f32.mrb[53].mxu1 }
 0x17e   :  { %v18375_v26 = vpop.f32.mrb[54].mxu0  ;;  %v18377_v44 = vpop.f32.mrb[54].mxu1  ;;  %v1818_v50 = vshrl.u32 %v1002_v19, 16  ;;  %v18408_v11 = vsel %vm16227_vm2, %v1755_v2, %v1759_v51  ;;  %v1801_v51 = vrot.slane %v1799_v63, 5  ;;  %v13948_v2 = vrot.slane %v18390_v10, 9 }
 0x17f   :  { %23792 = vst [vmem:[#allocation35_spill] sm:$0xff] %v18377_v44  ;;  %v678_v42 = vpop.f32.mrb[55].mxu0  ;;  %v806_v8 = vpop.f32.mrb[55].mxu1  ;;  %v1810_v10 = vor.u32 %v1809_v53, %v1806_v32 }
 0x180   :  { %v1821_v42 = vshll.u32 %v1002_v19, 16  ;;  %v18415_v8 = vsel %vm16227_vm2, %v1769_v27, %v1773_v18  ;;  %v1813_v19 = vshll.u32 %v1001_v38, 16  ;;  %v14040_v18 = vcombine.low %v18353_v12, %v18362_v46 }
 0x181   :  { %2525 = vmatmul.mubr.bf16.gmra.mrb[160].mxu1 %v13862_v22  ;;  %3906 = vmatmul.mubr.bf16.gmra.mrb[160].mxu0 %v14038_v55  ;;  %v18423_v55 = vsel %vm16533_vm5, %v13947_v57, %v3254_v37  ;;  %v3258_v22 = vrot.slane %v18395_v54, 5  ;;  %v1797_v27 = vrot.slane %v1796_v31, 4  ;;  %v1004_v57 = vld [vmem:[%s23714_s0 + $0x480] sm:$0xff]  ;;  %v1820_v54 = vrot.slane %v1818_v50, 4 }
 0x182   :  { %2532 = vmatprep.mubr.bf16.mxu1 %v13865_v47  ;;  %3913 = vmatprep.mubr.bf16.mxu0 %v14041_v28  ;;  %v13864_v28 = vcombine.low %v18347_v62, %v18358_v21  ;;  %v1827_v38 = vshll.u32 %v1003_v15, 16  ;;  %v13867_v5 = vcombine.high %v18408_v11, %v18415_v8  ;;  %v14043_v31 = vcombine.high %v18419_v41, %v18423_v55  ;;  %v2894_v62 = vld [vmem:[%s23714_s0 + $0x468] sm:$0x11]  ;;  %v1006_v21 = vld [vmem:[%s23714_s0 + $0x490] sm:$0xff] }
 0x183   :  { %v1823_v14 = vrot.slane %v1821_v42, 5  ;;  %v1815_v15 = vrot.slane %v1813_v19, 5  ;;  %v1832_v53 = vshrl.u32 %v1004_v57, 16  ;;  %v2896_v42 = vld [vmem:[%s23714_s0 + $0x478] sm:$0x11]  ;;  %v1811_v44 = vrot.slane %v1810_v10, 4 }
 0x184   :  { %v18427_v6 = vpop.f32.mrb[56].mxu0  ;;  %v18429_v47 = vpop.f32.mrb[56].mxu1  ;;  %v1829_v1 = vrot.slane %v1827_v38, 5  ;;  %v1846_v56 = vshrl.u32 %v1006_v21, 16  ;;  %v18466_v19 = vsel %vm16533_vm5, %v13948_v2, %v3258_v22  ;;  %v14042_v22 = vcombine.low %v18419_v41, %v18423_v55  ;;  %v1007_v41 = vld [vmem:[%s23714_s0 + $0x498] sm:$0x11] }
 0x185   :  { %23793 = vst [vmem:[#allocation36_spill] sm:$0xff] %v18429_v47  ;;  %v683_v37 = vpop.f32.mrb[57].mxu0  ;;  %v811_v63 = vpop.f32.mrb[57].mxu1  ;;  %v18441_v47 = vld [vmem:[%s23714_s0 + $0x460] sm:$0xee] }
 0x186   :  { %v18443_v12 = vpop.f32.mrb[58].mxu0  ;;  %v18445_v46 = vpop.f32.mrb[58].mxu1  ;;  %v2895_v37 = vld [vmem:[%s23714_s0 + $0x470] sm:$0xee]  ;;  %v13950_v63 = vrot.slane %v18441_v47, 9  ;;  %v18476_v47 = vsel %vm16227_vm2, %v18383_v52, %v18385_v35  ;;  %v1008_v52 = vld [vmem:[%s23714_s0 + $0x4a0] sm:$0xff] }
 0x187   :  { %23794 = vst [vmem:[#allocation37_spill] sm:$0xff] %v18443_v12  ;;  %23795 = vst [vmem:[#allocation38_spill] sm:$0xff] %v18445_v46  ;;  %v686_v32 = vpop.f32.mrb[59].mxu0  ;;  %v814_v50 = vpop.f32.mrb[59].mxu1  ;;  %v1835_v46 = vshll.u32 %v1004_v57, 16  ;;  %v1824_v12 = vor.u32 %v1823_v14, %v1820_v54  ;;  %v3266_v57 = vrot.slane %v2894_v62, 5 }
 0x188   :  { %v1849_v32 = vshll.u32 %v1006_v21, 16  ;;  %v18470_v50 = vsel %vm16533_vm5, %v13949_v0, %v3262_v7  ;;  %v1005_v0 = vld [vmem:[%s23714_s0 + $0x488] sm:$0x11]  ;;  %v13951_v38 = vrot.slane %v2895_v37, 9  ;;  %v1848_v62 = vrot.slane %v1846_v56, 4 }
 0x189   :  { %2533 = vmatmul.mubr.bf16.gmra.mrb[164].mxu1 %v13864_v28  ;;  %3914 = vmatmul.mubr.bf16.gmra.mrb[164].mxu0 %v14040_v18  ;;  %v18480_v18 = vsel %vm16227_vm2, %v1797_v27, %v1801_v51  ;;  %v1834_v28 = vrot.slane %v1832_v53, 4  ;;  %v1837_v7 = vrot.slane %v1835_v46, 5  ;;  %v13866_v27 = vcombine.low %v18408_v11, %v18415_v8  ;;  %v1010_v11 = vld [vmem:[%s23714_s0 + $0x4b0] sm:$0xff]  ;;  %v2897_v56 = vld [vmem:[%s23714_s0 + $0x480] sm:$0xee] }
 0x18a   :  { %2540 = vmatprep.mubr.bf16.mxu1 %v13867_v5  ;;  %3921 = vmatprep.mubr.bf16.mxu0 %v14043_v31  ;;  %v14045_v54 = vcombine.high %v18466_v19, %v18470_v50  ;;  %v3270_v5 = vrot.slane %v2896_v42, 5  ;;  %v13869_v31 = vcombine.high %v18476_v47, %v18480_v18  ;;  %v1825_v14 = vrot.slane %v1824_v12, 4 }
 0x18b   :  { %v1851_v21 = vrot.slane %v1849_v32, 5  ;;  %v1841_v37 = vshll.u32 %v1005_v0, 16  ;;  %v1860_v42 = vshrl.u32 %v1008_v52, 16  ;;  %v18519_v12 = vsel %vm16227_vm2, %v1811_v44, %v1815_v15  ;;  %v1009_v0 = vld [vmem:[%s23714_s0 + $0x4a8] sm:$0x11] }
 0x18c   :  { %v18482_v10 = vpop.f32.mrb[60].mxu0  ;;  %v18484_v2 = vpop.f32.mrb[60].mxu1  ;;  %v18523_v32 = vsel %vm16533_vm5, %v13950_v63, %v3266_v57  ;;  %v18533_v44 = vsel %vm16227_vm2, %v1825_v14, %v1829_v1  ;;  %v18537_v15 = vsel %vm16533_vm5, %v13951_v38, %v3270_v5  ;;  %v2900_v57 = vld [vmem:[%s23714_s0 + $0x498] sm:$0x11] }
 0x18d   :  { %23796 = vst [vmem:[#allocation39_spill] sm:$0xff] %v18484_v2  ;;  %v691_v35 = vpop.f32.mrb[61].mxu0  ;;  %v819_v51 = vpop.f32.mrb[61].mxu1  ;;  %v1838_v2 = vor.u32 %v1837_v7, %v1834_v28  ;;  %v1852_v63 = vor.u32 %v1851_v21, %v1848_v62  ;;  %v1843_v28 = vrot.slane %v1841_v37, 5  ;;  %v1862_v7 = vrot.slane %v1860_v42, 4 }
 0x18e   :  { %v18501_v55 = vpop.f32.mrb[62].mxu0  ;;  %v18503_v46 = vpop.f32.mrb[62].mxu1  ;;  %v1863_v35 = vshll.u32 %v1008_v52, 16  ;;  %v13868_v51 = vcombine.low %v18476_v47, %v18480_v18  ;;  %v1874_v47 = vshrl.u32 %v1010_v11, 16  ;;  %v1877_v18 = vshll.u32 %v1010_v11, 16 }
 0x18f   :  { %23797 = vst [vmem:[#allocation40_spill] sm:$0xff] %v18501_v55  ;;  %23798 = vst [vmem:[#allocation41_spill] sm:$0xff] %v18503_v46  ;;  %v694_v8 = vpop.f32.mrb[63].mxu0  ;;  %v822_v53 = vpop.f32.mrb[63].mxu1  ;;  %v14044_v46 = vcombine.low %v18466_v19, %v18470_v50  ;;  %v1855_v55 = vshll.u32 %v1007_v41, 16  ;;  %v3278_v21 = vrot.slane %v2900_v57, 5 }
 0x190   :  { %v2898_v19 = vld [vmem:[%s23714_s0 + $0x488] sm:$0x11]  ;;  %v2899_v50 = vld [vmem:[%s23714_s0 + $0x490] sm:$0xee]  ;;  %v1865_v52 = vrot.slane %v1863_v35, 5  ;;  %v1876_v11 = vrot.slane %v1874_v47, 4  ;;  %v13871_v35 = vcombine.high %v18519_v12, %v18533_v44 }
 0x191   :  { %2541 = vmatmul.mubr.bf16.gmra.mrb[168].mxu1 %v13866_v27  ;;  %3922 = vmatmul.mubr.bf16.gmra.mrb[168].mxu0 %v14042_v22  ;;  %v13952_v22 = vrot.slane %v2897_v56, 9  ;;  %v1857_v41 = vrot.slane %v1855_v55, 5  ;;  %v13953_v38 = vrot.slane %v2899_v50, 9  ;;  %v1879_v8 = vrot.slane %v1877_v18, 5  ;;  %v1012_v53 = vld [vmem:[%s23714_s0 + $0x4c0] sm:$0xff] }
 0x192   :  { %2548 = vmatprep.mubr.bf16.mxu1 %v13869_v31  ;;  %3929 = vmatprep.mubr.bf16.mxu0 %v14045_v54  ;;  %v1839_v54 = vrot.slane %v1838_v2, 4  ;;  %v3274_v31 = vrot.slane %v2898_v19, 5  ;;  %v14047_v2 = vcombine.high %v18523_v32, %v18537_v15  ;;  %v1853_v55 = vrot.slane %v1852_v63, 4 }
 0x193   :  { %v1869_v56 = vshll.u32 %v1009_v0, 16  ;;  %v1866_v57 = vor.u32 %v1865_v52, %v1862_v7  ;;  %v2902_v0 = vld [vmem:[%s23714_s0 + $0x4a8] sm:$0x11]  ;;  %v1888_v7 = vshrl.u32 %v1012_v53, 16  ;;  %v1891_v52 = vshll.u32 %v1012_v53, 16 }
 0x194   :  { %v2334_v27 = vpop.f32.mrb[64].mxu1  ;;  %v3715_v1 = vpop.f32.mrb[64].mxu0  ;;  %v18566_v63 = vsel %vm16227_vm2, %v1839_v54, %v1843_v28  ;;  %v2903_v54 = vld [vmem:[%s23714_s0 + $0x4b0] sm:$0xee] }
 0x195   :  { %v2653_v5 = vadd.f32 %v2334_v27, %v17270_v43  ;;  %v2336_v14 = vpop.f32.mrb[65].mxu1  ;;  %v3717_v62 = vpop.f32.mrb[65].mxu0  ;;  %v1011_v43 = vld [vmem:[%s23714_s0 + $0x4b8] sm:$0x11]  ;;  %v2901_v27 = vld [vmem:[%s23714_s0 + $0x4a0] sm:$0xee] }
 0x196   :  { %v2337_v37 = vpop.f32.mrb[66].mxu1  ;;  %v3718_v42 = vpop.f32.mrb[66].mxu0  ;;  %v14046_v14 = vcombine.low %v18523_v32, %v18537_v15  ;;  %v18578_v32 = vsel %vm16533_vm5, %v13952_v22, %v3274_v31  ;;  %v1880_v15 = vor.u32 %v1879_v8, %v1876_v11  ;;  %v1883_v28 = vshll.u32 %v1011_v43, 16 }
 0x197   :  { %v18556_v19 = vadd.f32 %v3715_v1, %v2653_v5  ;;  %v2654_v50 = vadd.f32 %v2337_v37, %v17293_v3  ;;  %v2339_v47 = vpop.f32.mrb[67].mxu1  ;;  %v3720_v18 = vpop.f32.mrb[67].mxu0  ;;  %v1014_v3 = vld [vmem:[%s23714_s0 + $0x4d0] sm:$0xff]  ;;  %v2904_v5 = vld [vmem:[%s23714_s0 + $0x4b8] sm:$0x11]  ;;  %v1871_v22 = vrot.slane %v1869_v56, 5 }
 0x198   :  { %v13954_v31 = vrot.slane %v2901_v27, 9  ;;  %v1867_v62 = vrot.slane %v1866_v57, 4  ;;  %v3282_v11 = vrot.slane %v2902_v0, 5  ;;  %v1902_v8 = vshrl.u32 %v1014_v3, 16  ;;  %v1013_v18 = vld [vmem:[%s23714_s0 + $0x4c8] sm:$0x11] }
 0x199   :  { %v18574_v1 = vadd.f32 %v3718_v42, %v2654_v50  ;;  %2549 = vmatmul.mubr.bf16.gmra.mrb[172].mxu1 %v13868_v51  ;;  %3930 = vmatmul.mubr.bf16.gmra.mrb[172].mxu0 %v14044_v46  ;;  %v18588_v51 = vsel %vm16227_vm2, %v1853_v55, %v1857_v41  ;;  %v18592_v46 = vsel %vm16533_vm5, %v13953_v38, %v3278_v21  ;;  %v1905_v53 = vshll.u32 %v1014_v3, 16 }
 0x19a   :  { %2556 = vmatprep.mubr.bf16.mxu1 %v13871_v35  ;;  %3937 = vmatprep.mubr.bf16.mxu0 %v14047_v2  ;;  %v13955_v43 = vrot.slane %v2903_v54, 9  ;;  %v3286_v50 = vrot.slane %v2904_v5, 5  ;;  %v1890_v35 = vrot.slane %v1888_v7, 4  ;;  %v1893_v2 = vrot.slane %v1891_v52, 5  ;;  %v18612_v54 = vld [vmem:[%s23714_s0 + $0x10] sm:$0xff]  ;;  %v18617_v5 = vld [vmem:[%s23714_s0 + $0x20] sm:$0xff] }
 0x19b   :  { %v13870_v38 = vcombine.low %v18519_v12, %v18533_v44  ;;  %v1881_v21 = vrot.slane %v1880_v15, 4  ;;  %v1885_v56 = vrot.slane %v1883_v28, 5  ;;  %v13873_v0 = vcombine.high %v18566_v63, %v18588_v51 }
 0x19c   :  { %v2342_v37 = vpop.f32.mrb[68].mxu1  ;;  %v3723_v42 = vpop.f32.mrb[68].mxu0  ;;  %v14049_v3 = vcombine.high %v18578_v32, %v18592_v46  ;;  %v1904_v15 = vrot.slane %v1902_v8, 4  ;;  %v1907_v28 = vrot.slane %v1905_v53, 5  ;;  %v1894_v8 = vor.u32 %v1893_v2, %v1890_v35 }
 0x19d   :  { %v2655_v47 = vadd.f32 %v2342_v37, %v17365_v33  ;;  %v2344_v41 = vpop.f32.mrb[69].mxu1  ;;  %v3725_v55 = vpop.f32.mrb[69].mxu0  ;;  %v14048_v33 = vcombine.low %v18578_v32, %v18592_v46  ;;  %v18621_v32 = vsel %vm16533_vm5, %v13954_v31, %v3282_v11  ;;  %v1015_v46 = vld [vmem:[%s23714_s0 + $0x4d8] sm:$0x11]  ;;  %v1897_v53 = vshll.u32 %v1013_v18, 16 }
 0x19e   :  { %v2345_v57 = vpop.f32.mrb[70].mxu1  ;;  %v3726_v27 = vpop.f32.mrb[70].mxu0  ;;  %v18638_v31 = vsel %vm16227_vm2, %v1881_v21, %v1885_v56  ;;  %v2905_v11 = vld [vmem:[%s23714_s0 + $0x4c0] sm:$0xee]  ;;  %v5300_v35 = vshrl.u32 %v18617_v5, 16  ;;  %v5303_v2 = vshll.u32 %v18617_v5, 16  ;;  %v1908_v55 = vor.u32 %v1907_v28, %v1904_v15 }
 0x19f   :  { %v18606_v7 = vadd.f32 %v3723_v42, %v2655_v47  ;;  %v2656_v12 = vadd.f32 %v2345_v57, %v17390_v20  ;;  %v2347_v44 = vpop.f32.mrb[71].mxu1  ;;  %v3728_v52 = vpop.f32.mrb[71].mxu0  ;;  %v18625_v20 = vsel %vm16533_vm5, %v13955_v43, %v3286_v50  ;;  %v18634_v42 = vsel %vm16227_vm2, %v1867_v62, %v1871_v22  ;;  %v2906_v43 = vld [vmem:[%s23714_s0 + $0x4c8] sm:$0x11]  ;;  %v2908_v22 = vld [vmem:[%s23714_s0 + $0x4d8] sm:$0x11] }
 0x1a0   :  { %v5286_v62 = vshrl.u32 %v18612_v54, 16  ;;  %v5289_v50 = vshll.u32 %v18612_v54, 16  ;;  %v13872_v47 = vcombine.low %v18566_v63, %v18588_v51  ;;  %v14051_v41 = vcombine.high %v18621_v32, %v18625_v20  ;;  %v14247_v51 = vld [vmem:[%s23714_s0 + $0x18] sm:$0x11] }
 0x1a1   :  { %23799 = vst [vmem:[#allocation42_spill] sm:$0xff] %v18606_v7  ;;  %v18630_v37 = vadd.f32 %v3726_v27, %v2656_v12  ;;  %2557 = vmatmul.mubr.bf16.gmra.mrb[176].mxu1 %v13870_v38  ;;  %3938 = vmatmul.mubr.bf16.gmra.mrb[176].mxu0 %v14046_v14  ;;  %v2907_v14 = vld [vmem:[%s23714_s0 + $0x4d0] sm:$0xee]  ;;  %v1911_v38 = vshll.u32 %v1015_v46, 16  ;;  %v1895_v18 = vrot.slane %v1894_v8, 4  ;;  %v1899_v57 = vrot.slane %v1897_v53, 5 }
 0x1a2   :  { %2564 = vmatprep.mubr.bf16.mxu1 %v13873_v0  ;;  %3945 = vmatprep.mubr.bf16.mxu0 %v14049_v3  ;;  %v13956_v27 = vrot.slane %v2905_v11, 9  ;;  %v3290_v0 = vrot.slane %v2906_v43, 5  ;;  %v13875_v52 = vcombine.high %v18634_v42, %v18638_v31  ;;  %v3294_v63 = vrot.slane %v2908_v22, 5  ;;  %v18675_v22 = vld [vmem:[%s23714_s0 + $0x30] sm:$0xff] }
 0x1a3   :  { %23800 = vst [vmem:[#allocation43_spill] sm:$0xff] %v18630_v37  ;;  %v13957_v37 = vrot.slane %v2907_v14, 9  ;;  %v5288_v46 = vrot.slane %v5286_v62, 4  ;;  %v5291_v8 = vrot.slane %v5289_v50, 5  ;;  %v5302_v53 = vrot.slane %v5300_v35, 4  ;;  %v18686_v35 = vld [vmem:[%s23714_s0 + $0x40] sm:$0xff] }
 0x1a4   :  { %v2350_v21 = vpop.f32.mrb[72].mxu1  ;;  %v3731_v56 = vpop.f32.mrb[72].mxu0  ;;  %v5305_v11 = vrot.slane %v5303_v2, 5  ;;  %v1913_v7 = vrot.slane %v1911_v38, 5  ;;  %v14249_v14 = vld [vmem:[%s23714_s0 + $0x28] sm:$0x11] }
 0x1a5   :  { %v2657_v3 = vadd.f32 %v2350_v21, %v17470_v17  ;;  %v2352_v12 = vpop.f32.mrb[73].mxu1  ;;  %v3733_v44 = vpop.f32.mrb[73].mxu0  ;;  %v5295_v50 = vshll.u32 %v14247_v51, 16  ;;  %v18690_v2 = vsel %vm16533_vm5, %v13957_v37, %v3294_v63  ;;  %v14050_v37 = vcombine.low %v18621_v32, %v18625_v20 }
 0x1a6   :  { %v2353_v15 = vpop.f32.mrb[74].mxu1  ;;  %v3734_v28 = vpop.f32.mrb[74].mxu0  ;;  %v1909_v44 = vrot.slane %v1908_v55, 4  ;;  %v5292_v55 = vor.u32 %v5291_v8, %v5288_v46  ;;  %v5306_v38 = vor.u32 %v5305_v11, %v5302_v53  ;;  %v5331_v63 = vshll.u32 %v18686_v35, 16  ;;  %v18714_v46 = vld [vmem:[%s23714_s0 + $0x50] sm:$0xff] }
 0x1a7   :  { %v18666_v43 = vadd.f32 %v3731_v56, %v2657_v3  ;;  %v2658_v17 = vadd.f32 %v2353_v15, %v17492_v39  ;;  %v2355_v21 = vpop.f32.mrb[75].mxu1  ;;  %v3736_v12 = vpop.f32.mrb[75].mxu0  ;;  %v18681_v39 = vsel %vm16533_vm5, %v13956_v27, %v3290_v0  ;;  %v5314_v27 = vshrl.u32 %v18675_v22, 16 }
 0x1a8   :  { %v18698_v56 = vsel %vm16227_vm2, %v1909_v44, %v1913_v7  ;;  %v5317_v0 = vshll.u32 %v18675_v22, 16  ;;  %v13874_v7 = vcombine.low %v18634_v42, %v18638_v31  ;;  %v14053_v15 = vcombine.high %v18681_v39, %v18690_v2  ;;  %v18721_v42 = vld [vmem:[%s23714_s0 + $0x60] sm:$0xff] }
 0x1a9   :  { %v18677_v62 = vadd.f32 %v3734_v28, %v2658_v17  ;;  %2565 = vmatmul.mubr.bf16.gmra.mrb[180].mxu1 %v13872_v47  ;;  %3946 = vmatmul.mubr.bf16.gmra.mrb[180].mxu0 %v14048_v33  ;;  %v5309_v47 = vshll.u32 %v14249_v14, 16  ;;  %v18694_v33 = vsel %vm16227_vm2, %v1895_v18, %v1899_v57  ;;  %v5297_v28 = vrot.slane %v5295_v50, 5  ;;  %v14251_v50 = vld [vmem:[%s23714_s0 + $0x38] sm:$0x11] }
 0x1aa   :  { %2572 = vmatprep.mubr.bf16.mxu1 %v13875_v52  ;;  %3953 = vmatprep.mubr.bf16.mxu0 %v14051_v41  ;;  %v5328_v52 = vshrl.u32 %v18686_v35, 16  ;;  %v13877_v8 = vcombine.high %v18694_v33, %v18698_v56  ;;  %v5307_v53 = vrot.slane %v5306_v38, 4  ;;  %v5316_v44 = vrot.slane %v5314_v27, 4 }
 0x1ab   :  { %v5311_v11 = vrot.slane %v5309_v47, 5  ;;  %v5319_v14 = vrot.slane %v5317_v0, 5  ;;  %v5333_v38 = vrot.slane %v5331_v63, 5  ;;  %v5342_v47 = vshrl.u32 %v18714_v46, 16 }
 0x1ac   :  { %v2358_v41 = vpop.f32.mrb[76].mxu1  ;;  %v3739_v3 = vpop.f32.mrb[76].mxu0  ;;  %v5356_v27 = vshrl.u32 %v18721_v42, 16  ;;  %v5359_v0 = vshll.u32 %v18721_v42, 16 }
 0x1ad   :  { %v2659_v18 = vadd.f32 %v2358_v41, %v17560_v59  ;;  %v2360_v57 = vpop.f32.mrb[77].mxu1  ;;  %v3741_v51 = vpop.f32.mrb[77].mxu0  ;;  %v5293_v59 = vrot.slane %v5292_v55, 4  ;;  %v5330_v55 = vrot.slane %v5328_v52, 4  ;;  %v5345_v41 = vshll.u32 %v18714_v46, 16 }
 0x1ae   :  { %v2361_v32 = vpop.f32.mrb[78].mxu1  ;;  %v3742_v20 = vpop.f32.mrb[78].mxu0  ;;  %v5320_v63 = vor.u32 %v5319_v14, %v5316_v44  ;;  %v14167_v44 = vcombine.high %v18612_v54, %v18617_v5 }
 0x1af   :  { %v18723_v31 = vadd.f32 %v3739_v3, %v2659_v18  ;;  %v2660_v17 = vadd.f32 %v2361_v32, %v17589_v16  ;;  %v2363_v21 = vpop.f32.mrb[79].mxu1  ;;  %v3744_v12 = vpop.f32.mrb[79].mxu0  ;;  %v14253_v16 = vld [vmem:[%s23714_s0 + $0x48] sm:$0x11]  ;;  %v14052_v3 = vcombine.low %v18681_v39, %v18690_v2  ;;  %v18742_v52 = vsel %vm16227_vm2, %v5293_v59, %v5297_v28  ;;  %v14255_v28 = vld [vmem:[%s23714_s0 + $0x58] sm:$0x11] }
 0x1b0   :  { %v5323_v18 = vshll.u32 %v14251_v50, 16  ;;  %v5334_v32 = vor.u32 %v5333_v38, %v5330_v55  ;;  %v13876_v2 = vcombine.low %v18694_v33, %v18698_v56  ;;  %v5358_v59 = vrot.slane %v5356_v27, 4  ;;  %v18764_v33 = vld [vmem:[%s23714_s0 + $0x70] sm:$0xff] }
 0x1b1   :  { %v18731_v57 = vadd.f32 %v3742_v20, %v2660_v17  ;;  %2573 = vmatmul.mubr.bf16.gmra.mrb[184].mxu1 %v13874_v7  ;;  %3954 = vmatmul.mubr.bf16.gmra.mrb[184].mxu0 %v14050_v37  ;;  %v18746_v37 = vsel %vm16227_vm2, %v5307_v53, %v5311_v11  ;;  %v5337_v20 = vshll.u32 %v14253_v16, 16  ;;  %v5344_v17 = vrot.slane %v5342_v47, 4  ;;  %v18772_v16 = vld [vmem:[%s23714_s0 + $0x80] sm:$0xff] }
 0x1b2   :  { %2580 = vmatprep.mubr.bf16.mxu1 %v13877_v8  ;;  %3961 = vmatprep.mubr.bf16.mxu0 %v14053_v15  ;;  %v5347_v8 = vrot.slane %v5345_v41, 5  ;;  %v5361_v53 = vrot.slane %v5359_v0, 5  ;;  %v14407_v14 = vcombine.high %v18742_v52, %v18746_v37  ;;  %v5321_v47 = vrot.slane %v5320_v63, 4 }
 0x1b3   :  { %v5325_v41 = vrot.slane %v5323_v18, 5  ;;  %v5335_v27 = vrot.slane %v5334_v32, 4  ;;  %v5339_v0 = vrot.slane %v5337_v20, 5  ;;  %v5373_v63 = vshll.u32 %v18764_v33, 16 }
 0x1b4   :  { %v2366_v51 = vpop.f32.mrb[80].mxu1  ;;  %v3747_v7 = vpop.f32.mrb[80].mxu0  ;;  %v5384_v18 = vshrl.u32 %v18772_v16, 16  ;;  %v14166_v32 = vcombine.low %v18612_v54, %v18617_v5  ;;  %v14406_v20 = vcombine.low %v18742_v52, %v18746_v37 }
 0x1b5   :  { %v2661_v15 = vadd.f32 %v2366_v51, %v17659_v25  ;;  %v2368_v21 = vpop.f32.mrb[81].mxu1  ;;  %v3749_v39 = vpop.f32.mrb[81].mxu0  ;;  %v14257_v25 = vld [vmem:[%s23714_s0 + $0x68] sm:$0x11]  ;;  %v5348_v51 = vor.u32 %v5347_v8, %v5344_v17  ;;  %v15717_v8 = vld [vmem:[%s23713_s1 + $0x280] sm:$0xff]   ;;  %v18796_v54 = vsel %vm16227_vm2, %v5335_v27, %v5339_v0 }
 0x1b6   :  { %v2369_v11 = vpop.f32.mrb[82].mxu1  ;;  %v3750_v12 = vpop.f32.mrb[82].mxu0  ;;  %v5351_v21 = vshll.u32 %v14255_v28, 16  ;;  %v18792_v28 = vsel %vm16227_vm2, %v5321_v47, %v5325_v41  ;;  %v5386_v47 = vrot.slane %v5384_v18, 4  ;;  %v18807_v27 = vld [vmem:[%s23714_s0 + $0xc0] sm:$0xff] }
 0x1b7   :  { %v18766_v56 = vadd.f32 %v3747_v7, %v2661_v15  ;;  %v2662_v50 = vadd.f32 %v2369_v11, %v17683_v30  ;;  %v2371_v55 = vpop.f32.mrb[83].mxu1  ;;  %v3752_v38 = vpop.f32.mrb[83].mxu0  ;;  %v5362_v7 = vor.u32 %v5361_v53, %v5358_v59  ;;  %v5365_v15 = vshll.u32 %v14257_v25, 16  ;;  %v18802_v25 = vld [vmem:[%s23714_s0 + $0xb0] sm:$0xff] }
 0x1b8   :  { %v5370_v30 = vshrl.u32 %v18764_v33, 16  ;;  %v5387_v11 = vshll.u32 %v18772_v16, 16  ;;  %v5349_v5 = vrot.slane %v5348_v51, 4  ;;  %v5353_v52 = vrot.slane %v5351_v21, 5 }
 0x1b9   :  { %v18774_v39 = vadd.f32 %v3750_v12, %v2662_v50  ;;  %2581 = vmatmul.mubr.bf16.gmra.mrb[188].mxu1 %v13876_v2  ;;  %3962 = vmatmul.mubr.bf16.gmra.mrb[188].mxu0 %v14052_v3  ;;  %v15718_v2 = vld [vmem:[%s23713_s1 + $0x300] sm:$0xff]   ;;  %v5363_v12 = vrot.slane %v5362_v7, 4  ;;  %v5375_v38 = vrot.slane %v5373_v63, 5  ;;  %v14169_v7 = vcombine.high %v18675_v22, %v18686_v35  ;;  %v14261_v63 = vld [vmem:[%s23714_s0 + $0x88] sm:$0x11] }
 0x1ba   :  { %4708 = vmatprep.mubr.bf16.mxu1 %v14167_v44  ;;  %6598 = vmatprep.mubr.bf16.mxu0 %v14407_v14  ;;  %v5367_v44 = vrot.slane %v5365_v15, 5  ;;  %v5372_v14 = vrot.slane %v5370_v30, 4  ;;  %v5389_v41 = vrot.slane %v5387_v11, 5  ;;  %v14409_v15 = vcombine.high %v18792_v28, %v18796_v54  ;;  %v14259_v30 = vld [vmem:[%s23714_s0 + $0x78] sm:$0x11] }
 0x1bb   :  { %v18824_v18 = vsel %vm16227_vm2, %v5349_v5, %v5353_v52  ;;  %v5401_v11 = vshll.u32 %v18802_v25, 16  ;;  %v15723_v5 = vld [vmem:[%s23713_s1 + $0x288] sm:$0xff]  }
 0x1bc   :  { %v2374_v17 = vpop.f32.mrb[84].mxu1  ;;  %v3755_v3 = vpop.f32.mrb[84].mxu0  ;;  %v15724_v52 = vld [vmem:[%s23713_s1 + $0x308] sm:$0xff]  }
 0x1bd   :  { %v2663_v37 = vadd.f32 %v2374_v17, %v17758_v34  ;;  %v2376_v59 = vpop.f32.mrb[85].mxu1  ;;  %v3757_v53 = vpop.f32.mrb[85].mxu0 }
 0x1be   :  { %v2377_v50 = vpop.f32.mrb[86].mxu1  ;;  %v3758_v55 = vpop.f32.mrb[86].mxu0  ;;  %v5415_v59 = vshll.u32 %v18807_v27, 16  ;;  %v5390_v53 = vor.u32 %v5389_v41, %v5386_v47  ;;  %v5403_v47 = vrot.slane %v5401_v11, 5 }
 0x1bf   :  { %v18809_v34 = vadd.f32 %v3755_v3, %v2663_v37  ;;  %v2664_v0 = vadd.f32 %v2377_v50, %v17777_v24  ;;  %v2379_v51 = vpop.f32.mrb[87].mxu1  ;;  %v3760_v21 = vpop.f32.mrb[87].mxu0  ;;  %v5398_v24 = vshrl.u32 %v18802_v25, 16  ;;  %v18832_v3 = vsel %vm16227_vm2, %v5363_v12, %v5367_v44 }
 0x1c0   :  { %v5412_v37 = vshrl.u32 %v18807_v27, 16  ;;  %v5393_v50 = vshll.u32 %v14261_v63, 16  ;;  %v14168_v12 = vcombine.low %v18675_v22, %v18686_v35  ;;  %v14265_v22 = vld [vmem:[%s23714_s0 + $0xc8] sm:$0x11]  ;;  %v5417_v21 = vrot.slane %v5415_v59, 5 }
 0x1c1   :  { %v18828_v17 = vadd.f32 %v3758_v55, %v2664_v0  ;;  %4709 = vmatmul.mubr.bf16.vlgmr.msra.gmra.mrb[192].mxu1 %v14166_v32  ;;  %6599 = vmatmul.mubr.bf16.vlgmr.msra.gmra.mrb[192].mxu0 %v14406_v20  ;;  %v5376_v32 = vor.u32 %v5375_v38, %v5372_v14  ;;  %v5379_v20 = vshll.u32 %v14259_v30, 16  ;;  %v14408_v55 = vcombine.low %v18792_v28, %v18796_v54 }
 0x1c2   :  { %7945 = vmatpush1.bf16.msra.mxu1 %v15717_v8  ;;  %8940 = vmatpush1.bf16.msra.mxu0 %v15718_v2  ;;  %v14263_v8 = vld [vmem:[%s23714_s0 + $0xb8] sm:$0x11]  ;;  %v14171_v14 = vcombine.high %v18714_v46, %v18721_v42  ;;  %v23802_v38 = vmov 0   ;;  %v5400_v35 = vrot.slane %v5398_v24, 4  ;;  %v14411_v28 = vcombine.high %v18824_v18, %v18832_v3 }
 0x1c3   :  { %23801 = vst [vmem:[#allocation44_spill] sm:$0xff] %v18828_v17  ;;  %4716 = vmatprep.mubr.bf16.mxu1 %v14169_v7  ;;  %6606 = vmatprep.mubr.bf16.mxu0 %v14409_v15  ;;  %v5414_v54 = vrot.slane %v5412_v37, 4  ;;  %v18862_v7 = vld [vmem:[%s23714_s0 + $0xd0] sm:$0xff]  ;;  %v5377_v63 = vrot.slane %v5376_v32, 4  ;;  %v5381_v24 = vrot.slane %v5379_v20, 5  ;;  %v5391_v11 = vrot.slane %v5390_v53, 4 }
 0x1c4   :  { %v2382_v2 = vpop.f32.mrb[88].mxu1  ;;  %v3763_v44 = vpop.f32.mrb[88].mxu0  ;;  %7946 = vmatprep.subr.bf16.mxu1 %v23802_v38  ;;  %8941 = vmatprep.subr.bf16.mxu0 %v23802_v38  ;;  %v5407_v59 = vshll.u32 %v14263_v8, 16  ;;  %v15729_v17 = vld [vmem:[%s23713_s1 + $0x290] sm:$0xff]   ;;  %v5421_v32 = vshll.u32 %v14265_v22, 16  ;;  %v5426_v20 = vshrl.u32 %v18862_v7, 16 }
 0x1c5   :  { %v2665_v41 = vadd.f32 %v2382_v2, %v17840_v40  ;;  %v2384_v0 = vpop.f32.mrb[89].mxu1  ;;  %v3765_v51 = vpop.f32.mrb[89].mxu0  ;;  %v5395_v40 = vrot.slane %v5393_v50, 5  ;;  %v5429_v53 = vshll.u32 %v18862_v7, 16  ;;  %v5418_v8 = vor.u32 %v5417_v21, %v5414_v54 }
 0x1c6   :  { %v2385_v15 = vpop.f32.mrb[90].mxu1  ;;  %v3766_v30 = vpop.f32.mrb[90].mxu0  ;;  %7947 = vmatpush1.bf16.msra.mxu1 %v15723_v5  ;;  %8942 = vmatpush1.bf16.msra.mxu0 %v15724_v52  ;;  %v15730_v5 = vld [vmem:[%s23713_s1 + $0x310] sm:$0xff]   ;;  %v18878_v52 = vld [vmem:[%s23714_s0 + $0xe0] sm:$0xff]  ;;  %v5423_v54 = vrot.slane %v5421_v32, 5  ;;  %v5428_v21 = vrot.slane %v5426_v20, 4 }
 0x1c7   :  { %v18864_v2 = vadd.f32 %v3763_v44, %v2665_v41  ;;  %v2666_v0 = vadd.f32 %v2385_v15, %v17861_v48  ;;  %v2387_v51 = vpop.f32.mrb[91].mxu1  ;;  %v3768_v37 = vpop.f32.mrb[91].mxu0  ;;  %7948 = vmatprep.subr.bf16.mxu1 %v23802_v38  ;;  %8943 = vmatprep.subr.bf16.mxu0 %v23802_v38  ;;  %v5404_v48 = vor.u32 %v5403_v47, %v5400_v35  ;;  %v5440_v44 = vshrl.u32 %v18878_v52, 16 }
 0x1c8   :  { %v5443_v41 = vshll.u32 %v18878_v52, 16  ;;  %v18888_v15 = vsel %vm16227_vm2, %v5377_v63, %v5381_v24  ;;  %v18892_v22 = vsel %vm16227_vm2, %v5391_v11, %v5395_v40  ;;  %v5409_v35 = vrot.slane %v5407_v59, 5  ;;  %v14267_v51 = vld [vmem:[%s23714_s0 + $0xd8] sm:$0x11]  ;;  %v18913_v37 = vld [vmem:[%s23714_s0 + $0xf0] sm:$0xff] }
 0x1c9   :  { %v18882_v50 = vadd.f32 %v3766_v30, %v2666_v0  ;;  %4717 = vmatmul.mubr.bf16.gmra.mrb[196].mxu1 %v14168_v12  ;;  %6607 = vmatmul.mubr.bf16.gmra.mrb[196].mxu0 %v14408_v55  ;;  %v15735_v12 = vld [vmem:[%s23713_s1 + $0x298] sm:$0xff]   ;;  %v5431_v30 = vrot.slane %v5429_v53, 5  ;;  %v14170_v11 = vcombine.low %v18714_v46, %v18721_v42  ;;  %v14410_v40 = vcombine.low %v18824_v18, %v18832_v3  ;;  %v14269_v42 = vld [vmem:[%s23714_s0 + $0xe8] sm:$0x11] }
 0x1ca   :  { %4724 = vmatprep.mubr.bf16.mxu1 %v14171_v14  ;;  %6614 = vmatprep.mubr.bf16.mxu0 %v14411_v28  ;;  %v15736_v55 = vld [vmem:[%s23713_s1 + $0x318] sm:$0xff]   ;;  %v5405_v28 = vrot.slane %v5404_v48, 4  ;;  %v5419_v0 = vrot.slane %v5418_v8, 4  ;;  %v14413_v46 = vcombine.high %v18888_v15, %v18892_v22  ;;  %v5442_v18 = vrot.slane %v5440_v44, 4  ;;  %v18928_v8 = vld [vmem:[%s23714_s0 + $0x100] sm:$0xff] }
 0x1cb   :  { %7949 = vmatpush1.bf16.msra.mxu1 %v15729_v17  ;;  %8944 = vmatpush1.bf16.msra.mxu0 %v15730_v5  ;;  %v14173_v5 = vcombine.high %v18764_v33, %v18772_v16  ;;  %v5445_v3 = vrot.slane %v5443_v41, 5  ;;  %v15742_v44 = vld [vmem:[%s23713_s1 + $0x320] sm:$0xff]   ;;  %v5432_v41 = vor.u32 %v5431_v30, %v5428_v21 }
 0x1cc   :  { %v2390_v14 = vpop.f32.mrb[92].mxu1  ;;  %v3771_v47 = vpop.f32.mrb[92].mxu0  ;;  %7950 = vmatprep.subr.bf16.mxu1 %v23802_v38  ;;  %8945 = vmatprep.subr.bf16.mxu0 %v23802_v38  ;;  %v18948_v21 = vsel %vm16227_vm2, %v5419_v0, %v5423_v54  ;;  %v15748_v54 = vld [vmem:[%s23713_s1 + $0x328] sm:$0xff]  }
 0x1cd   :  { %v2667_v17 = vadd.f32 %v2390_v14, %v17915_v61  ;;  %v2392_v63 = vpop.f32.mrb[93].mxu1  ;;  %v3773_v24 = vpop.f32.mrb[93].mxu0  ;;  %v15741_v14 = vld [vmem:[%s23713_s1 + $0x2a0] sm:$0xff]   ;;  %v5446_v30 = vor.u32 %v5445_v3, %v5442_v18  ;;  %v14175_v18 = vcombine.high %v18802_v25, %v18807_v27 }
 0x1ce   :  { %v2393_v59 = vpop.f32.mrb[94].mxu1  ;;  %v3774_v61 = vpop.f32.mrb[94].mxu0  ;;  %v5449_v63 = vshll.u32 %v14269_v42, 16  ;;  %v5468_v24 = vshrl.u32 %v18928_v8, 16 }
 0x1cf   :  { %v18922_v48 = vadd.f32 %v3771_v47, %v2667_v17  ;;  %v2668_v32 = vadd.f32 %v2393_v59, %v17933_v45  ;;  %v2395_v20 = vpop.f32.mrb[95].mxu1  ;;  %v3776_v53 = vpop.f32.mrb[95].mxu0  ;;  %7951 = vmatpush1.bf16.msra.mxu1 %v15735_v12  ;;  %8946 = vmatpush1.bf16.msra.mxu0 %v15736_v55  ;;  %v5454_v45 = vshrl.u32 %v18913_v37, 16  ;;  %v5457_v47 = vshll.u32 %v18913_v37, 16 }
 0x1d0   :  { %7952 = vmatprep.subr.bf16.mxu1 %v23802_v38  ;;  %8947 = vmatprep.subr.bf16.mxu0 %v23802_v38  ;;  %v18944_v12 = vsel %vm16227_vm2, %v5405_v28, %v5409_v35  ;;  %v5435_v55 = vshll.u32 %v14267_v51, 16  ;;  %v14172_v59 = vcombine.low %v18764_v33, %v18772_v16  ;;  %v5471_v35 = vshll.u32 %v18928_v8, 16  ;;  %v15747_v28 = vld [vmem:[%s23713_s1 + $0x2a8] sm:$0xff]  }
 0x1d1   :  { %v18940_v17 = vadd.f32 %v3774_v61, %v2668_v32  ;;  %4725 = vmatmul.mubr.bf16.gmra.mrb[200].mxu1 %v14170_v11  ;;  %6615 = vmatmul.mubr.bf16.gmra.mrb[200].mxu0 %v14410_v40  ;;  %v14271_v11 = vld [vmem:[%s23714_s0 + $0xf8] sm:$0x11]  ;;  %v14412_v33 = vcombine.low %v18888_v15, %v18892_v22  ;;  %v5433_v16 = vrot.slane %v5432_v41, 4  ;;  %v5456_v51 = vrot.slane %v5454_v45, 4  ;;  %v14273_v15 = vld [vmem:[%s23714_s0 + $0x108] sm:$0x11] }
 0x1d2   :  { %4732 = vmatprep.mubr.bf16.mxu1 %v14173_v5  ;;  %6622 = vmatprep.mubr.bf16.mxu0 %v14413_v46  ;;  %v5459_v61 = vrot.slane %v5457_v47, 5  ;;  %v14415_v3 = vcombine.high %v18944_v12, %v18948_v21  ;;  %v5437_v32 = vrot.slane %v5435_v55, 5  ;;  %v18978_v22 = vld [vmem:[%s23714_s0 + $0x110] sm:$0xff]  ;;  %v5447_v53 = vrot.slane %v5446_v30, 4 }
 0x1d3   :  { %23803 = vst [vmem:[#allocation45_spill] sm:$0xff] %v18940_v17  ;;  %7953 = vmatpush1.bf16.msra.mxu1 %v15741_v14  ;;  %8948 = vmatpush1.bf16.msra.mxu0 %v15742_v44  ;;  %v5451_v14 = vrot.slane %v5449_v63, 5  ;;  %v5463_v44 = vshll.u32 %v14271_v11, 16  ;;  %v5470_v41 = vrot.slane %v5468_v24, 4  ;;  %v15753_v30 = vld [vmem:[%s23713_s1 + $0x2b0] sm:$0xff]   ;;  %v5482_v11 = vshrl.u32 %v18978_v22, 16 }
 0x1d4   :  { %v2398_v40 = vpop.f32.mrb[96].mxu1  ;;  %v3779_v0 = vpop.f32.mrb[96].mxu0  ;;  %7954 = vmatprep.subr.bf16.mxu1 %v23802_v38  ;;  %8949 = vmatprep.subr.bf16.mxu0 %v23802_v38  ;;  %v15754_v63 = vld [vmem:[%s23713_s1 + $0x330] sm:$0xff]   ;;  %v5460_v24 = vor.u32 %v5459_v61, %v5456_v51  ;;  %v19004_v51 = vsel %vm16227_vm2, %v5433_v16, %v5437_v32 }
 0x1d5   :  { %v2669_v5 = vadd.f32 %v2398_v40, %v17993_v36  ;;  %v2400_v46 = vpop.f32.mrb[97].mxu1  ;;  %v3781_v42 = vpop.f32.mrb[97].mxu0  ;;  %v19008_v61 = vsel %vm16227_vm2, %v5447_v53, %v5451_v14  ;;  %v23806_v53 = vld [vmem:[#allocation22_spill] sm:$0xff] }
 0x1d6   :  { %v2401_v20 = vpop.f32.mrb[98].mxu1  ;;  %v3782_v36 = vpop.f32.mrb[98].mxu0  ;;  %v5473_v46 = vrot.slane %v5471_v35, 5  ;;  %v18986_v42 = vld [vmem:[%s23714_s0 + $0x120] sm:$0xff]  ;;  %v5461_v16 = vrot.slane %v5460_v24, 4 }
 0x1d7   :  { %v18980_v45 = vadd.f32 %v3779_v0, %v2669_v5  ;;  %v2670_v47 = vadd.f32 %v2401_v20, %v18011_v13  ;;  %v2403_v55 = vpop.f32.mrb[99].mxu1  ;;  %v3784_v40 = vpop.f32.mrb[99].mxu0  ;;  %7955 = vmatpush1.bf16.msra.mxu1 %v15747_v28  ;;  %8950 = vmatpush1.bf16.msra.mxu0 %v15748_v54  ;;  %v5477_v13 = vshll.u32 %v14273_v15, 16  ;;  %v5485_v28 = vshll.u32 %v18978_v22, 16 }
 0x1d8   :  { %7956 = vmatprep.subr.bf16.mxu1 %v23802_v38  ;;  %8951 = vmatprep.subr.bf16.mxu0 %v23802_v38  ;;  %v5496_v54 = vshrl.u32 %v18986_v42, 16  ;;  %v5499_v0 = vshll.u32 %v18986_v42, 16  ;;  %v5465_v5 = vrot.slane %v5463_v44, 5  ;;  %v5474_v15 = vor.u32 %v5473_v46, %v5470_v41  ;;  %v14275_v40 = vld [vmem:[%s23714_s0 + $0x118] sm:$0x11] }
 0x1d9   :  { %23804 = vst [vmem:[#allocation46_spill] sm:$0xff] %v18980_v45  ;;  %v18997_v35 = vadd.f32 %v3782_v36, %v2670_v47  ;;  %4733 = vmatmul.mubr.bf16.gmra.mrb[204].mxu1 %v14172_v59  ;;  %6623 = vmatmul.mubr.bf16.gmra.mrb[204].mxu0 %v14412_v33  ;;  %v15759_v59 = vld [vmem:[%s23713_s1 + $0x2b8] sm:$0xff]   ;;  %v5479_v32 = vrot.slane %v5477_v13, 5  ;;  %v19016_v20 = vrot.slane %v5482_v11, 4  ;;  %v19021_v36 = vld [vmem:[%s23714_s0 + $0x150] sm:$0xff]  ;;  %v14174_v47 = vcombine.low %v18802_v25, %v18807_v27  ;;  %v15765_v45 = vld [vmem:[%s23713_s1 + $0x2c0] sm:$0xff]  }
 0x1da   :  { %4740 = vmatprep.mubr.bf16.mxu1 %v14175_v18  ;;  %6630 = vmatprep.mubr.bf16.mxu0 %v14415_v3  ;;  %v15760_v33 = vld [vmem:[%s23713_s1 + $0x338] sm:$0xff]   ;;  %v14414_v55 = vcombine.low %v18944_v12, %v18948_v21  ;;  %v5487_v46 = vrot.slane %v5485_v28, 5  ;;  %v14177_v13 = vcombine.high %v18862_v7, %v18878_v52  ;;  %v14417_v25 = vcombine.high %v19004_v51, %v19008_v61  ;;  %v14277_v27 = vld [vmem:[%s23714_s0 + $0x128] sm:$0x11] }
 0x1db   :  { %23805 = vst [vmem:[#allocation47_spill] sm:$0xff] %v18997_v35  ;;  %7957 = vmatpush1.bf16.msra.mxu1 %v15753_v30  ;;  %8952 = vmatpush1.bf16.msra.mxu0 %v15754_v63  ;;  %v19036_v30 = vld [vmem:[%s23714_s0 + $0x160] sm:$0xff]  ;;  %v5498_v12 = vrot.slane %v5496_v54, 4  ;;  %v5501_v21 = vrot.slane %v5499_v0, 5  ;;  %v5510_v35 = vshrl.u32 %v19021_v36, 16  ;;  %v5513_v0 = vshll.u32 %v19021_v36, 16 }
 0x1dc   :  { %v2406_v18 = vpop.f32.mrb[100].mxu1  ;;  %v3787_v3 = vpop.f32.mrb[100].mxu0  ;;  %7958 = vmatprep.subr.bf16.mxu1 %v23802_v38  ;;  %8953 = vmatprep.subr.bf16.mxu0 %v23802_v38  ;;  %v23808_v28 = vld [vmem:[#allocation24_spill] sm:$0xff] }
 0x1dd   :  { %v2671_v14 = vadd.f32 %v2406_v18, %v23806_v53  ;;  %v2408_v44 = vpop.f32.mrb[101].mxu1  ;;  %v3789_v41 = vpop.f32.mrb[101].mxu0  ;;  %v15766_v54 = vld [vmem:[%s23713_s1 + $0x340] sm:$0xff]  }
 0x1de   :  { %v2409_v63 = vpop.f32.mrb[102].mxu1  ;;  %v3790_v24 = vpop.f32.mrb[102].mxu0  ;;  %v5475_v41 = vrot.slane %v5474_v15, 4 }
 0x1df   :  { %v19045_v11 = vadd.f32 %v3787_v3, %v2671_v14  ;;  %v2672_v18 = vadd.f32 %v2409_v63, %v23808_v28  ;;  %v2411_v53 = vpop.f32.mrb[103].mxu1  ;;  %v3792_v44 = vpop.f32.mrb[103].mxu0  ;;  %7959 = vmatpush1.bf16.msra.mxu1 %v15759_v59  ;;  %8954 = vmatpush1.bf16.msra.mxu0 %v15760_v33  ;;  %v5524_v3 = vshrl.u32 %v19036_v30, 16  ;;  %v5527_v14 = vshll.u32 %v19036_v30, 16 }
 0x1e0   :  { %7960 = vmatprep.subr.bf16.mxu1 %v23802_v38  ;;  %8955 = vmatprep.subr.bf16.mxu0 %v23802_v38  ;;  %v5488_v59 = vor.u32 %v5487_v46, %v19016_v20  ;;  %v5491_v33 = vshll.u32 %v14275_v40, 16  ;;  %v5505_v63 = vshll.u32 %v14277_v27, 16  ;;  %v14176_v28 = vcombine.low %v18862_v7, %v18878_v52  ;;  %v14279_v44 = vld [vmem:[%s23714_s0 + $0x158] sm:$0x11]  ;;  %v14281_v7 = vld [vmem:[%s23714_s0 + $0x168] sm:$0x11] }
 0x1e1   :  { %23807 = vst [vmem:[#allocation22_spill] sm:$0xff] %v19045_v11  ;;  %v19060_v15 = vadd.f32 %v3790_v24, %v2672_v18  ;;  %4741 = vmatmul.mubr.bf16.gmra.mrb[208].mxu1 %v14174_v47  ;;  %6631 = vmatmul.mubr.bf16.gmra.mrb[208].mxu0 %v14414_v55  ;;  %v5502_v53 = vor.u32 %v5501_v21, %v5498_v12  ;;  %v5512_v52 = vrot.slane %v5510_v35, 4  ;;  %v15771_v55 = vld [vmem:[%s23713_s1 + $0x2c8] sm:$0xff]   ;;  %v5526_v40 = vrot.slane %v5524_v3, 4  ;;  %v23810_v35 = vld [vmem:[#allocation26_spill] sm:$0xff]  ;;  %v19102_v11 = vld [vmem:[%s23714_s0 + $0x180] sm:$0xff] }
 0x1e2   :  { %4748 = vmatprep.mubr.bf16.mxu1 %v14177_v13  ;;  %6638 = vmatprep.mubr.bf16.mxu0 %v14417_v25  ;;  %v14416_v24 = vcombine.low %v19004_v51, %v19008_v61  ;;  %v19072_v47 = vsel %vm16227_vm2, %v5461_v16, %v5465_v5  ;;  %v19076_v20 = vsel %vm16227_vm2, %v5475_v41, %v5479_v32  ;;  %v15772_v51 = vld [vmem:[%s23713_s1 + $0x348] sm:$0xff]   ;;  %v5515_v32 = vrot.slane %v5513_v0, 5 }
 0x1e3   :  { %23809 = vst [vmem:[#allocation24_spill] sm:$0xff] %v19060_v15  ;;  %7961 = vmatpush1.bf16.msra.mxu1 %v15765_v45  ;;  %8956 = vmatpush1.bf16.msra.mxu0 %v15766_v54  ;;  %v14179_v16 = vcombine.high %v18913_v37, %v18928_v8  ;;  %v5529_v46 = vrot.slane %v5527_v14, 5  ;;  %v19092_v45 = vld [vmem:[%s23714_s0 + $0x170] sm:$0xff]  ;;  %v5489_v12 = vrot.slane %v5488_v59, 4  ;;  %v5493_v21 = vrot.slane %v5491_v33, 5 }
 0x1e4   :  { %v2414_v61 = vpop.f32.mrb[104].mxu1  ;;  %v3795_v5 = vpop.f32.mrb[104].mxu0  ;;  %7962 = vmatprep.subr.bf16.mxu1 %v23802_v38  ;;  %8957 = vmatprep.subr.bf16.mxu0 %v23802_v38  ;;  %v5507_v18 = vrot.slane %v5505_v63, 5  ;;  %v14419_v0 = vcombine.high %v19072_v47, %v19076_v20  ;;  %v5503_v3 = vrot.slane %v5502_v53, 4  ;;  %v5519_v14 = vshll.u32 %v14279_v44, 16  ;;  %v15777_v53 = vld [vmem:[%s23713_s1 + $0x2d0] sm:$0xff]  }
 0x1e5   :  { %v2673_v13 = vadd.f32 %v2414_v61, %v23810_v35  ;;  %v2416_v25 = vpop.f32.mrb[105].mxu1  ;;  %v3797_v27 = vpop.f32.mrb[105].mxu0  ;;  %v5533_v15 = vshll.u32 %v14281_v7, 16  ;;  %v23811_v61 = vld [vmem:[#allocation28_spill] sm:$0xff]  ;;  %v5538_v63 = vshrl.u32 %v19092_v45, 16  ;;  %v15778_v44 = vld [vmem:[%s23713_s1 + $0x350] sm:$0xff]   ;;  %v5516_v7 = vor.u32 %v5515_v32, %v5512_v52 }
 0x1e6   :  { %v2417_v41 = vpop.f32.mrb[106].mxu1  ;;  %v3798_v54 = vpop.f32.mrb[106].mxu0  ;;  %v5541_v25 = vshll.u32 %v19092_v45, 16  ;;  %v19123_v27 = vsel %vm16227_vm2, %v5489_v12, %v5493_v21  ;;  %v19127_v52 = vsel %vm16227_vm2, %v5503_v3, %v5507_v18  ;;  %v5521_v32 = vrot.slane %v5519_v14, 5  ;;  %v14283_v12 = vld [vmem:[%s23714_s0 + $0x178] sm:$0x11] }
 0x1e7   :  { %v19104_v17 = vadd.f32 %v3795_v5, %v2673_v13  ;;  %v2674_v35 = vadd.f32 %v2417_v41, %v23811_v61  ;;  %v2419_v59 = vpop.f32.mrb[107].mxu1  ;;  %v3800_v33 = vpop.f32.mrb[107].mxu0  ;;  %7963 = vmatpush1.bf16.msra.mxu1 %v15771_v55  ;;  %8958 = vmatpush1.bf16.msra.mxu0 %v15772_v51  ;;  %v5530_v5 = vor.u32 %v5529_v46, %v5526_v40  ;;  %v5552_v55 = vshrl.u32 %v19102_v11, 16 }
 0x1e8   :  { %7964 = vmatprep.subr.bf16.mxu1 %v23802_v38  ;;  %8959 = vmatprep.subr.bf16.mxu0 %v23802_v38  ;;  %v5555_v51 = vshll.u32 %v19102_v11, 16  ;;  %v5535_v40 = vrot.slane %v5533_v15, 5  ;;  %v5540_v46 = vrot.slane %v5538_v63, 4  ;;  %v5543_v41 = vrot.slane %v5541_v25, 5 }
 0x1e9   :  { %v19117_v13 = vadd.f32 %v3798_v54, %v2674_v35  ;;  %4749 = vmatmul.mubr.bf16.gmra.mrb[212].mxu1 %v14176_v28  ;;  %6639 = vmatmul.mubr.bf16.gmra.mrb[212].mxu0 %v14416_v24  ;;  %v5517_v54 = vrot.slane %v5516_v7, 4  ;;  %v14418_v3 = vcombine.low %v19072_v47, %v19076_v20  ;;  %v14181_v59 = vcombine.high %v18978_v22, %v18986_v42  ;;  %v19157_v7 = vld [vmem:[%s23714_s0 + $0x1a0] sm:$0xff] }
 0x1ea   :  { %4756 = vmatprep.mubr.bf16.mxu1 %v14179_v16  ;;  %6646 = vmatprep.mubr.bf16.mxu0 %v14419_v0  ;;  %v14178_v16 = vcombine.low %v18913_v37, %v18928_v8  ;;  %v5531_v0 = vrot.slane %v5530_v5, 4  ;;  %v14285_v37 = vld [vmem:[%s23714_s0 + $0x188] sm:$0x11]  ;;  %v5554_v8 = vrot.slane %v5552_v55, 4  ;;  %v5557_v14 = vrot.slane %v5555_v51, 5 }
 0x1eb   :  { %7965 = vmatpush1.bf16.msra.mxu1 %v15777_v53  ;;  %8960 = vmatpush1.bf16.msra.mxu0 %v15778_v44  ;;  %v14421_v33 = vcombine.high %v19123_v27, %v19127_v52  ;;  %v5544_v20 = vor.u32 %v5543_v41, %v5540_v46  ;;  %v5547_v53 = vshll.u32 %v14283_v12, 16  ;;  %v19152_v44 = vld [vmem:[%s23714_s0 + $0x190] sm:$0xff]  ;;  %v19161_v5 = vsel %vm16227_vm2, %v5517_v54, %v5521_v32  ;;  %v15783_v41 = vld [vmem:[%s23713_s1 + $0x2d8] sm:$0xff]  }
 0x1ec   :  { %v2422_v28 = vpop.f32.mrb[108].mxu1  ;;  %v3803_v24 = vpop.f32.mrb[108].mxu0  ;;  %7966 = vmatprep.subr.bf16.mxu1 %v23802_v38  ;;  %8961 = vmatprep.subr.bf16.mxu0 %v23802_v38  ;;  %v5561_v55 = vshll.u32 %v14285_v37, 16  ;;  %v19167_v51 = vsel %vm16227_vm2, %v5531_v0, %v5535_v40  ;;  %v5558_v46 = vor.u32 %v5557_v14, %v5554_v8  ;;  %v5569_v32 = vshll.u32 %v19152_v44, 16  ;;  %v19186_v37 = vld [vmem:[%s23714_s0 + $0x1b0] sm:$0xff] }
 0x1ed   :  { %v2675_v15 = vadd.f32 %v2422_v28, %v18222_v60  ;;  %v2424_v21 = vpop.f32.mrb[109].mxu1  ;;  %v3805_v18 = vpop.f32.mrb[109].mxu0  ;;  %v5566_v28 = vshrl.u32 %v19152_v44, 16  ;;  %v5545_v54 = vrot.slane %v5544_v20, 4  ;;  %v5549_v12 = vrot.slane %v5547_v53, 5 }
 0x1ee   :  { %v2425_v61 = vpop.f32.mrb[110].mxu1  ;;  %v3806_v35 = vpop.f32.mrb[110].mxu0  ;;  %v14420_v21 = vcombine.low %v19123_v27, %v19127_v52  ;;  %v5563_v18 = vrot.slane %v5561_v55, 5  ;;  %v5559_v27 = vrot.slane %v5558_v46, 4  ;;  %v14289_v52 = vld [vmem:[%s23714_s0 + $0x1a8] sm:$0x11] }
 0x1ef   :  { %v19146_v60 = vadd.f32 %v3803_v24, %v2675_v15  ;;  %v2676_v63 = vadd.f32 %v2425_v61, %v18242_v49  ;;  %v2427_v25 = vpop.f32.mrb[111].mxu1  ;;  %v3808_v47 = vpop.f32.mrb[111].mxu0  ;;  %v5580_v24 = vshrl.u32 %v19157_v7, 16  ;;  %7967 = vmatpush1.bf16.msra.mxu1 %v15783_v41  ;;  %v14180_v15 = vcombine.low %v18978_v22, %v18986_v42 }
 0x1f0   :  { %7968 = vmatprep.subr.bf16.mxu1 %v23802_v38  ;;  %v14183_v22 = vcombine.high %v19021_v36, %v19036_v30  ;;  %v14423_v42 = vcombine.high %v19161_v5, %v19167_v51  ;;  %v5594_v41 = vshrl.u32 %v19186_v37, 16 }
 0x1f1   :  { %v19163_v49 = vadd.f32 %v3806_v35, %v2676_v63  ;;  %4757 = vmatmul.mubr.bf16.gmra.mrb[216].mxu1 %v14178_v16  ;;  %6647 = vmatmul.mubr.bf16.gmra.mrb[216].mxu0 %v14418_v3  ;;  %v5583_v16 = vshll.u32 %v19157_v7, 16  ;;  %v14287_v3 = vld [vmem:[%s23714_s0 + $0x198] sm:$0x11]  ;;  %v19200_v35 = vld [vmem:[%s23714_s0 + $0x1c0] sm:$0xff]  ;;  %v5571_v63 = vrot.slane %v5569_v32, 5  ;;  %v5582_v25 = vrot.slane %v5580_v24, 4 }
 0x1f2   :  { %4764 = vmatprep.mubr.bf16.mxu1 %v14181_v59  ;;  %6654 = vmatprep.mubr.bf16.mxu0 %v14421_v33  ;;  %v5568_v33 = vrot.slane %v5566_v28, 4  ;;  %v5611_v28 = vshll.u32 %v19200_v35, 16  ;;  %v5575_v24 = vshll.u32 %v14287_v3, 16  ;;  %v14291_v3 = vld [vmem:[%s23714_s0 + $0x1b8] sm:$0x11] }
 0x1f3   :  { %v5585_v47 = vrot.slane %v5583_v16, 5 }
 0x1f4   :  { %v2430_v40 = vpop.f32.mrb[112].mxu1  ;;  %v3811_v0 = vpop.f32.mrb[112].mxu0 }
 0x1f5   :  { %v2677_v8 = vadd.f32 %v2430_v40, %v18294_v23  ;;  %v2432_v14 = vpop.f32.mrb[113].mxu1  ;;  %v3813_v61 = vpop.f32.mrb[113].mxu0  ;;  %v5597_v40 = vshll.u32 %v19186_v37, 16  ;;  %v5586_v16 = vor.u32 %v5585_v47, %v5582_v25 }
 0x1f6   :  { %v2433_v59 = vpop.f32.mrb[114].mxu1  ;;  %v3814_v23 = vpop.f32.mrb[114].mxu0  ;;  %v15784_v14 = vld [vmem:[%s23713_s1 + $0x358] sm:$0xff]   ;;  %v5608_v61 = vshrl.u32 %v19200_v35, 16 }
 0x1f7   :  { %v19202_v20 = vadd.f32 %v3811_v0, %v2677_v8  ;;  %v2678_v53 = vadd.f32 %v2433_v59, %v18310_v9  ;;  %v2435_v55 = vpop.f32.mrb[115].mxu1  ;;  %v3816_v46 = vpop.f32.mrb[115].mxu0  ;;  %v5572_v9 = vor.u32 %v5571_v63, %v5568_v33  ;;  %v5589_v0 = vshll.u32 %v14289_v52, 16  ;;  %8962 = vmatpush1.bf16.msra.mxu0 %v15784_v14 }
 0x1f8   :  { %v19216_v8 = vsel %vm16227_vm2, %v5545_v54, %v5549_v12  ;;  %v19220_v59 = vsel %vm16227_vm2, %v5559_v27, %v5563_v18  ;;  %v5596_v55 = vrot.slane %v5594_v41, 4  ;;  %v5599_v46 = vrot.slane %v5597_v40, 5  ;;  %8963 = vmatprep.subr.bf16.mxu0 %v23802_v38 }
 0x1f9   :  { %v19212_v32 = vadd.f32 %v3814_v23, %v2678_v53  ;;  %4765 = vmatmul.mubr.bf16.gmra.mrb[220].mxu1 %v14180_v15  ;;  %6655 = vmatmul.mubr.bf16.gmra.mrb[220].mxu0 %v14420_v21  ;;  %v14182_v21 = vcombine.low %v19021_v36, %v19036_v30  ;;  %v14422_v27 = vcombine.low %v19161_v5, %v19167_v51  ;;  %v5577_v33 = vrot.slane %v5575_v24, 5  ;;  %v14293_v36 = vld [vmem:[%s23714_s0 + $0x1c8] sm:$0x11]  ;;  %v19239_v30 = vld [vmem:[%s23714_s0 + $0x1f0] sm:$0xff]  ;;  %v19246_v53 = vld [vmem:[%s23714_s0 + $0x200] sm:$0xff] }
 0x1fa   :  { %4772 = vmatprep.mubr.bf16.mxu1 %v14183_v22  ;;  %6662 = vmatprep.mubr.bf16.mxu0 %v14423_v42  ;;  %v5610_v22 = vrot.slane %v5608_v61, 4  ;;  %v5613_v42 = vrot.slane %v5611_v28, 5  ;;  %v14185_v52 = vcombine.high %v19092_v45, %v19102_v11  ;;  %v14425_v25 = vcombine.high %v19216_v8, %v19220_v59 }
 0x1fb   :  { %v5573_v47 = vrot.slane %v5572_v9, 4  ;;  %v5587_v5 = vrot.slane %v5586_v16, 4  ;;  %v5591_v51 = vrot.slane %v5589_v0, 5  ;;  %v5600_v28 = vor.u32 %v5599_v46, %v5596_v55 }
 0x1fc   :  { %v2438_v23 = vpop.f32.mrb[116].mxu1  ;;  %v3819_v15 = vpop.f32.mrb[116].mxu0  ;;  %v5603_v24 = vshll.u32 %v14291_v3, 16  ;;  %v5625_v9 = vshll.u32 %v19239_v30, 16  ;;  %v5636_v0 = vshrl.u32 %v19246_v53, 16  ;;  %v14184_v55 = vcombine.low %v19092_v45, %v19102_v11 }
 0x1fd   :  { %v2679_v54 = vadd.f32 %v2438_v23, %v18366_v58  ;;  %v2440_v12 = vpop.f32.mrb[117].mxu1  ;;  %v3821_v18 = vpop.f32.mrb[117].mxu0  ;;  %v5614_v23 = vor.u32 %v5613_v42, %v5610_v22  ;;  %v19264_v46 = vsel %vm16227_vm2, %v5573_v47, %v5577_v33  ;;  %v5601_v3 = vrot.slane %v5600_v28, 4  ;;  %v23813_v28 = vld [vmem:[#allocation37_spill] sm:$0xff] }
 0x1fe   :  { %v2441_v63 = vpop.f32.mrb[118].mxu1  ;;  %v3822_v58 = vpop.f32.mrb[118].mxu0  ;;  %v5617_v12 = vshll.u32 %v14293_v36, 16  ;;  %v5622_v18 = vshrl.u32 %v19239_v30, 16  ;;  %v5605_v22 = vrot.slane %v5603_v24, 5  ;;  %v5638_v47 = vrot.slane %v5636_v0, 4 }
 0x1ff   :  { %v19248_v41 = vadd.f32 %v3819_v15, %v2679_v54  ;;  %v2680_v40 = vadd.f32 %v2441_v63, %v18375_v26  ;;  %v2443_v14 = vpop.f32.mrb[119].mxu1  ;;  %v3824_v61 = vpop.f32.mrb[119].mxu0  ;;  %v5639_v15 = vshll.u32 %v19246_v53, 16  ;;  %v15789_v26 = vld [vmem:[%s23713_s1 + $0x2e0] sm:$0xff]   ;;  %v5627_v63 = vrot.slane %v5625_v9, 5 }
 0x200   :  { %7969 = vmatpush1.bf16.msra.mxu1 %v15789_v26  ;;  %v5619_v36 = vrot.slane %v5617_v12, 5  ;;  %v14187_v14 = vcombine.high %v19152_v44, %v19157_v7  ;;  %v15790_v9 = vld [vmem:[%s23713_s1 + $0x360] sm:$0xff]   ;;  %v19302_v0 = vsel %vm16227_vm2, %v5601_v3, %v5605_v22 }
 0x201   :  { %v19253_v16 = vadd.f32 %v3822_v58, %v2680_v40  ;;  %4773 = vmatmul.mubr.bf16.gmra.mrb[224].mxu1 %v14182_v21  ;;  %6663 = vmatmul.mubr.bf16.gmra.mrb[224].mxu0 %v14422_v27  ;;  %v19268_v21 = vsel %vm16227_vm2, %v5587_v5, %v5591_v51  ;;  %v5615_v27 = vrot.slane %v5614_v23, 4  ;;  %v14424_v58 = vcombine.low %v19216_v8, %v19220_v59  ;;  %v19287_v8 = vld [vmem:[%s23714_s0 + $0x210] sm:$0xff] }
 0x202   :  { %4780 = vmatprep.mubr.bf16.mxu1 %v14185_v52  ;;  %6670 = vmatprep.mubr.bf16.mxu0 %v14425_v25  ;;  %v5624_v52 = vrot.slane %v5622_v18, 4  ;;  %v14295_v25 = vld [vmem:[%s23714_s0 + $0x1f8] sm:$0x11]  ;;  %v5641_v5 = vrot.slane %v5639_v15, 5  ;;  %v14427_v61 = vcombine.high %v19264_v46, %v19268_v21  ;;  %v19295_v18 = vld [vmem:[%s23714_s0 + $0x220] sm:$0xff] }
 0x203   :  { %7970 = vmatprep.subr.bf16.mxu1 %v23802_v38  ;;  %v19306_v15 = vsel %vm16227_vm2, %v5615_v27, %v5619_v36  ;;  %v5664_v3 = vshrl.u32 %v19295_v18, 16  ;;  %v5667_v22 = vshll.u32 %v19295_v18, 16  ;;  %v14186_v27 = vcombine.low %v19152_v44, %v19157_v7  ;;  %8964 = vmatpush1.bf16.msra.mxu0 %v15790_v9  ;;  %v19328_v44 = vld [vmem:[%s23714_s0 + $0x230] sm:$0xff] }
 0x204   :  { %v2446_v42 = vpop.f32.mrb[120].mxu1  ;;  %v3827_v54 = vpop.f32.mrb[120].mxu0  ;;  %v5628_v26 = vor.u32 %v5627_v63, %v5624_v52  ;;  %v14426_v36 = vcombine.low %v19264_v46, %v19268_v21  ;;  %8965 = vmatprep.subr.bf16.mxu0 %v23802_v38 }
 0x205   :  { %v2681_v11 = vadd.f32 %v2446_v42, %v18427_v6  ;;  %v2448_v45 = vpop.f32.mrb[121].mxu1  ;;  %v3829_v33 = vpop.f32.mrb[121].mxu0  ;;  %v14297_v6 = vld [vmem:[%s23714_s0 + $0x208] sm:$0x11]  ;;  %v5631_v42 = vshll.u32 %v14295_v25, 16  ;;  %v14429_v25 = vcombine.high %v19302_v0, %v19306_v15  ;;  %v5666_v9 = vrot.slane %v5664_v3, 4 }
 0x206   :  { %v2449_v51 = vpop.f32.mrb[122].mxu1  ;;  %v3830_v40 = vpop.f32.mrb[122].mxu0  ;;  %v5645_v45 = vshll.u32 %v14297_v6, 16  ;;  %v5650_v33 = vshrl.u32 %v19287_v8, 16  ;;  %v19335_v6 = vld [vmem:[%s23714_s0 + $0x240] sm:$0xff] }
 0x207   :  { %v19289_v59 = vadd.f32 %v3827_v54, %v2681_v11  ;;  %v2682_v24 = vadd.f32 %v2449_v51, %v23813_v28  ;;  %v2451_v23 = vpop.f32.mrb[123].mxu1  ;;  %v3832_v12 = vpop.f32.mrb[123].mxu0  ;;  %v5642_v11 = vor.u32 %v5641_v5, %v5638_v47  ;;  %v5653_v51 = vshll.u32 %v19287_v8, 16 }
 0x208   :  { %v5629_v47 = vrot.slane %v5628_v26, 4  ;;  %v5633_v5 = vrot.slane %v5631_v42, 5  ;;  %v5669_v26 = vrot.slane %v5667_v22, 5 }
 0x209   :  { %23812 = vst [vmem:[#allocation26_spill] sm:$0xff] %v19289_v59  ;;  %v19308_v54 = vadd.f32 %v3830_v40, %v2682_v24  ;;  %4781 = vmatmul.mubr.bf16.gmra.mrb[228].mxu1 %v14184_v55  ;;  %6671 = vmatmul.mubr.bf16.gmra.mrb[228].mxu0 %v14424_v58  ;;  %v14299_v55 = vld [vmem:[%s23714_s0 + $0x218] sm:$0x11]  ;;  %v14189_v58 = vcombine.high %v19186_v37, %v19200_v35  ;;  %v5643_v40 = vrot.slane %v5642_v11, 4  ;;  %v5655_v23 = vrot.slane %v5653_v51, 5 }
 0x20a   :  { %4788 = vmatprep.mubr.bf16.mxu1 %v14187_v14  ;;  %6678 = vmatprep.mubr.bf16.mxu0 %v14427_v61  ;;  %v5647_v14 = vrot.slane %v5645_v45, 5  ;;  %v5652_v61 = vrot.slane %v5650_v33, 4  ;;  %v5659_v12 = vshll.u32 %v14299_v55, 16  ;;  %v14301_v11 = vld [vmem:[%s23714_s0 + $0x228] sm:$0x11]  ;;  %v5678_v45 = vshrl.u32 %v19328_v44, 16 }
 0x20b   :  { %23814 = vst [vmem:[#allocation28_spill] sm:$0xff] %v19308_v54  ;;  %v23816_v54 = vld [vmem:[#allocation40_spill] sm:$0xff]  ;;  %v5681_v33 = vshll.u32 %v19328_v44, 16  ;;  %v5695_v51 = vshll.u32 %v19335_v6, 16  ;;  %v19354_v22 = vsel %vm16227_vm2, %v5629_v47, %v5633_v5 }
 0x20c   :  { %v2454_v52 = vpop.f32.mrb[124].mxu1  ;;  %v3835_v63 = vpop.f32.mrb[124].mxu0  ;;  %v5656_v55 = vor.u32 %v5655_v23, %v5652_v61  ;;  %v23818_v5 = vld [vmem:[#allocation4_spill] sm:$0xff] }
 0x20d   :  { %v2683_v7 = vadd.f32 %v2454_v52, %v18482_v10  ;;  %v2456_v46 = vpop.f32.mrb[125].mxu1  ;;  %v3837_v21 = vpop.f32.mrb[125].mxu0  ;;  %v5697_v47 = vrot.slane %v5695_v51, 5 }
 0x20e   :  { %v2457_v28 = vpop.f32.mrb[126].mxu1  ;;  %v3838_v24 = vpop.f32.mrb[126].mxu0  ;;  %v5692_v21 = vshrl.u32 %v19335_v6, 16 }
 0x20f   :  { %v19337_v42 = vadd.f32 %v3835_v63, %v2683_v7  ;;  %v2684_v10 = vadd.f32 %v2457_v28, %v23816_v54  ;;  %v2459_v52 = vpop.f32.mrb[127].mxu1  ;;  %v3840_v46 = vpop.f32.mrb[127].mxu0  ;;  %v15795_v54 = vld [vmem:[%s23713_s1 + $0x2e8] sm:$0xff]   ;;  %v5670_v63 = vor.u32 %v5669_v26, %v5666_v9  ;;  %v5673_v7 = vshll.u32 %v14301_v11, 16 }
 0x210   :  { %v19358_v28 = vsel %vm16227_vm2, %v5643_v40, %v5647_v14  ;;  %7971 = vmatpush1.bf16.msra.mxu1 %v15795_v54  ;;  %v14188_v40 = vcombine.low %v19186_v37, %v19200_v35  ;;  %v14428_v14 = vcombine.low %v19302_v0, %v19306_v15  ;;  %v14305_v26 = vld [vmem:[%s23714_s0 + $0x248] sm:$0x11]  ;;  %v19377_v46 = vld [vmem:[%s23714_s0 + $0x250] sm:$0xff]  ;;  %v5657_v15 = vrot.slane %v5656_v55, 4 }
 0x211   :  { %23815 = vst [vmem:[#allocation37_spill] sm:$0xff] %v19337_v42  ;;  %v19347_v3 = vadd.f32 %v3838_v24, %v2684_v10  ;;  %4789 = vmatmul.mubr.bf16.gmra.mrb[232].mxu1 %v14186_v27  ;;  %6679 = vmatmul.mubr.bf16.gmra.mrb[232].mxu0 %v14426_v36  ;;  %v5661_v24 = vrot.slane %v5659_v12, 5  ;;  %v5680_v27 = vrot.slane %v5678_v45, 4  ;;  %v5683_v36 = vrot.slane %v5681_v33, 5  ;;  %v15796_v11 = vld [vmem:[%s23713_s1 + $0x368] sm:$0xff]  }
 0x212   :  { %4796 = vmatprep.mubr.bf16.mxu1 %v14189_v58  ;;  %6686 = vmatprep.mubr.bf16.mxu0 %v14429_v25  ;;  %v14303_v58 = vld [vmem:[%s23714_s0 + $0x238] sm:$0x11]  ;;  %v5694_v25 = vrot.slane %v5692_v21, 4  ;;  %v14191_v12 = vcombine.high %v19239_v30, %v19246_v53  ;;  %v14431_v0 = vcombine.high %v19354_v22, %v19358_v28  ;;  %v5671_v45 = vrot.slane %v5670_v63, 4  ;;  %v19387_v21 = vld [vmem:[%s23714_s0 + $0x260] sm:$0xff]  ;;  %v23819_v54 = vld [vmem:[#allocation5_spill] sm:$0xff] }
 0x213   :  { %23817 = vst [vmem:[#allocation40_spill] sm:$0xff] %v19347_v3  ;;  %7972 = vmatprep.subr.bf16.mxu1 %v23802_v38  ;;  %v5675_v33 = vrot.slane %v5673_v7, 5  ;;  %v5687_v3 = vshll.u32 %v14303_v58, 16  ;;  %8966 = vmatpush1.bf16.msra.mxu0 %v15796_v11  ;;  %v5701_v59 = vshll.u32 %v14305_v26, 16  ;;  %v5706_v55 = vshrl.u32 %v19377_v46, 16 }
 0x214   :  { %v2462_v10 = vpop.f32.mrb[128].mxu1  ;;  %v3843_v52 = vpop.f32.mrb[128].mxu0  ;;  %v5698_v42 = vor.u32 %v5697_v47, %v5694_v25  ;;  %v5709_v63 = vshll.u32 %v19377_v46, 16  ;;  %8967 = vmatprep.subr.bf16.mxu0 %v23802_v38 }
 0x215   :  { %v2685_v61 = vadd.f32 %v2462_v10, %v23818_v5  ;;  %v2464_v23 = vpop.f32.mrb[129].mxu1  ;;  %v3845_v9 = vpop.f32.mrb[129].mxu0  ;;  %v19407_v58 = vsel %vm16227_vm2, %v5671_v45, %v5675_v33  ;;  %v5689_v47 = vrot.slane %v5687_v3, 5  ;;  %v5703_v11 = vrot.slane %v5701_v59, 5 }
 0x216   :  { %v2465_v37 = vpop.f32.mrb[130].mxu1  ;;  %v3846_v35 = vpop.f32.mrb[130].mxu0  ;;  %v5684_v9 = vor.u32 %v5683_v36, %v5680_v27  ;;  %v14190_v27 = vcombine.low %v19239_v30, %v19246_v53  ;;  %v19403_v36 = vsel %vm16227_vm2, %v5657_v15, %v5661_v24  ;;  %v5699_v26 = vrot.slane %v5698_v42, 4  ;;  %v14307_v24 = vld [vmem:[%s23714_s0 + $0x258] sm:$0x11] }
 0x217   :  { %v19389_v51 = vadd.f32 %v3843_v52, %v2685_v61  ;;  %v2686_v10 = vadd.f32 %v2465_v37, %v23819_v54  ;;  %v2467_v5 = vpop.f32.mrb[131].mxu1  ;;  %v3848_v23 = vpop.f32.mrb[131].mxu0  ;;  %v5720_v52 = vshrl.u32 %v19387_v21, 16  ;;  %v5723_v61 = vshll.u32 %v19387_v21, 16 }
 0x218   :  { %v5685_v25 = vrot.slane %v5684_v9, 4  ;;  %v5708_v37 = vrot.slane %v5706_v55, 4  ;;  %v14430_v53 = vcombine.low %v19354_v22, %v19358_v28  ;;  %v14193_v59 = vcombine.high %v19287_v8, %v19295_v18  ;;  %v23823_v22 = vld [vmem:[#allocation7_spill] sm:$0xff]  ;;  %v19428_v55 = vld [vmem:[%s23714_s0 + $0x290] sm:$0xff] }
 0x219   :  { %v19395_v7 = vadd.f32 %v3846_v35, %v2686_v10  ;;  %4797 = vmatmul.mubr.bf16.gmra.mrb[236].mxu1 %v14188_v40  ;;  %6687 = vmatmul.mubr.bf16.gmra.mrb[236].mxu0 %v14428_v14  ;;  %v23821_v35 = vld [vmem:[#allocation6_spill] sm:$0xff]  ;;  %v5722_v15 = vrot.slane %v5720_v52, 4  ;;  %v5725_v45 = vrot.slane %v5723_v61, 5  ;;  %v14433_v42 = vcombine.high %v19403_v36, %v19407_v58  ;;  %v14309_v10 = vld [vmem:[%s23714_s0 + $0x268] sm:$0x11] }
 0x21a   :  { %4804 = vmatprep.mubr.bf16.mxu1 %v14191_v12  ;;  %6694 = vmatprep.mubr.bf16.mxu0 %v14431_v0  ;;  %v5711_v12 = vrot.slane %v5709_v63, 5  ;;  %v19433_v63 = vld [vmem:[%s23714_s0 + $0x2a0] sm:$0xff]  ;;  %v19437_v52 = vsel %vm16227_vm2, %v5685_v25, %v5689_v47  ;;  %v5734_v25 = vshrl.u32 %v19428_v55, 16  ;;  %v5737_v47 = vshll.u32 %v19428_v55, 16 }
 0x21b   :  { %23820 = vst [vmem:[#allocation4_spill] sm:$0xff] %v19395_v7 }
 0x21c   :  { %v2470_v40 = vpop.f32.mrb[132].mxu1  ;;  %v3851_v14 = vpop.f32.mrb[132].mxu0  ;;  %v5712_v61 = vor.u32 %v5711_v12, %v5708_v37  ;;  %v5748_v37 = vshrl.u32 %v19433_v63, 16 }
 0x21d   :  { %v2687_v0 = vadd.f32 %v2470_v40, %v23821_v35  ;;  %v2472_v54 = vpop.f32.mrb[133].mxu1  ;;  %v3853_v30 = vpop.f32.mrb[133].mxu0  ;;  %v5715_v40 = vshll.u32 %v14307_v24, 16  ;;  %v19443_v35 = vsel %vm16227_vm2, %v5699_v26, %v5703_v11  ;;  %v14192_v26 = vcombine.low %v19287_v8, %v19295_v18 }
 0x21e   :  { %v2473_v3 = vpop.f32.mrb[134].mxu1  ;;  %v3854_v33 = vpop.f32.mrb[134].mxu0  ;;  %v5729_v54 = vshll.u32 %v14309_v10, 16  ;;  %v15801_v30 = vld [vmem:[%s23713_s1 + $0x2f0] sm:$0xff]   ;;  %v14195_v24 = vcombine.high %v19328_v44, %v19335_v6  ;;  %v14435_v8 = vcombine.high %v19437_v52, %v19443_v35 }
 0x21f   :  { %v19422_v5 = vadd.f32 %v3851_v14, %v2687_v0  ;;  %v2688_v28 = vadd.f32 %v2473_v3, %v23823_v22  ;;  %v2475_v23 = vpop.f32.mrb[135].mxu1  ;;  %v3856_v9 = vpop.f32.mrb[135].mxu0  ;;  %v5726_v0 = vor.u32 %v5725_v45, %v5722_v15  ;;  %7973 = vmatpush1.bf16.msra.mxu1 %v15801_v30  ;;  %v5713_v15 = vrot.slane %v5712_v61, 4  ;;  %v23825_v3 = vld [vmem:[#allocation8_spill] sm:$0xff] }
 0x220   :  { %v5717_v45 = vrot.slane %v5715_v40, 5  ;;  %7974 = vmatprep.subr.bf16.mxu1 %v23802_v38  ;;  %v5731_v10 = vrot.slane %v5729_v54, 5  ;;  %v5736_v23 = vrot.slane %v5734_v25, 4  ;;  %v5739_v9 = vrot.slane %v5737_v47, 5  ;;  %v19482_v25 = vld [vmem:[%s23714_s0 + $0x2c0] sm:$0xff] }
 0x221   :  { %23822 = vst [vmem:[#allocation5_spill] sm:$0xff] %v19422_v5  ;;  %v19439_v14 = vadd.f32 %v3854_v33, %v2688_v28  ;;  %4805 = vmatmul.mubr.bf16.gmra.mrb[240].mxu1 %v14190_v27  ;;  %6695 = vmatmul.mubr.bf16.gmra.mrb[240].mxu0 %v14430_v53  ;;  %v5751_v27 = vshll.u32 %v19433_v63, 16  ;;  %v14432_v53 = vcombine.low %v19403_v36, %v19407_v58  ;;  %v5727_v18 = vrot.slane %v5726_v0, 4  ;;  %v19465_v36 = vld [vmem:[%s23714_s0 + $0x2b0] sm:$0xff] }
 0x222   :  { %4812 = vmatprep.mubr.bf16.mxu1 %v14193_v59  ;;  %6702 = vmatprep.mubr.bf16.mxu0 %v14433_v42  ;;  %v15802_v58 = vld [vmem:[%s23713_s1 + $0x370] sm:$0xff]   ;;  %v5750_v61 = vrot.slane %v5748_v37, 4  ;;  %v5762_v47 = vshrl.u32 %v19465_v36, 16  ;;  %v5765_v37 = vshll.u32 %v19465_v36, 16 }
 0x223   :  { %23824 = vst [vmem:[#allocation6_spill] sm:$0xff] %v19439_v14  ;;  %v5753_v40 = vrot.slane %v5751_v27, 5  ;;  %8968 = vmatpush1.bf16.msra.mxu0 %v15802_v58  ;;  %v5740_v58 = vor.u32 %v5739_v9, %v5736_v23  ;;  %v14197_v23 = vcombine.high %v19377_v46, %v19387_v21  ;;  %v19522_v14 = vld [vmem:[%s23714_s0 + $0x2e0] sm:$0xff] }
 0x224   :  { %v2478_v11 = vpop.f32.mrb[136].mxu1  ;;  %v3859_v12 = vpop.f32.mrb[136].mxu0  ;;  %8969 = vmatprep.subr.bf16.mxu0 %v23802_v38 }
 0x225   :  { %v2689_v33 = vadd.f32 %v2478_v11, %v23825_v3  ;;  %v2480_v59 = vpop.f32.mrb[137].mxu1  ;;  %v3861_v42 = vpop.f32.mrb[137].mxu0  ;;  %v23827_v11 = vld [vmem:[#allocation9_spill] sm:$0xff] }
 0x226   :  { %v2481_v22 = vpop.f32.mrb[138].mxu1  ;;  %v3862_v28 = vpop.f32.mrb[138].mxu0  ;;  %v14311_v59 = vld [vmem:[%s23714_s0 + $0x298] sm:$0x11]  ;;  %v14313_v42 = vld [vmem:[%s23714_s0 + $0x2a8] sm:$0x11] }
 0x227   :  { %v19470_v30 = vadd.f32 %v3859_v12, %v2689_v33  ;;  %v2690_v0 = vadd.f32 %v2481_v22, %v23827_v11  ;;  %v2483_v54 = vpop.f32.mrb[139].mxu1  ;;  %v3864_v3 = vpop.f32.mrb[139].mxu0  ;;  %v19491_v12 = vsel %vm16227_vm2, %v5713_v15, %v5717_v45  ;;  %v19495_v33 = vsel %vm16227_vm2, %v5727_v18, %v5731_v10 }
 0x228   :  { %v5743_v22 = vshll.u32 %v14311_v59, 16  ;;  %v5754_v11 = vor.u32 %v5753_v40, %v5750_v61  ;;  %v5757_v54 = vshll.u32 %v14313_v42, 16  ;;  %v5776_v3 = vshrl.u32 %v19482_v25, 16  ;;  %v14315_v61 = vld [vmem:[%s23714_s0 + $0x2b8] sm:$0x11] }
 0x229   :  { %23826 = vst [vmem:[#allocation7_spill] sm:$0xff] %v19470_v30  ;;  %v19487_v27 = vadd.f32 %v3862_v28, %v2690_v0  ;;  %4813 = vmatmul.mubr.bf16.gmra.mrb[244].mxu1 %v14192_v26  ;;  %6703 = vmatmul.mubr.bf16.gmra.mrb[244].mxu0 %v14432_v53  ;;  %v5779_v28 = vshll.u32 %v19482_v25, 16  ;;  %v14194_v15 = vcombine.low %v19328_v44, %v19335_v6  ;;  %v5764_v45 = vrot.slane %v5762_v47, 4  ;;  %v19514_v44 = vld [vmem:[%s23714_s0 + $0x2d0] sm:$0xff] }
 0x22a   :  { %4820 = vmatprep.mubr.bf16.mxu1 %v14195_v24  ;;  %6710 = vmatprep.mubr.bf16.mxu0 %v14435_v8  ;;  %v5767_v0 = vrot.slane %v5765_v37, 5  ;;  %v14434_v8 = vcombine.low %v19437_v52, %v19443_v35  ;;  %v14437_v9 = vcombine.high %v19491_v12, %v19495_v33  ;;  %v5741_v59 = vrot.slane %v5740_v58, 4  ;;  %v23831_v37 = vld [vmem:[#allocation11_spill] sm:$0xff]  ;;  %v14317_v58 = vld [vmem:[%s23714_s0 + $0x2c8] sm:$0x11] }
 0x22b   :  { %23828 = vst [vmem:[#allocation8_spill] sm:$0xff] %v19487_v27  ;;  %v23829_v27 = vld [vmem:[#allocation10_spill] sm:$0xff]  ;;  %v5745_v42 = vrot.slane %v5743_v22, 5  ;;  %v5755_v52 = vrot.slane %v5754_v11, 4  ;;  %v5759_v35 = vrot.slane %v5757_v54, 5  ;;  %v5781_v30 = vrot.slane %v5779_v28, 5 }
 0x22c   :  { %v2486_v26 = vpop.f32.mrb[140].mxu1  ;;  %v3867_v53 = vpop.f32.mrb[140].mxu0  ;;  %v5768_v22 = vor.u32 %v5767_v0, %v5764_v45  ;;  %v5771_v11 = vshll.u32 %v14315_v61, 16  ;;  %v5790_v54 = vshrl.u32 %v19514_v44, 16  ;;  %v15807_v28 = vld [vmem:[%s23713_s1 + $0x2f8] sm:$0xff]  }
 0x22d   :  { %v2691_v18 = vadd.f32 %v2486_v26, %v23829_v27  ;;  %v2488_v10 = vpop.f32.mrb[141].mxu1  ;;  %v3869_v24 = vpop.f32.mrb[141].mxu0  ;;  %v19538_v45 = vsel %vm16227_vm2, %v5741_v59, %v5745_v42  ;;  %7975 = vmatpush1.bf16.msra.mxu1 %v15807_v28  ;;  %v14196_v59 = vcombine.low %v19377_v46, %v19387_v21  ;;  %v14436_v42 = vcombine.low %v19491_v12, %v19495_v33  ;;  %v14321_v21 = vld [vmem:[%s23714_s0 + $0x2e8] sm:$0x11] }
 0x22e   :  { %v2489_v6 = vpop.f32.mrb[142].mxu1  ;;  %v3870_v40 = vpop.f32.mrb[142].mxu0  ;;  %v5778_v24 = vrot.slane %v5776_v3, 4  ;;  %v5793_v3 = vshll.u32 %v19514_v44, 16  ;;  %10829 = vmatprep.subr.bf16.mxu1 %v23802_v38 }
 0x22f   :  { %v19516_v47 = vadd.f32 %v3867_v53, %v2691_v18  ;;  %v2692_v27 = vadd.f32 %v2489_v6, %v23831_v37  ;;  %v2491_v26 = vpop.f32.mrb[143].mxu1  ;;  %v3872_v10 = vpop.f32.mrb[143].mxu0  ;;  %v5804_v18 = vshrl.u32 %v19522_v14, 16  ;;  %v5807_v6 = vshll.u32 %v19522_v14, 16 }
 0x230   :  { %v5782_v0 = vor.u32 %v5781_v30, %v5778_v24  ;;  %v5769_v37 = vrot.slane %v5768_v22, 4  ;;  %v14319_v30 = vld [vmem:[%s23714_s0 + $0x2d8] sm:$0x11]  ;;  %v14199_v22 = vcombine.high %v19428_v55, %v19433_v63 }
 0x231   :  { %23830 = vst [vmem:[#allocation9_spill] sm:$0xff] %v19516_v47  ;;  %v19528_v53 = vadd.f32 %v3870_v40, %v2692_v27  ;;  %4821 = vmatmul.mubr.bf16.gmra.mrb[248].mxu1 %v14194_v15  ;;  %6711 = vmatmul.mubr.bf16.gmra.mrb[248].mxu0 %v14434_v8  ;;  %v19542_v15 = vsel %vm16227_vm2, %v5755_v52, %v5759_v35  ;;  %v5785_v8 = vshll.u32 %v14317_v58, 16  ;;  %v23833_v27 = vld [vmem:[#allocation12_spill] sm:$0xff]  ;;  %v5795_v52 = vrot.slane %v5793_v3, 5  ;;  %v15808_v35 = vld [vmem:[%s23713_s1 + $0x378] sm:$0xff]  }
 0x232   :  { %4828 = vmatprep.mubr.bf16.mxu1 %v14197_v23  ;;  %6718 = vmatprep.mubr.bf16.mxu0 %v14437_v9  ;;  %v5773_v23 = vrot.slane %v5771_v11, 5  ;;  %v5792_v9 = vrot.slane %v5790_v54, 4  ;;  %v14439_v46 = vcombine.high %v19538_v45, %v19542_v15  ;;  %v5806_v12 = vrot.slane %v5804_v18, 4  ;;  %v23835_v54 = vld [vmem:[#allocation13_spill] sm:$0xff]  ;;  %v19574_v47 = vld [vmem:[%s23714_s0 + $0x300] sm:$0xff] }
 0x233   :  { %23832 = vst [vmem:[#allocation10_spill] sm:$0xff] %v19528_v53  ;;  %v5809_v33 = vrot.slane %v5807_v6, 5  ;;  %8970 = vmatpush1.bf16.msra.mxu0 %v15808_v35 }
 0x234   :  { %v2494_v61 = vpop.f32.mrb[144].mxu1  ;;  %v3875_v40 = vpop.f32.mrb[144].mxu0  ;;  %12207 = vmatprep.subr.bf16.mxu0 %v23802_v38  ;;  %v5796_v6 = vor.u32 %v5795_v52, %v5792_v9  ;;  %v5835_v9 = vshll.u32 %v19574_v47, 16  ;;  %v14198_v52 = vcombine.low %v19428_v55, %v19433_v63 }
 0x235   :  { %v2693_v26 = vadd.f32 %v2494_v61, %v23833_v27  ;;  %v2496_v10 = vpop.f32.mrb[145].mxu1  ;;  %v3877_v53 = vpop.f32.mrb[145].mxu0  ;;  %v5783_v61 = vrot.slane %v5782_v0, 4  ;;  %v5787_v27 = vrot.slane %v5785_v8, 5  ;;  %v5799_v0 = vshll.u32 %v14319_v30, 16 }
 0x236   :  { %v2497_v24 = vpop.f32.mrb[146].mxu1  ;;  %v3878_v58 = vpop.f32.mrb[146].mxu0  ;;  %v19569_v10 = vld [vmem:[%s23714_s0 + $0x2f0] sm:$0xff]  ;;  %v5813_v8 = vshll.u32 %v14321_v21, 16 }
 0x237   :  { %v19563_v11 = vadd.f32 %v3875_v40, %v2693_v26  ;;  %v2694_v53 = vadd.f32 %v2497_v24, %v23835_v54  ;;  %v2499_v3 = vpop.f32.mrb[147].mxu1  ;;  %v3880_v28 = vpop.f32.mrb[147].mxu0  ;;  %v5810_v40 = vor.u32 %v5809_v33, %v5806_v12  ;;  %v5818_v26 = vshrl.u32 %v19569_v10, 16 }
 0x238   :  { %v5821_v35 = vshll.u32 %v19569_v10, 16  ;;  %v19583_v24 = vsel %vm16227_vm2, %v5769_v37, %v5773_v23  ;;  %v14201_v37 = vcombine.high %v19465_v36, %v19482_v25  ;;  %v23837_v23 = vld [vmem:[#allocation14_spill] sm:$0xff]  ;;  %v5797_v33 = vrot.slane %v5796_v6, 4 }
 0x239   :  { %23834 = vst [vmem:[#allocation11_spill] sm:$0xff] %v19563_v11  ;;  %v19577_v18 = vadd.f32 %v3878_v58, %v2694_v53  ;;  %4829 = vmatmul.mubr.bf16.gmra.mrb[252].mxu1 %v14196_v59  ;;  %6719 = vmatmul.mubr.bf16.gmra.mrb[252].mxu0 %v14436_v42  ;;  %v19587_v58 = vsel %vm16227_vm2, %v5783_v61, %v5787_v27  ;;  %v5832_v59 = vshrl.u32 %v19574_v47, 16  ;;  %v5801_v54 = vrot.slane %v5799_v0, 5  ;;  %v19601_v3 = vld [vmem:[%s23714_s0 + $0x330] sm:$0xff]  ;;  %v19608_v27 = vld [vmem:[%s23714_s0 + $0x340] sm:$0xff] }
 0x23a   :  { %4836 = vmatprep.mubr.bf16.mxu1 %v14199_v22  ;;  %6726 = vmatprep.mubr.bf16.mxu0 %v14439_v46  ;;  %v14438_v22 = vcombine.low %v19538_v45, %v19542_v15  ;;  %v5815_v53 = vrot.slane %v5813_v8, 5  ;;  %v14441_v63 = vcombine.high %v19583_v24, %v19587_v58  ;;  %v5811_v45 = vrot.slane %v5810_v40, 4  ;;  %v23839_v0 = vld [vmem:[#allocation15_spill] sm:$0xff]  ;;  %v14325_v40 = vld [vmem:[%s23714_s0 + $0x308] sm:$0x11] }
 0x23b   :  { %23836 = vst [vmem:[#allocation12_spill] sm:$0xff] %v19577_v18  ;;  %v5820_v15 = vrot.slane %v5818_v26, 4  ;;  %v5823_v61 = vrot.slane %v5821_v35, 5  ;;  %v5837_v18 = vrot.slane %v5835_v9, 5  ;;  %v5846_v26 = vshrl.u32 %v19601_v3, 16 }
 0x23c   :  { %v2502_v42 = vpop.f32.mrb[148].mxu1  ;;  %v3883_v30 = vpop.f32.mrb[148].mxu0  ;;  %v5849_v35 = vshll.u32 %v19601_v3, 16 }
 0x23d   :  { %v2695_v46 = vadd.f32 %v2502_v42, %v23837_v23  ;;  %v2504_v21 = vpop.f32.mrb[149].mxu1  ;;  %v3885_v12 = vpop.f32.mrb[149].mxu0 }
 0x23e   :  { %v2505_v28 = vpop.f32.mrb[150].mxu1  ;;  %v3886_v55 = vpop.f32.mrb[150].mxu0  ;;  %v14323_v21 = vld [vmem:[%s23714_s0 + $0x2f8] sm:$0x11]  ;;  %v5834_v12 = vrot.slane %v5832_v59, 4  ;;  %v5824_v59 = vor.u32 %v5823_v61, %v5820_v15  ;;  %v5851_v15 = vrot.slane %v5849_v35, 5 }
 0x23f   :  { %v19610_v6 = vadd.f32 %v3883_v30, %v2695_v46  ;;  %v2696_v8 = vadd.f32 %v2505_v28, %v23839_v0  ;;  %v2507_v42 = vpop.f32.mrb[151].mxu1  ;;  %v3888_v23 = vpop.f32.mrb[151].mxu0  ;;  %v5860_v46 = vshrl.u32 %v19608_v27, 16  ;;  %v5863_v28 = vshll.u32 %v19608_v27, 16  ;;  %v23841_v61 = vld [vmem:[#allocation16_spill] sm:$0xff] }
 0x240   :  { %v5827_v9 = vshll.u32 %v14323_v21, 16  ;;  %v19627_v0 = vsel %vm16227_vm2, %v5797_v33, %v5801_v54  ;;  %v19631_v42 = vsel %vm16227_vm2, %v5811_v45, %v5815_v53  ;;  %v14200_v23 = vcombine.low %v19465_v36, %v19482_v25 }
 0x241   :  { %23838 = vst [vmem:[#allocation13_spill] sm:$0xff] %v19610_v6  ;;  %v19621_v30 = vadd.f32 %v3886_v55, %v2696_v8  ;;  %4837 = vmatmul.mubr.bf16.gmra.mrb[0].mxu1 %v14198_v52  ;;  %6727 = vmatmul.mubr.bf16.gmra.mrb[0].mxu0 %v14438_v22  ;;  %v5838_v55 = vor.u32 %v5837_v18, %v5834_v12  ;;  %v5841_v8 = vshll.u32 %v14325_v40, 16  ;;  %v14329_v18 = vld [vmem:[%s23714_s0 + $0x348] sm:$0x11]  ;;  %v5862_v45 = vrot.slane %v5860_v46, 4  ;;  %v19659_v6 = vld [vmem:[%s23714_s0 + $0x360] sm:$0xff] }
 0x242   :  { %4844 = vmatprep.mubr.bf16.mxu1 %v14201_v37  ;;  %6734 = vmatprep.mubr.bf16.mxu0 %v14441_v63  ;;  %v14327_v37 = vld [vmem:[%s23714_s0 + $0x338] sm:$0x11]  ;;  %v5848_v63 = vrot.slane %v5846_v26, 4  ;;  %v14440_v53 = vcombine.low %v19583_v24, %v19587_v58  ;;  %v5865_v12 = vrot.slane %v5863_v28, 5  ;;  %v14203_v40 = vcombine.high %v19514_v44, %v19522_v14  ;;  %v19651_v24 = vld [vmem:[%s23714_s0 + $0x350] sm:$0xff] }
 0x243   :  { %23840 = vst [vmem:[#allocation14_spill] sm:$0xff] %v19621_v30  ;;  %v14443_v26 = vcombine.high %v19627_v0, %v19631_v42  ;;  %v5825_v35 = vrot.slane %v5824_v59, 4  ;;  %v5843_v30 = vrot.slane %v5841_v8, 5  ;;  %v5869_v11 = vshll.u32 %v14329_v18, 16 }
 0x244   :  { %v2510_v52 = vpop.f32.mrb[152].mxu1  ;;  %v3891_v22 = vpop.f32.mrb[152].mxu0  ;;  %v5852_v59 = vor.u32 %v5851_v15, %v5848_v63  ;;  %v5891_v8 = vshll.u32 %v19659_v6, 16  ;;  %v14202_v63 = vcombine.low %v19514_v44, %v19522_v14  ;;  %v14442_v18 = vcombine.low %v19627_v0, %v19631_v42  ;;  %v14331_v0 = vld [vmem:[%s23714_s0 + $0x358] sm:$0x11] }
 0x245   :  { %v2697_v33 = vadd.f32 %v2510_v52, %v23841_v61  ;;  %v2512_v54 = vpop.f32.mrb[153].mxu1  ;;  %v3893_v21 = vpop.f32.mrb[153].mxu0  ;;  %v5829_v52 = vrot.slane %v5827_v9, 5  ;;  %v23843_v61 = vld [vmem:[#allocation17_spill] sm:$0xff]  ;;  %v5855_v9 = vshll.u32 %v14327_v37, 16 }
 0x246   :  { %v2513_v36 = vpop.f32.mrb[154].mxu1  ;;  %v3894_v25 = vpop.f32.mrb[154].mxu0  ;;  %v5839_v21 = vrot.slane %v5838_v55, 4  ;;  %v5888_v55 = vshrl.u32 %v19659_v6, 16  ;;  %v5893_v42 = vrot.slane %v5891_v8, 5 }
 0x247   :  { %v19653_v58 = vadd.f32 %v3891_v22, %v2697_v33  ;;  %v2698_v46 = vadd.f32 %v2513_v36, %v23843_v61  ;;  %v2515_v28 = vpop.f32.mrb[155].mxu1  ;;  %v3896_v54 = vpop.f32.mrb[155].mxu0  ;;  %v5866_v22 = vor.u32 %v5865_v12, %v5862_v45  ;;  %v5874_v33 = vshrl.u32 %v19651_v24, 16 }
 0x248   :  { %v5877_v36 = vshll.u32 %v19651_v24, 16  ;;  %v19671_v37 = vsel %vm16227_vm2, %v5825_v35, %v5829_v52  ;;  %v5853_v45 = vrot.slane %v5852_v59, 4  ;;  %v5857_v12 = vrot.slane %v5855_v9, 5  ;;  %v23847_v59 = vld [vmem:[#allocation19_spill] sm:$0xff] }
 0x249   :  { %23842 = vst [vmem:[#allocation15_spill] sm:$0xff] %v19653_v58  ;;  %v19661_v5 = vadd.f32 %v3894_v25, %v2698_v46  ;;  %4845 = vmatmul.mubr.bf16.gmra.mrb[4].mxu1 %v14200_v23  ;;  %6735 = vmatmul.mubr.bf16.gmra.mrb[4].mxu0 %v14440_v53  ;;  %v19675_v23 = vsel %vm16227_vm2, %v5839_v21, %v5843_v30  ;;  %v5871_v25 = vrot.slane %v5869_v11, 5  ;;  %v5867_v44 = vrot.slane %v5866_v22, 4  ;;  %v14337_v58 = vld [vmem:[%s23714_s0 + $0x388] sm:$0x11] }
 0x24a   :  { %4852 = vmatprep.mubr.bf16.mxu1 %v14203_v40  ;;  %6742 = vmatprep.mubr.bf16.mxu0 %v14443_v26  ;;  %v23845_v40 = vld [vmem:[#allocation18_spill] sm:$0xff]  ;;  %v5876_v46 = vrot.slane %v5874_v33, 4  ;;  %v5879_v35 = vrot.slane %v5877_v36, 5  ;;  %v14205_v30 = vcombine.high %v19569_v10, %v19574_v47  ;;  %v14445_v54 = vcombine.high %v19671_v37, %v19675_v23  ;;  %v14333_v36 = vld [vmem:[%s23714_s0 + $0x368] sm:$0x11] }
 0x24b   :  { %23844 = vst [vmem:[#allocation16_spill] sm:$0xff] %v19661_v5  ;;  %v5890_v11 = vrot.slane %v5888_v55, 4  ;;  %v19705_v55 = vld [vmem:[%s23714_s0 + $0x380] sm:$0xff] }
 0x24c   :  { %v2518_v15 = vpop.f32.mrb[156].mxu1  ;;  %v3899_v53 = vpop.f32.mrb[156].mxu0 }
 0x24d   :  { %v2699_v26 = vadd.f32 %v2518_v15, %v23845_v40  ;;  %v2520_v61 = vpop.f32.mrb[157].mxu1  ;;  %v3901_v14 = vpop.f32.mrb[157].mxu0  ;;  %v19696_v15 = vld [vmem:[%s23714_s0 + $0x370] sm:$0xff]  ;;  %v19700_v40 = vsel %vm16227_vm2, %v5853_v45, %v5857_v12  ;;  %v5897_v45 = vshll.u32 %v14333_v36, 16 }
 0x24e   :  { %v2521_v52 = vpop.f32.mrb[158].mxu1  ;;  %v3902_v28 = vpop.f32.mrb[158].mxu0  ;;  %v5883_v61 = vshll.u32 %v14331_v0, 16  ;;  %v5894_v14 = vor.u32 %v5893_v42, %v5890_v11  ;;  %v5902_v12 = vshrl.u32 %v19696_v15, 16 }
 0x24f   :  { %v19687_v21 = vadd.f32 %v3899_v53, %v2699_v26  ;;  %v2700_v9 = vadd.f32 %v2521_v52, %v23847_v59  ;;  %v2523_v22 = vpop.f32.mrb[159].mxu1  ;;  %v3904_v33 = vpop.f32.mrb[159].mxu0  ;;  %v19711_v53 = vsel %vm16227_vm2, %v5867_v44, %v5871_v25  ;;  %v5880_v26 = vor.u32 %v5879_v35, %v5876_v46  ;;  %v23849_v35 = vld [vmem:[#allocation20_spill] sm:$0xff] }
 0x250   :  { %v5905_v52 = vshll.u32 %v19696_v15, 16  ;;  %v5916_v59 = vshrl.u32 %v19705_v55, 16  ;;  %v14204_v25 = vcombine.low %v19569_v10, %v19574_v47  ;;  %v14444_v44 = vcombine.low %v19671_v37, %v19675_v23  ;;  %v19729_v22 = vld [vmem:[%s23714_s0 + $0x390] sm:$0xff]  ;;  %v19734_v47 = vld [vmem:[%s23714_s0 + $0x3a0] sm:$0xff] }
 0x251   :  { %23846 = vst [vmem:[#allocation17_spill] sm:$0xff] %v19687_v21  ;;  %v19707_v8 = vadd.f32 %v3902_v28, %v2700_v9  ;;  %4853 = vmatmul.mubr.bf16.gmra.mrb[8].mxu1 %v14202_v63  ;;  %6743 = vmatmul.mubr.bf16.gmra.mrb[8].mxu0 %v14442_v18  ;;  %v5919_v28 = vshll.u32 %v19705_v55, 16  ;;  %v14207_v46 = vcombine.high %v19601_v3, %v19608_v27  ;;  %v5881_v42 = vrot.slane %v5880_v26, 4  ;;  %v23851_v26 = vld [vmem:[#allocation21_spill] sm:$0xff] }
 0x252   :  { %4860 = vmatprep.mubr.bf16.mxu1 %v14205_v30  ;;  %6750 = vmatprep.mubr.bf16.mxu0 %v14445_v54  ;;  %v14447_v11 = vcombine.high %v19700_v40, %v19711_v53  ;;  %v5885_v9 = vrot.slane %v5883_v61, 5  ;;  %v5895_v23 = vrot.slane %v5894_v14, 4  ;;  %v5899_v33 = vrot.slane %v5897_v45, 5 }
 0x253   :  { %23848 = vst [vmem:[#allocation18_spill] sm:$0xff] %v19707_v8  ;;  %v5904_v36 = vrot.slane %v5902_v12, 4  ;;  %v14335_v8 = vld [vmem:[%s23714_s0 + $0x378] sm:$0x11]  ;;  %v5918_v21 = vrot.slane %v5916_v59, 4  ;;  %v5921_v5 = vrot.slane %v5919_v28, 5 }
 0x254   :  { %v2526_v63 = vpop.f32.mrb[160].mxu1  ;;  %v3907_v18 = vpop.f32.mrb[160].mxu0  ;;  %v5930_v14 = vshrl.u32 %v19729_v22, 16  ;;  %v5933_v45 = vshll.u32 %v19729_v22, 16  ;;  %v5944_v12 = vshrl.u32 %v19734_v47, 16  ;;  %v5911_v28 = vshll.u32 %v14335_v8, 16 }
 0x255   :  { %v2701_v30 = vadd.f32 %v2526_v63, %v23849_v35  ;;  %v2528_v54 = vpop.f32.mrb[161].mxu1  ;;  %v3909_v0 = vpop.f32.mrb[161].mxu0  ;;  %v5907_v63 = vrot.slane %v5905_v52, 5  ;;  %v5947_v52 = vshll.u32 %v19734_v47, 16 }
 0x256   :  { %v2529_v10 = vpop.f32.mrb[162].mxu1  ;;  %v3910_v37 = vpop.f32.mrb[162].mxu0 }
 0x257   :  { %v19736_v35 = vadd.f32 %v3907_v18, %v2701_v30  ;;  %v2702_v61 = vadd.f32 %v2529_v10, %v23851_v26  ;;  %v2531_v54 = vpop.f32.mrb[163].mxu1  ;;  %v3912_v0 = vpop.f32.mrb[163].mxu0  ;;  %v5908_v59 = vor.u32 %v5907_v63, %v5904_v36  ;;  %v19753_v30 = vsel %vm16227_vm2, %v5881_v42, %v5885_v9 }
 0x258   :  { %v19757_v10 = vsel %vm16227_vm2, %v5895_v23, %v5899_v33  ;;  %v5922_v26 = vor.u32 %v5921_v5, %v5918_v21  ;;  %v5925_v54 = vshll.u32 %v14337_v58, 16  ;;  %v14206_v42 = vcombine.low %v19601_v3, %v19608_v27  ;;  %v14339_v5 = vld [vmem:[%s23714_s0 + $0x398] sm:$0x11]  ;;  %v14341_v58 = vld [vmem:[%s23714_s0 + $0x3a8] sm:$0x11] }
 0x259   :  { %23850 = vst [vmem:[#allocation19_spill] sm:$0xff] %v19736_v35  ;;  %v19749_v18 = vadd.f32 %v3910_v37, %v2702_v61  ;;  %4861 = vmatmul.mubr.bf16.gmra.mrb[12].mxu1 %v14204_v25  ;;  %6751 = vmatmul.mubr.bf16.gmra.mrb[12].mxu0 %v14444_v44  ;;  %v5932_v37 = vrot.slane %v5930_v14, 4  ;;  %v5935_v61 = vrot.slane %v5933_v45, 5  ;;  %v5946_v25 = vrot.slane %v5944_v12, 4  ;;  %v23854_v14 = vld [vmem:[#allocation25_spill] sm:$0xff] }
 0x25a   :  { %4868 = vmatprep.mubr.bf16.mxu1 %v14207_v46  ;;  %6758 = vmatprep.mubr.bf16.mxu0 %v14447_v11  ;;  %v5949_v44 = vrot.slane %v5947_v52, 5  ;;  %v23853_v46 = vld [vmem:[#allocation23_spill] sm:$0xff]  ;;  %v14446_v9 = vcombine.low %v19700_v40, %v19711_v53  ;;  %v14209_v33 = vcombine.high %v19651_v24, %v19659_v6  ;;  %v14449_v63 = vcombine.high %v19753_v30, %v19757_v10  ;;  %v19777_v40 = vld [vmem:[%s23714_s0 + $0x3d0] sm:$0xff] }
 0x25b   :  { %23852 = vst [vmem:[#allocation20_spill] sm:$0xff] %v19749_v18  ;;  %v5909_v3 = vrot.slane %v5908_v59, 4  ;;  %v5913_v27 = vrot.slane %v5911_v28, 5  ;;  %v5953_v7 = vshll.u32 %v14341_v58, 16  ;;  %v19785_v59 = vld [vmem:[%s23714_s0 + $0x3e0] sm:$0xff] }
 0x25c   :  { %v2534_v0 = vpop.f32.mrb[164].mxu1  ;;  %v3915_v35 = vpop.f32.mrb[164].mxu0  ;;  %v5950_v18 = vor.u32 %v5949_v44, %v5946_v25  ;;  %v5975_v25 = vshll.u32 %v19785_v59, 16 }
 0x25d   :  { %v2703_v11 = vadd.f32 %v2534_v0, %v23853_v46  ;;  %v2536_v36 = vpop.f32.mrb[165].mxu1  ;;  %v3917_v8 = vpop.f32.mrb[165].mxu0  ;;  %v5923_v0 = vrot.slane %v5922_v26, 4  ;;  %v5927_v46 = vrot.slane %v5925_v54, 5  ;;  %v14208_v26 = vcombine.low %v19651_v24, %v19659_v6  ;;  %v23856_v24 = vld [vmem:[#allocation27_spill] sm:$0xff] }
 0x25e   :  { %v2537_v21 = vpop.f32.mrb[166].mxu1  ;;  %v3918_v23 = vpop.f32.mrb[166].mxu0  ;;  %v5936_v36 = vor.u32 %v5935_v61, %v5932_v37  ;;  %v5939_v8 = vshll.u32 %v14339_v5, 16  ;;  %v19795_v54 = vsel %vm16227_vm2, %v5909_v3, %v5913_v27  ;;  %v5972_v61 = vshrl.u32 %v19785_v59, 16  ;;  %v14343_v3 = vld [vmem:[%s23714_s0 + $0x3d8] sm:$0x11] }
 0x25f   :  { %v19779_v53 = vadd.f32 %v3915_v35, %v2703_v11  ;;  %v2704_v45 = vadd.f32 %v2537_v21, %v23854_v14  ;;  %v2539_v12 = vpop.f32.mrb[167].mxu1  ;;  %v3920_v52 = vpop.f32.mrb[167].mxu0  ;;  %v5958_v35 = vshrl.u32 %v19777_v40, 16  ;;  %v5961_v11 = vshll.u32 %v19777_v40, 16 }
 0x260   :  { %v19799_v37 = vsel %vm16227_vm2, %v5923_v0, %v5927_v46  ;;  %v5941_v5 = vrot.slane %v5939_v8, 5  ;;  %v5951_v58 = vrot.slane %v5950_v18, 4  ;;  %v5955_v6 = vrot.slane %v5953_v7, 5  ;;  %v23858_v0 = vld [vmem:[#allocation29_spill] sm:$0xff] }
 0x261   :  { %v19787_v28 = vadd.f32 %v3918_v23, %v2704_v45  ;;  %4869 = vmatmul.mubr.bf16.gmra.mrb[16].mxu1 %v14206_v42  ;;  %6759 = vmatmul.mubr.bf16.gmra.mrb[16].mxu0 %v14446_v9  ;;  %v5937_v9 = vrot.slane %v5936_v36, 4  ;;  %v5960_v27 = vrot.slane %v5958_v35, 4  ;;  %v5963_v14 = vrot.slane %v5961_v11, 5  ;;  %v19819_v35 = vld [vmem:[%s23714_s0 + $0x3f0] sm:$0xff]  ;;  %v19824_v11 = vld [vmem:[%s23714_s0 + $0x400] sm:$0xff] }
 0x262   :  { %4876 = vmatprep.mubr.bf16.mxu1 %v14209_v33  ;;  %6766 = vmatprep.mubr.bf16.mxu0 %v14449_v63  ;;  %v14448_v63 = vcombine.low %v19753_v30, %v19757_v10  ;;  %v14211_v52 = vcombine.high %v19696_v15, %v19705_v55  ;;  %v14451_v7 = vcombine.high %v19795_v54, %v19799_v37  ;;  %v5974_v10 = vrot.slane %v5972_v61, 4 }
 0x263   :  { %23855 = vst [vmem:[#allocation21_spill] sm:$0xff] %v19787_v28  ;;  %v5977_v8 = vrot.slane %v5975_v25, 5  ;;  %v5967_v61 = vshll.u32 %v14343_v3, 16  ;;  %v19869_v28 = vld [vmem:[%s23714_s0 + $0x420] sm:$0xff] }
 0x264   :  { %v2542_v44 = vpop.f32.mrb[168].mxu1  ;;  %v3923_v42 = vpop.f32.mrb[168].mxu0 }
 0x265   :  { %v2705_v21 = vadd.f32 %v2542_v44, %v23856_v24  ;;  %v2544_v23 = vpop.f32.mrb[169].mxu1  ;;  %v3925_v33 = vpop.f32.mrb[169].mxu0  ;;  %v19828_v44 = vsel %vm16227_vm2, %v5937_v9, %v5941_v5  ;;  %v19837_v24 = vsel %vm16227_vm2, %v5951_v58, %v5955_v6  ;;  %v5989_v9 = vshll.u32 %v19819_v35, 16 }
 0x266   :  { %v2545_v45 = vpop.f32.mrb[170].mxu1  ;;  %v3926_v12 = vpop.f32.mrb[170].mxu0  ;;  %v5986_v23 = vshrl.u32 %v19819_v35, 16  ;;  %v6000_v5 = vshrl.u32 %v19824_v11, 16  ;;  %v6003_v33 = vshll.u32 %v19824_v11, 16  ;;  %v5978_v3 = vor.u32 %v5977_v8, %v5974_v10 }
 0x267   :  { %v19813_v18 = vadd.f32 %v3923_v42, %v2705_v21  ;;  %v2706_v46 = vadd.f32 %v2545_v45, %v23858_v0  ;;  %v2547_v36 = vpop.f32.mrb[171].mxu1  ;;  %v3928_v30 = vpop.f32.mrb[171].mxu0  ;;  %v14345_v42 = vld [vmem:[%s23714_s0 + $0x3e8] sm:$0x11]  ;;  %v5964_v21 = vor.u32 %v5963_v14, %v5960_v27  ;;  %v14450_v58 = vcombine.low %v19795_v54, %v19799_v37  ;;  %v23860_v27 = vld [vmem:[#allocation30_spill] sm:$0xff] }
 0x268   :  { %v5981_v45 = vshll.u32 %v14345_v42, 16  ;;  %v5969_v6 = vrot.slane %v5967_v61, 5  ;;  %v14213_v0 = vcombine.high %v19729_v22, %v19734_v47  ;;  %v14347_v30 = vld [vmem:[%s23714_s0 + $0x3f8] sm:$0x11]  ;;  %v5988_v37 = vrot.slane %v5986_v23, 4 }
 0x269   :  { %23857 = vst [vmem:[#allocation23_spill] sm:$0xff] %v19813_v18  ;;  %v19833_v25 = vadd.f32 %v3926_v12, %v2706_v46  ;;  %4877 = vmatmul.mubr.bf16.gmra.mrb[20].mxu1 %v14208_v26  ;;  %6767 = vmatmul.mubr.bf16.gmra.mrb[20].mxu0 %v14448_v63  ;;  %v14210_v63 = vcombine.low %v19696_v15, %v19705_v55  ;;  %v5965_v36 = vrot.slane %v5964_v21, 4  ;;  %v19858_v15 = vld [vmem:[%s23714_s0 + $0x410] sm:$0xff]  ;;  %v5991_v10 = vrot.slane %v5989_v9, 5  ;;  %v14349_v18 = vld [vmem:[%s23714_s0 + $0x408] sm:$0x11] }
 0x26a   :  { %4884 = vmatprep.mubr.bf16.mxu1 %v14211_v52  ;;  %6774 = vmatprep.mubr.bf16.mxu0 %v14451_v7  ;;  %v14453_v46 = vcombine.high %v19828_v44, %v19837_v24  ;;  %v6002_v8 = vrot.slane %v6000_v5, 4  ;;  %v6005_v42 = vrot.slane %v6003_v33, 5  ;;  %v6014_v23 = vshrl.u32 %v19858_v15, 16 }
 0x26b   :  { %23859 = vst [vmem:[#allocation25_spill] sm:$0xff] %v19833_v25  ;;  %v5983_v25 = vrot.slane %v5981_v45, 5  ;;  %v6017_v9 = vshll.u32 %v19858_v15, 16  ;;  %v5995_v33 = vshll.u32 %v14347_v30, 16 }
 0x26c   :  { %v2550_v12 = vpop.f32.mrb[172].mxu1  ;;  %v3931_v26 = vpop.f32.mrb[172].mxu0  ;;  %v6006_v45 = vor.u32 %v6005_v42, %v6002_v8  ;;  %v14351_v42 = vld [vmem:[%s23714_s0 + $0x418] sm:$0x11] }
 0x26d   :  { %v2707_v14 = vadd.f32 %v2550_v12, %v23860_v27  ;;  %v2552_v52 = vpop.f32.mrb[173].mxu1  ;;  %v3933_v7 = vpop.f32.mrb[173].mxu0  ;;  %v23862_v12 = vld [vmem:[#allocation31_spill] sm:$0xff]  ;;  %v6019_v30 = vrot.slane %v6017_v9, 5  ;;  %v5997_v8 = vrot.slane %v5995_v33, 5 }
 0x26e   :  { %v2553_v55 = vpop.f32.mrb[174].mxu1  ;;  %v3934_v54 = vpop.f32.mrb[174].mxu0  ;;  %v5979_v7 = vrot.slane %v5978_v3, 4  ;;  %v5992_v3 = vor.u32 %v5991_v10, %v5988_v37 }
 0x26f   :  { %v19860_v61 = vadd.f32 %v3931_v26, %v2707_v14  ;;  %v2708_v27 = vadd.f32 %v2553_v55, %v23862_v12  ;;  %v2555_v21 = vpop.f32.mrb[175].mxu1  ;;  %v3936_v52 = vpop.f32.mrb[175].mxu0  ;;  %v6009_v26 = vshll.u32 %v14349_v18, 16  ;;  %v19877_v14 = vsel %vm16227_vm2, %v5965_v36, %v5969_v6  ;;  %v23864_v18 = vld [vmem:[#allocation32_spill] sm:$0xff] }
 0x270   :  { %v19881_v55 = vsel %vm16227_vm2, %v5979_v7, %v5983_v25  ;;  %v6028_v12 = vshrl.u32 %v19869_v28, 16  ;;  %v14452_v36 = vcombine.low %v19828_v44, %v19837_v24  ;;  %v14215_v25 = vcombine.high %v19777_v40, %v19785_v59  ;;  %v19900_v44 = vld [vmem:[%s23714_s0 + $0x430] sm:$0xff] }
 0x271   :  { %23861 = vst [vmem:[#allocation27_spill] sm:$0xff] %v19860_v61  ;;  %v19873_v5 = vadd.f32 %v3934_v54, %v2708_v27  ;;  %4885 = vmatmul.mubr.bf16.gmra.mrb[24].mxu1 %v14210_v63  ;;  %6775 = vmatmul.mubr.bf16.gmra.mrb[24].mxu0 %v14450_v58  ;;  %v6031_v54 = vshll.u32 %v19869_v28, 16  ;;  %v6007_v52 = vrot.slane %v6006_v45, 4  ;;  %v6011_v7 = vrot.slane %v6009_v26, 5 }
 0x272   :  { %4892 = vmatprep.mubr.bf16.mxu1 %v14213_v0  ;;  %6782 = vmatprep.mubr.bf16.mxu0 %v14453_v46  ;;  %v14212_v0 = vcombine.low %v19729_v22, %v19734_v47  ;;  %v6016_v46 = vrot.slane %v6014_v23, 4  ;;  %v14455_v22 = vcombine.high %v19877_v14, %v19881_v55  ;;  %v5993_v47 = vrot.slane %v5992_v3, 4  ;;  %v23866_v23 = vld [vmem:[#allocation33_spill] sm:$0xff] }
 0x273   :  { %23863 = vst [vmem:[#allocation29_spill] sm:$0xff] %v19873_v5  ;;  %v14353_v3 = vld [vmem:[%s23714_s0 + $0x428] sm:$0x11]  ;;  %v6023_v26 = vshll.u32 %v14351_v42, 16 }
 0x274   :  { %v2558_v63 = vpop.f32.mrb[176].mxu1  ;;  %v3939_v58 = vpop.f32.mrb[176].mxu0  ;;  %v6020_v45 = vor.u32 %v6019_v30, %v6016_v46  ;;  %v19925_v46 = vsel %vm16227_vm2, %v6007_v52, %v6011_v7  ;;  %v6037_v30 = vshll.u32 %v14353_v3, 16  ;;  %v14357_v3 = vld [vmem:[%s23714_s0 + $0x448] sm:$0x11] }
 0x275   :  { %v2709_v37 = vadd.f32 %v2558_v63, %v23864_v18  ;;  %v2560_v10 = vpop.f32.mrb[177].mxu1  ;;  %v3941_v6 = vpop.f32.mrb[177].mxu0  ;;  %v6030_v18 = vrot.slane %v6028_v12, 4  ;;  %v6045_v12 = vshll.u32 %v19900_v44, 16 }
 0x276   :  { %v2561_v27 = vpop.f32.mrb[178].mxu1  ;;  %v3942_v21 = vpop.f32.mrb[178].mxu0  ;;  %v6033_v10 = vrot.slane %v6031_v54, 5  ;;  %v19908_v6 = vld [vmem:[%s23714_s0 + $0x440] sm:$0xff] }
 0x277   :  { %v19902_v24 = vadd.f32 %v3939_v58, %v2709_v37  ;;  %v2710_v9 = vadd.f32 %v2561_v27, %v23866_v23  ;;  %v2563_v33 = vpop.f32.mrb[179].mxu1  ;;  %v3944_v63 = vpop.f32.mrb[179].mxu0  ;;  %v6042_v58 = vshrl.u32 %v19900_v44, 16  ;;  %v6056_v54 = vshrl.u32 %v19908_v6, 16  ;;  %v23868_v23 = vld [vmem:[#allocation34_spill] sm:$0xff] }
 0x278   :  { %v6059_v37 = vshll.u32 %v19908_v6, 16  ;;  %v19921_v27 = vsel %vm16227_vm2, %v5993_v47, %v5997_v8  ;;  %v14454_v8 = vcombine.low %v19877_v14, %v19881_v55  ;;  %v14355_v47 = vld [vmem:[%s23714_s0 + $0x438] sm:$0x11]  ;;  %v6047_v7 = vrot.slane %v6045_v12, 5 }
 0x279   :  { %23865 = vst [vmem:[#allocation30_spill] sm:$0xff] %v19902_v24  ;;  %v19913_v5 = vadd.f32 %v3942_v21, %v2710_v9  ;;  %4893 = vmatmul.mubr.bf16.gmra.mrb[28].mxu1 %v14212_v0  ;;  %6783 = vmatmul.mubr.bf16.gmra.mrb[28].mxu0 %v14452_v36  ;;  %v6034_v0 = vor.u32 %v6033_v10, %v6030_v18  ;;  %v6021_v21 = vrot.slane %v6020_v45, 4  ;;  %v6044_v52 = vrot.slane %v6042_v58, 4 }
 0x27a   :  { %4900 = vmatprep.mubr.bf16.mxu1 %v14215_v25  ;;  %6790 = vmatprep.mubr.bf16.mxu0 %v14455_v22  ;;  %v14214_v25 = vcombine.low %v19777_v40, %v19785_v59  ;;  %v6025_v22 = vrot.slane %v6023_v26, 5  ;;  %v14217_v40 = vcombine.high %v19819_v35, %v19824_v11  ;;  %v14457_v59 = vcombine.high %v19921_v27, %v19925_v46  ;;  %v23870_v26 = vld [vmem:[#allocation35_spill] sm:$0xff] }
 0x27b   :  { %23867 = vst [vmem:[#allocation31_spill] sm:$0xff] %v19913_v5  ;;  %v6058_v45 = vrot.slane %v6056_v54, 4  ;;  %v6061_v14 = vrot.slane %v6059_v37, 5  ;;  %v19953_v5 = vld [vmem:[%s23714_s0 + $0x480] sm:$0xff]  ;;  %v6048_v37 = vor.u32 %v6047_v7, %v6044_v52  ;;  %v14216_v7 = vcombine.low %v19819_v35, %v19824_v11 }
 0x27c   :  { %v2566_v36 = vpop.f32.mrb[180].mxu1  ;;  %v3947_v42 = vpop.f32.mrb[180].mxu0 }
 0x27d   :  { %v2711_v9 = vadd.f32 %v2566_v36, %v23868_v23  ;;  %v2568_v33 = vpop.f32.mrb[181].mxu1  ;;  %v3949_v63 = vpop.f32.mrb[181].mxu0  ;;  %v6035_v23 = vrot.slane %v6034_v0, 4  ;;  %v6062_v0 = vor.u32 %v6061_v14, %v6058_v45  ;;  %v6049_v14 = vrot.slane %v6048_v37, 4 }
 0x27e   :  { %v2569_v18 = vpop.f32.mrb[182].mxu1  ;;  %v3950_v10 = vpop.f32.mrb[182].mxu0  ;;  %v6039_v33 = vrot.slane %v6037_v30, 5  ;;  %v19948_v63 = vld [vmem:[%s23714_s0 + $0x470] sm:$0xff] }
 0x27f   :  { %v19942_v55 = vadd.f32 %v3947_v42, %v2711_v9  ;;  %v2712_v36 = vadd.f32 %v2569_v18, %v23870_v26  ;;  %v2571_v58 = vpop.f32.mrb[183].mxu1  ;;  %v3952_v12 = vpop.f32.mrb[183].mxu0  ;;  %v6051_v42 = vshll.u32 %v14355_v47, 16  ;;  %v6065_v9 = vshll.u32 %v14357_v3, 16 }
 0x280   :  { %v6070_v30 = vshrl.u32 %v19948_v63, 16  ;;  %v6073_v18 = vshll.u32 %v19948_v63, 16  ;;  %v19961_v26 = vsel %vm16227_vm2, %v6021_v21, %v6025_v22  ;;  %v14219_v21 = vcombine.high %v19858_v15, %v19869_v28  ;;  %v23872_v22 = vld [vmem:[#allocation36_spill] sm:$0xff]  ;;  %v19979_v12 = vld [vmem:[%s23714_s0 + $0x490] sm:$0xff] }
 0x281   :  { %23869 = vst [vmem:[#allocation32_spill] sm:$0xff] %v19942_v55  ;;  %v19955_v54 = vadd.f32 %v3950_v10, %v2712_v36  ;;  %4901 = vmatmul.mubr.bf16.gmra.mrb[32].mxu1 %v14214_v25  ;;  %6791 = vmatmul.mubr.bf16.gmra.mrb[32].mxu0 %v14454_v8  ;;  %v19965_v10 = vsel %vm16227_vm2, %v6035_v23, %v6039_v33  ;;  %v6084_v25 = vshrl.u32 %v19953_v5, 16  ;;  %v6087_v8 = vshll.u32 %v19953_v5, 16 }
 0x282   :  { %4908 = vmatprep.mubr.bf16.mxu1 %v14217_v40  ;;  %6798 = vmatprep.mubr.bf16.mxu0 %v14457_v59  ;;  %v14456_v40 = vcombine.low %v19921_v27, %v19925_v46  ;;  %v6053_v36 = vrot.slane %v6051_v42, 5  ;;  %v6067_v58 = vrot.slane %v6065_v9, 5  ;;  %v14459_v11 = vcombine.high %v19961_v26, %v19965_v10  ;;  %v23874_v42 = vld [vmem:[#allocation38_spill] sm:$0xff] }
 0x283   :  { %23871 = vst [vmem:[#allocation33_spill] sm:$0xff] %v19955_v54  ;;  %v6063_v27 = vrot.slane %v6062_v0, 4  ;;  %v6072_v46 = vrot.slane %v6070_v30, 4  ;;  %v6075_v33 = vrot.slane %v6073_v18, 5  ;;  %v6086_v54 = vrot.slane %v6084_v25, 4 }
 0x284   :  { %v2574_v47 = vpop.f32.mrb[184].mxu1  ;;  %v3955_v52 = vpop.f32.mrb[184].mxu0  ;;  %v6089_v55 = vrot.slane %v6087_v8, 5  ;;  %v14361_v0 = vld [vmem:[%s23714_s0 + $0x488] sm:$0x11]  ;;  %v6098_v30 = vshrl.u32 %v19979_v12, 16 }
 0x285   :  { %v2713_v59 = vadd.f32 %v2574_v47, %v23872_v22  ;;  %v2576_v3 = vpop.f32.mrb[185].mxu1  ;;  %v3957_v45 = vpop.f32.mrb[185].mxu0  ;;  %v19986_v47 = vld [vmem:[%s23714_s0 + $0x4a0] sm:$0xff]  ;;  %v6101_v18 = vshll.u32 %v19979_v12, 16  ;;  %v6076_v25 = vor.u32 %v6075_v33, %v6072_v46 }
 0x286   :  { %v2577_v23 = vpop.f32.mrb[186].mxu1  ;;  %v3958_v35 = vpop.f32.mrb[186].mxu0  ;;  %v14359_v45 = vld [vmem:[%s23714_s0 + $0x478] sm:$0x11] }
 0x287   :  { %v19988_v37 = vadd.f32 %v3955_v52, %v2713_v59  ;;  %v2714_v9 = vadd.f32 %v2577_v23, %v23874_v42  ;;  %v2579_v22 = vpop.f32.mrb[187].mxu1  ;;  %v3960_v3 = vpop.f32.mrb[187].mxu0  ;;  %v6112_v59 = vshrl.u32 %v19986_v47, 16  ;;  %v6115_v23 = vshll.u32 %v19986_v47, 16  ;;  %v23876_v33 = vld [vmem:[#allocation39_spill] sm:$0xff] }
 0x288   :  { %v6079_v8 = vshll.u32 %v14359_v45, 16  ;;  %v20005_v42 = vsel %vm16227_vm2, %v6049_v14, %v6053_v36  ;;  %v20009_v22 = vsel %vm16227_vm2, %v6063_v27, %v6067_v58  ;;  %v14218_v3 = vcombine.low %v19858_v15, %v19869_v28 }
 0x289   :  { %23873 = vst [vmem:[#allocation34_spill] sm:$0xff] %v19988_v37  ;;  %v19999_v52 = vadd.f32 %v3958_v35, %v2714_v9  ;;  %4909 = vmatmul.mubr.bf16.gmra.mrb[36].mxu1 %v14216_v7  ;;  %6799 = vmatmul.mubr.bf16.gmra.mrb[36].mxu0 %v14456_v40  ;;  %v6090_v35 = vor.u32 %v6089_v55, %v6086_v54  ;;  %v6093_v9 = vshll.u32 %v14361_v0, 16  ;;  %v6103_v46 = vrot.slane %v6101_v18, 5  ;;  %v14365_v55 = vld [vmem:[%s23714_s0 + $0x4a8] sm:$0x11]  ;;  %v20037_v37 = vld [vmem:[%s23714_s0 + $0x4c0] sm:$0xff] }
 0x28a   :  { %4916 = vmatprep.mubr.bf16.mxu1 %v14219_v21  ;;  %6806 = vmatprep.mubr.bf16.mxu0 %v14459_v11  ;;  %v14363_v21 = vld [vmem:[%s23714_s0 + $0x498] sm:$0x11]  ;;  %v6100_v11 = vrot.slane %v6098_v30, 4  ;;  %v14458_v58 = vcombine.low %v19961_v26, %v19965_v10  ;;  %v6114_v54 = vrot.slane %v6112_v59, 4  ;;  %v6117_v27 = vrot.slane %v6115_v23, 5  ;;  %v20029_v26 = vld [vmem:[%s23714_s0 + $0x4b0] sm:$0xff] }
 0x28b   :  { %23875 = vst [vmem:[#allocation35_spill] sm:$0xff] %v19999_v52  ;;  %v14221_v0 = vcombine.high %v19900_v44, %v19908_v6  ;;  %v14461_v30 = vcombine.high %v20005_v42, %v20009_v22  ;;  %v6077_v18 = vrot.slane %v6076_v25, 4  ;;  %v6095_v52 = vrot.slane %v6093_v9, 5 }
 0x28c   :  { %v2582_v7 = vpop.f32.mrb[188].mxu1  ;;  %v3963_v40 = vpop.f32.mrb[188].mxu0  ;;  %v6104_v25 = vor.u32 %v6103_v46, %v6100_v11  ;;  %v6121_v24 = vshll.u32 %v14365_v55, 16  ;;  %v6143_v9 = vshll.u32 %v20037_v37, 16  ;;  %v14220_v11 = vcombine.low %v19900_v44, %v19908_v6 }
 0x28d   :  { %v2715_v14 = vadd.f32 %v2582_v7, %v23876_v33  ;;  %v2584_v36 = vpop.f32.mrb[189].mxu1  ;;  %v3965_v45 = vpop.f32.mrb[189].mxu0  ;;  %v6081_v7 = vrot.slane %v6079_v8, 5  ;;  %v23877_v33 = vld [vmem:[#allocation41_spill] sm:$0xff]  ;;  %v6107_v8 = vshll.u32 %v14363_v21, 16  ;;  %v14460_v55 = vcombine.low %v20005_v42, %v20009_v22 }
 0x28e   :  { %v2585_v28 = vpop.f32.mrb[190].mxu1  ;;  %v3966_v15 = vpop.f32.mrb[190].mxu0  ;;  %v6091_v45 = vrot.slane %v6090_v35, 4  ;;  %v6140_v35 = vshrl.u32 %v20037_v37, 16  ;;  %v14367_v42 = vld [vmem:[%s23714_s0 + $0x4b8] sm:$0x11] }
 0x28f   :  { %v20031_v10 = vadd.f32 %v3963_v40, %v2715_v14  ;;  %v2716_v59 = vadd.f32 %v2585_v28, %v23877_v33  ;;  %v2587_v23 = vpop.f32.mrb[191].mxu1  ;;  %v3968_v36 = vpop.f32.mrb[191].mxu0  ;;  %v6118_v40 = vor.u32 %v6117_v27, %v6114_v54  ;;  %v6126_v14 = vshrl.u32 %v20029_v26, 16 }
 0x290   :  { %v6129_v28 = vshll.u32 %v20029_v26, 16  ;;  %v20049_v21 = vsel %vm16227_vm2, %v6077_v18, %v6081_v7  ;;  %v6105_v54 = vrot.slane %v6104_v25, 4  ;;  %v6109_v27 = vrot.slane %v6107_v8, 5  ;;  %v14369_v25 = vld [vmem:[%s23714_s0 + $0x4c8] sm:$0x11]  ;;  %v20072_v8 = vld [vmem:[%s23714_s0 + $0x4d0] sm:$0xff] }
 0x291   :  { %v20039_v61 = vadd.f32 %v3966_v15, %v2716_v59  ;;  %4917 = vmatmul.mubr.bf16.gmra.mrb[40].mxu1 %v14218_v3  ;;  %6807 = vmatmul.mubr.bf16.gmra.mrb[40].mxu0 %v14458_v58  ;;  %v20053_v3 = vsel %vm16227_vm2, %v6091_v45, %v6095_v52  ;;  %v6123_v15 = vrot.slane %v6121_v24, 5  ;;  %v6119_v6 = vrot.slane %v6118_v40, 4 }
 0x292   :  { %4924 = vmatprep.mubr.bf16.mxu1 %v14221_v0  ;;  %6814 = vmatprep.mubr.bf16.mxu0 %v14461_v30  ;;  %v6128_v33 = vrot.slane %v6126_v14, 4  ;;  %v6131_v18 = vrot.slane %v6129_v28, 5  ;;  %v14223_v52 = vcombine.high %v19948_v63, %v19953_v5  ;;  %v14463_v23 = vcombine.high %v20049_v21, %v20053_v3 }
 0x293   :  { %v6142_v24 = vrot.slane %v6140_v35, 4  ;;  %v6145_v22 = vrot.slane %v6143_v9, 5  ;;  %v20078_v14 = vsel %vm16227_vm2, %v6105_v54, %v6109_v27  ;;  %v20087_v28 = vsel %vm16227_vm2, %v6119_v6, %v6123_v15 }
 0x294   :  { %v4710_v46 = vpop.f32.mrb[192].mxu1  ;;  %v6600_v58 = vpop.f32.mrb[192].mxu0  ;;  %v6132_v35 = vor.u32 %v6131_v18, %v6128_v33  ;;  %v6135_v9 = vshll.u32 %v14367_v42, 16  ;;  %v6149_v54 = vshll.u32 %v14369_v25, 16  ;;  %v6154_v27 = vshrl.u32 %v20072_v8, 16  ;;  %v23879_v18 = vld [vmem:[#allocation42_spill] sm:$0xff] }
 0x295   :  { %v5029_v0 = vadd.f32 %v4710_v46, %v18556_v19  ;;  %v4712_v30 = vpop.f32.mrb[193].mxu1  ;;  %v6602_v44 = vpop.f32.mrb[193].mxu0  ;;  %v14222_v15 = vcombine.low %v19948_v63, %v19953_v5  ;;  %v14462_v6 = vcombine.low %v20049_v21, %v20053_v3  ;;  %v14225_v33 = vcombine.high %v19979_v12, %v19986_v47  ;;  %v23880_v25 = vld [vmem:[#allocation43_spill] sm:$0xff] }
 0x296   :  { %v4713_v7 = vpop.f32.mrb[194].mxu1  ;;  %v6603_v59 = vpop.f32.mrb[194].mxu0  ;;  %v6133_v42 = vrot.slane %v6132_v35, 4  ;;  %v6156_v5 = vrot.slane %v6154_v27, 4  ;;  %v14373_v35 = vld [vmem:[%s23714_s0 + $0x4e8] sm:$0x11] }
 0x297   :  { %v5030_v19 = vadd.f32 %v4713_v7, %v18574_v1  ;;  %v4715_v36 = vpop.f32.mrb[195].mxu1  ;;  %v6605_v45 = vpop.f32.mrb[195].mxu0  ;;  %v20074_v40 = vadd.f32 %v6600_v58, %v5029_v0  ;;  %v20083_v1 = vld [vmem:[%s23714_s0 + $0x4e0] sm:$0xff]  ;;  %v6146_v58 = vor.u32 %v6145_v22, %v6142_v24  ;;  %v6157_v0 = vshll.u32 %v20072_v8, 16 }
 0x298   :  { %v6168_v30 = vshrl.u32 %v20083_v1, 16  ;;  %v6137_v24 = vrot.slane %v6135_v9, 5  ;;  %v6151_v45 = vrot.slane %v6149_v54, 5 }
 0x299   :  { %4925 = vmatmul.mubr.bf16.gmra.mrb[44].mxu1 %v14220_v11  ;;  %6815 = vmatmul.mubr.bf16.gmra.mrb[44].mxu0 %v14460_v55  ;;  %v20089_v46 = vadd.f32 %v6603_v59, %v5030_v19  ;;  %v6171_v11 = vshll.u32 %v20083_v1, 16  ;;  %v6147_v36 = vrot.slane %v6146_v58, 4  ;;  %v6159_v63 = vrot.slane %v6157_v0, 5 }
 0x29a   :  { %4932 = vmatprep.mubr.bf16.mxu1 %v14223_v52  ;;  %6822 = vmatprep.mubr.bf16.mxu0 %v14463_v23  ;;  %v14465_v23 = vcombine.high %v20078_v14, %v20087_v28  ;;  %v6138_v54 = vsel %vm16227_vm2, %v6133_v42, %v6137_v24  ;;  %v14227_v42 = vcombine.high %v20029_v26, %v20037_v37 }
 0x29b   :  { %23878 = vst [vmem:[#allocation36_spill] sm:$0xff] %v20089_v46  ;;  %v6160_v58 = vor.u32 %v6159_v63, %v6156_v5  ;;  %v6152_v27 = vsel %vm16227_vm2, %v6147_v36, %v6151_v45 }
 0x29c   :  { %v4718_v55 = vpop.f32.mrb[196].mxu1  ;;  %v6608_v44 = vpop.f32.mrb[196].mxu0  ;;  %v14467_v24 = vcombine.high %v6138_v54, %v6152_v27 }
 0x29d   :  { %v5031_v7 = vadd.f32 %v4718_v55, %v23879_v18  ;;  %v4720_v59 = vpop.f32.mrb[197].mxu1  ;;  %v6610_v52 = vpop.f32.mrb[197].mxu0  ;;  %v14371_v55 = vld [vmem:[%s23714_s0 + $0x4d8] sm:$0x11]  ;;  %v6170_v18 = vrot.slane %v6168_v30, 4  ;;  %v6177_v30 = vshll.u32 %v14373_v35, 16 }
 0x29e   :  { %v4721_v22 = vpop.f32.mrb[198].mxu1  ;;  %v6611_v19 = vpop.f32.mrb[198].mxu0  ;;  %v6173_v59 = vrot.slane %v6171_v11, 5  ;;  %v6161_v36 = vrot.slane %v6160_v58, 4  ;;  %v14489_v35 = vld [vmem:[%s23714_s0 + $0x28] sm:$0x11] }
 0x29f   :  { %v5032_v21 = vadd.f32 %v4721_v22, %v23880_v25  ;;  %v4723_v3 = vpop.f32.mrb[199].mxu1  ;;  %v6613_v46 = vpop.f32.mrb[199].mxu0  ;;  %v20108_v52 = vadd.f32 %v6608_v44, %v5031_v7 }
 0x2a0   :  { %v6163_v46 = vshll.u32 %v14371_v55, 16  ;;  %v6174_v0 = vor.u32 %v6173_v59, %v6170_v18  ;;  %v14488_v59 = vld [vmem:[%s23714_s0 + $0x20] sm:$0xee] }
 0x2a1   :  { %4933 = vmatmul.mubr.bf16.gmra.mrb[48].mxu1 %v14222_v15  ;;  %6823 = vmatmul.mubr.bf16.gmra.mrb[48].mxu0 %v14462_v6  ;;  %v20113_v9 = vadd.f32 %v6611_v19, %v5032_v21  ;;  %v6179_v21 = vrot.slane %v6177_v30, 5  ;;  %v14226_v30 = vcombine.low %v20029_v26, %v20037_v37 }
 0x2a2   :  { %4940 = vmatprep.mubr.bf16.mxu1 %v14225_v33  ;;  %6830 = vmatprep.mubr.bf16.mxu0 %v14465_v23  ;;  %v14224_v33 = vcombine.low %v19979_v12, %v19986_v47  ;;  %v14464_v23 = vcombine.low %v20078_v14, %v20087_v28  ;;  %v6165_v45 = vrot.slane %v6163_v46, 5  ;;  %v6175_v25 = vrot.slane %v6174_v0, 4  ;;  %v14487_v28 = vld [vmem:[%s23714_s0 + $0x18] sm:$0x11] }
 0x2a4   :  { %v4726_v11 = vpop.f32.mrb[200].mxu1  ;;  %v6616_v44 = vpop.f32.mrb[200].mxu0  ;;  %v6166_v47 = vsel %vm16227_vm2, %v6161_v36, %v6165_v45  ;;  %v6180_v14 = vsel %vm16227_vm2, %v6175_v25, %v6179_v21 }
 0x2a5   :  { %v5033_v7 = vadd.f32 %v4726_v11, %v18666_v43  ;;  %v4728_v15 = vpop.f32.mrb[201].mxu1  ;;  %v6618_v6 = vpop.f32.mrb[201].mxu0  ;;  %v14466_v11 = vcombine.low %v6138_v54, %v6152_v27  ;;  %v14491_v27 = vld [vmem:[%s23714_s0 + $0x38] sm:$0x11] }
 0x2a6   :  { %v4729_v22 = vpop.f32.mrb[202].mxu1  ;;  %v6619_v19 = vpop.f32.mrb[202].mxu0  ;;  %v14229_v15 = vcombine.high %v20072_v8, %v20083_v1  ;;  %v14469_v6 = vcombine.high %v6166_v47, %v6180_v14 }
 0x2a7   :  { %v5034_v5 = vadd.f32 %v4729_v22, %v18677_v62  ;;  %v4731_v63 = vpop.f32.mrb[203].mxu1  ;;  %v6621_v43 = vpop.f32.mrb[203].mxu0  ;;  %v20127_v3 = vadd.f32 %v6616_v44, %v5033_v7  ;;  %v14486_v62 = vld [vmem:[%s23714_s0 + $0x10] sm:$0xee] }
 0x2a8   :  { %v14492_v63 = vld [vmem:[%s23714_s0 + $0x40] sm:$0xee]  ;;  %v14493_v43 = vld [vmem:[%s23714_s0 + $0x48] sm:$0x11] }
 0x2a9   :  { %4941 = vmatmul.mubr.bf16.gmra.mrb[52].mxu1 %v14224_v33  ;;  %6831 = vmatmul.mubr.bf16.gmra.mrb[52].mxu0 %v14464_v23  ;;  %v20129_v12 = vadd.f32 %v6619_v19, %v5034_v5  ;;  %v14614_v33 = vrot.slane %v14486_v62, 9  ;;  %v7305_v23 = vrot.slane %v14487_v28, 5  ;;  %v14228_v28 = vcombine.low %v20072_v8, %v20083_v1 }
 0x2aa   :  { %4948 = vmatprep.mubr.bf16.mxu1 %v14227_v42  ;;  %6838 = vmatprep.mubr.bf16.mxu0 %v14467_v24  ;;  %v14615_v24 = vrot.slane %v14488_v59, 9 }
 0x2ab   :  { %v7306_v26 = vsel %vm16533_vm5, %v14614_v33, %v7305_v23  ;;  %v14496_v23 = vld [vmem:[%s23714_s0 + $0x60] sm:$0xee] }
 0x2ac   :  { %v4734_v55 = vpop.f32.mrb[204].mxu1  ;;  %v6624_v18 = vpop.f32.mrb[204].mxu0 }
 0x2ad   :  { %v5035_v58 = vadd.f32 %v4734_v55, %v18723_v31  ;;  %v4736_v46 = vpop.f32.mrb[205].mxu1  ;;  %v6626_v0 = vpop.f32.mrb[205].mxu0  ;;  %v7309_v31 = vrot.slane %v14489_v35, 5  ;;  %v14468_v55 = vcombine.low %v6166_v47, %v6180_v14  ;;  %v14495_v14 = vld [vmem:[%s23714_s0 + $0x58] sm:$0x11] }
 0x2ae   :  { %v4737_v44 = vpop.f32.mrb[206].mxu1  ;;  %v6627_v7 = vpop.f32.mrb[206].mxu0  ;;  %v7313_v0 = vrot.slane %v14491_v27, 5 }
 0x2af   :  { %v5036_v22 = vadd.f32 %v4737_v44, %v18731_v57  ;;  %v4739_v19 = vpop.f32.mrb[207].mxu1  ;;  %v6629_v42 = vpop.f32.mrb[207].mxu0  ;;  %v20153_v36 = vadd.f32 %v6624_v18, %v5035_v58  ;;  %v7310_v54 = vsel %vm16533_vm5, %v14615_v24, %v7309_v31  ;;  %v14490_v57 = vld [vmem:[%s23714_s0 + $0x30] sm:$0xee] }
 0x2b0   :  { %v14711_v35 = vcombine.high %v7306_v26, %v7310_v54  ;;  %v15813_v58 = vld [vmem:[%s23714_s0 + $0x24] ss:$16 sps:$4 sm:$0xff]   ;;  %v14616_v46 = vrot.slane %v14490_v57, 9  ;;  %v14710_v31 = vcombine.low %v7306_v26, %v7310_v54  ;;  %v15811_v57 = vld [vmem:[%s23714_s0 + $0x20] ss:$16 sps:$4 sm:$0xff]  }
 0x2b1   :  { %4949 = vmatmul.mubr.bf16.gmra.mrb[56].mxu1 %v14226_v30  ;;  %6839 = vmatmul.mubr.bf16.gmra.mrb[56].mxu0 %v14466_v11  ;;  %v20155_v37 = vadd.f32 %v6627_v7, %v5036_v22  ;;  %v7317_v7 = vrot.slane %v14493_v43, 5  ;;  %v14497_v22 = vld [vmem:[%s23714_s0 + $0x68] sm:$0x11] }
 0x2b2   :  { %4956 = vmatprep.mubr.bf16.mxu1 %v14229_v15  ;;  %6846 = vmatprep.mubr.bf16.mxu0 %v14469_v6  ;;  %v20186_v1 = vsel %vm16533_vm5, %v14616_v46, %v7313_v0  ;;  %v23881_v26 = vld [vmem:[#allocation44_spill] sm:$0xff] }
 0x2b3   :  { %v15823_v46 = vld [vmem:[%s23713_s1 + $0x408] sm:$0xff]  }
 0x2b4   :  { %v4742_v45 = vpop.f32.mrb[208].mxu1  ;;  %v6632_v5 = vpop.f32.mrb[208].mxu0 }
 0x2b5   :  { %v5037_v25 = vadd.f32 %v4742_v45, %v18766_v56  ;;  %v4744_v21 = vpop.f32.mrb[209].mxu1  ;;  %v6634_v62 = vpop.f32.mrb[209].mxu0  ;;  %v14617_v56 = vrot.slane %v14492_v63, 9  ;;  %v15815_v63 = vld [vmem:[%s23713_s1 + $0x400] sm:$0xff]  }
 0x2b6   :  { %v4745_v18 = vpop.f32.mrb[210].mxu1  ;;  %v6635_v59 = vpop.f32.mrb[210].mxu0 }
 0x2b7   :  { %v5038_v30 = vadd.f32 %v4745_v18, %v18774_v39  ;;  %v4747_v11 = vpop.f32.mrb[211].mxu1  ;;  %v6637_v44 = vpop.f32.mrb[211].mxu0  ;;  %v20180_v15 = vadd.f32 %v6632_v5, %v5037_v25  ;;  %v20190_v47 = vsel %vm16533_vm5, %v14617_v56, %v7317_v7  ;;  %v14494_v39 = vld [vmem:[%s23714_s0 + $0x50] sm:$0xee]  ;;  %v15814_v5 = vld [vmem:[%s23713_s1 + $0x380] sm:$0xff]   ;;  %v7321_v25 = vrot.slane %v14495_v14, 5 }
 0x2b8   :  { %v14618_v43 = vrot.slane %v14494_v39, 9  ;;  %v7325_v18 = vrot.slane %v14497_v22, 5  ;;  %v14498_v11 = vld [vmem:[%s23714_s0 + $0x70] sm:$0xee]  ;;  %v14499_v44 = vld [vmem:[%s23714_s0 + $0x78] sm:$0x11]  ;;  %v14712_v22 = vcombine.low %v20186_v1, %v20190_v47 }
 0x2b9   :  { %4957 = vmatmul.mubr.bf16.gmra.mrb[60].mxu1 %v14228_v28  ;;  %6847 = vmatmul.mubr.bf16.gmra.mrb[60].mxu0 %v14468_v55  ;;  %v20182_v8 = vadd.f32 %v6635_v59, %v5038_v30  ;;  %v15818_v28 = vld [vmem:[%s23714_s0 + $0x44] ss:$16 sps:$4 sm:$0xff]   ;;  %v14619_v55 = vrot.slane %v14496_v23, 9  ;;  %v14501_v14 = vld [vmem:[%s23714_s0 + $0x88] sm:$0x11] }
 0x2ba   :  { %7976 = vmatprep.mubr.bf16.mxu1 %v14711_v35  ;;  %8971 = vmatprep.mubr.bf16.mxu0 %v15813_v58  ;;  %v15822_v58 = vld [vmem:[%s23713_s1 + $0x388] sm:$0xff]   ;;  %v20232_v0 = vsel %vm16533_vm5, %v14618_v43, %v7321_v25  ;;  %v14500_v39 = vld [vmem:[%s23714_s0 + $0x80] sm:$0xee]  ;;  %v15831_v43 = vld [vmem:[%s23713_s1 + $0x410] sm:$0xff]  }
 0x2bb   :  { %v20236_v30 = vsel %vm16533_vm5, %v14619_v55, %v7325_v18  ;;  %v15839_v55 = vld [vmem:[%s23713_s1 + $0x418] sm:$0xff]  }
 0x2bc   :  { %v4750_v6 = vpop.f32.mrb[212].mxu1  ;;  %v6640_v33 = vpop.f32.mrb[212].mxu0 }
 0x2bd   :  { %v5039_v19 = vadd.f32 %v4750_v6, %v18809_v34  ;;  %v4752_v42 = vpop.f32.mrb[213].mxu1  ;;  %v6642_v24 = vpop.f32.mrb[213].mxu0  ;;  %v14713_v34 = vcombine.high %v20186_v1, %v20190_v47 }
 0x2be   :  { %v4753_v27 = vpop.f32.mrb[214].mxu1  ;;  %v6643_v45 = vpop.f32.mrb[214].mxu0 }
 0x2bf   :  { %v5040_v54 = vadd.f32 %v4753_v27, %v23881_v26  ;;  %v4755_v21 = vpop.f32.mrb[215].mxu1  ;;  %v6645_v62 = vpop.f32.mrb[215].mxu0  ;;  %v20220_v59 = vadd.f32 %v6640_v33, %v5039_v19  ;;  %v15816_v19 = vld [vmem:[%s23714_s0 + $0x40] ss:$16 sps:$4 sm:$0xff]   ;;  %v7329_v27 = vrot.slane %v14499_v44, 5 }
 0x2c0   :  { %v14502_v26 = vld [vmem:[%s23714_s0 + $0xb0] sm:$0xee]  ;;  %v14503_v62 = vld [vmem:[%s23714_s0 + $0xb8] sm:$0x11] }
 0x2c1   :  { %7977 = vmatmul.mubr.bf16.vlgmr.msra.gmra.mrb[64].mxu1 %v14710_v31  ;;  %8972 = vmatmul.mubr.bf16.vlgmr.msra.gmra.mrb[64].mxu0 %v15811_v57  ;;  %v20222_v35 = vadd.f32 %v6643_v45, %v5040_v54  ;;  %v14715_v31 = vcombine.high %v20232_v0, %v20236_v30  ;;  %v15821_v57 = vld [vmem:[%s23714_s0 + $0x64] ss:$16 sps:$4 sm:$0xff]  }
 0x2c2   :  { %10830 = vmatpush1.bf16.msra.mxu1 %v15814_v5  ;;  %12208 = vmatpush1.bf16.msra.mxu0 %v15815_v63  ;;  %v14621_v5 = vrot.slane %v14500_v39, 9  ;;  %v7333_v63 = vrot.slane %v14501_v14, 5  ;;  %v14714_v39 = vcombine.low %v20232_v0, %v20236_v30  ;;  %v15819_v14 = vld [vmem:[%s23714_s0 + $0x60] ss:$16 sps:$4 sm:$0xff]  }
 0x2c3   :  { %7984 = vmatprep.mubr.bf16.mxu1 %v14713_v34  ;;  %8979 = vmatprep.mubr.bf16.mxu0 %v15818_v28  ;;  %v15830_v34 = vld [vmem:[%s23713_s1 + $0x390] sm:$0xff]   ;;  %v15838_v28 = vld [vmem:[%s23713_s1 + $0x398] sm:$0xff]  }
 0x2c4   :  { %v4758_v56 = vpop.f32.mrb[216].mxu1  ;;  %v6648_v7 = vpop.f32.mrb[216].mxu0  ;;  %10831 = vmatprep.subr.bf16.mxu1 %v23802_v38  ;;  %12209 = vmatprep.subr.bf16.mxu0 %v23802_v38  ;;  %v20285_v21 = vsel %vm16533_vm5, %v14621_v5, %v7333_v63 }
 0x2c5   :  { %v5041_v6 = vadd.f32 %v4758_v56, %v18864_v2  ;;  %v4760_v33 = vpop.f32.mrb[217].mxu1  ;;  %v6650_v23 = vpop.f32.mrb[217].mxu0  ;;  %v14620_v2 = vrot.slane %v14498_v11, 9  ;;  %v14505_v11 = vld [vmem:[%s23714_s0 + $0xc8] sm:$0x11] }
 0x2c6   :  { %v4761_v42 = vpop.f32.mrb[218].mxu1  ;;  %v6651_v24 = vpop.f32.mrb[218].mxu0  ;;  %10832 = vmatpush1.bf16.msra.mxu1 %v15822_v58  ;;  %12210 = vmatpush1.bf16.msra.mxu0 %v15823_v46  ;;  %v14504_v46 = vld [vmem:[%s23714_s0 + $0xc0] sm:$0xee]  ;;  %v7341_v30 = vrot.slane %v14505_v11, 5 }
 0x2c7   :  { %v5042_v45 = vadd.f32 %v4761_v42, %v18882_v50  ;;  %v4763_v1 = vpop.f32.mrb[219].mxu1  ;;  %v6653_v47 = vpop.f32.mrb[219].mxu0  ;;  %10833 = vmatprep.subr.bf16.mxu1 %v23802_v38  ;;  %12211 = vmatprep.subr.bf16.mxu0 %v23802_v38  ;;  %v20272_v25 = vadd.f32 %v6648_v7, %v5041_v6  ;;  %v20281_v54 = vsel %vm16533_vm5, %v14620_v2, %v7329_v27  ;;  %v23882_v42 = vld [vmem:[#allocation45_spill] sm:$0xff]  ;;  %v14623_v0 = vrot.slane %v14504_v46, 9  ;;  %v15846_v2 = vld [vmem:[%s23713_s1 + $0x3a0] sm:$0xff]  }
 0x2c8   :  { %v14717_v23 = vcombine.high %v20281_v54, %v20285_v21  ;;  %v15847_v27 = vld [vmem:[%s23713_s1 + $0x420] sm:$0xff]   ;;  %v14506_v47 = vld [vmem:[%s23714_s0 + $0xd0] sm:$0xee] }
 0x2c9   :  { %7985 = vmatmul.mubr.bf16.gmra.mrb[68].mxu1 %v14712_v22  ;;  %8980 = vmatmul.mubr.bf16.gmra.mrb[68].mxu0 %v15816_v19  ;;  %v20274_v50 = vadd.f32 %v6651_v24, %v5042_v45  ;;  %v15826_v22 = vld [vmem:[%s23714_s0 + $0x84] ss:$16 sps:$4 sm:$0xff]   ;;  %v14622_v19 = vrot.slane %v14502_v26, 9  ;;  %v20337_v63 = vsel %vm16533_vm5, %v14623_v0, %v7341_v30  ;;  %v15855_v26 = vld [vmem:[%s23713_s1 + $0x428] sm:$0xff]  }
 0x2ca   :  { %7992 = vmatprep.mubr.bf16.mxu1 %v14715_v31  ;;  %8987 = vmatprep.mubr.bf16.mxu0 %v15821_v57 }
 0x2cb   :  { %10834 = vmatpush1.bf16.msra.mxu1 %v15830_v34  ;;  %12212 = vmatpush1.bf16.msra.mxu0 %v15831_v43  ;;  %v14507_v34 = vld [vmem:[%s23714_s0 + $0xd8] sm:$0x11]  ;;  %v15854_v43 = vld [vmem:[%s23713_s1 + $0x3a8] sm:$0xff]  }
 0x2cc   :  { %v4766_v18 = vpop.f32.mrb[220].mxu1  ;;  %v6656_v58 = vpop.f32.mrb[220].mxu0  ;;  %10835 = vmatprep.subr.bf16.mxu1 %v23802_v38  ;;  %12213 = vmatprep.subr.bf16.mxu0 %v23802_v38 }
 0x2cd   :  { %v5043_v44 = vadd.f32 %v4766_v18, %v18922_v48  ;;  %v4768_v56 = vpop.f32.mrb[221].mxu1  ;;  %v6658_v7 = vpop.f32.mrb[221].mxu0  ;;  %v7337_v48 = vrot.slane %v14503_v62, 5  ;;  %v14509_v18 = vld [vmem:[%s23714_s0 + $0xe8] sm:$0x11] }
 0x2ce   :  { %v4769_v6 = vpop.f32.mrb[222].mxu1  ;;  %v6659_v33 = vpop.f32.mrb[222].mxu0  ;;  %v14716_v56 = vcombine.low %v20281_v54, %v20285_v21  ;;  %v15824_v7 = vld [vmem:[%s23714_s0 + $0x80] ss:$16 sps:$4 sm:$0xff]   ;;  %v7349_v21 = vrot.slane %v14509_v18, 5 }
 0x2cf   :  { %v5044_v24 = vadd.f32 %v4769_v6, %v23882_v42  ;;  %v4771_v31 = vpop.f32.mrb[223].mxu1  ;;  %v6661_v57 = vpop.f32.mrb[223].mxu0  ;;  %10836 = vmatpush1.bf16.msra.mxu1 %v15838_v28  ;;  %12214 = vmatpush1.bf16.msra.mxu0 %v15839_v55  ;;  %v20324_v45 = vadd.f32 %v6656_v58, %v5043_v44  ;;  %v20333_v5 = vsel %vm16533_vm5, %v14622_v19, %v7337_v48  ;;  %v14508_v55 = vld [vmem:[%s23714_s0 + $0xe0] sm:$0xee]  ;;  %v23883_v58 = vld [vmem:[#allocation46_spill] sm:$0xff]  ;;  %v23884_v19 = vld [vmem:[#allocation47_spill] sm:$0xff] }
 0x2d0   :  { %10837 = vmatprep.subr.bf16.mxu1 %v23802_v38  ;;  %12215 = vmatprep.subr.bf16.mxu0 %v23802_v38  ;;  %v14719_v6 = vcombine.high %v20333_v5, %v20337_v63  ;;  %v14625_v54 = vrot.slane %v14508_v55, 9  ;;  %v15862_v31 = vld [vmem:[%s23713_s1 + $0x3b0] sm:$0xff]   ;;  %v14512_v55 = vld [vmem:[%s23714_s0 + $0x100] sm:$0xee]  ;;  %v14513_v18 = vld [vmem:[%s23714_s0 + $0x108] sm:$0x11] }
 0x2d1   :  { %7993 = vmatmul.mubr.bf16.gmra.mrb[72].mxu1 %v14714_v39  ;;  %8988 = vmatmul.mubr.bf16.gmra.mrb[72].mxu0 %v15819_v14  ;;  %v20326_v1 = vadd.f32 %v6659_v33, %v5044_v24  ;;  %v15829_v33 = vld [vmem:[%s23714_s0 + $0xc4] ss:$16 sps:$4 sm:$0xff]  }
 0x2d2   :  { %8000 = vmatprep.mubr.bf16.mxu1 %v14717_v23  ;;  %8995 = vmatprep.mubr.bf16.mxu0 %v15826_v22  ;;  %v14624_v23 = vrot.slane %v14506_v47, 9  ;;  %v7345_v22 = vrot.slane %v14507_v34, 5  ;;  %v15863_v57 = vld [vmem:[%s23713_s1 + $0x430] sm:$0xff]   ;;  %v20389_v47 = vsel %vm16533_vm5, %v14625_v54, %v7349_v21  ;;  %v14511_v34 = vld [vmem:[%s23714_s0 + $0xf8] sm:$0x11]  ;;  %v15878_v54 = vld [vmem:[%s23713_s1 + $0x3c0] sm:$0xff]  }
 0x2d3   :  { %10838 = vmatpush1.bf16.msra.mxu1 %v15846_v2  ;;  %12216 = vmatpush1.bf16.msra.mxu0 %v15847_v27  ;;  %v14510_v2 = vld [vmem:[%s23714_s0 + $0xf0] sm:$0xee]  ;;  %v15879_v21 = vld [vmem:[%s23713_s1 + $0x440] sm:$0xff]  }
 0x2d4   :  { %v4774_v62 = vpop.f32.mrb[224].mxu1  ;;  %v6664_v28 = vpop.f32.mrb[224].mxu0  ;;  %10839 = vmatprep.subr.bf16.mxu1 %v23802_v38  ;;  %12217 = vmatprep.subr.bf16.mxu0 %v23802_v38  ;;  %v20385_v27 = vsel %vm16533_vm5, %v14624_v23, %v7345_v22  ;;  %v14626_v23 = vrot.slane %v14510_v2, 9  ;;  %v7353_v22 = vrot.slane %v14511_v34, 5  ;;  %v14514_v2 = vld [vmem:[%s23714_s0 + $0x110] sm:$0xee] }
 0x2d5   :  { %v5045_v46 = vadd.f32 %v4774_v62, %v23883_v58  ;;  %v4776_v11 = vpop.f32.mrb[225].mxu1  ;;  %v6666_v44 = vpop.f32.mrb[225].mxu0  ;;  %v23885_v58 = vld [vmem:[#allocation22_spill] sm:$0xff] }
 0x2d6   :  { %v4777_v39 = vpop.f32.mrb[226].mxu1  ;;  %v6667_v14 = vpop.f32.mrb[226].mxu0  ;;  %v20437_v34 = vsel %vm16533_vm5, %v14626_v23, %v7353_v22  ;;  %v15837_v23 = vld [vmem:[%s23714_s0 + $0x104] ss:$16 sps:$4 sm:$0xff]   ;;  %v14628_v22 = vrot.slane %v14514_v2, 9 }
 0x2d7   :  { %v5046_v48 = vadd.f32 %v4777_v39, %v23884_v19  ;;  %v4779_v42 = vpop.f32.mrb[227].mxu1  ;;  %v6669_v24 = vpop.f32.mrb[227].mxu0  ;;  %10840 = vmatpush1.bf16.msra.mxu1 %v15854_v43  ;;  %12218 = vmatpush1.bf16.msra.mxu0 %v15855_v26  ;;  %v20376_v0 = vadd.f32 %v6664_v28, %v5045_v46  ;;  %v15870_v43 = vld [vmem:[%s23713_s1 + $0x3b8] sm:$0xff]   ;;  %v23886_v19 = vld [vmem:[#allocation24_spill] sm:$0xff]  ;;  %v14518_v2 = vld [vmem:[%s23714_s0 + $0x150] sm:$0xee] }
 0x2d8   :  { %10841 = vmatprep.subr.bf16.mxu1 %v23802_v38  ;;  %12219 = vmatprep.subr.bf16.mxu0 %v23802_v38  ;;  %v15871_v26 = vld [vmem:[%s23713_s1 + $0x438] sm:$0xff]  }
 0x2d9   :  { %8001 = vmatmul.mubr.bf16.gmra.mrb[76].mxu1 %v14716_v56  ;;  %8996 = vmatmul.mubr.bf16.gmra.mrb[76].mxu0 %v15824_v7  ;;  %v20378_v30 = vadd.f32 %v6667_v14, %v5046_v48  ;;  %v14718_v56 = vcombine.low %v20333_v5, %v20337_v63  ;;  %v15827_v7 = vld [vmem:[%s23714_s0 + $0xc0] ss:$16 sps:$4 sm:$0xff]   ;;  %v14627_v5 = vrot.slane %v14512_v55, 9  ;;  %v7357_v63 = vrot.slane %v14513_v18, 5 }
 0x2da   :  { %8008 = vmatprep.mubr.bf16.mxu1 %v14719_v6  ;;  %9003 = vmatprep.mubr.bf16.mxu0 %v15829_v33  ;;  %v14721_v6 = vcombine.high %v20385_v27, %v20389_v47  ;;  %v15834_v33 = vld [vmem:[%s23714_s0 + $0xe4] ss:$16 sps:$4 sm:$0xff]  }
 0x2db   :  { %10842 = vmatpush1.bf16.msra.mxu1 %v15862_v31  ;;  %12220 = vmatpush1.bf16.msra.mxu0 %v15863_v57 }
 0x2dc   :  { %v4782_v62 = vpop.f32.mrb[228].mxu1  ;;  %v6672_v28 = vpop.f32.mrb[228].mxu0  ;;  %10843 = vmatprep.subr.bf16.mxu1 %v23802_v38  ;;  %12221 = vmatprep.subr.bf16.mxu0 %v23802_v38 }
 0x2dd   :  { %v5047_v46 = vadd.f32 %v4782_v62, %v23885_v58  ;;  %v4784_v11 = vpop.f32.mrb[229].mxu1  ;;  %v6674_v44 = vpop.f32.mrb[229].mxu0  ;;  %v15886_v62 = vld [vmem:[%s23713_s1 + $0x3c8] sm:$0xff]   ;;  %v14516_v58 = vld [vmem:[%s23714_s0 + $0x120] sm:$0xee] }
 0x2de   :  { %v4785_v39 = vpop.f32.mrb[230].mxu1  ;;  %v6675_v14 = vpop.f32.mrb[230].mxu0 }
 0x2df   :  { %v5048_v48 = vadd.f32 %v4785_v39, %v23886_v19  ;;  %v4787_v42 = vpop.f32.mrb[231].mxu1  ;;  %v6677_v24 = vpop.f32.mrb[231].mxu0  ;;  %10844 = vmatpush1.bf16.msra.mxu1 %v15870_v43  ;;  %12222 = vmatpush1.bf16.msra.mxu0 %v15871_v26  ;;  %v20428_v31 = vadd.f32 %v6672_v28, %v5047_v46  ;;  %v20441_v43 = vsel %vm16533_vm5, %v14627_v5, %v7357_v63  ;;  %v14515_v26 = vld [vmem:[%s23714_s0 + $0x118] sm:$0x11]  ;;  %v15887_v28 = vld [vmem:[%s23713_s1 + $0x448] sm:$0xff]   ;;  %v15895_v5 = vld [vmem:[%s23713_s1 + $0x450] sm:$0xff]  }
 0x2e0   :  { %10845 = vmatprep.subr.bf16.mxu1 %v23802_v38  ;;  %12223 = vmatprep.subr.bf16.mxu0 %v23802_v38  ;;  %v14517_v46 = vld [vmem:[%s23714_s0 + $0x128] sm:$0x11]  ;;  %v15832_v39 = vld [vmem:[%s23714_s0 + $0xe0] ss:$16 sps:$4 sm:$0xff]  }
 0x2e1   :  { %8009 = vmatmul.mubr.bf16.gmra.mrb[80].mxu1 %v14718_v56  ;;  %9004 = vmatmul.mubr.bf16.gmra.mrb[80].mxu0 %v15827_v7  ;;  %v20430_v57 = vadd.f32 %v6675_v14, %v5048_v48  ;;  %v14720_v7 = vcombine.low %v20385_v27, %v20389_v47  ;;  %v14629_v27 = vrot.slane %v14516_v58, 9  ;;  %v7365_v47 = vrot.slane %v14517_v46, 5  ;;  %v15894_v24 = vld [vmem:[%s23713_s1 + $0x3d0] sm:$0xff]  }
 0x2e2   :  { %8016 = vmatprep.mubr.bf16.mxu1 %v14721_v6  ;;  %9011 = vmatprep.mubr.bf16.mxu0 %v15834_v33  ;;  %v14723_v33 = vcombine.high %v20437_v34, %v20441_v43 }
 0x2e3   :  { %10846 = vmatpush1.bf16.msra.mxu1 %v15878_v54  ;;  %12224 = vmatpush1.bf16.msra.mxu0 %v15879_v21  ;;  %v20490_v21 = vsel %vm16533_vm5, %v14629_v27, %v7365_v47  ;;  %v14522_v47 = vld [vmem:[%s23714_s0 + $0x170] sm:$0xee] }
 0x2e4   :  { %v4790_v55 = vpop.f32.mrb[232].mxu1  ;;  %v6680_v18 = vpop.f32.mrb[232].mxu0  ;;  %10847 = vmatprep.subr.bf16.mxu1 %v23802_v38  ;;  %12225 = vmatprep.subr.bf16.mxu0 %v23802_v38 }
 0x2e5   :  { %v5049_v11 = vadd.f32 %v4790_v55, %v19104_v17  ;;  %v4792_v44 = vpop.f32.mrb[233].mxu1  ;;  %v6682_v56 = vpop.f32.mrb[233].mxu0  ;;  %v7361_v17 = vrot.slane %v14515_v26, 5  ;;  %v14519_v26 = vld [vmem:[%s23714_s0 + $0x158] sm:$0x11] }
 0x2e6   :  { %v4793_v14 = vpop.f32.mrb[234].mxu1  ;;  %v6683_v6 = vpop.f32.mrb[234].mxu0  ;;  %v14520_v55 = vld [vmem:[%s23714_s0 + $0x160] sm:$0xee]  ;;  %v14722_v44 = vcombine.low %v20437_v34, %v20441_v43 }
 0x2e7   :  { %v5050_v19 = vadd.f32 %v4793_v14, %v19117_v13  ;;  %v4795_v48 = vpop.f32.mrb[235].mxu1  ;;  %v6685_v42 = vpop.f32.mrb[235].mxu0  ;;  %10848 = vmatpush1.bf16.msra.mxu1 %v15886_v62  ;;  %12226 = vmatpush1.bf16.msra.mxu0 %v15887_v28  ;;  %v20480_v63 = vadd.f32 %v6680_v18, %v5049_v11  ;;  %v20486_v54 = vsel %vm16533_vm5, %v14628_v22, %v7361_v17  ;;  %v14521_v18 = vld [vmem:[%s23714_s0 + $0x168] sm:$0x11]  ;;  %v15835_v56 = vld [vmem:[%s23714_s0 + $0x100] ss:$16 sps:$4 sm:$0xff]  }
 0x2e8   :  { %10849 = vmatprep.subr.bf16.mxu1 %v23802_v38  ;;  %12227 = vmatprep.subr.bf16.mxu0 %v23802_v38  ;;  %v14725_v14 = vcombine.high %v20486_v54, %v20490_v21  ;;  %v14631_v34 = vrot.slane %v14520_v55, 9  ;;  %v7373_v43 = vrot.slane %v14521_v18, 5  ;;  %v15902_v48 = vld [vmem:[%s23713_s1 + $0x3d8] sm:$0xff]  }
 0x2e9   :  { %8017 = vmatmul.mubr.bf16.gmra.mrb[84].mxu1 %v14720_v7  ;;  %9012 = vmatmul.mubr.bf16.gmra.mrb[84].mxu0 %v15832_v39  ;;  %v20482_v13 = vadd.f32 %v6683_v6, %v5050_v19  ;;  %v15842_v6 = vld [vmem:[%s23714_s0 + $0x124] ss:$16 sps:$4 sm:$0xff]  }
 0x2ea   :  { %8024 = vmatprep.mubr.bf16.mxu1 %v14723_v33  ;;  %9019 = vmatprep.mubr.bf16.mxu0 %v15837_v23  ;;  %v14630_v33 = vrot.slane %v14518_v2, 9 }
 0x2eb   :  { %10850 = vmatpush1.bf16.msra.mxu1 %v15894_v24  ;;  %12228 = vmatpush1.bf16.msra.mxu0 %v15895_v5  ;;  %v14523_v24 = vld [vmem:[%s23714_s0 + $0x178] sm:$0x11] }
 0x2ec   :  { %v4798_v62 = vpop.f32.mrb[236].mxu1  ;;  %v6688_v28 = vpop.f32.mrb[236].mxu0  ;;  %10851 = vmatprep.subr.bf16.mxu1 %v23802_v38  ;;  %12229 = vmatprep.subr.bf16.mxu0 %v23802_v38 }
 0x2ed   :  { %v5051_v58 = vadd.f32 %v4798_v62, %v19146_v60  ;;  %v4800_v46 = vpop.f32.mrb[237].mxu1  ;;  %v6690_v11 = vpop.f32.mrb[237].mxu0  ;;  %v7369_v60 = vrot.slane %v14519_v26, 5  ;;  %v14524_v26 = vld [vmem:[%s23714_s0 + $0x180] sm:$0xee] }
 0x2ee   :  { %v4801_v7 = vpop.f32.mrb[238].mxu1  ;;  %v6691_v39 = vpop.f32.mrb[238].mxu0  ;;  %v14525_v62 = vld [vmem:[%s23714_s0 + $0x188] sm:$0x11]  ;;  %v15840_v46 = vld [vmem:[%s23714_s0 + $0x120] ss:$16 sps:$4 sm:$0xff]  }
 0x2ef   :  { %v5052_v23 = vadd.f32 %v4801_v7, %v19163_v49  ;;  %v4803_v22 = vpop.f32.mrb[239].mxu1  ;;  %v6693_v17 = vpop.f32.mrb[239].mxu0  ;;  %v20518_v19 = vadd.f32 %v6688_v28, %v5051_v58  ;;  %v7370_v27 = vsel %vm16533_vm5, %v14630_v33, %v7369_v60  ;;  %v7374_v49 = vsel %vm16533_vm5, %v14631_v34, %v7373_v43  ;;  %10852 = vmatpush1.bf16.msra.mxu1 %v15902_v48  ;;  %v15903_v11 = vld [vmem:[%s23713_s1 + $0x458] sm:$0xff]   ;;  %v14526_v34 = vld [vmem:[%s23714_s0 + $0x190] sm:$0xee] }
 0x2f0   :  { %10853 = vmatprep.subr.bf16.mxu1 %v23802_v38  ;;  %v14724_v58 = vcombine.low %v20486_v54, %v20490_v21  ;;  %v14727_v7 = vcombine.high %v7370_v27, %v7374_v49  ;;  %v14633_v33 = vrot.slane %v14524_v26, 9  ;;  %v7381_v60 = vrot.slane %v14525_v62, 5  ;;  %12230 = vmatpush1.bf16.msra.mxu0 %v15903_v11  ;;  %v14527_v43 = vld [vmem:[%s23714_s0 + $0x198] sm:$0x11]  ;;  %v15850_v11 = vld [vmem:[%s23714_s0 + $0x184] ss:$16 sps:$4 sm:$0xff]  }
 0x2f1   :  { %8025 = vmatmul.mubr.bf16.gmra.mrb[88].mxu1 %v14722_v44  ;;  %9020 = vmatmul.mubr.bf16.gmra.mrb[88].mxu0 %v15835_v56  ;;  %v20523_v42 = vadd.f32 %v6691_v39, %v5052_v23  ;;  %v14632_v39 = vrot.slane %v14522_v47, 9 }
 0x2f2   :  { %8032 = vmatprep.mubr.bf16.mxu1 %v14725_v14  ;;  %9027 = vmatprep.mubr.bf16.mxu0 %v15842_v6  ;;  %v7377_v14 = vrot.slane %v14523_v24, 5  ;;  %v14528_v24 = vld [vmem:[%s23714_s0 + $0x1a0] sm:$0xee] }
 0x2f3   :  { %12231 = vmatprep.subr.bf16.mxu0 %v23802_v38 }
 0x2f4   :  { %v4806_v5 = vpop.f32.mrb[240].mxu1  ;;  %v6696_v2 = vpop.f32.mrb[240].mxu0  ;;  %v7378_v17 = vsel %vm16533_vm5, %v14632_v39, %v7377_v14  ;;  %v14635_v39 = vrot.slane %v14528_v24, 9 }
 0x2f5   :  { %v5053_v28 = vadd.f32 %v4806_v5, %v19202_v20  ;;  %v4808_v55 = vpop.f32.mrb[241].mxu1  ;;  %v6698_v18 = vpop.f32.mrb[241].mxu0  ;;  %v15845_v20 = vld [vmem:[%s23714_s0 + $0x164] ss:$16 sps:$4 sm:$0xff]   ;;  %v14529_v5 = vld [vmem:[%s23714_s0 + $0x1a8] sm:$0x11] }
 0x2f6   :  { %v4809_v44 = vpop.f32.mrb[242].mxu1  ;;  %v6699_v56 = vpop.f32.mrb[242].mxu0  ;;  %v15843_v55 = vld [vmem:[%s23714_s0 + $0x160] ss:$16 sps:$4 sm:$0xff]   ;;  %v7389_v14 = vrot.slane %v14529_v5, 5 }
 0x2f7   :  { %v5054_v6 = vadd.f32 %v4809_v44, %v19212_v32  ;;  %v4811_v54 = vpop.f32.mrb[243].mxu1  ;;  %v6701_v21 = vpop.f32.mrb[243].mxu0  ;;  %v20555_v23 = vadd.f32 %v6696_v2, %v5053_v28  ;;  %v7382_v32 = vsel %vm16533_vm5, %v14633_v33, %v7381_v60  ;;  %v14726_v28 = vcombine.low %v7370_v27, %v7374_v49  ;;  %v15910_v49 = vld [vmem:[%s23713_s1 + $0x3e0] sm:$0xff]   ;;  %v14531_v33 = vld [vmem:[%s23714_s0 + $0x1b8] sm:$0x11] }
 0x2f8   :  { %v14634_v44 = vrot.slane %v14526_v34, 9  ;;  %v14530_v21 = vld [vmem:[%s23714_s0 + $0x1b0] sm:$0xee]  ;;  %10854 = vmatpush1.bf16.msra.mxu1 %v15910_v49 }
 0x2f9   :  { %8033 = vmatmul.mubr.bf16.gmra.mrb[92].mxu1 %v14724_v58  ;;  %9028 = vmatmul.mubr.bf16.gmra.mrb[92].mxu0 %v15840_v46  ;;  %v20558_v22 = vadd.f32 %v6699_v56, %v5054_v6  ;;  %v14729_v46 = vcombine.high %v7378_v17, %v7382_v32  ;;  %v7385_v56 = vrot.slane %v14527_v43, 5  ;;  %v14532_v43 = vld [vmem:[%s23714_s0 + $0x1c0] sm:$0xee] }
 0x2fa   :  { %8040 = vmatprep.mubr.bf16.mxu1 %v14727_v7  ;;  %9035 = vmatprep.mubr.bf16.mxu0 %v15845_v20 }
 0x2fb   :  { %v7386_v54 = vsel %vm16533_vm5, %v14634_v44, %v7385_v56  ;;  %10855 = vmatprep.subr.bf16.mxu1 %v23802_v38  ;;  %v7393_v44 = vrot.slane %v14531_v33, 5  ;;  %v23890_v56 = vld [vmem:[#allocation28_spill] sm:$0xff]  ;;  %v14534_v33 = vld [vmem:[%s23714_s0 + $0x1f0] sm:$0xee] }
 0x2fc   :  { %v4814_v48 = vpop.f32.mrb[244].mxu1  ;;  %v6704_v47 = vpop.f32.mrb[244].mxu0 }
 0x2fd   :  { %v5055_v2 = vadd.f32 %v4814_v48, %v19248_v41  ;;  %v4816_v26 = vpop.f32.mrb[245].mxu1  ;;  %v6706_v62 = vpop.f32.mrb[245].mxu0  ;;  %v14533_v48 = vld [vmem:[%s23714_s0 + $0x1c8] sm:$0x11] }
 0x2fe   :  { %v4817_v18 = vpop.f32.mrb[246].mxu1  ;;  %v6707_v58 = vpop.f32.mrb[246].mxu0  ;;  %v14728_v26 = vcombine.low %v7378_v17, %v7382_v32  ;;  %v15848_v62 = vld [vmem:[%s23714_s0 + $0x180] ss:$16 sps:$4 sm:$0xff]  }
 0x2ff   :  { %v5056_v7 = vadd.f32 %v4817_v18, %v19253_v16  ;;  %v4819_v20 = vpop.f32.mrb[247].mxu1  ;;  %v6709_v41 = vpop.f32.mrb[247].mxu0  ;;  %v20584_v27 = vadd.f32 %v6704_v47, %v5055_v2  ;;  %v7390_v16 = vsel %vm16533_vm5, %v14635_v39, %v7389_v14  ;;  %v23889_v47 = vld [vmem:[#allocation26_spill] sm:$0xff] }
 0x300   :  { %v14637_v20 = vrot.slane %v14532_v43, 9  ;;  %v7397_v41 = vrot.slane %v14533_v48, 5  ;;  %v14536_v48 = vld [vmem:[%s23714_s0 + $0x200] sm:$0xee] }
 0x301   :  { %23887 = vst [vmem:[#allocation38_spill] sm:$0xff] %v20584_v27  ;;  %8041 = vmatmul.mubr.bf16.gmra.mrb[96].mxu1 %v14726_v28  ;;  %9036 = vmatmul.mubr.bf16.gmra.mrb[96].mxu0 %v15843_v55  ;;  %v20589_v6 = vadd.f32 %v6707_v58, %v5056_v7  ;;  %v15911_v28 = vld [vmem:[%s23713_s1 + $0x460] sm:$0xff]   ;;  %v14731_v58 = vcombine.high %v7386_v54, %v7390_v16 }
 0x302   :  { %8048 = vmatprep.mubr.bf16.mxu1 %v14729_v46  ;;  %9043 = vmatprep.mubr.bf16.mxu0 %v15850_v11  ;;  %v15853_v46 = vld [vmem:[%s23714_s0 + $0x1a4] ss:$16 sps:$4 sm:$0xff]   ;;  %v14636_v11 = vrot.slane %v14530_v21, 9  ;;  %v7398_v21 = vsel %vm16533_vm5, %v14637_v20, %v7397_v41  ;;  %v14639_v20 = vrot.slane %v14536_v48, 9  ;;  %v14539_v48 = vld [vmem:[%s23714_s0 + $0x218] sm:$0x11] }
 0x303   :  { %23888 = vst [vmem:[#allocation39_spill] sm:$0xff] %v20589_v6  ;;  %12232 = vmatpush1.bf16.msra.mxu0 %v15911_v28  ;;  %v15851_v28 = vld [vmem:[%s23714_s0 + $0x1a0] ss:$16 sps:$4 sm:$0xff]  }
 0x304   :  { %v4822_v60 = vpop.f32.mrb[248].mxu1  ;;  %v6712_v34 = vpop.f32.mrb[248].mxu0  ;;  %12233 = vmatprep.subr.bf16.mxu0 %v23802_v38  ;;  %v7394_v49 = vsel %vm16533_vm5, %v14636_v11, %v7393_v44  ;;  %v14638_v11 = vrot.slane %v14534_v33, 9 }
 0x305   :  { %v5057_v24 = vadd.f32 %v4822_v60, %v23889_v47  ;;  %v4824_v5 = vpop.f32.mrb[249].mxu1  ;;  %v6714_v2 = vpop.f32.mrb[249].mxu0  ;;  %v14535_v60 = vld [vmem:[%s23714_s0 + $0x1f8] sm:$0x11]  ;;  %v14537_v47 = vld [vmem:[%s23714_s0 + $0x208] sm:$0x11] }
 0x306   :  { %v4825_v55 = vpop.f32.mrb[250].mxu1  ;;  %v6715_v18 = vpop.f32.mrb[250].mxu0  ;;  %v7401_v44 = vrot.slane %v14535_v60, 5  ;;  %v7405_v41 = vrot.slane %v14537_v47, 5 }
 0x307   :  { %v5058_v7 = vadd.f32 %v4825_v55, %v23890_v56  ;;  %v4827_v17 = vpop.f32.mrb[251].mxu1  ;;  %v6717_v32 = vpop.f32.mrb[251].mxu0  ;;  %v20619_v39 = vadd.f32 %v6712_v34, %v5057_v24  ;;  %v23893_v24 = vld [vmem:[#allocation37_spill] sm:$0xff]  ;;  %v23894_v56 = vld [vmem:[#allocation40_spill] sm:$0xff] }
 0x308   :  { %v7402_v33 = vsel %vm16533_vm5, %v14638_v11, %v7401_v44  ;;  %v7406_v60 = vsel %vm16533_vm5, %v14639_v20, %v7405_v41  ;;  %v15861_v44 = vld [vmem:[%s23714_s0 + $0x204] ss:$16 sps:$4 sm:$0xff]  }
 0x309   :  { %23891 = vst [vmem:[#allocation41_spill] sm:$0xff] %v20619_v39  ;;  %8049 = vmatmul.mubr.bf16.gmra.mrb[100].mxu1 %v14728_v26  ;;  %9044 = vmatmul.mubr.bf16.gmra.mrb[100].mxu0 %v15848_v62  ;;  %v20622_v14 = vadd.f32 %v6715_v18, %v5058_v7  ;;  %v14730_v62 = vcombine.low %v7386_v54, %v7390_v16  ;;  %v15918_v16 = vld [vmem:[%s23713_s1 + $0x3e8] sm:$0xff]  }
 0x30a   :  { %8056 = vmatprep.mubr.bf16.mxu1 %v14731_v58  ;;  %9051 = vmatprep.mubr.bf16.mxu0 %v15853_v46  ;;  %v14733_v58 = vcombine.high %v7394_v49, %v7398_v21  ;;  %v15858_v46 = vld [vmem:[%s23714_s0 + $0x1c4] ss:$16 sps:$4 sm:$0xff]   ;;  %v14735_v11 = vcombine.high %v7402_v33, %v7406_v60 }
 0x30b   :  { %23892 = vst [vmem:[#allocation42_spill] sm:$0xff] %v20622_v14  ;;  %10856 = vmatpush1.bf16.msra.mxu1 %v15918_v16 }
 0x30c   :  { %v4830_v34 = vpop.f32.mrb[252].mxu1  ;;  %v6720_v43 = vpop.f32.mrb[252].mxu0  ;;  %10857 = vmatprep.subr.bf16.mxu1 %v23802_v38 }
 0x30d   :  { %v5059_v5 = vadd.f32 %v4830_v34, %v23893_v24  ;;  %v4832_v2 = vpop.f32.mrb[253].mxu1  ;;  %v6722_v26 = vpop.f32.mrb[253].mxu0 }
 0x30e   :  { %v4833_v55 = vpop.f32.mrb[254].mxu1  ;;  %v6723_v18 = vpop.f32.mrb[254].mxu0  ;;  %v14541_v2 = vld [vmem:[%s23714_s0 + $0x228] sm:$0x11] }
 0x30f   :  { %v5060_v7 = vadd.f32 %v4833_v55, %v23894_v56  ;;  %v4835_v17 = vpop.f32.mrb[255].mxu1  ;;  %v6725_v32 = vpop.f32.mrb[255].mxu0  ;;  %v20648_v54 = vadd.f32 %v6720_v43, %v5059_v5  ;;  %v14538_v43 = vld [vmem:[%s23714_s0 + $0x210] sm:$0xee]  ;;  %v14540_v5 = vld [vmem:[%s23714_s0 + $0x220] sm:$0xee]  ;;  %v14732_v55 = vcombine.low %v7394_v49, %v7398_v21 }
 0x310   :  { %v14640_v56 = vrot.slane %v14538_v43, 9  ;;  %v23897_v17 = vld [vmem:[#allocation4_spill] sm:$0xff]  ;;  %v14641_v41 = vrot.slane %v14540_v5, 9  ;;  %v7413_v16 = vrot.slane %v14541_v2, 5  ;;  %v14542_v5 = vld [vmem:[%s23714_s0 + $0x230] sm:$0xee] }
 0x311   :  { %23895 = vst [vmem:[#allocation43_spill] sm:$0xff] %v20648_v54  ;;  %8057 = vmatmul.mubr.bf16.gmra.mrb[104].mxu1 %v14730_v62  ;;  %9052 = vmatmul.mubr.bf16.gmra.mrb[104].mxu0 %v15851_v28  ;;  %v20653_v34 = vadd.f32 %v6723_v18, %v5060_v7  ;;  %v15856_v18 = vld [vmem:[%s23714_s0 + $0x1c0] ss:$16 sps:$4 sm:$0xff]   ;;  %v7409_v7 = vrot.slane %v14539_v48, 5  ;;  %v15919_v49 = vld [vmem:[%s23713_s1 + $0x468] sm:$0xff]  }
 0x312   :  { %8064 = vmatprep.mubr.bf16.mxu1 %v14733_v58  ;;  %9059 = vmatprep.mubr.bf16.mxu0 %v15858_v46  ;;  %v7414_v48 = vsel %vm16533_vm5, %v14641_v41, %v7413_v16  ;;  %v23901_v41 = vld [vmem:[#allocation6_spill] sm:$0xff] }
 0x313   :  { %23896 = vst [vmem:[#allocation44_spill] sm:$0xff] %v20653_v34  ;;  %v7410_v43 = vsel %vm16533_vm5, %v14640_v56, %v7409_v7  ;;  %12234 = vmatpush1.bf16.msra.mxu0 %v15919_v49 }
 0x314   :  { %v4838_v47 = vpop.f32.mrb[0].mxu1  ;;  %v6728_v24 = vpop.f32.mrb[0].mxu0  ;;  %12235 = vmatprep.subr.bf16.mxu0 %v23802_v38 }
 0x315   :  { %v5061_v26 = vadd.f32 %v4838_v47, %v19389_v51  ;;  %v4840_v62 = vpop.f32.mrb[1].mxu1  ;;  %v6730_v28 = vpop.f32.mrb[1].mxu0 }
 0x316   :  { %v4841_v58 = vpop.f32.mrb[2].mxu1  ;;  %v6731_v46 = vpop.f32.mrb[2].mxu0  ;;  %v14544_v62 = vld [vmem:[%s23714_s0 + $0x240] sm:$0xee]  ;;  %v14545_v28 = vld [vmem:[%s23714_s0 + $0x248] sm:$0x11] }
 0x317   :  { %v5062_v32 = vadd.f32 %v4841_v58, %v23897_v17  ;;  %v4843_v20 = vpop.f32.mrb[3].mxu1  ;;  %v6733_v51 = vpop.f32.mrb[3].mxu0  ;;  %v20683_v21 = vadd.f32 %v6728_v24, %v5061_v26  ;;  %v14543_v24 = vld [vmem:[%s23714_s0 + $0x238] sm:$0x11]  ;;  %v14737_v17 = vcombine.high %v7410_v43, %v7414_v48 }
 0x318   :  { %v14642_v20 = vrot.slane %v14542_v5, 9  ;;  %v7417_v51 = vrot.slane %v14543_v24, 5 }
 0x319   :  { %23898 = vst [vmem:[#allocation45_spill] sm:$0xff] %v20683_v21  ;;  %8065 = vmatmul.mubr.bf16.gmra.mrb[108].mxu1 %v14732_v55  ;;  %9060 = vmatmul.mubr.bf16.gmra.mrb[108].mxu0 %v15856_v18  ;;  %v20685_v47 = vadd.f32 %v6731_v46, %v5062_v32  ;;  %v23900_v55 = vld [vmem:[#allocation5_spill] sm:$0xff]  ;;  %v15866_v32 = vld [vmem:[%s23714_s0 + $0x224] ss:$16 sps:$4 sm:$0xff]  }
 0x31a   :  { %8072 = vmatprep.mubr.bf16.mxu1 %v14735_v11  ;;  %9067 = vmatprep.mubr.bf16.mxu0 %v15861_v44  ;;  %v14734_v11 = vcombine.low %v7402_v33, %v7406_v60  ;;  %v15859_v44 = vld [vmem:[%s23714_s0 + $0x200] ss:$16 sps:$4 sm:$0xff]   ;;  %v7418_v5 = vsel %vm16533_vm5, %v14642_v20, %v7417_v51  ;;  %v14736_v20 = vcombine.low %v7410_v43, %v7414_v48 }
 0x31b   :  { %23899 = vst [vmem:[#allocation46_spill] sm:$0xff] %v20685_v47  ;;  %v15926_v60 = vld [vmem:[%s23713_s1 + $0x3f0] sm:$0xff]  }
 0x31c   :  { %v4846_v2 = vpop.f32.mrb[4].mxu1  ;;  %v6736_v26 = vpop.f32.mrb[4].mxu0  ;;  %10858 = vmatpush1.bf16.msra.mxu1 %v15926_v60  ;;  %v15864_v51 = vld [vmem:[%s23714_s0 + $0x220] ss:$16 sps:$4 sm:$0xff]  }
 0x31d   :  { %v5063_v18 = vadd.f32 %v4846_v2, %v23900_v55  ;;  %v4848_v58 = vpop.f32.mrb[5].mxu1  ;;  %v6738_v46 = vpop.f32.mrb[5].mxu0  ;;  %v14643_v55 = vrot.slane %v14544_v62, 9  ;;  %v14547_v62 = vld [vmem:[%s23714_s0 + $0x258] sm:$0x11]  ;;  %10859 = vmatprep.subr.bf16.mxu1 %v23802_v38  ;;  %v23905_v60 = vld [vmem:[#allocation8_spill] sm:$0xff] }
 0x31e   :  { %v4849_v56 = vpop.f32.mrb[6].mxu1  ;;  %v6739_v7 = vpop.f32.mrb[6].mxu0  ;;  %v7421_v58 = vrot.slane %v14545_v28, 5  ;;  %v15927_v43 = vld [vmem:[%s23713_s1 + $0x470] sm:$0xff]  }
 0x31f   :  { %v5064_v16 = vadd.f32 %v4849_v56, %v23901_v41  ;;  %v4851_v49 = vpop.f32.mrb[7].mxu1  ;;  %v6741_v2 = vpop.f32.mrb[7].mxu0  ;;  %v20712_v33 = vadd.f32 %v6736_v26, %v5063_v18  ;;  %v14546_v26 = vld [vmem:[%s23714_s0 + $0x250] sm:$0xee]  ;;  %v23904_v56 = vld [vmem:[#allocation7_spill] sm:$0xff]  ;;  %12236 = vmatpush1.bf16.msra.mxu0 %v15927_v43  ;;  %v23934_v21 = vld [vmem:[#allocation25_spill] sm:$0xff] }
 0x320   :  { %v7422_v24 = vsel %vm16533_vm5, %v14643_v55, %v7421_v58  ;;  %v15869_v2 = vld [vmem:[%s23714_s0 + $0x244] ss:$16 sps:$4 sm:$0xff]   ;;  %v14644_v55 = vrot.slane %v14546_v26, 9  ;;  %v7425_v58 = vrot.slane %v14547_v62, 5  ;;  %12237 = vmatprep.subr.bf16.mxu0 %v23802_v38 }
 0x321   :  { %23902 = vst [vmem:[#allocation47_spill] sm:$0xff] %v20712_v33  ;;  %8073 = vmatmul.mubr.bf16.gmra.mrb[112].mxu1 %v14734_v11  ;;  %9068 = vmatmul.mubr.bf16.gmra.mrb[112].mxu0 %v15859_v44  ;;  %v20717_v46 = vadd.f32 %v6739_v7, %v5064_v16  ;;  %v14548_v11 = vld [vmem:[%s23714_s0 + $0x260] sm:$0xee]  ;;  %v14549_v44 = vld [vmem:[%s23714_s0 + $0x268] sm:$0x11]  ;;  %v14739_v49 = vcombine.high %v7418_v5, %v7422_v24  ;;  %v23909_v43 = vld [vmem:[#allocation10_spill] sm:$0xff] }
 0x322   :  { %8080 = vmatprep.mubr.bf16.mxu1 %v14737_v17  ;;  %9075 = vmatprep.mubr.bf16.mxu0 %v15866_v32  ;;  %v7426_v26 = vsel %vm16533_vm5, %v14644_v55, %v7425_v58  ;;  %v14550_v62 = vld [vmem:[%s23714_s0 + $0x290] sm:$0xee] }
 0x323   :  { %23903 = vst [vmem:[#allocation22_spill] sm:$0xff] %v20717_v46 }
 0x324   :  { %v4854_v28 = vpop.f32.mrb[8].mxu1  ;;  %v6744_v18 = vpop.f32.mrb[8].mxu0 }
 0x325   :  { %v5065_v7 = vadd.f32 %v4854_v28, %v23904_v56  ;;  %v4856_v17 = vpop.f32.mrb[9].mxu1  ;;  %v6746_v32 = vpop.f32.mrb[9].mxu0  ;;  %v14645_v56 = vrot.slane %v14548_v11, 9 }
 0x326   :  { %v4857_v41 = vpop.f32.mrb[10].mxu1  ;;  %v6747_v16 = vpop.f32.mrb[10].mxu0  ;;  %v7429_v17 = vrot.slane %v14549_v44, 5  ;;  %v14552_v44 = vld [vmem:[%s23714_s0 + $0x2a0] sm:$0xee] }
 0x327   :  { %v5066_v46 = vadd.f32 %v4857_v41, %v23905_v60  ;;  %v4859_v33 = vpop.f32.mrb[11].mxu1  ;;  %v6749_v28 = vpop.f32.mrb[11].mxu0  ;;  %v20747_v48 = vadd.f32 %v6744_v18, %v5065_v7  ;;  %v14551_v18 = vld [vmem:[%s23714_s0 + $0x298] sm:$0x11]  ;;  %v14553_v7 = vld [vmem:[%s23714_s0 + $0x2a8] sm:$0x11] }
 0x328   :  { %v7430_v33 = vsel %vm16533_vm5, %v14645_v56, %v7429_v17  ;;  %v15874_v28 = vld [vmem:[%s23714_s0 + $0x264] ss:$16 sps:$4 sm:$0xff]   ;;  %v14646_v56 = vrot.slane %v14550_v62, 9  ;;  %v7433_v17 = vrot.slane %v14551_v18, 5 }
 0x329   :  { %23906 = vst [vmem:[#allocation24_spill] sm:$0xff] %v20747_v48  ;;  %8081 = vmatmul.mubr.bf16.gmra.mrb[116].mxu1 %v14736_v20  ;;  %9076 = vmatmul.mubr.bf16.gmra.mrb[116].mxu0 %v15864_v51  ;;  %v20749_v32 = vadd.f32 %v6747_v16, %v5066_v46  ;;  %v23908_v20 = vld [vmem:[#allocation9_spill] sm:$0xff]  ;;  %v14741_v60 = vcombine.high %v7426_v26, %v7430_v33  ;;  %v14554_v18 = vld [vmem:[%s23714_s0 + $0x2b0] sm:$0xee] }
 0x32a   :  { %8088 = vmatprep.mubr.bf16.mxu1 %v14739_v49  ;;  %9083 = vmatprep.mubr.bf16.mxu0 %v15869_v2  ;;  %v14738_v49 = vcombine.low %v7418_v5, %v7422_v24  ;;  %v15867_v2 = vld [vmem:[%s23714_s0 + $0x240] ss:$16 sps:$4 sm:$0xff]   ;;  %v15934_v24 = vld [vmem:[%s23713_s1 + $0x3f8] sm:$0xff]   ;;  %v7434_v62 = vsel %vm16533_vm5, %v14646_v56, %v7433_v17 }
 0x32b   :  { %23907 = vst [vmem:[#allocation26_spill] sm:$0xff] %v20749_v32  ;;  %10860 = vmatpush1.bf16.msra.mxu1 %v15934_v24  ;;  %v15872_v56 = vld [vmem:[%s23714_s0 + $0x260] ss:$16 sps:$4 sm:$0xff]  }
 0x32c   :  { %v4862_v11 = vpop.f32.mrb[12].mxu1  ;;  %v6752_v46 = vpop.f32.mrb[12].mxu0 }
 0x32d   :  { %v5067_v51 = vadd.f32 %v4862_v11, %v23908_v20  ;;  %v4864_v41 = vpop.f32.mrb[13].mxu1  ;;  %v6754_v16 = vpop.f32.mrb[13].mxu0  ;;  %v14647_v20 = vrot.slane %v14552_v44, 9 }
 0x32e   :  { %v4865_v55 = vpop.f32.mrb[14].mxu1  ;;  %v6755_v58 = vpop.f32.mrb[14].mxu0  ;;  %v7437_v41 = vrot.slane %v14553_v7, 5 }
 0x32f   :  { %v5068_v38 = vadd.f32 %v4865_v55, %v23909_v43  ;;  %v4867_v32 = vpop.f32.mrb[15].mxu1  ;;  %v6757_v11 = vpop.f32.mrb[15].mxu0  ;;  %v20776_v5 = vadd.f32 %v6752_v46, %v5067_v51  ;;  %v14555_v46 = vld [vmem:[%s23714_s0 + $0x2b8] sm:$0x11]  ;;  %v14556_v51 = vld [vmem:[%s23714_s0 + $0x2c0] sm:$0xee] }
 0x330   :  { %v7438_v32 = vsel %vm16533_vm5, %v14647_v20, %v7437_v41  ;;  %v15877_v11 = vld [vmem:[%s23714_s0 + $0x2a4] ss:$16 sps:$4 sm:$0xff]   ;;  %v14648_v20 = vrot.slane %v14554_v18, 9 }
 0x331   :  { %23910 = vst [vmem:[#allocation28_spill] sm:$0xff] %v20776_v5  ;;  %8089 = vmatmul.mubr.bf16.gmra.mrb[120].mxu1 %v14738_v49  ;;  %9084 = vmatmul.mubr.bf16.gmra.mrb[120].mxu0 %v15867_v2  ;;  %v20781_v16 = vadd.f32 %v6755_v58, %v5068_v38  ;;  %v14557_v49 = vld [vmem:[%s23714_s0 + $0x2c8] sm:$0x11]  ;;  %v23912_v2 = vld [vmem:[#allocation11_spill] sm:$0xff]  ;;  %v14743_v38 = vcombine.high %v7434_v62, %v7438_v32 }
 0x332   :  { %8096 = vmatprep.mubr.bf16.mxu1 %v14741_v60  ;;  %9091 = vmatprep.mubr.bf16.mxu0 %v15874_v28  ;;  %v14740_v28 = vcombine.low %v7426_v26, %v7430_v33  ;;  %v23913_v41 = vld [vmem:[#allocation12_spill] sm:$0xff]  ;;  %v15935_v26 = vld [vmem:[%s23713_s1 + $0x478] sm:$0xff]  }
 0x333   :  { %23911 = vst [vmem:[#allocation37_spill] sm:$0xff] %v20781_v16  ;;  %12238 = vmatpush1.bf16.msra.mxu0 %v15935_v26 }
 0x334   :  { %v4870_v44 = vpop.f32.mrb[16].mxu1  ;;  %v6760_v7 = vpop.f32.mrb[16].mxu0 }
 0x335   :  { %v5069_v55 = vadd.f32 %v4870_v44, %v23912_v2  ;;  %v4872_v58 = vpop.f32.mrb[17].mxu1  ;;  %v6762_v60 = vpop.f32.mrb[17].mxu0  ;;  %v7441_v44 = vrot.slane %v14555_v46, 5  ;;  %v14649_v2 = vrot.slane %v14556_v51, 9  ;;  %v14559_v46 = vld [vmem:[%s23714_s0 + $0x2d8] sm:$0x11] }
 0x336   :  { %v4873_v17 = vpop.f32.mrb[18].mxu1  ;;  %v6763_v43 = vpop.f32.mrb[18].mxu0  ;;  %v7445_v58 = vrot.slane %v14557_v49, 5  ;;  %v14560_v49 = vld [vmem:[%s23714_s0 + $0x2e0] sm:$0xee] }
 0x337   :  { %v5070_v24 = vadd.f32 %v4873_v17, %v23913_v41  ;;  %v4875_v16 = vpop.f32.mrb[19].mxu1  ;;  %v6765_v5 = vpop.f32.mrb[19].mxu0  ;;  %v20810_v33 = vadd.f32 %v6760_v7, %v5069_v55  ;;  %v7442_v18 = vsel %vm16533_vm5, %v14648_v20, %v7441_v44  ;;  %v14561_v55 = vld [vmem:[%s23714_s0 + $0x2e8] sm:$0x11]  ;;  %v15882_v44 = vld [vmem:[%s23714_s0 + $0x2c4] ss:$16 sps:$4 sm:$0xff]  }
 0x338   :  { %v7446_v5 = vsel %vm16533_vm5, %v14649_v2, %v7445_v58  ;;  %v14558_v16 = vld [vmem:[%s23714_s0 + $0x2d0] sm:$0xee] }
 0x339   :  { %23914 = vst [vmem:[#allocation40_spill] sm:$0xff] %v20810_v33  ;;  %8097 = vmatmul.mubr.bf16.gmra.mrb[124].mxu1 %v14740_v28  ;;  %9092 = vmatmul.mubr.bf16.gmra.mrb[124].mxu0 %v15872_v56  ;;  %v20812_v60 = vadd.f32 %v6763_v43, %v5070_v24  ;;  %v23916_v28 = vld [vmem:[#allocation13_spill] sm:$0xff]  ;;  %v14745_v24 = vcombine.high %v7442_v18, %v7446_v5  ;;  %v14650_v2 = vrot.slane %v14558_v16, 9  ;;  %v23917_v58 = vld [vmem:[#allocation14_spill] sm:$0xff] }
 0x33a   :  { %8104 = vmatprep.mubr.bf16.mxu1 %v14743_v38  ;;  %9099 = vmatprep.mubr.bf16.mxu0 %v15877_v11  ;;  %v14742_v38 = vcombine.low %v7434_v62, %v7438_v32  ;;  %v15875_v11 = vld [vmem:[%s23714_s0 + $0x2a0] ss:$16 sps:$4 sm:$0xff]  }
 0x33b   :  { %23915 = vst [vmem:[#allocation4_spill] sm:$0xff] %v20812_v60 }
 0x33c   :  { %v4878_v7 = vpop.f32.mrb[20].mxu1  ;;  %v6768_v51 = vpop.f32.mrb[20].mxu0 }
 0x33d   :  { %v5071_v56 = vadd.f32 %v4878_v7, %v23916_v28  ;;  %v4880_v17 = vpop.f32.mrb[21].mxu1  ;;  %v6770_v43 = vpop.f32.mrb[21].mxu0  ;;  %v7449_v7 = vrot.slane %v14559_v46, 5  ;;  %v14651_v28 = vrot.slane %v14560_v49, 9  ;;  %v14564_v49 = vld [vmem:[%s23714_s0 + $0x300] sm:$0xee] }
 0x33e   :  { %v4881_v20 = vpop.f32.mrb[22].mxu1  ;;  %v6771_v41 = vpop.f32.mrb[22].mxu0  ;;  %v7453_v17 = vrot.slane %v14561_v55, 5  ;;  %v14565_v55 = vld [vmem:[%s23714_s0 + $0x308] sm:$0x11] }
 0x33f   :  { %v5072_v26 = vadd.f32 %v4881_v20, %v23917_v58  ;;  %v4883_v60 = vpop.f32.mrb[23].mxu1  ;;  %v6773_v33 = vpop.f32.mrb[23].mxu0  ;;  %v20838_v62 = vadd.f32 %v6768_v51, %v5071_v56  ;;  %v7450_v43 = vsel %vm16533_vm5, %v14650_v2, %v7449_v7  ;;  %v23920_v56 = vld [vmem:[#allocation15_spill] sm:$0xff] }
 0x340   :  { %v7454_v16 = vsel %vm16533_vm5, %v14651_v28, %v7453_v17  ;;  %v14562_v33 = vld [vmem:[%s23714_s0 + $0x2f0] sm:$0xee]  ;;  %v14563_v60 = vld [vmem:[%s23714_s0 + $0x2f8] sm:$0x11]  ;;  %v23921_v28 = vld [vmem:[#allocation16_spill] sm:$0xff] }
 0x341   :  { %8105 = vmatmul.mubr.bf16.gmra.mrb[128].mxu1 %v14742_v38  ;;  %9100 = vmatmul.mubr.bf16.gmra.mrb[128].mxu0 %v15875_v11  ;;  %23918 = vst [vmem:[#allocation5_spill] sm:$0xff] %v20838_v62  ;;  %v20840_v32 = vadd.f32 %v6771_v41, %v5072_v26  ;;  %v14744_v41 = vcombine.low %v7442_v18, %v7446_v5  ;;  %v15885_v26 = vld [vmem:[%s23714_s0 + $0x2e4] ss:$16 sps:$4 sm:$0xff]   ;;  %v14652_v7 = vrot.slane %v14562_v33, 9 }
 0x342   :  { %8112 = vmatprep.mubr.bf16.mxu1 %v14745_v24  ;;  %9107 = vmatprep.mubr.bf16.mxu0 %v15882_v44  ;;  %v15880_v24 = vld [vmem:[%s23714_s0 + $0x2c0] ss:$16 sps:$4 sm:$0xff]   ;;  %v14747_v58 = vcombine.high %v7450_v43, %v7454_v16 }
 0x343   :  { %23919 = vst [vmem:[#allocation6_spill] sm:$0xff] %v20840_v32  ;;  %v14566_v33 = vld [vmem:[%s23714_s0 + $0x330] sm:$0xee] }
 0x344   :  { %v4886_v46 = vpop.f32.mrb[24].mxu1  ;;  %v6776_v51 = vpop.f32.mrb[24].mxu0 }
 0x345   :  { %v5073_v38 = vadd.f32 %v4886_v46, %v23920_v56  ;;  %v4888_v11 = vpop.f32.mrb[25].mxu1  ;;  %v6778_v20 = vpop.f32.mrb[25].mxu0  ;;  %v7457_v46 = vrot.slane %v14563_v60, 5  ;;  %v14653_v56 = vrot.slane %v14564_v49, 9 }
 0x346   :  { %v4889_v44 = vpop.f32.mrb[26].mxu1  ;;  %v6779_v2 = vpop.f32.mrb[26].mxu0  ;;  %v7461_v11 = vrot.slane %v14565_v55, 5  ;;  %v14568_v55 = vld [vmem:[%s23714_s0 + $0x340] sm:$0xee] }
 0x347   :  { %v5074_v17 = vadd.f32 %v4889_v44, %v23921_v28  ;;  %v4891_v32 = vpop.f32.mrb[27].mxu1  ;;  %v6781_v62 = vpop.f32.mrb[27].mxu0  ;;  %v7458_v18 = vsel %vm16533_vm5, %v14652_v7, %v7457_v46  ;;  %v14569_v20 = vld [vmem:[%s23714_s0 + $0x348] sm:$0x11]  ;;  %v14746_v7 = vcombine.low %v7450_v43, %v7454_v16 }
 0x348   :  { %v7462_v5 = vsel %vm16533_vm5, %v14653_v56, %v7461_v11  ;;  %v14567_v62 = vld [vmem:[%s23714_s0 + $0x338] sm:$0x11]  ;;  %v20876_v32 = vadd.f32 %v6776_v51, %v5073_v38  ;;  %v15883_v51 = vld [vmem:[%s23714_s0 + $0x2e0] ss:$16 sps:$4 sm:$0xff]   ;;  %v15890_v56 = vld [vmem:[%s23714_s0 + $0x304] ss:$16 sps:$4 sm:$0xff]  }
 0x349   :  { %8113 = vmatmul.mubr.bf16.gmra.mrb[132].mxu1 %v14744_v41  ;;  %9108 = vmatmul.mubr.bf16.gmra.mrb[132].mxu0 %v15880_v24  ;;  %v20884_v41 = vadd.f32 %v6779_v2, %v5074_v17  ;;  %v23924_v24 = vld [vmem:[#allocation17_spill] sm:$0xff]  ;;  %v14749_v46 = vcombine.high %v7458_v18, %v7462_v5  ;;  %v14654_v11 = vrot.slane %v14566_v33, 9  ;;  %v14570_v33 = vld [vmem:[%s23714_s0 + $0x350] sm:$0xee] }
 0x34a   :  { %8120 = vmatprep.mubr.bf16.mxu1 %v14747_v58  ;;  %9115 = vmatprep.mubr.bf16.mxu0 %v15885_v26  ;;  %23922 = vst [vmem:[#allocation7_spill] sm:$0xff] %v20876_v32  ;;  %v23925_v32 = vld [vmem:[#allocation18_spill] sm:$0xff] }
 0x34b   :  { %23923 = vst [vmem:[#allocation8_spill] sm:$0xff] %v20884_v41 }
 0x34c   :  { %v4894_v60 = vpop.f32.mrb[28].mxu1  ;;  %v6784_v49 = vpop.f32.mrb[28].mxu0 }
 0x34d   :  { %v5075_v44 = vadd.f32 %v4894_v60, %v23924_v24  ;;  %v4896_v58 = vpop.f32.mrb[29].mxu1  ;;  %v6786_v26 = vpop.f32.mrb[29].mxu0  ;;  %v7465_v60 = vrot.slane %v14567_v62, 5  ;;  %v14655_v24 = vrot.slane %v14568_v55, 9  ;;  %v14571_v62 = vld [vmem:[%s23714_s0 + $0x358] sm:$0x11] }
 0x34e   :  { %v4897_v38 = vpop.f32.mrb[30].mxu1  ;;  %v6787_v28 = vpop.f32.mrb[30].mxu0  ;;  %v7469_v58 = vrot.slane %v14569_v20, 5  ;;  %v14573_v20 = vld [vmem:[%s23714_s0 + $0x368] sm:$0x11] }
 0x34f   :  { %v5076_v2 = vadd.f32 %v4897_v38, %v23925_v32  ;;  %v4899_v17 = vpop.f32.mrb[31].mxu1  ;;  %v6789_v41 = vpop.f32.mrb[31].mxu0  ;;  %v20894_v43 = vadd.f32 %v6784_v49, %v5075_v44  ;;  %v7466_v16 = vsel %vm16533_vm5, %v14654_v11, %v7465_v60  ;;  %v14572_v49 = vld [vmem:[%s23714_s0 + $0x360] sm:$0xee]  ;;  %v14748_v38 = vcombine.low %v7458_v18, %v7462_v5 }
 0x350   :  { %v7470_v26 = vsel %vm16533_vm5, %v14655_v24, %v7469_v58  ;;  %v23927_v41 = vld [vmem:[#allocation19_spill] sm:$0xff]  ;;  %v15893_v24 = vld [vmem:[%s23714_s0 + $0x344] ss:$16 sps:$4 sm:$0xff]   ;;  %v14656_v58 = vrot.slane %v14570_v33, 9  ;;  %v14657_v18 = vrot.slane %v14572_v49, 9  ;;  %v7477_v5 = vrot.slane %v14573_v20, 5 }
 0x351   :  { %8121 = vmatmul.mubr.bf16.gmra.mrb[136].mxu1 %v14746_v7  ;;  %9116 = vmatmul.mubr.bf16.gmra.mrb[136].mxu0 %v15883_v51  ;;  %23926 = vst [vmem:[#allocation9_spill] sm:$0xff] %v20894_v43  ;;  %v14751_v60 = vcombine.high %v7466_v16, %v7470_v26  ;;  %v23929_v43 = vld [vmem:[#allocation20_spill] sm:$0xff]  ;;  %v14575_v33 = vld [vmem:[%s23714_s0 + $0x378] sm:$0x11] }
 0x352   :  { %8128 = vmatprep.mubr.bf16.mxu1 %v14749_v46  ;;  %9123 = vmatprep.mubr.bf16.mxu0 %v15890_v56  ;;  %v15888_v46 = vld [vmem:[%s23714_s0 + $0x300] ss:$16 sps:$4 sm:$0xff]   ;;  %v20916_v56 = vadd.f32 %v6787_v28, %v5076_v2  ;;  %v7478_v2 = vsel %vm16533_vm5, %v14657_v18, %v7477_v5  ;;  %v14577_v20 = vld [vmem:[%s23714_s0 + $0x388] sm:$0x11] }
 0x353   :  { %v23931_v18 = vld [vmem:[#allocation21_spill] sm:$0xff] }
 0x354   :  { %v4902_v32 = vpop.f32.mrb[32].mxu1  ;;  %v6792_v55 = vpop.f32.mrb[32].mxu0  ;;  %23928 = vst [vmem:[#allocation10_spill] sm:$0xff] %v20916_v56 }
 0x355   :  { %v5077_v44 = vadd.f32 %v4902_v32, %v23927_v41  ;;  %v4904_v7 = vpop.f32.mrb[33].mxu1  ;;  %v6794_v51 = vpop.f32.mrb[33].mxu0 }
 0x356   :  { %v4905_v11 = vpop.f32.mrb[34].mxu1  ;;  %v6795_v17 = vpop.f32.mrb[34].mxu0  ;;  %v7473_v7 = vrot.slane %v14571_v62, 5 }
 0x357   :  { %v5078_v48 = vadd.f32 %v4905_v11, %v23929_v43  ;;  %v4907_v32 = vpop.f32.mrb[35].mxu1  ;;  %v6797_v41 = vpop.f32.mrb[35].mxu0  ;;  %v20922_v51 = vadd.f32 %v6792_v55, %v5077_v44  ;;  %v14574_v43 = vld [vmem:[%s23714_s0 + $0x370] sm:$0xee]  ;;  %v14576_v55 = vld [vmem:[%s23714_s0 + $0x380] sm:$0xee]  ;;  %v14750_v11 = vcombine.low %v7466_v16, %v7470_v26 }
 0x358   :  { %v7474_v28 = vsel %vm16533_vm5, %v14656_v58, %v7473_v7  ;;  %v15898_v41 = vld [vmem:[%s23714_s0 + $0x364] ss:$16 sps:$4 sm:$0xff]   ;;  %v14658_v7 = vrot.slane %v14574_v43, 9 }
 0x359   :  { %8129 = vmatmul.mubr.bf16.gmra.mrb[140].mxu1 %v14748_v38  ;;  %9124 = vmatmul.mubr.bf16.gmra.mrb[140].mxu0 %v15888_v46  ;;  %23930 = vst [vmem:[#allocation11_spill] sm:$0xff] %v20922_v51  ;;  %v14753_v32 = vcombine.high %v7474_v28, %v7478_v2  ;;  %v14578_v43 = vld [vmem:[%s23714_s0 + $0x390] sm:$0xee] }
 0x35a   :  { %8136 = vmatprep.mubr.bf16.mxu1 %v14751_v60  ;;  %9131 = vmatprep.mubr.bf16.mxu0 %v15893_v24  ;;  %v15891_v60 = vld [vmem:[%s23714_s0 + $0x340] ss:$16 sps:$4 sm:$0xff]   ;;  %v14660_v47 = vrot.slane %v14578_v43, 9  ;;  %v14583_v43 = vld [vmem:[%s23714_s0 + $0x3d8] sm:$0x11] }
 0x35c   :  { %v4910_v62 = vpop.f32.mrb[36].mxu1  ;;  %v6800_v49 = vpop.f32.mrb[36].mxu0 }
 0x35d   :  { %v5079_v44 = vadd.f32 %v4910_v62, %v19779_v53  ;;  %v4912_v38 = vpop.f32.mrb[37].mxu1  ;;  %v6802_v46 = vpop.f32.mrb[37].mxu0  ;;  %v7481_v53 = vrot.slane %v14575_v33, 5  ;;  %v14659_v62 = vrot.slane %v14576_v55, 9  ;;  %v14580_v55 = vld [vmem:[%s23714_s0 + $0x3a0] sm:$0xee] }
 0x35e   :  { %v4913_v24 = vpop.f32.mrb[38].mxu1  ;;  %v6803_v58 = vpop.f32.mrb[38].mxu0  ;;  %v7485_v38 = vrot.slane %v14577_v20, 5  ;;  %v14581_v20 = vld [vmem:[%s23714_s0 + $0x3a8] sm:$0x11]  ;;  %v20964_v46 = vadd.f32 %v6795_v17, %v5078_v48 }
 0x35f   :  { %v5080_v5 = vadd.f32 %v4913_v24, %v23931_v18  ;;  %v4915_v51 = vpop.f32.mrb[39].mxu1  ;;  %v6805_v56 = vpop.f32.mrb[39].mxu0  ;;  %v7482_v16 = vsel %vm16533_vm5, %v14658_v7, %v7481_v53  ;;  %v15896_v7 = vld [vmem:[%s23714_s0 + $0x360] ss:$16 sps:$4 sm:$0xff]  }
 0x360   :  { %v7486_v26 = vsel %vm16533_vm5, %v14659_v62, %v7485_v38  ;;  %v14579_v56 = vld [vmem:[%s23714_s0 + $0x398] sm:$0x11]  ;;  %23932 = vst [vmem:[#allocation12_spill] sm:$0xff] %v20964_v46  ;;  %v15901_v38 = vld [vmem:[%s23714_s0 + $0x384] ss:$16 sps:$4 sm:$0xff]  }
 0x361   :  { %8137 = vmatmul.mubr.bf16.gmra.mrb[144].mxu1 %v14750_v11  ;;  %9132 = vmatmul.mubr.bf16.gmra.mrb[144].mxu0 %v15891_v60  ;;  %v23933_v11 = vld [vmem:[#allocation23_spill] sm:$0xff]  ;;  %v14755_v62 = vcombine.high %v7482_v16, %v7486_v26 }
 0x362   :  { %8144 = vmatprep.mubr.bf16.mxu1 %v14753_v32  ;;  %9139 = vmatprep.mubr.bf16.mxu0 %v15898_v41  ;;  %v14752_v41 = vcombine.low %v7474_v28, %v7478_v2  ;;  %v20974_v28 = vadd.f32 %v6800_v49, %v5079_v44  ;;  %v14584_v49 = vld [vmem:[%s23714_s0 + $0x3e0] sm:$0xee]  ;;  %v23936_v44 = vld [vmem:[#allocation27_spill] sm:$0xff] }
 0x363   :  { %v14663_v34 = vrot.slane %v14584_v49, 9  ;;  %v14589_v49 = vld [vmem:[%s23714_s0 + $0x408] sm:$0x11] }
 0x364   :  { %v4918_v51 = vpop.f32.mrb[40].mxu1  ;;  %v6808_v33 = vpop.f32.mrb[40].mxu0  ;;  %23935 = vst [vmem:[#allocation13_spill] sm:$0xff] %v20974_v28 }
 0x365   :  { %v5081_v60 = vadd.f32 %v4918_v51, %v23933_v11  ;;  %v4920_v24 = vpop.f32.mrb[41].mxu1  ;;  %v6810_v32 = vpop.f32.mrb[41].mxu0  ;;  %v7489_v51 = vrot.slane %v14579_v56, 5  ;;  %v14661_v11 = vrot.slane %v14580_v55, 9 }
 0x366   :  { %v4921_v18 = vpop.f32.mrb[42].mxu1  ;;  %v6811_v53 = vpop.f32.mrb[42].mxu0  ;;  %v7493_v24 = vrot.slane %v14581_v20, 5 }
 0x367   :  { %v5082_v48 = vadd.f32 %v4921_v18, %v23934_v21  ;;  %v4923_v17 = vpop.f32.mrb[43].mxu1  ;;  %v6813_v46 = vpop.f32.mrb[43].mxu0  ;;  %v7490_v2 = vsel %vm16533_vm5, %v14660_v47, %v7489_v51  ;;  %v14582_v21 = vld [vmem:[%s23714_s0 + $0x3d0] sm:$0xee]  ;;  %v14585_v47 = vld [vmem:[%s23714_s0 + $0x3e8] sm:$0x11]  ;;  %v21001_v28 = vadd.f32 %v6808_v33, %v5081_v60 }
 0x368   :  { %v7494_v32 = vsel %vm16533_vm5, %v14661_v11, %v7493_v24  ;;  %v15899_v18 = vld [vmem:[%s23714_s0 + $0x380] ss:$16 sps:$4 sm:$0xff]   ;;  %v15906_v11 = vld [vmem:[%s23714_s0 + $0x3a4] ss:$16 sps:$4 sm:$0xff]   ;;  %v14662_v24 = vrot.slane %v14582_v21, 9 }
 0x369   :  { %8145 = vmatmul.mubr.bf16.gmra.mrb[148].mxu1 %v14752_v41  ;;  %9140 = vmatmul.mubr.bf16.gmra.mrb[148].mxu0 %v15896_v7  ;;  %v14754_v7 = vcombine.low %v7482_v16, %v7486_v26  ;;  %v14757_v51 = vcombine.high %v7490_v2, %v7494_v32  ;;  %23938 = vst [vmem:[#allocation15_spill] sm:$0xff] %v21001_v28  ;;  %v14586_v60 = vld [vmem:[%s23714_s0 + $0x3f0] sm:$0xee]  ;;  %v23946_v28 = vld [vmem:[#allocation33_spill] sm:$0xff] }
 0x36a   :  { %8152 = vmatprep.mubr.bf16.mxu1 %v14755_v62  ;;  %9147 = vmatprep.mubr.bf16.mxu0 %v15901_v38  ;;  %v20996_v62 = vadd.f32 %v6803_v58, %v5080_v5  ;;  %v7501_v58 = vrot.slane %v14585_v47, 5  ;;  %v23942_v47 = vld [vmem:[#allocation30_spill] sm:$0xff] }
 0x36c   :  { %v4926_v56 = vpop.f32.mrb[44].mxu1  ;;  %v6816_v55 = vpop.f32.mrb[44].mxu0  ;;  %23937 = vst [vmem:[#allocation14_spill] sm:$0xff] %v20996_v62  ;;  %v7502_v33 = vsel %vm16533_vm5, %v14663_v34, %v7501_v58 }
 0x36d   :  { %v5083_v20 = vadd.f32 %v4926_v56, %v23936_v44  ;;  %v4928_v46 = vpop.f32.mrb[45].mxu1  ;;  %v6818_v41 = vpop.f32.mrb[45].mxu0  ;;  %v21003_v56 = vadd.f32 %v6811_v53, %v5082_v48  ;;  %v23940_v44 = vld [vmem:[#allocation29_spill] sm:$0xff]  ;;  %v14587_v53 = vld [vmem:[%s23714_s0 + $0x3f8] sm:$0x11] }
 0x36e   :  { %v4929_v38 = vpop.f32.mrb[46].mxu1  ;;  %v6819_v17 = vpop.f32.mrb[46].mxu0  ;;  %v7497_v41 = vrot.slane %v14583_v43, 5 }
 0x36f   :  { %23939 = vst [vmem:[#allocation16_spill] sm:$0xff] %v21003_v56  ;;  %v5084_v16 = vadd.f32 %v4929_v38, %v23940_v44  ;;  %v4931_v26 = vpop.f32.mrb[47].mxu1  ;;  %v6821_v46 = vpop.f32.mrb[47].mxu0  ;;  %v21006_v5 = vadd.f32 %v6816_v55, %v5083_v20  ;;  %v14588_v55 = vld [vmem:[%s23714_s0 + $0x400] sm:$0xee] }
 0x370   :  { %v7498_v21 = vsel %vm16533_vm5, %v14662_v24, %v7497_v41  ;;  %v15904_v38 = vld [vmem:[%s23714_s0 + $0x3a0] ss:$16 sps:$4 sm:$0xff]   ;;  %v15909_v44 = vld [vmem:[%s23714_s0 + $0x3e4] ss:$16 sps:$4 sm:$0xff]   ;;  %v14664_v26 = vrot.slane %v14586_v60, 9 }
 0x371   :  { %8153 = vmatmul.mubr.bf16.gmra.mrb[152].mxu1 %v14754_v7  ;;  %9148 = vmatmul.mubr.bf16.gmra.mrb[152].mxu0 %v15899_v18  ;;  %23941 = vst [vmem:[#allocation17_spill] sm:$0xff] %v21006_v5  ;;  %v14756_v18 = vcombine.low %v7490_v2, %v7494_v32  ;;  %v14759_v24 = vcombine.high %v7498_v21, %v7502_v33  ;;  %v23943_v46 = vld [vmem:[#allocation31_spill] sm:$0xff]  ;;  %v14590_v60 = vld [vmem:[%s23714_s0 + $0x410] sm:$0xee] }
 0x372   :  { %8160 = vmatprep.mubr.bf16.mxu1 %v14757_v51  ;;  %9155 = vmatprep.mubr.bf16.mxu0 %v15906_v11  ;;  %v14666_v56 = vrot.slane %v14590_v60, 9  ;;  %v14595_v60 = vld [vmem:[%s23714_s0 + $0x438] sm:$0x11] }
 0x374   :  { %v4934_v48 = vpop.f32.mrb[48].mxu1  ;;  %v6824_v43 = vpop.f32.mrb[48].mxu0 }
 0x375   :  { %v5085_v34 = vadd.f32 %v4934_v48, %v23942_v47  ;;  %v4936_v20 = vpop.f32.mrb[49].mxu1  ;;  %v6826_v7 = vpop.f32.mrb[49].mxu0  ;;  %v7505_v48 = vrot.slane %v14587_v53, 5  ;;  %v14665_v47 = vrot.slane %v14588_v55, 9 }
 0x376   :  { %v4937_v51 = vpop.f32.mrb[50].mxu1  ;;  %v6827_v11 = vpop.f32.mrb[50].mxu0  ;;  %v7509_v20 = vrot.slane %v14589_v49, 5  ;;  %v14592_v49 = vld [vmem:[%s23714_s0 + $0x420] sm:$0xee] }
 0x377   :  { %v5086_v41 = vadd.f32 %v4937_v51, %v23943_v46  ;;  %v4939_v58 = vpop.f32.mrb[51].mxu1  ;;  %v6829_v5 = vpop.f32.mrb[51].mxu0  ;;  %v7506_v2 = vsel %vm16533_vm5, %v14664_v26, %v7505_v48  ;;  %v14593_v7 = vld [vmem:[%s23714_s0 + $0x428] sm:$0x11]  ;;  %v14758_v26 = vcombine.low %v7498_v21, %v7502_v33  ;;  %v15907_v46 = vld [vmem:[%s23714_s0 + $0x3e0] ss:$16 sps:$4 sm:$0xff]   ;;  %v21058_v21 = vadd.f32 %v6824_v43, %v5085_v34 }
 0x378   :  { %v7510_v32 = vsel %vm16533_vm5, %v14665_v47, %v7509_v20  ;;  %v14591_v5 = vld [vmem:[%s23714_s0 + $0x418] sm:$0x11]  ;;  %v15914_v20 = vld [vmem:[%s23714_s0 + $0x404] ss:$16 sps:$4 sm:$0xff]  }
 0x379   :  { %8161 = vmatmul.mubr.bf16.gmra.mrb[156].mxu1 %v14756_v18  ;;  %9156 = vmatmul.mubr.bf16.gmra.mrb[156].mxu0 %v15904_v38  ;;  %v21048_v18 = vadd.f32 %v6819_v17, %v5084_v16  ;;  %v23945_v38 = vld [vmem:[#allocation32_spill] sm:$0xff]  ;;  %v14761_v47 = vcombine.high %v7506_v2, %v7510_v32  ;;  %23947 = vst [vmem:[#allocation19_spill] sm:$0xff] %v21058_v21  ;;  %v23948_v34 = vld [vmem:[#allocation34_spill] sm:$0xff] }
 0x37a   :  { %8168 = vmatprep.mubr.bf16.mxu1 %v14759_v24  ;;  %9163 = vmatprep.mubr.bf16.mxu0 %v15909_v44  ;;  %v14596_v43 = vld [vmem:[%s23714_s0 + $0x440] sm:$0xee] }
 0x37b   :  { %23944 = vst [vmem:[#allocation18_spill] sm:$0xff] %v21048_v18  ;;  %v14669_v62 = vrot.slane %v14596_v43, 9  ;;  %v14601_v43 = vld [vmem:[%s23714_s0 + $0x488] sm:$0x11] }
 0x37c   :  { %v4942_v53 = vpop.f32.mrb[52].mxu1  ;;  %v6832_v55 = vpop.f32.mrb[52].mxu0 }
 0x37d   :  { %v5087_v51 = vadd.f32 %v4942_v53, %v23945_v38  ;;  %v4944_v24 = vpop.f32.mrb[53].mxu1  ;;  %v6834_v44 = vpop.f32.mrb[53].mxu0  ;;  %v7513_v53 = vrot.slane %v14591_v5, 5  ;;  %v14667_v38 = vrot.slane %v14592_v49, 9 }
 0x37e   :  { %v4945_v58 = vpop.f32.mrb[54].mxu1  ;;  %v6835_v48 = vpop.f32.mrb[54].mxu0  ;;  %v7517_v24 = vrot.slane %v14593_v7, 5 }
 0x37f   :  { %v5088_v17 = vadd.f32 %v4945_v58, %v23946_v28  ;;  %v4947_v16 = vpop.f32.mrb[55].mxu1  ;;  %v6837_v18 = vpop.f32.mrb[55].mxu0  ;;  %v7514_v33 = vsel %vm16533_vm5, %v14666_v56, %v7513_v53  ;;  %v14594_v28 = vld [vmem:[%s23714_s0 + $0x430] sm:$0xee]  ;;  %v14597_v56 = vld [vmem:[%s23714_s0 + $0x448] sm:$0x11]  ;;  %v21085_v21 = vadd.f32 %v6832_v55, %v5087_v51 }
 0x380   :  { %v7518_v44 = vsel %vm16533_vm5, %v14667_v38, %v7517_v24  ;;  %v15912_v58 = vld [vmem:[%s23714_s0 + $0x400] ss:$16 sps:$4 sm:$0xff]   ;;  %v15917_v38 = vld [vmem:[%s23714_s0 + $0x424] ss:$16 sps:$4 sm:$0xff]   ;;  %v14668_v24 = vrot.slane %v14594_v28, 9 }
 0x381   :  { %8169 = vmatmul.mubr.bf16.gmra.mrb[160].mxu1 %v14758_v26  ;;  %9164 = vmatmul.mubr.bf16.gmra.mrb[160].mxu0 %v15907_v46  ;;  %v14760_v46 = vcombine.low %v7506_v2, %v7510_v32  ;;  %v14763_v53 = vcombine.high %v7514_v33, %v7518_v44  ;;  %23950 = vst [vmem:[#allocation21_spill] sm:$0xff] %v21085_v21  ;;  %v14598_v51 = vld [vmem:[%s23714_s0 + $0x470] sm:$0xee] }
 0x382   :  { %8176 = vmatprep.mubr.bf16.mxu1 %v14761_v47  ;;  %9171 = vmatprep.mubr.bf16.mxu0 %v15914_v20  ;;  %v21080_v47 = vadd.f32 %v6827_v11, %v5086_v41  ;;  %v7525_v11 = vrot.slane %v14597_v56, 5 }
 0x384   :  { %v4950_v5 = vpop.f32.mrb[56].mxu1  ;;  %v6840_v49 = vpop.f32.mrb[56].mxu0  ;;  %23949 = vst [vmem:[#allocation20_spill] sm:$0xff] %v21080_v47  ;;  %v7526_v55 = vsel %vm16533_vm5, %v14669_v62, %v7525_v11  ;;  %v14602_v11 = vld [vmem:[%s23714_s0 + $0x490] sm:$0xee] }
 0x385   :  { %v5089_v7 = vadd.f32 %v4950_v5, %v23948_v34  ;;  %v4952_v18 = vpop.f32.mrb[57].mxu1  ;;  %v6842_v26 = vpop.f32.mrb[57].mxu0  ;;  %v21087_v5 = vadd.f32 %v6835_v48, %v5088_v17  ;;  %v23952_v34 = vld [vmem:[#allocation35_spill] sm:$0xff] }
 0x386   :  { %v4953_v20 = vpop.f32.mrb[58].mxu1  ;;  %v6843_v16 = vpop.f32.mrb[58].mxu0  ;;  %v7521_v26 = vrot.slane %v14595_v60, 5  ;;  %v14599_v48 = vld [vmem:[%s23714_s0 + $0x478] sm:$0x11] }
 0x387   :  { %23951 = vst [vmem:[#allocation23_spill] sm:$0xff] %v21087_v5  ;;  %v5090_v2 = vadd.f32 %v4953_v20, %v23952_v34  ;;  %v4955_v32 = vpop.f32.mrb[59].mxu1  ;;  %v6845_v18 = vpop.f32.mrb[59].mxu0  ;;  %v21090_v41 = vadd.f32 %v6840_v49, %v5089_v7  ;;  %v14600_v49 = vld [vmem:[%s23714_s0 + $0x480] sm:$0xee]  ;;  %v14670_v34 = vrot.slane %v14598_v51, 9 }
 0x388   :  { %v7522_v28 = vsel %vm16533_vm5, %v14668_v24, %v7521_v26  ;;  %v15922_v24 = vld [vmem:[%s23714_s0 + $0x444] ss:$16 sps:$4 sm:$0xff]   ;;  %v7529_v26 = vrot.slane %v14599_v48, 5  ;;  %v14603_v51 = vld [vmem:[%s23714_s0 + $0x498] sm:$0x11] }
 0x389   :  { %8177 = vmatmul.mubr.bf16.gmra.mrb[164].mxu1 %v14760_v46  ;;  %9172 = vmatmul.mubr.bf16.gmra.mrb[164].mxu0 %v15912_v58  ;;  %23953 = vst [vmem:[#allocation25_spill] sm:$0xff] %v21090_v41  ;;  %v14762_v46 = vcombine.low %v7514_v33, %v7518_v44  ;;  %v15915_v58 = vld [vmem:[%s23714_s0 + $0x420] ss:$16 sps:$4 sm:$0xff]   ;;  %v14671_v33 = vrot.slane %v14600_v49, 9  ;;  %v7533_v44 = vrot.slane %v14601_v43, 5 }
 0x38a   :  { %8184 = vmatprep.mubr.bf16.mxu1 %v14763_v53  ;;  %9179 = vmatprep.mubr.bf16.mxu0 %v15917_v38  ;;  %v14765_v38 = vcombine.high %v7522_v28, %v7526_v55  ;;  %v14605_v48 = vld [vmem:[%s23714_s0 + $0x4a8] sm:$0x11]  ;;  %v21139_v49 = vsel %vm16533_vm5, %v14670_v34, %v7529_v26  ;;  %v7537_v34 = vrot.slane %v14603_v51, 5 }
 0x38b   :  { %v21143_v43 = vsel %vm16533_vm5, %v14671_v33, %v7533_v44  ;;  %v7541_v41 = vrot.slane %v14605_v48, 5  ;;  %v14966_v48 = vld [vmem:[%s23714_s0 + $0x20] sm:$0xff] }
 0x38c   :  { %v4958_v17 = vpop.f32.mrb[60].mxu1  ;;  %v21102_v60 = vpop.f32.mrb[60].mxu0  ;;  %v14767_v44 = vcombine.high %v21139_v49, %v21143_v43 }
 0x38d   :  { %v5091_v62 = vadd.f32 %v4958_v17, %v20031_v10  ;;  %v4960_v56 = vpop.f32.mrb[61].mxu1  ;;  %v6850_v7 = vpop.f32.mrb[61].mxu0  ;;  %v15920_v17 = vld [vmem:[%s23714_s0 + $0x440] ss:$16 sps:$4 sm:$0xff]  }
 0x38e   :  { %v4961_v20 = vpop.f32.mrb[62].mxu1  ;;  %v21114_v53 = vpop.f32.mrb[62].mxu0 }
 0x38f   :  { %v21120_v32 = vadd.f32 %v4961_v20, %v20039_v61  ;;  %v4963_v10 = vpop.f32.mrb[63].mxu1  ;;  %v6853_v18 = vpop.f32.mrb[63].mxu0  ;;  %v14604_v61 = vld [vmem:[%s23714_s0 + $0x4a0] sm:$0xee]  ;;  %v14672_v20 = vrot.slane %v14602_v11, 9 }
 0x390   :  { %v14673_v26 = vrot.slane %v14604_v61, 9  ;;  %v14608_v61 = vld [vmem:[%s23714_s0 + $0x4c0] sm:$0xee] }
 0x391   :  { %8185 = vmatmul.mubr.bf16.gmra.mrb[168].mxu1 %v14762_v46  ;;  %9180 = vmatmul.mubr.bf16.gmra.mrb[168].mxu0 %v15915_v58  ;;  %v14764_v46 = vcombine.low %v7522_v28, %v7526_v55  ;;  %v15925_v58 = vld [vmem:[%s23714_s0 + $0x484] ss:$16 sps:$4 sm:$0xff]  }
 0x392   :  { %8192 = vmatprep.mubr.bf16.mxu1 %v14765_v38  ;;  %9187 = vmatprep.mubr.bf16.mxu0 %v15922_v24  ;;  %v21148_v38 = vadd.f32 %v6843_v16, %v5090_v2  ;;  %v14606_v28 = vld [vmem:[%s23714_s0 + $0x4b0] sm:$0xee]  ;;  %v14607_v16 = vld [vmem:[%s23714_s0 + $0x4b8] sm:$0x11] }
 0x394   :  { %v7978_v56 = vpop.f32.mrb[64].mxu1  ;;  %v8973_v7 = vpop.f32.mrb[64].mxu0  ;;  %23954 = vst [vmem:[#allocation27_spill] sm:$0xff] %v21148_v38 }
 0x395   :  { %v8297_v24 = vadd.f32 %v7978_v56, %v20074_v40  ;;  %v7980_v10 = vpop.f32.mrb[65].mxu1  ;;  %v8975_v18 = vpop.f32.mrb[65].mxu0  ;;  %v23956_v40 = vld [vmem:[#allocation36_spill] sm:$0xff] }
 0x396   :  { %v7981_v5 = vpop.f32.mrb[66].mxu1  ;;  %v8976_v33 = vpop.f32.mrb[66].mxu0  ;;  %v14609_v56 = vld [vmem:[%s23714_s0 + $0x4c8] sm:$0x11]  ;;  %v21181_v10 = vsel %vm16533_vm5, %v14672_v20, %v7537_v34  ;;  %v14612_v18 = vld [vmem:[%s23714_s0 + $0x4e0] sm:$0xee] }
 0x397   :  { %v21159_v2 = vadd.f32 %v8973_v7, %v8297_v24  ;;  %v8298_v55 = vadd.f32 %v7981_v5, %v23956_v40  ;;  %v7983_v11 = vpop.f32.mrb[67].mxu1  ;;  %v8978_v51 = vpop.f32.mrb[67].mxu0  ;;  %v14610_v7 = vld [vmem:[%s23714_s0 + $0x4d0] sm:$0xee]  ;;  %v14611_v5 = vld [vmem:[%s23714_s0 + $0x4d8] sm:$0x11] }
 0x398   :  { %v14613_v40 = vld [vmem:[%s23714_s0 + $0x4e8] sm:$0x11]  ;;  %v14968_v11 = vld [vmem:[%s23714_s0 + $0x30] sm:$0xff]  ;;  %v9549_v20 = vshrl.u32 %v14966_v48, 16  ;;  %v9552_v34 = vshll.u32 %v14966_v48, 16  ;;  %v7545_v51 = vrot.slane %v14607_v16, 5  ;;  %v14766_v48 = vcombine.low %v21139_v49, %v21143_v43 }
 0x399   :  { %23955 = vst [vmem:[#allocation29_spill] sm:$0xff] %v21159_v2  ;;  %v21177_v24 = vadd.f32 %v8976_v33, %v8298_v55  ;;  %8193 = vmatmul.mubr.bf16.gmra.mrb[172].mxu1 %v14764_v46  ;;  %9188 = vmatmul.mubr.bf16.gmra.mrb[172].mxu0 %v15920_v17  ;;  %v21193_v33 = vadd.f32 %v21102_v60, %v5091_v62  ;;  %v14674_v46 = vrot.slane %v14606_v28, 9  ;;  %v15923_v55 = vld [vmem:[%s23714_s0 + $0x480] ss:$16 sps:$4 sm:$0xff]   ;;  %v7549_v2 = vrot.slane %v14609_v56, 5 }
 0x39a   :  { %8200 = vmatprep.mubr.bf16.mxu1 %v14767_v44  ;;  %9195 = vmatprep.mubr.bf16.mxu0 %v15925_v58  ;;  %v21197_v17 = vsel %vm16533_vm5, %v14673_v26, %v7541_v41  ;;  %v14676_v38 = vrot.slane %v14610_v7, 9  ;;  %v7553_v62 = vrot.slane %v14611_v5, 5  ;;  %v14677_v44 = vrot.slane %v14612_v18, 9  ;;  %v15930_v16 = vld [vmem:[%s23714_s0 + $0x4a4] ss:$16 sps:$4 sm:$0xff]  }
 0x39b   :  { %23957 = vst [vmem:[#allocation30_spill] sm:$0xff] %v21177_v24  ;;  %23958 = vst [vmem:[#allocation31_spill] sm:$0xff] %v21193_v33  ;;  %v14675_v24 = vrot.slane %v14608_v61, 9  ;;  %v7557_v58 = vrot.slane %v14613_v40, 5  ;;  %v9563_v33 = vshrl.u32 %v14968_v11, 16  ;;  %v9566_v61 = vshll.u32 %v14968_v11, 16 }
 0x39c   :  { %v7986_v21 = vpop.f32.mrb[68].mxu1  ;;  %v8981_v60 = vpop.f32.mrb[68].mxu0  ;;  %v14769_v5 = vcombine.high %v21181_v10, %v21197_v17  ;;  %v9551_v18 = vrot.slane %v9549_v20, 4  ;;  %v9554_v40 = vrot.slane %v9552_v34, 5  ;;  %v21218_v11 = vsel %vm16533_vm5, %v14674_v46, %v7545_v51  ;;  %v14969_v46 = vld [vmem:[%s23714_s0 + $0x38] sm:$0x11] }
 0x39d   :  { %v8299_v41 = vadd.f32 %v7986_v21, %v20108_v52  ;;  %v7988_v26 = vpop.f32.mrb[69].mxu1  ;;  %v8983_v28 = vpop.f32.mrb[69].mxu0  ;;  %v14970_v52 = vld [vmem:[%s23714_s0 + $0x40] sm:$0xff]  ;;  %v21225_v20 = vsel %vm16533_vm5, %v14675_v24, %v7549_v2  ;;  %v21229_v34 = vsel %vm16533_vm5, %v14676_v38, %v7553_v62  ;;  %v9565_v51 = vrot.slane %v9563_v33, 4 }
 0x39e   :  { %v7989_v56 = vpop.f32.mrb[70].mxu1  ;;  %v8984_v7 = vpop.f32.mrb[70].mxu0  ;;  %v14967_v28 = vld [vmem:[%s23714_s0 + $0x28] sm:$0x11]  ;;  %v9577_v2 = vshrl.u32 %v14970_v52, 16  ;;  %v9580_v24 = vshll.u32 %v14970_v52, 16  ;;  %v9555_v38 = vor.u32 %v9554_v40, %v9551_v18 }
 0x39f   :  { %v21213_v21 = vadd.f32 %v8981_v60, %v8299_v41  ;;  %v8300_v49 = vadd.f32 %v7989_v56, %v20113_v9  ;;  %v7991_v43 = vpop.f32.mrb[71].mxu1  ;;  %v8986_v26 = vpop.f32.mrb[71].mxu0  ;;  %v21233_v9 = vsel %vm16533_vm5, %v14677_v44, %v7557_v58  ;;  %v9568_v41 = vrot.slane %v9566_v61, 5  ;;  %v15928_v58 = vld [vmem:[%s23714_s0 + $0x4a0] ss:$16 sps:$4 sm:$0xff]  }
 0x3a0   :  { %v9558_v62 = vshll.u32 %v14967_v28, 16  ;;  %v14768_v44 = vcombine.low %v21181_v10, %v21197_v17  ;;  %v9572_v56 = vshll.u32 %v14969_v46, 16  ;;  %v15208_v10 = vld [vmem:[%s23714_s0 + $0x30] sm:$0xee]  ;;  %v14971_v52 = vld [vmem:[%s23714_s0 + $0x48] sm:$0x11]  ;;  %v21278_v43 = vadd.f32 %v21114_v53, %v21120_v32 }
 0x3a1   :  { %23959 = vst [vmem:[#allocation32_spill] sm:$0xff] %v21213_v21  ;;  %v21238_v60 = vadd.f32 %v8984_v7, %v8300_v49  ;;  %8201 = vmatmul.mubr.bf16.gmra.mrb[176].mxu1 %v14766_v48  ;;  %9196 = vmatmul.mubr.bf16.gmra.mrb[176].mxu0 %v15923_v55  ;;  %v21250_v55 = vld [vmem:[%s23714_s0 + $0x20] sm:$0xee]  ;;  %v15207_v48 = vld [vmem:[%s23714_s0 + $0x28] sm:$0x11]  ;;  %v14972_v17 = vld [vmem:[%s23714_s0 + $0x50] sm:$0xff]  ;;  %v14771_v7 = vcombine.high %v21218_v11, %v21225_v20 }
 0x3a2   :  { %8208 = vmatprep.mubr.bf16.mxu1 %v14769_v5  ;;  %9203 = vmatprep.mubr.bf16.mxu0 %v15930_v16  ;;  %v15933_v5 = vld [vmem:[%s23714_s0 + $0x4c4] ss:$16 sps:$4 sm:$0xff]   ;;  %v14973_v49 = vld [vmem:[%s23714_s0 + $0x58] sm:$0x11]  ;;  %v9569_v18 = vor.u32 %v9568_v41, %v9565_v51  ;;  %v9579_v33 = vrot.slane %v9577_v2, 4  ;;  %v9556_v54 = vrot.slane %v9555_v38, 4 }
 0x3a3   :  { %23960 = vst [vmem:[#allocation33_spill] sm:$0xff] %v21238_v60  ;;  %v15209_v40 = vld [vmem:[%s23714_s0 + $0x38] sm:$0x11]  ;;  %v9582_v60 = vrot.slane %v9580_v24, 5  ;;  %v9560_v14 = vrot.slane %v9558_v62, 5  ;;  %v9591_v39 = vshrl.u32 %v14972_v17, 16 }
 0x3a4   :  { %v7994_v16 = vpop.f32.mrb[72].mxu1  ;;  %v8989_v61 = vpop.f32.mrb[72].mxu0  ;;  %v9594_v6 = vshll.u32 %v14972_v17, 16  ;;  %v9600_v51 = vshll.u32 %v14973_v49, 16  ;;  %v14974_v41 = vld [vmem:[%s23714_s0 + $0x60] sm:$0xff]  ;;  %v15334_v2 = vrot.slane %v21250_v55, 9 }
 0x3a5   :  { %v8301_v26 = vadd.f32 %v7994_v16, %v20127_v3  ;;  %v7996_v28 = vpop.f32.mrb[73].mxu1  ;;  %v8991_v46 = vpop.f32.mrb[73].mxu0  ;;  %v9586_v16 = vshll.u32 %v14971_v52, 16  ;;  %v11568_v24 = vrot.slane %v15207_v48, 5  ;;  %v11572_v38 = vrot.slane %v15209_v40, 5  ;;  %v14976_v62 = vld [vmem:[%s23714_s0 + $0x70] sm:$0xff] }
 0x3a6   :  { %v7997_v21 = vpop.f32.mrb[74].mxu1  ;;  %v8992_v47 = vpop.f32.mrb[74].mxu0  ;;  %v15335_v28 = vrot.slane %v15208_v10, 9  ;;  %v21299_v52 = vld [vmem:[%s23714_s0 + $0x40] sm:$0xee]  ;;  %v9593_v48 = vrot.slane %v9591_v39, 4 }
 0x3a7   :  { %v21284_v27 = vadd.f32 %v8989_v61, %v8301_v26  ;;  %v8302_v53 = vadd.f32 %v7997_v21, %v20129_v12  ;;  %v7999_v3 = vpop.f32.mrb[75].mxu1  ;;  %v8994_v32 = vpop.f32.mrb[75].mxu0  ;;  %v9570_v12 = vrot.slane %v9569_v18, 4  ;;  %v9574_v21 = vrot.slane %v9572_v56, 5  ;;  %v21304_v55 = vld [vmem:[%s23714_s0 + $0x48] sm:$0x11] }
 0x3a8   :  { %v9583_v61 = vor.u32 %v9582_v60, %v9579_v33  ;;  %v9605_v10 = vshrl.u32 %v14974_v41, 16  ;;  %v15931_v60 = vld [vmem:[%s23714_s0 + $0x4c0] ss:$16 sps:$4 sm:$0xff]   ;;  %v9588_v33 = vrot.slane %v9586_v16, 5  ;;  %v21313_v56 = vrot.slane %v9600_v51, 5 }
 0x3a9   :  { %23961 = vst [vmem:[#allocation34_spill] sm:$0xff] %v21284_v27  ;;  %v21294_v17 = vadd.f32 %v8992_v47, %v8302_v53  ;;  %8209 = vmatmul.mubr.bf16.gmra.mrb[180].mxu1 %v14768_v44  ;;  %9204 = vmatmul.mubr.bf16.gmra.mrb[180].mxu0 %v15928_v58  ;;  %v9596_v47 = vrot.slane %v9594_v6, 5  ;;  %v9608_v44 = vshll.u32 %v14974_v41, 16  ;;  %v21311_v58 = vsel %vm16227_vm2, %v9556_v54, %v9560_v14  ;;  %v15938_v18 = vld [vmem:[%s23714_s0 + $0x4e4] ss:$16 sps:$4 sm:$0xff]  }
 0x3aa   :  { %8216 = vmatprep.mubr.bf16.mxu1 %v14771_v7  ;;  %9211 = vmatprep.mubr.bf16.mxu0 %v15933_v5  ;;  %v21318_v7 = vld [vmem:[%s23714_s0 + $0x50] sm:$0xee]  ;;  %v9619_v39 = vshrl.u32 %v14976_v62, 16  ;;  %v21325_v40 = vsel %vm16533_vm5, %v15334_v2, %v11568_v24  ;;  %v21329_v14 = vsel %vm16533_vm5, %v15335_v28, %v11572_v38  ;;  %v21334_v54 = vld [vmem:[%s23714_s0 + $0x58] sm:$0x11]  ;;  %v15336_v49 = vrot.slane %v21299_v52, 9 }
 0x3ab   :  { %23962 = vst [vmem:[#allocation35_spill] sm:$0xff] %v21294_v17  ;;  %v11576_v26 = vrot.slane %v21304_v55, 5  ;;  %v21341_v32 = vsel %vm16227_vm2, %v9570_v12, %v9574_v21  ;;  %v9584_v16 = vrot.slane %v9583_v61, 4  ;;  %v14975_v51 = vld [vmem:[%s23714_s0 + $0x68] sm:$0x11]  ;;  %v9622_v2 = vshll.u32 %v14976_v62, 16 }
 0x3ac   :  { %v8002_v6 = vpop.f32.mrb[76].mxu1  ;;  %v8997_v5 = vpop.f32.mrb[76].mxu0  ;;  %v14977_v41 = vld [vmem:[%s23714_s0 + $0x78] sm:$0x11]  ;;  %v9597_v38 = vor.u32 %v9596_v47, %v9593_v48  ;;  %v9607_v52 = vrot.slane %v9605_v10, 4  ;;  %v9610_v55 = vrot.slane %v9608_v44, 5  ;;  %v15127_v10 = vcombine.high %v21311_v58, %v21341_v32 }
 0x3ad   :  { %v8303_v46 = vadd.f32 %v8002_v6, %v20153_v36  ;;  %v8004_v53 = vpop.f32.mrb[77].mxu1  ;;  %v8999_v3 = vpop.f32.mrb[77].mxu0  ;;  %v15337_v36 = vrot.slane %v21318_v7, 9  ;;  %v14978_v12 = vld [vmem:[%s23714_s0 + $0x80] sm:$0xff]  ;;  %v9621_v62 = vrot.slane %v9619_v39, 4  ;;  %v23966_v47 = vcombine.high %v21229_v34, %v21233_v9 }
 0x3ae   :  { %v8005_v24 = vpop.f32.mrb[78].mxu1  ;;  %v9000_v28 = vpop.f32.mrb[78].mxu0  ;;  %v11580_v3 = vrot.slane %v21334_v54, 5  ;;  %v15214_v48 = vld [vmem:[%s23714_s0 + $0x60] sm:$0xee]  ;;  %v9636_v44 = vshll.u32 %v14978_v12, 16  ;;  %v21390_v27 = vsel %vm16227_vm2, %v9584_v16, %v9588_v33 }
 0x3af   :  { %v21353_v21 = vadd.f32 %v8997_v5, %v8303_v46  ;;  %v8304_v61 = vadd.f32 %v8005_v24, %v20155_v37  ;;  %v8007_v6 = vpop.f32.mrb[79].mxu1  ;;  %v9002_v53 = vpop.f32.mrb[79].mxu0  ;;  %v15431_v37 = vcombine.high %v21325_v40, %v21329_v14  ;;  %v15215_v7 = vld [vmem:[%s23714_s0 + $0x68] sm:$0x11]  ;;  %v15216_v39 = vld [vmem:[%s23714_s0 + $0x70] sm:$0xee]  ;;  %v23965_v46 = vcombine.low %v21218_v11, %v21225_v20 }
 0x3b0   :  { %v15217_v5 = vld [vmem:[%s23714_s0 + $0x78] sm:$0x11]  ;;  %v9624_v24 = vrot.slane %v9622_v2, 5  ;;  %v14980_v6 = vld [vmem:[%s23714_s0 + $0x90] sm:$0xff]  ;;  %v9633_v53 = vshrl.u32 %v14978_v12, 16  ;;  %v15338_v17 = vrot.slane %v15214_v48, 9  ;;  %v21394_v12 = vsel %vm16533_vm5, %v15336_v49, %v11576_v26 }
 0x3b1   :  { %23963 = vst [vmem:[#allocation36_spill] sm:$0xff] %v21353_v21  ;;  %v21377_v54 = vadd.f32 %v9000_v28, %v8304_v61  ;;  %8217 = vmatmul.mubr.bf16.gmra.mrb[184].mxu1 %v23965_v46  ;;  %9212 = vmatmul.mubr.bf16.gmra.mrb[184].mxu0 %v15931_v60  ;;  %v9598_v21 = vrot.slane %v9597_v38, 4  ;;  %v9611_v28 = vor.u32 %v9610_v55, %v9607_v52  ;;  %v9614_v61 = vshll.u32 %v14975_v51, 16  ;;  %v15936_v48 = vld [vmem:[%s23714_s0 + $0x4e0] ss:$16 sps:$4 sm:$0xff]  }
 0x3b2   :  { %8224 = vmatprep.mubr.bf16.mxu1 %v23966_v47  ;;  %9219 = vmatprep.mubr.bf16.mxu0 %v15938_v18  ;;  %v11584_v11 = vrot.slane %v15215_v7, 5  ;;  %v15339_v20 = vrot.slane %v15216_v39, 9  ;;  %v11588_v60 = vrot.slane %v15217_v5, 5  ;;  %v14979_v18 = vld [vmem:[%s23714_s0 + $0x88] sm:$0x11]  ;;  %v9647_v51 = vshrl.u32 %v14980_v6, 16 }
 0x3b3   :  { %23964 = vst [vmem:[#allocation48_spill] sm:$0xff] %v21377_v54  ;;  %v9628_v54 = vshll.u32 %v14977_v41, 16  ;;  %v9650_v41 = vshll.u32 %v14980_v6, 16  ;;  %v9625_v33 = vor.u32 %v9624_v24, %v9621_v62  ;;  %v9635_v16 = vrot.slane %v9633_v53, 4  ;;  %v14981_v6 = vld [vmem:[%s23714_s0 + $0x98] sm:$0x11] }
 0x3b4   :  { %v8010_v2 = vpop.f32.mrb[80].mxu1  ;;  %v9005_v46 = vpop.f32.mrb[80].mxu0  ;;  %v9638_v47 = vrot.slane %v9636_v44, 5  ;;  %v21406_v26 = vsel %vm16227_vm2, %v9598_v21, %v21313_v56  ;;  %v21410_v39 = vsel %vm16533_vm5, %v15337_v36, %v11580_v3  ;;  %v21420_v56 = vsel %vm16533_vm5, %v15338_v17, %v11584_v11  ;;  %v14982_v17 = vld [vmem:[%s23714_s0 + $0xc0] sm:$0xff] }
 0x3b5   :  { %v8305_v38 = vadd.f32 %v8010_v2, %v20180_v15  ;;  %v8012_v52 = vpop.f32.mrb[81].mxu1  ;;  %v9007_v55 = vpop.f32.mrb[81].mxu0  ;;  %v9616_v15 = vrot.slane %v9614_v61, 5  ;;  %v9630_v5 = vrot.slane %v9628_v54, 5  ;;  %v9612_v2 = vrot.slane %v9611_v28, 4 }
 0x3b6   :  { %v8013_v7 = vpop.f32.mrb[82].mxu1  ;;  %v9008_v49 = vpop.f32.mrb[82].mxu0  ;;  %v9642_v52 = vshll.u32 %v14979_v18, 16  ;;  %v21424_v36 = vsel %vm16533_vm5, %v15339_v20, %v11588_v60  ;;  %v9649_v21 = vrot.slane %v9647_v51, 4  ;;  %v9652_v3 = vrot.slane %v9650_v41, 5 }
 0x3b7   :  { %v21415_v62 = vadd.f32 %v9005_v46, %v8305_v38  ;;  %v8306_v44 = vadd.f32 %v8013_v7, %v20182_v8  ;;  %v8015_v24 = vpop.f32.mrb[83].mxu1  ;;  %v9010_v53 = vpop.f32.mrb[83].mxu0  ;;  %v23968_v61 = vcombine.low %v21229_v34, %v21233_v9  ;;  %v9626_v8 = vrot.slane %v9625_v33, 4  ;;  %v15218_v9 = vld [vmem:[%s23714_s0 + $0x80] sm:$0xee]  ;;  %v14984_v38 = vld [vmem:[%s23714_s0 + $0xd0] sm:$0xff] }
 0x3b8   :  { %v9639_v28 = vor.u32 %v9638_v47, %v9635_v16  ;;  %v9656_v46 = vshll.u32 %v14981_v6, 16  ;;  %v15433_v34 = vcombine.high %v21394_v12, %v21410_v39  ;;  %v15129_v60 = vcombine.high %v21390_v27, %v21406_v26  ;;  %v15219_v51 = vld [vmem:[%s23714_s0 + $0x88] sm:$0x11]  ;;  %v15220_v41 = vld [vmem:[%s23714_s0 + $0x90] sm:$0xee] }
 0x3b9   :  { %v21426_v54 = vadd.f32 %v9008_v49, %v8306_v44  ;;  %8225 = vmatmul.mubr.bf16.gmra.mrb[188].mxu1 %v23968_v61  ;;  %9220 = vmatmul.mubr.bf16.gmra.mrb[188].mxu0 %v15936_v48  ;;  %v9644_v18 = vrot.slane %v9642_v52, 5  ;;  %v9653_v16 = vor.u32 %v9652_v3, %v9649_v21  ;;  %v15221_v47 = vld [vmem:[%s23714_s0 + $0x98] sm:$0x11]  ;;  %v9661_v7 = vshrl.u32 %v14982_v17, 16  ;;  %v14983_v52 = vld [vmem:[%s23714_s0 + $0xc8] sm:$0x11] }
 0x3ba   :  { %10861 = vmatprep.mubr.bf16.mxu1 %v15127_v10  ;;  %12239 = vmatprep.mubr.bf16.mxu0 %v15431_v37  ;;  %v21447_v10 = vsel %vm16227_vm2, %v9612_v2, %v9616_v15  ;;  %v9664_v49 = vshll.u32 %v14982_v17, 16  ;;  %v21468_v24 = vsel %vm16227_vm2, %v9626_v8, %v9630_v5  ;;  %v9640_v53 = vrot.slane %v9639_v28, 4  ;;  %v14986_v28 = vld [vmem:[%s23714_s0 + $0xe0] sm:$0xff] }
 0x3bb   :  { %23967 = vst [vmem:[#allocation49_spill] sm:$0xff] %v21426_v54  ;;  %v9658_v2 = vrot.slane %v9656_v46, 5  ;;  %v15340_v61 = vrot.slane %v15218_v9, 9  ;;  %v11592_v37 = vrot.slane %v15219_v51, 5  ;;  %v9675_v33 = vshrl.u32 %v14984_v38, 16  ;;  %v14988_v9 = vld [vmem:[%s23714_s0 + $0xf0] sm:$0xff] }
 0x3bc   :  { %v8018_v55 = vpop.f32.mrb[84].mxu1  ;;  %v9013_v48 = vpop.f32.mrb[84].mxu0  ;;  %v9678_v17 = vshll.u32 %v14984_v38, 16  ;;  %v15341_v5 = vrot.slane %v15220_v41, 9  ;;  %v11596_v8 = vrot.slane %v15221_v47, 5  ;;  %v9654_v46 = vrot.slane %v9653_v16, 4 }
 0x3bd   :  { %v8307_v15 = vadd.f32 %v8018_v55, %v20220_v59  ;;  %v8020_v6 = vpop.f32.mrb[85].mxu1  ;;  %v9015_v44 = vpop.f32.mrb[85].mxu0  ;;  %v9666_v11 = vrot.slane %v9664_v49, 5  ;;  %v9670_v54 = vshll.u32 %v14983_v52, 16  ;;  %v23970_v41 = vcombine.low %v21325_v40, %v21329_v14  ;;  %v14985_v16 = vld [vmem:[%s23714_s0 + $0xd8] sm:$0x11] }
 0x3be   :  { %v8021_v21 = vpop.f32.mrb[86].mxu1  ;;  %v9016_v3 = vpop.f32.mrb[86].mxu0  ;;  %v9663_v44 = vrot.slane %v9661_v7, 4  ;;  %v15130_v38 = vcombine.low %v21447_v10, %v21468_v24  ;;  %v15222_v47 = vld [vmem:[%s23714_s0 + $0xc0] sm:$0xee]  ;;  %v9677_v40 = vrot.slane %v9675_v33, 4  ;;  %v21514_v52 = vsel %vm16533_vm5, %v15340_v61, %v11592_v37 }
 0x3bf   :  { %v21473_v20 = vadd.f32 %v9013_v48, %v8307_v15  ;;  %v8308_v59 = vadd.f32 %v8021_v21, %v20222_v35  ;;  %v8023_v55 = vpop.f32.mrb[87].mxu1  ;;  %v9018_v6 = vpop.f32.mrb[87].mxu0  ;;  %v23969_v35 = vcombine.low %v21311_v58, %v21341_v32  ;;  %v15131_v48 = vcombine.high %v21447_v10, %v21468_v24  ;;  %v15223_v58 = vld [vmem:[%s23714_s0 + $0xc8] sm:$0x11]  ;;  %v21506_v32 = vld [vmem:[%s23714_s0 + $0xd0] sm:$0xee] }
 0x3c0   :  { %v9680_v14 = vrot.slane %v9678_v17, 5  ;;  %v9689_v7 = vshrl.u32 %v14986_v28, 16  ;;  %v9692_v49 = vshll.u32 %v14986_v28, 16  ;;  %v21510_v15 = vsel %vm16227_vm2, %v9640_v53, %v9644_v18  ;;  %v15225_v18 = vld [vmem:[%s23714_s0 + $0xd8] sm:$0x11]  ;;  %v14996_v10 = vld [vmem:[%s23714_s0 + $0x130] sm:$0xff] }
 0x3c1   :  { %v21482_v51 = vadd.f32 %v9016_v3, %v8308_v59  ;;  %10862 = vmatmul.mubr.bf16.vlgmr.msra.gmra.mrb[192].mxu1 %v23969_v35  ;;  %12240 = vmatmul.mubr.bf16.vlgmr.msra.gmra.mrb[192].mxu0 %v23970_v41  ;;  %v9703_v21 = vshrl.u32 %v14988_v9, 16  ;;  %v21518_v3 = vsel %vm16533_vm5, %v15341_v5, %v11596_v8  ;;  %v9667_v17 = vor.u32 %v9666_v11, %v9663_v44  ;;  %v14987_v11 = vld [vmem:[%s23714_s0 + $0xe8] sm:$0x11] }
 0x3c2   :  { %10869 = vmatprep.mubr.bf16.mxu1 %v15129_v60  ;;  %12247 = vmatprep.mubr.bf16.mxu0 %v15433_v34  ;;  %v9706_v60 = vshll.u32 %v14988_v9, 16  ;;  %v9672_v59 = vrot.slane %v9670_v54, 5  ;;  %v9684_v55 = vshll.u32 %v14985_v16, 16  ;;  %v15342_v61 = vrot.slane %v15222_v47, 9 }
 0x3c3   :  { %v11600_v28 = vrot.slane %v15223_v58, 5  ;;  %v15343_v9 = vrot.slane %v21506_v32, 9  ;;  %v21527_v5 = vsel %vm16227_vm2, %v9654_v46, %v9658_v2  ;;  %v9681_v54 = vor.u32 %v9680_v14, %v9677_v40  ;;  %v14989_v32 = vld [vmem:[%s23714_s0 + $0xf8] sm:$0x11] }
 0x3c4   :  { %v8026_v34 = vpop.f32.mrb[88].mxu1  ;;  %v9021_v33 = vpop.f32.mrb[88].mxu0  ;;  %v9691_v8 = vrot.slane %v9689_v7, 4  ;;  %v9694_v44 = vrot.slane %v9692_v49, 5  ;;  %v9708_v2 = vrot.slane %v9706_v60, 5  ;;  %v9668_v14 = vrot.slane %v9667_v17, 4 }
 0x3c5   :  { %v8309_v53 = vadd.f32 %v8026_v34, %v20272_v25  ;;  %v8028_v6 = vpop.f32.mrb[89].mxu1  ;;  %v9023_v37 = vpop.f32.mrb[89].mxu0  ;;  %v9705_v34 = vrot.slane %v9703_v21, 4  ;;  %v11604_v7 = vrot.slane %v15225_v18, 5  ;;  %v15227_v49 = vld [vmem:[%s23714_s0 + $0xe8] sm:$0x11]  ;;  %v23971_v21 = vcombine.low %v21390_v27, %v21406_v26 }
 0x3c6   :  { %v8029_v35 = vpop.f32.mrb[90].mxu1  ;;  %v9024_v41 = vpop.f32.mrb[90].mxu0  ;;  %v23972_v60 = vcombine.low %v21394_v12, %v21410_v39  ;;  %v15133_v18 = vcombine.high %v21510_v15, %v21527_v5  ;;  %v15228_v6 = vld [vmem:[%s23714_s0 + $0xf0] sm:$0xee]  ;;  %v15229_v27 = vld [vmem:[%s23714_s0 + $0xf8] sm:$0x11]  ;;  %v23973_v26 = vcombine.high %v21420_v56, %v21424_v36 }
 0x3c7   :  { %v21532_v25 = vadd.f32 %v9021_v33, %v8309_v53  ;;  %v8310_v16 = vadd.f32 %v8029_v35, %v20274_v50  ;;  %v8031_v47 = vpop.f32.mrb[91].mxu1  ;;  %v9026_v58 = vpop.f32.mrb[91].mxu0  ;;  %v15226_v50 = vld [vmem:[%s23714_s0 + $0xe0] sm:$0xee]  ;;  %v9686_v53 = vrot.slane %v9684_v55, 5  ;;  %v9682_v39 = vrot.slane %v9681_v54, 4 }
 0x3c8   :  { %v14990_v12 = vld [vmem:[%s23714_s0 + $0x100] sm:$0xff]  ;;  %v21574_v55 = vsel %vm16533_vm5, %v15342_v61, %v11600_v28  ;;  %v9698_v37 = vshll.u32 %v14987_v11, 16  ;;  %v9712_v35 = vshll.u32 %v14989_v32, 16  ;;  %v9709_v47 = vor.u32 %v9708_v2, %v9705_v34 }
 0x3c9   :  { %v21548_v33 = vadd.f32 %v9024_v41, %v8310_v16  ;;  %10870 = vmatmul.mubr.bf16.gmra.mrb[196].mxu1 %v23971_v21  ;;  %12248 = vmatmul.mubr.bf16.gmra.mrb[196].mxu0 %v23972_v60  ;;  %v14992_v41 = vld [vmem:[%s23714_s0 + $0x110] sm:$0xff]  ;;  %v9695_v16 = vor.u32 %v9694_v44, %v9691_v8  ;;  %v15344_v58 = vrot.slane %v15226_v50, 9  ;;  %v11608_v21 = vrot.slane %v15227_v49, 5 }
 0x3ca   :  { %10877 = vmatprep.mubr.bf16.mxu1 %v15131_v48  ;;  %12255 = vmatprep.mubr.bf16.mxu0 %v23973_v26  ;;  %v15345_v46 = vrot.slane %v15228_v6, 9  ;;  %v11612_v17 = vrot.slane %v15229_v27, 5  ;;  %v9717_v26 = vshrl.u32 %v14990_v12, 16  ;;  %v9720_v54 = vshll.u32 %v14990_v12, 16 }
 0x3cb   :  { %v21582_v11 = vsel %vm16227_vm2, %v9668_v14, %v9672_v59  ;;  %v21586_v8 = vsel %vm16533_vm5, %v15343_v9, %v11604_v7  ;;  %v9731_v44 = vshrl.u32 %v14992_v41, 16  ;;  %v21590_v2 = vsel %vm16227_vm2, %v9682_v39, %v9686_v53  ;;  %v14994_v7 = vld [vmem:[%s23714_s0 + $0x120] sm:$0xff] }
 0x3cc   :  { %v8034_v48 = vpop.f32.mrb[92].mxu1  ;;  %v9029_v60 = vpop.f32.mrb[92].mxu0  ;;  %v9700_v50 = vrot.slane %v9698_v37, 5  ;;  %v9714_v49 = vrot.slane %v9712_v35, 5  ;;  %v9696_v12 = vrot.slane %v9695_v16, 4  ;;  %v21597_v9 = vsel %vm16533_vm5, %v15344_v58, %v11608_v21 }
 0x3cd   :  { %v8311_v40 = vadd.f32 %v8034_v48, %v20324_v45  ;;  %v8036_v61 = vpop.f32.mrb[93].mxu1  ;;  %v9031_v28 = vpop.f32.mrb[93].mxu0  ;;  %v9734_v45 = vshll.u32 %v14992_v41, 16  ;;  %v9710_v53 = vrot.slane %v9709_v47, 4  ;;  %v21604_v39 = vsel %vm16533_vm5, %v15345_v46, %v11612_v17  ;;  %v14993_v16 = vld [vmem:[%s23714_s0 + $0x118] sm:$0x11] }
 0x3ce   :  { %v8037_v32 = vpop.f32.mrb[94].mxu1  ;;  %v9032_v34 = vpop.f32.mrb[94].mxu0  ;;  %v21613_v37 = vrot.slane %v9720_v54, 5  ;;  %v23975_v41 = vcombine.low %v21420_v56, %v21424_v36  ;;  %v15439_v17 = vcombine.high %v21574_v55, %v21586_v8  ;;  %v9733_v47 = vrot.slane %v9731_v44, 4  ;;  %v15230_v58 = vld [vmem:[%s23714_s0 + $0x100] sm:$0xee] }
 0x3cf   :  { %v21592_v6 = vadd.f32 %v9029_v60, %v8311_v40  ;;  %v8312_v27 = vadd.f32 %v8037_v32, %v20326_v1  ;;  %v8039_v59 = vpop.f32.mrb[95].mxu1  ;;  %v9034_v14 = vpop.f32.mrb[95].mxu0  ;;  %v21609_v1 = vld [vmem:[%s23714_s0 + $0x108] sm:$0x11]  ;;  %v21611_v40 = vrot.slane %v9717_v26, 4  ;;  %v23976_v56 = vcombine.high %v21514_v52, %v21518_v3 }
 0x3d0   :  { %v15135_v24 = vcombine.high %v21582_v11, %v21590_v2  ;;  %v15231_v21 = vld [vmem:[%s23714_s0 + $0x108] sm:$0x11]  ;;  %v21648_v48 = vsel %vm16227_vm2, %v9696_v12, %v9700_v50  ;;  %v9726_v26 = vshll.u32 %v21609_v1, 16  ;;  %v15232_v54 = vld [vmem:[%s23714_s0 + $0x110] sm:$0xee]  ;;  %v9748_v28 = vshll.u32 %v14994_v7, 16 }
 0x3d1   :  { %v21615_v35 = vadd.f32 %v9032_v34, %v8312_v27  ;;  %10878 = vmatmul.mubr.bf16.gmra.mrb[200].mxu1 %v15130_v38  ;;  %12256 = vmatmul.mubr.bf16.gmra.mrb[200].mxu0 %v23975_v41  ;;  %v9736_v38 = vrot.slane %v9734_v45, 5  ;;  %v15233_v61 = vld [vmem:[%s23714_s0 + $0x118] sm:$0x11]  ;;  %v21661_v34 = vsel %vm16227_vm2, %v9710_v53, %v9714_v49  ;;  %v9723_v50 = vor.u32 %v21613_v37, %v21611_v40  ;;  %v14995_v27 = vld [vmem:[%s23714_s0 + $0x128] sm:$0x11]  ;;  %v14998_v40 = vld [vmem:[%s23714_s0 + $0x160] sm:$0xff] }
 0x3d2   :  { %10885 = vmatprep.mubr.bf16.mxu1 %v15133_v18  ;;  %12263 = vmatprep.mubr.bf16.mxu0 %v23976_v56  ;;  %v9745_v18 = vshrl.u32 %v14994_v7, 16  ;;  %v9740_v45 = vshll.u32 %v14993_v16, 16  ;;  %v9759_v59 = vshrl.u32 %v14996_v10, 16  ;;  %v15346_v7 = vrot.slane %v15230_v58, 9 }
 0x3d3   :  { %23974 = vst [vmem:[#allocation50_spill] sm:$0xff] %v21615_v35  ;;  %v11616_v41 = vrot.slane %v15231_v21, 5  ;;  %v9762_v56 = vshll.u32 %v14996_v10, 16  ;;  %v9737_v49 = vor.u32 %v9736_v38, %v9733_v47  ;;  %v15347_v53 = vrot.slane %v15232_v54, 9  ;;  %v14997_v10 = vld [vmem:[%s23714_s0 + $0x138] sm:$0x11] }
 0x3d4   :  { %v8042_v44 = vpop.f32.mrb[96].mxu1  ;;  %v9037_v32 = vpop.f32.mrb[96].mxu0  ;;  %v11620_v36 = vrot.slane %v15233_v61, 5  ;;  %v9747_v35 = vrot.slane %v9745_v18, 4  ;;  %v9750_v58 = vrot.slane %v9748_v28, 5  ;;  %v9754_v21 = vshll.u32 %v14995_v27, 16 }
 0x3d5   :  { %v8313_v14 = vadd.f32 %v8042_v44, %v20376_v0  ;;  %v8044_v12 = vpop.f32.mrb[97].mxu1  ;;  %v9039_v1 = vpop.f32.mrb[97].mxu0  ;;  %v15136_v47 = vcombine.low %v21648_v48, %v21661_v34  ;;  %v15137_v38 = vcombine.high %v21648_v48, %v21661_v34  ;;  %v15441_v18 = vcombine.high %v21597_v9, %v21604_v39  ;;  %v15244_v48 = vld [vmem:[%s23714_s0 + $0x190] sm:$0xee] }
 0x3d6   :  { %v8045_v60 = vpop.f32.mrb[98].mxu1  ;;  %v9040_v46 = vpop.f32.mrb[98].mxu0  ;;  %v9761_v54 = vrot.slane %v9759_v59, 4  ;;  %v23977_v28 = vcombine.low %v21510_v15, %v21527_v5  ;;  %v9764_v27 = vrot.slane %v9762_v56, 5  ;;  %v21705_v59 = vld [vmem:[%s23714_s0 + $0x130] sm:$0xee]  ;;  %v21709_v15 = vsel %vm16533_vm5, %v15346_v7, %v11616_v41 }
 0x3d7   :  { %v21672_v37 = vadd.f32 %v9037_v32, %v8313_v14  ;;  %v8314_v16 = vadd.f32 %v8045_v60, %v20378_v30  ;;  %v8047_v0 = vpop.f32.mrb[99].mxu1  ;;  %v9042_v44 = vpop.f32.mrb[99].mxu0  ;;  %v21687_v30 = vld [vmem:[%s23714_s0 + $0x120] sm:$0xee]  ;;  %v21692_v60 = vld [vmem:[%s23714_s0 + $0x128] sm:$0x11]  ;;  %v23978_v32 = vcombine.low %v21514_v52, %v21518_v3  ;;  %v21713_v52 = vsel %vm16533_vm5, %v15347_v53, %v11620_v36 }
 0x3d8   :  { %v9773_v14 = vshrl.u32 %v14998_v40, 16  ;;  %v9776_v12 = vshll.u32 %v14998_v40, 16  ;;  %v9728_v1 = vrot.slane %v9726_v26, 5  ;;  %v9742_v0 = vrot.slane %v9740_v45, 5  ;;  %v15237_v56 = vld [vmem:[%s23714_s0 + $0x138] sm:$0x11] }
 0x3d9   :  { %v21694_v61 = vadd.f32 %v9040_v46, %v8314_v16  ;;  %10886 = vmatmul.mubr.bf16.gmra.mrb[204].mxu1 %v23977_v28  ;;  %12264 = vmatmul.mubr.bf16.gmra.mrb[204].mxu0 %v23978_v32  ;;  %v9724_v46 = vrot.slane %v9723_v50, 4  ;;  %v9738_v16 = vrot.slane %v9737_v49, 4  ;;  %v9751_v3 = vor.u32 %v9750_v58, %v9747_v35  ;;  %v14999_v40 = vld [vmem:[%s23714_s0 + $0x168] sm:$0x11] }
 0x3da   :  { %10893 = vmatprep.mubr.bf16.mxu1 %v15135_v24  ;;  %12271 = vmatprep.mubr.bf16.mxu0 %v15439_v17  ;;  %v9756_v5 = vrot.slane %v9754_v21, 5  ;;  %v15000_v17 = vld [vmem:[%s23714_s0 + $0x170] sm:$0xff]  ;;  %v9768_v50 = vshll.u32 %v14997_v10, 16  ;;  %v15348_v45 = vrot.slane %v21687_v30, 9  ;;  %v11624_v7 = vrot.slane %v21692_v60, 5 }
 0x3db   :  { %v15349_v36 = vrot.slane %v21705_v59, 9  ;;  %v9765_v53 = vor.u32 %v9764_v27, %v9761_v54  ;;  %v9775_v44 = vrot.slane %v9773_v14, 4  ;;  %v9778_v58 = vrot.slane %v9776_v12, 5 }
 0x3dc   :  { %v8050_v24 = vpop.f32.mrb[100].mxu1  ;;  %v9045_v26 = vpop.f32.mrb[100].mxu0  ;;  %v21730_v10 = vsel %vm16227_vm2, %v9724_v46, %v9728_v1  ;;  %v21734_v30 = vsel %vm16227_vm2, %v9738_v16, %v9742_v0  ;;  %v9787_v54 = vshrl.u32 %v15000_v17, 16  ;;  %v9790_v60 = vshll.u32 %v15000_v17, 16  ;;  %v15002_v17 = vld [vmem:[%s23714_s0 + $0x180] sm:$0xff] }
 0x3dd   :  { %v8315_v35 = vadd.f32 %v8050_v24, %v20428_v31  ;;  %v8052_v41 = vpop.f32.mrb[101].mxu1  ;;  %v9047_v49 = vpop.f32.mrb[101].mxu0  ;;  %v15001_v31 = vld [vmem:[%s23714_s0 + $0x178] sm:$0x11]  ;;  %v9752_v12 = vrot.slane %v9751_v3, 4  ;;  %v11628_v24 = vrot.slane %v15237_v56, 5  ;;  %v23980_v3 = vcombine.low %v21574_v55, %v21586_v8 }
 0x3de   :  { %v8053_v21 = vpop.f32.mrb[102].mxu1  ;;  %v9048_v28 = vpop.f32.mrb[102].mxu0  ;;  %v9770_v16 = vrot.slane %v9768_v50, 5  ;;  %v9782_v0 = vshll.u32 %v14999_v40, 16  ;;  %v9766_v56 = vrot.slane %v9765_v53, 4  ;;  %v9796_v41 = vshll.u32 %v15001_v31, 16 }
 0x3df   :  { %v21739_v32 = vadd.f32 %v9045_v26, %v8315_v35  ;;  %v8316_v27 = vadd.f32 %v8053_v21, %v20430_v57  ;;  %v8055_v59 = vpop.f32.mrb[103].mxu1  ;;  %v9050_v14 = vpop.f32.mrb[103].mxu0  ;;  %v23979_v57 = vcombine.low %v21582_v11, %v21590_v2  ;;  %v9779_v35 = vor.u32 %v9778_v58, %v9775_v44  ;;  %v15238_v50 = vld [vmem:[%s23714_s0 + $0x160] sm:$0xee]  ;;  %v15004_v49 = vld [vmem:[%s23714_s0 + $0x190] sm:$0xff] }
 0x3e0   :  { %v15139_v11 = vcombine.high %v21730_v10, %v21734_v30  ;;  %v21767_v55 = vsel %vm16533_vm5, %v15348_v45, %v11624_v7  ;;  %v9789_v8 = vrot.slane %v9787_v54, 4  ;;  %v9792_v2 = vrot.slane %v9790_v60, 5  ;;  %v15239_v53 = vld [vmem:[%s23714_s0 + $0x168] sm:$0x11]  ;;  %v15241_v45 = vld [vmem:[%s23714_s0 + $0x178] sm:$0x11] }
 0x3e1   :  { %v21749_v26 = vadd.f32 %v9048_v28, %v8316_v27  ;;  %10894 = vmatmul.mubr.bf16.gmra.mrb[208].mxu1 %v23979_v57  ;;  %12272 = vmatmul.mubr.bf16.gmra.mrb[208].mxu0 %v23980_v3  ;;  %v21774_v40 = vsel %vm16227_vm2, %v9752_v12, %v9756_v5  ;;  %v9801_v7 = vshrl.u32 %v15002_v17, 16  ;;  %v9804_v44 = vshll.u32 %v15002_v17, 16 }
 0x3e2   :  { %10901 = vmatprep.mubr.bf16.mxu1 %v15137_v38  ;;  %12279 = vmatprep.mubr.bf16.mxu0 %v15441_v18  ;;  %v21778_v38 = vsel %vm16533_vm5, %v15349_v36, %v11628_v24  ;;  %v15240_v18 = vld [vmem:[%s23714_s0 + $0x170] sm:$0xee]  ;;  %v9784_v28 = vrot.slane %v9782_v0, 5  ;;  %v15350_v31 = vrot.slane %v15238_v50, 9  ;;  %v9815_v5 = vshrl.u32 %v15004_v49, 16 }
 0x3e3   :  { %v9818_v54 = vshll.u32 %v15004_v49, 16  ;;  %v21789_v59 = vsel %vm16227_vm2, %v9766_v56, %v9770_v16  ;;  %v9780_v14 = vrot.slane %v9779_v35, 4  ;;  %v9798_v12 = vrot.slane %v9796_v41, 5  ;;  %v15003_v35 = vld [vmem:[%s23714_s0 + $0x188] sm:$0x11] }
 0x3e4   :  { %v8058_v58 = vpop.f32.mrb[104].mxu1  ;;  %v9053_v21 = vpop.f32.mrb[104].mxu0  ;;  %v9793_v3 = vor.u32 %v9792_v2, %v9789_v8  ;;  %v11632_v17 = vrot.slane %v15239_v53, 5  ;;  %v15351_v46 = vrot.slane %v15240_v18, 9  ;;  %v11636_v1 = vrot.slane %v15241_v45, 5 }
 0x3e5   :  { %v8317_v60 = vadd.f32 %v8058_v58, %v20480_v63  ;;  %v8060_v36 = vpop.f32.mrb[105].mxu1  ;;  %v9055_v27 = vpop.f32.mrb[105].mxu0  ;;  %v9803_v58 = vrot.slane %v9801_v7, 4  ;;  %v15138_v16 = vcombine.low %v21730_v10, %v21734_v30  ;;  %v15005_v41 = vld [vmem:[%s23714_s0 + $0x198] sm:$0x11]  ;;  %v9817_v8 = vrot.slane %v9815_v5, 4 }
 0x3e6   :  { %v8061_v24 = vpop.f32.mrb[106].mxu1  ;;  %v9056_v57 = vpop.f32.mrb[106].mxu0  ;;  %v9806_v36 = vrot.slane %v9804_v44, 5  ;;  %v23981_v10 = vcombine.low %v21597_v9, %v21604_v39  ;;  %v15140_v30 = vcombine.low %v21774_v40, %v21789_v59  ;;  %v15445_v53 = vcombine.high %v21767_v55, %v21778_v38  ;;  %v15242_v18 = vld [vmem:[%s23714_s0 + $0x180] sm:$0xee] }
 0x3e7   :  { %v21791_v0 = vadd.f32 %v9053_v21, %v8317_v60  ;;  %v8318_v50 = vadd.f32 %v8061_v24, %v20482_v13  ;;  %v8063_v49 = vpop.f32.mrb[107].mxu1  ;;  %v9058_v63 = vpop.f32.mrb[107].mxu0  ;;  %v9820_v13 = vrot.slane %v9818_v54, 5  ;;  %v15243_v45 = vld [vmem:[%s23714_s0 + $0x188] sm:$0x11]  ;;  %v23982_v9 = vcombine.high %v21709_v15, %v21713_v52  ;;  %v15006_v44 = vld [vmem:[%s23714_s0 + $0x1a0] sm:$0xff] }
 0x3e8   :  { %v15141_v39 = vcombine.high %v21774_v40, %v21789_v59  ;;  %v21832_v34 = vsel %vm16227_vm2, %v9780_v14, %v9784_v28  ;;  %v21836_v7 = vsel %vm16533_vm5, %v15350_v31, %v11632_v17  ;;  %v21846_v21 = vsel %vm16533_vm5, %v15351_v46, %v11636_v1  ;;  %v15008_v31 = vld [vmem:[%s23714_s0 + $0x1b0] sm:$0xff] }
 0x3e9   :  { %v21804_v2 = vadd.f32 %v9056_v57, %v8318_v50  ;;  %10902 = vmatmul.mubr.bf16.gmra.mrb[212].mxu1 %v15136_v47  ;;  %12280 = vmatmul.mubr.bf16.gmra.mrb[212].mxu0 %v23981_v10  ;;  %v9794_v47 = vrot.slane %v9793_v3, 4  ;;  %v9807_v5 = vor.u32 %v9806_v36, %v9803_v58  ;;  %v9810_v28 = vshll.u32 %v15003_v35, 16 }
 0x3ea   :  { %10909 = vmatprep.mubr.bf16.mxu1 %v15139_v11  ;;  %12287 = vmatprep.mubr.bf16.mxu0 %v23982_v9  ;;  %v15245_v11 = vld [vmem:[%s23714_s0 + $0x198] sm:$0x11]  ;;  %v9824_v54 = vshll.u32 %v15005_v41, 16  ;;  %v9821_v14 = vor.u32 %v9820_v13, %v9817_v8  ;;  %v15352_v24 = vrot.slane %v15242_v18, 9  ;;  %v11640_v57 = vrot.slane %v15243_v45, 5 }
 0x3eb   :  { %v15353_v3 = vrot.slane %v15244_v48, 9  ;;  %v11644_v63 = vrot.slane %v15245_v11, 5  ;;  %v9829_v46 = vshrl.u32 %v15006_v44, 16  ;;  %v9832_v1 = vshll.u32 %v15006_v44, 16  ;;  %v15010_v11 = vld [vmem:[%s23714_s0 + $0x1c0] sm:$0xff] }
 0x3ec   :  { %v8066_v60 = vpop.f32.mrb[108].mxu1  ;;  %v9061_v27 = vpop.f32.mrb[108].mxu0  ;;  %v21854_v35 = vsel %vm16227_vm2, %v9794_v47, %v9798_v12  ;;  %v9843_v8 = vshrl.u32 %v15008_v31, 16  ;;  %v9846_v13 = vshll.u32 %v15008_v31, 16  ;;  %v9808_v48 = vrot.slane %v9807_v5, 4 }
 0x3ed   :  { %v8319_v17 = vadd.f32 %v8066_v60, %v20518_v19  ;;  %v8068_v50 = vpop.f32.mrb[109].mxu1  ;;  %v9063_v49 = vpop.f32.mrb[109].mxu0  ;;  %v9812_v9 = vrot.slane %v9810_v28, 5  ;;  %v9822_v47 = vrot.slane %v9821_v14, 4  ;;  %v9826_v44 = vrot.slane %v9824_v54, 5 }
 0x3ee   :  { %v8069_v58 = vpop.f32.mrb[110].mxu1  ;;  %v9064_v36 = vpop.f32.mrb[110].mxu0  ;;  %v21868_v31 = vsel %vm16533_vm5, %v15352_v24, %v11640_v57  ;;  %v23984_v5 = vcombine.low %v21709_v15, %v21713_v52  ;;  %v21880_v28 = vsel %vm16533_vm5, %v15353_v3, %v11644_v63  ;;  %v15009_v54 = vld [vmem:[%s23714_s0 + $0x1b8] sm:$0x11]  ;;  %v9834_v14 = vrot.slane %v9832_v1, 5  ;;  %v15012_v24 = vld [vmem:[%s23714_s0 + $0x1d0] sm:$0xff] }
 0x3ef   :  { %v21858_v10 = vadd.f32 %v9061_v27, %v8319_v17  ;;  %v8320_v19 = vadd.f32 %v8069_v58, %v20523_v42  ;;  %v8071_v18 = vpop.f32.mrb[111].mxu1  ;;  %v9066_v45 = vpop.f32.mrb[111].mxu0  ;;  %v15007_v42 = vld [vmem:[%s23714_s0 + $0x1a8] sm:$0x11]  ;;  %v9831_v27 = vrot.slane %v9829_v46, 4  ;;  %v9845_v52 = vrot.slane %v9843_v8, 4 }
 0x3f0   :  { %v15246_v57 = vld [vmem:[%s23714_s0 + $0x1a0] sm:$0xee]  ;;  %v9857_v3 = vshrl.u32 %v15010_v11, 16  ;;  %v15143_v17 = vcombine.high %v21832_v34, %v21854_v35  ;;  %v21897_v50 = vsel %vm16227_vm2, %v9808_v48, %v9812_v9  ;;  %v9838_v49 = vshll.u32 %v15007_v42, 16  ;;  %v15011_v8 = vld [vmem:[%s23714_s0 + $0x1c8] sm:$0x11] }
 0x3f1   :  { %v21873_v60 = vadd.f32 %v9064_v36, %v8320_v19  ;;  %10910 = vmatmul.mubr.bf16.gmra.mrb[216].mxu1 %v15138_v16  ;;  %12288 = vmatmul.mubr.bf16.gmra.mrb[216].mxu0 %v23984_v5  ;;  %v9848_v16 = vrot.slane %v9846_v13, 5  ;;  %v9860_v63 = vshll.u32 %v15010_v11, 16  ;;  %v21909_v58 = vsel %vm16227_vm2, %v9822_v47, %v9826_v44  ;;  %v15249_v47 = vld [vmem:[%s23714_s0 + $0x1b8] sm:$0x11] }
 0x3f2   :  { %10917 = vmatprep.mubr.bf16.mxu1 %v15141_v39  ;;  %12295 = vmatprep.mubr.bf16.mxu0 %v15445_v53  ;;  %v15247_v53 = vld [vmem:[%s23714_s0 + $0x1a8] sm:$0x11]  ;;  %v21905_v39 = vld [vmem:[%s23714_s0 + $0x1b0] sm:$0xee]  ;;  %v9871_v13 = vshrl.u32 %v15012_v24, 16  ;;  %v9874_v19 = vshll.u32 %v15012_v24, 16  ;;  %v9835_v11 = vor.u32 %v9834_v14, %v9831_v27  ;;  %v23988_v40 = vcombine.high %v21836_v7, %v21846_v21 }
 0x3f3   :  { %23983 = vst [vmem:[#allocation51_spill] sm:$0xff] %v21873_v60  ;;  %v9852_v42 = vshll.u32 %v15009_v54, 16  ;;  %v9849_v36 = vor.u32 %v9848_v16, %v9845_v52  ;;  %v15354_v41 = vrot.slane %v15246_v57, 9  ;;  %v11648_v15 = vrot.slane %v15247_v53, 5  ;;  %v15013_v14 = vld [vmem:[%s23714_s0 + $0x1d8] sm:$0x11] }
 0x3f4   :  { %v8074_v46 = vpop.f32.mrb[112].mxu1  ;;  %v9069_v1 = vpop.f32.mrb[112].mxu0  ;;  %v9859_v12 = vrot.slane %v9857_v3, 4  ;;  %v9866_v9 = vshll.u32 %v15011_v8, 16  ;;  %v9840_v27 = vrot.slane %v9838_v49, 5  ;;  %v15355_v54 = vrot.slane %v21905_v39, 9 }
 0x3f5   :  { %v8321_v18 = vadd.f32 %v8074_v46, %v20555_v23  ;;  %v8076_v45 = vpop.f32.mrb[113].mxu1  ;;  %v9071_v48 = vpop.f32.mrb[113].mxu0  ;;  %v9873_v56 = vrot.slane %v9871_v13, 4  ;;  %v9876_v52 = vrot.slane %v9874_v19, 5  ;;  %v9836_v57 = vrot.slane %v9835_v11, 4  ;;  %v15014_v39 = vld [vmem:[%s23714_s0 + $0x200] sm:$0xff] }
 0x3f6   :  { %v8077_v44 = vpop.f32.mrb[114].mxu1  ;;  %v9072_v5 = vpop.f32.mrb[114].mxu0  ;;  %v9862_v48 = vrot.slane %v9860_v63, 5  ;;  %v9854_v3 = vrot.slane %v9852_v42, 5  ;;  %v11652_v49 = vrot.slane %v15249_v47, 5  ;;  %v21952_v59 = vsel %vm16533_vm5, %v15354_v41, %v11648_v15  ;;  %v15016_v41 = vld [vmem:[%s23714_s0 + $0x210] sm:$0xff] }
 0x3f7   :  { %v21922_v24 = vadd.f32 %v9069_v1, %v8321_v18  ;;  %v8322_v23 = vadd.f32 %v8077_v44, %v20558_v22  ;;  %v8079_v46 = vpop.f32.mrb[115].mxu1  ;;  %v9074_v45 = vpop.f32.mrb[115].mxu0  ;;  %v23987_v22 = vcombine.low %v21767_v55, %v21778_v38  ;;  %v15250_v53 = vld [vmem:[%s23714_s0 + $0x1c0] sm:$0xee]  ;;  %v15145_v38 = vcombine.high %v21897_v50, %v21909_v58  ;;  %v15253_v63 = vld [vmem:[%s23714_s0 + $0x1d8] sm:$0x11] }
 0x3f8   :  { %v9850_v1 = vrot.slane %v9849_v36, 4  ;;  %v9863_v8 = vor.u32 %v9862_v48, %v9859_v12  ;;  %v9868_v13 = vrot.slane %v9866_v9, 5  ;;  %v9880_v19 = vshll.u32 %v15013_v14, 16 }
 0x3f9   :  { %23985 = vst [vmem:[#allocation52_spill] sm:$0xff] %v21922_v24  ;;  %v21929_v16 = vadd.f32 %v9072_v5, %v8322_v23  ;;  %10918 = vmatmul.mubr.bf16.gmra.mrb[220].mxu1 %v15140_v30  ;;  %12296 = vmatmul.mubr.bf16.gmra.mrb[220].mxu0 %v23987_v22  ;;  %v15251_v30 = vld [vmem:[%s23714_s0 + $0x1c8] sm:$0x11]  ;;  %v9877_v11 = vor.u32 %v9876_v52, %v9873_v56  ;;  %v15356_v42 = vrot.slane %v15250_v53, 9  ;;  %v9885_v47 = vshrl.u32 %v15014_v39, 16  ;;  %v23989_v5 = vld [vmem:[#allocation38_spill] sm:$0xff] }
 0x3fa   :  { %10925 = vmatprep.mubr.bf16.mxu1 %v15143_v17  ;;  %12303 = vmatprep.mubr.bf16.mxu0 %v23988_v40  ;;  %v15252_v17 = vld [vmem:[%s23714_s0 + $0x1d0] sm:$0xee]  ;;  %v9888_v44 = vshll.u32 %v15014_v39, 16  ;;  %v11656_v22 = vrot.slane %v15251_v30, 5  ;;  %v11660_v36 = vrot.slane %v15253_v63, 5  ;;  %v21969_v48 = vsel %vm16227_vm2, %v9836_v57, %v9840_v27  ;;  %v23991_v30 = vld [vmem:[#allocation39_spill] sm:$0xff] }
 0x3fb   :  { %23986 = vst [vmem:[#allocation53_spill] sm:$0xff] %v21929_v16  ;;  %v15357_v40 = vrot.slane %v15252_v17, 9  ;;  %v21973_v14 = vsel %vm16533_vm5, %v15355_v54, %v11652_v49  ;;  %v15015_v56 = vld [vmem:[%s23714_s0 + $0x208] sm:$0x11]  ;;  %v9899_v52 = vshrl.u32 %v15016_v41, 16  ;;  %v9902_v53 = vshll.u32 %v15016_v41, 16 }
 0x3fc   :  { %v8082_v15 = vpop.f32.mrb[116].mxu1  ;;  %v9077_v18 = vpop.f32.mrb[116].mxu0  ;;  %v21983_v27 = vsel %vm16227_vm2, %v9850_v1, %v9854_v3  ;;  %v9882_v57 = vrot.slane %v9880_v19, 5  ;;  %v15018_v54 = vld [vmem:[%s23714_s0 + $0x220] sm:$0xff]  ;;  %v9864_v49 = vrot.slane %v9863_v8, 4  ;;  %v21998_v3 = vsel %vm16533_vm5, %v15356_v42, %v11656_v22  ;;  %v15020_v19 = vld [vmem:[%s23714_s0 + $0x230] sm:$0xff] }
 0x3fd   :  { %v8323_v23 = vadd.f32 %v8082_v15, %v23989_v5  ;;  %v8084_v46 = vpop.f32.mrb[117].mxu1  ;;  %v9079_v45 = vpop.f32.mrb[117].mxu0  ;;  %v9878_v5 = vrot.slane %v9877_v11, 4  ;;  %v22002_v1 = vsel %vm16533_vm5, %v15357_v40, %v11660_v36  ;;  %v9894_v8 = vshll.u32 %v15015_v56, 16  ;;  %v15017_v22 = vld [vmem:[%s23714_s0 + $0x218] sm:$0x11] }
 0x3fe   :  { %v8085_v12 = vpop.f32.mrb[118].mxu1  ;;  %v9080_v9 = vpop.f32.mrb[118].mxu0  ;;  %v9887_v46 = vrot.slane %v9885_v47, 4  ;;  %v9890_v45 = vrot.slane %v9888_v44, 5  ;;  %v9916_v11 = vshll.u32 %v15018_v54, 16  ;;  %v15147_v47 = vcombine.high %v21969_v48, %v21983_v27 }
 0x3ff   :  { %v21978_v39 = vadd.f32 %v9077_v18, %v8323_v23  ;;  %v8324_v17 = vadd.f32 %v8085_v12, %v23991_v30  ;;  %v8087_v63 = vpop.f32.mrb[119].mxu1  ;;  %v9082_v15 = vpop.f32.mrb[119].mxu0  ;;  %v23993_v18 = vcombine.low %v21832_v34, %v21854_v35  ;;  %v23994_v23 = vcombine.low %v21836_v7, %v21846_v21  ;;  %v15254_v40 = vld [vmem:[%s23714_s0 + $0x200] sm:$0xee]  ;;  %v15255_v36 = vld [vmem:[%s23714_s0 + $0x208] sm:$0x11] }
 0x400   :  { %v23995_v34 = vcombine.high %v21868_v31, %v21880_v28  ;;  %v9901_v7 = vrot.slane %v9899_v52, 4  ;;  %v9904_v21 = vrot.slane %v9902_v53, 5  ;;  %v9913_v35 = vshrl.u32 %v15018_v54, 16  ;;  %v15256_v30 = vld [vmem:[%s23714_s0 + $0x210] sm:$0xee]  ;;  %v23996_v63 = vld [vmem:[#allocation41_spill] sm:$0xff] }
 0x401   :  { %23990 = vst [vmem:[#allocation38_spill] sm:$0xff] %v21978_v39  ;;  %v21988_v41 = vadd.f32 %v9080_v9, %v8324_v17  ;;  %10926 = vmatmul.mubr.bf16.gmra.mrb[224].mxu1 %v23993_v18  ;;  %12304 = vmatmul.mubr.bf16.gmra.mrb[224].mxu0 %v23994_v23  ;;  %v22029_v56 = vsel %vm16227_vm2, %v9864_v49, %v9868_v13  ;;  %v9927_v17 = vshrl.u32 %v15020_v19, 16  ;;  %v15257_v13 = vld [vmem:[%s23714_s0 + $0x218] sm:$0x11]  ;;  %v9918_v42 = vrot.slane %v9916_v11, 5 }
 0x402   :  { %10933 = vmatprep.mubr.bf16.mxu1 %v15145_v38  ;;  %12311 = vmatprep.mubr.bf16.mxu0 %v23995_v34  ;;  %v15451_v38 = vcombine.high %v21952_v59, %v21973_v14  ;;  %v22033_v52 = vsel %vm16227_vm2, %v9878_v5, %v9882_v57  ;;  %v9891_v53 = vor.u32 %v9890_v45, %v9887_v46  ;;  %v9896_v34 = vrot.slane %v9894_v8, 5  ;;  %v15021_v11 = vld [vmem:[%s23714_s0 + $0x238] sm:$0x11] }
 0x403   :  { %23992 = vst [vmem:[#allocation39_spill] sm:$0xff] %v21988_v41  ;;  %v9930_v57 = vshll.u32 %v15020_v19, 16  ;;  %v9905_v46 = vor.u32 %v9904_v21, %v9901_v7  ;;  %v9908_v45 = vshll.u32 %v15017_v22, 16  ;;  %v9915_v44 = vrot.slane %v9913_v35, 4  ;;  %v15019_v19 = vld [vmem:[%s23714_s0 + $0x228] sm:$0x11] }
 0x404   :  { %v8090_v12 = vpop.f32.mrb[120].mxu1  ;;  %v9085_v9 = vpop.f32.mrb[120].mxu0  ;;  %v15358_v55 = vrot.slane %v15254_v40, 9  ;;  %v11664_v41 = vrot.slane %v15255_v36, 5  ;;  %v9892_v7 = vrot.slane %v9891_v53, 4  ;;  %v15359_v21 = vrot.slane %v15256_v30, 9 }
 0x405   :  { %v8325_v15 = vadd.f32 %v8090_v12, %v23996_v63  ;;  %v8092_v54 = vpop.f32.mrb[121].mxu1  ;;  %v9087_v18 = vpop.f32.mrb[121].mxu0  ;;  %v15022_v12 = vld [vmem:[%s23714_s0 + $0x240] sm:$0xff]  ;;  %v11668_v35 = vrot.slane %v15257_v13, 5  ;;  %v9929_v22 = vrot.slane %v9927_v17, 4  ;;  %v24001_v40 = vcombine.low %v21868_v31, %v21880_v28  ;;  %v15024_v53 = vld [vmem:[%s23714_s0 + $0x250] sm:$0xff] }
 0x406   :  { %v8093_v49 = vpop.f32.mrb[122].mxu1  ;;  %v9088_v5 = vpop.f32.mrb[122].mxu0  ;;  %v23998_v54 = vld [vmem:[#allocation42_spill] sm:$0xff]  ;;  %v9932_v36 = vrot.slane %v9930_v57, 5  ;;  %v9941_v30 = vshrl.u32 %v15022_v12, 16  ;;  %v9906_v17 = vrot.slane %v9905_v46, 4  ;;  %v15149_v31 = vcombine.high %v22029_v56, %v22033_v52 }
 0x407   :  { %v22047_v63 = vadd.f32 %v9085_v9, %v8325_v15  ;;  %v8326_v18 = vadd.f32 %v8093_v49, %v23998_v54  ;;  %v8095_v8 = vpop.f32.mrb[123].mxu1  ;;  %v9090_v23 = vpop.f32.mrb[123].mxu0  ;;  %v24000_v15 = vcombine.low %v21897_v50, %v21909_v58  ;;  %v9910_v13 = vrot.slane %v9908_v45, 5  ;;  %v15258_v50 = vld [vmem:[%s23714_s0 + $0x220] sm:$0xee]  ;;  %v24002_v54 = vld [vmem:[#allocation43_spill] sm:$0xff] }
 0x408   :  { %v9944_v23 = vshll.u32 %v15022_v12, 16  ;;  %v9919_v49 = vor.u32 %v9918_v42, %v9915_v44  ;;  %v15453_v28 = vcombine.high %v21998_v3, %v22002_v1  ;;  %v22076_v58 = vsel %vm16533_vm5, %v15358_v55, %v11664_v41  ;;  %v15259_v42 = vld [vmem:[%s23714_s0 + $0x228] sm:$0x11]  ;;  %v15260_v44 = vld [vmem:[%s23714_s0 + $0x230] sm:$0xee] }
 0x409   :  { %23997 = vst [vmem:[#allocation41_spill] sm:$0xff] %v22047_v63  ;;  %v22056_v9 = vadd.f32 %v9088_v5, %v8326_v18  ;;  %10934 = vmatmul.mubr.bf16.gmra.mrb[228].mxu1 %v24000_v15  ;;  %12312 = vmatmul.mubr.bf16.gmra.mrb[228].mxu0 %v24001_v40  ;;  %v9922_v5 = vshll.u32 %v15019_v19, 16  ;;  %v22086_v46 = vsel %vm16227_vm2, %v9892_v7, %v9896_v34  ;;  %v15261_v55 = vld [vmem:[%s23714_s0 + $0x238] sm:$0x11]  ;;  %v9955_v41 = vshrl.u32 %v15024_v53, 16 }
 0x40a   :  { %10941 = vmatprep.mubr.bf16.mxu1 %v15147_v47  ;;  %12319 = vmatprep.mubr.bf16.mxu0 %v15451_v38  ;;  %v9936_v47 = vshll.u32 %v15021_v11, 16  ;;  %v22090_v45 = vsel %vm16533_vm5, %v15359_v21, %v11668_v35  ;;  %v9958_v12 = vshll.u32 %v15024_v53, 16  ;;  %v9933_v11 = vor.u32 %v9932_v36, %v9929_v22  ;;  %v15023_v34 = vld [vmem:[%s23714_s0 + $0x248] sm:$0x11] }
 0x40b   :  { %23999 = vst [vmem:[#allocation42_spill] sm:$0xff] %v22056_v9  ;;  %v9943_v7 = vrot.slane %v9941_v30, 4  ;;  %v9946_v15 = vrot.slane %v9944_v23, 5  ;;  %v22101_v35 = vsel %vm16227_vm2, %v9906_v17, %v9910_v13  ;;  %v9920_v9 = vrot.slane %v9919_v49, 4  ;;  %v15026_v30 = vld [vmem:[%s23714_s0 + $0x260] sm:$0xff] }
 0x40c   :  { %v8098_v38 = vpop.f32.mrb[124].mxu1  ;;  %v9093_v57 = vpop.f32.mrb[124].mxu0  ;;  %v9924_v63 = vrot.slane %v9922_v5, 5  ;;  %v15360_v53 = vrot.slane %v15258_v50, 9  ;;  %v11676_v23 = vrot.slane %v15261_v55, 5  ;;  %v9950_v16 = vshll.u32 %v15023_v34, 16 }
 0x40d   :  { %v8327_v18 = vadd.f32 %v8098_v38, %v24002_v54  ;;  %v8100_v8 = vpop.f32.mrb[125].mxu1  ;;  %v9095_v19 = vpop.f32.mrb[125].mxu0  ;;  %v24004_v38 = vld [vmem:[#allocation44_spill] sm:$0xff]  ;;  %v9957_v24 = vrot.slane %v9955_v41, 4  ;;  %v9960_v17 = vrot.slane %v9958_v12, 5  ;;  %v24006_v49 = vcombine.low %v21969_v48, %v21983_v27  ;;  %v15028_v12 = vld [vmem:[%s23714_s0 + $0x270] sm:$0xff] }
 0x40e   :  { %v8101_v40 = vpop.f32.mrb[126].mxu1  ;;  %v9096_v21 = vpop.f32.mrb[126].mxu0  ;;  %v11672_v8 = vrot.slane %v15259_v42, 5  ;;  %v15361_v19 = vrot.slane %v15260_v44, 9  ;;  %v24007_v5 = vcombine.low %v21952_v59, %v21973_v14  ;;  %v9934_v50 = vrot.slane %v9933_v11, 4 }
 0x40f   :  { %v22103_v39 = vadd.f32 %v9093_v57, %v8327_v18  ;;  %v8328_v54 = vadd.f32 %v8101_v40, %v24004_v38  ;;  %v8103_v22 = vpop.f32.mrb[127].mxu1  ;;  %v9098_v36 = vpop.f32.mrb[127].mxu0  ;;  %v9938_v42 = vrot.slane %v9936_v47, 5  ;;  %v15025_v44 = vld [vmem:[%s23714_s0 + $0x258] sm:$0x11]  ;;  %v9947_v57 = vor.u32 %v9946_v15, %v9943_v7  ;;  %v24008_v40 = vld [vmem:[#allocation45_spill] sm:$0xff] }
 0x410   :  { %v15148_v55 = vcombine.low %v22029_v56, %v22033_v52  ;;  %v22127_v59 = vld [vmem:[%s23714_s0 + $0x240] sm:$0xee]  ;;  %v9969_v14 = vshrl.u32 %v15026_v30, 16  ;;  %v9972_v27 = vshll.u32 %v15026_v30, 16  ;;  %v15151_v47 = vcombine.high %v22086_v46, %v22101_v35  ;;  %v15027_v15 = vld [vmem:[%s23714_s0 + $0x268] sm:$0x11] }
 0x411   :  { %24003 = vst [vmem:[#allocation43_spill] sm:$0xff] %v22103_v39  ;;  %v22109_v13 = vadd.f32 %v9096_v21, %v8328_v54  ;;  %10942 = vmatmul.mubr.bf16.gmra.mrb[232].mxu1 %v24006_v49  ;;  %12320 = vmatmul.mubr.bf16.gmra.mrb[232].mxu0 %v24007_v5  ;;  %v15455_v41 = vcombine.high %v22076_v58, %v22090_v45  ;;  %v9964_v7 = vshll.u32 %v15025_v44, 16  ;;  %v9948_v22 = vrot.slane %v9947_v57, 4  ;;  %v15265_v36 = vld [vmem:[%s23714_s0 + $0x258] sm:$0x11] }
 0x412   :  { %10949 = vmatprep.mubr.bf16.mxu1 %v15149_v31  ;;  %12327 = vmatprep.mubr.bf16.mxu0 %v15453_v28  ;;  %v22135_v56 = vsel %vm16227_vm2, %v9920_v9, %v9924_v63  ;;  %v22139_v52 = vsel %vm16533_vm5, %v15360_v53, %v11672_v8  ;;  %v15263_v31 = vld [vmem:[%s23714_s0 + $0x248] sm:$0x11]  ;;  %v15264_v28 = vld [vmem:[%s23714_s0 + $0x250] sm:$0xee]  ;;  %v22152_v63 = vsel %vm16533_vm5, %v15361_v19, %v11676_v23  ;;  %v9952_v9 = vrot.slane %v9950_v16, 5 }
 0x413   :  { %24005 = vst [vmem:[#allocation44_spill] sm:$0xff] %v22109_v13  ;;  %v9961_v34 = vor.u32 %v9960_v17, %v9957_v24  ;;  %v22160_v54 = vsel %vm16227_vm2, %v9934_v50, %v9938_v42  ;;  %v15362_v24 = vrot.slane %v22127_v59, 9  ;;  %v9971_v19 = vrot.slane %v9969_v14, 4  ;;  %v24010_v5 = vld [vmem:[#allocation46_spill] sm:$0xff]  ;;  %v15030_v14 = vld [vmem:[%s23714_s0 + $0x2a0] sm:$0xff] }
 0x414   :  { %v8106_v18 = vpop.f32.mrb[128].mxu1  ;;  %v9101_v11 = vpop.f32.mrb[128].mxu0  ;;  %v9974_v30 = vrot.slane %v9972_v27, 5  ;;  %v9983_v23 = vshrl.u32 %v15028_v12, 16  ;;  %v9986_v17 = vshll.u32 %v15028_v12, 16  ;;  %v11680_v42 = vrot.slane %v15263_v31, 5 }
 0x415   :  { %v8329_v21 = vadd.f32 %v8106_v18, %v24008_v40  ;;  %v8108_v53 = vpop.f32.mrb[129].mxu1  ;;  %v9103_v38 = vpop.f32.mrb[129].mxu0  ;;  %v15029_v57 = vld [vmem:[%s23714_s0 + $0x278] sm:$0x11]  ;;  %v9978_v40 = vshll.u32 %v15027_v15, 16  ;;  %v9966_v59 = vrot.slane %v9964_v7, 5  ;;  %v24012_v12 = vcombine.low %v21998_v3, %v22002_v1 }
 0x416   :  { %v8109_v16 = vpop.f32.mrb[130].mxu1  ;;  %v9104_v8 = vpop.f32.mrb[130].mxu0  ;;  %v9962_v53 = vrot.slane %v9961_v34, 4  ;;  %v15363_v38 = vrot.slane %v15264_v28, 9  ;;  %v11684_v48 = vrot.slane %v15265_v36, 5  ;;  %v15150_v31 = vcombine.low %v22086_v46, %v22101_v35  ;;  %v15032_v3 = vld [vmem:[%s23714_s0 + $0x2b0] sm:$0xff] }
 0x417   :  { %v22166_v49 = vadd.f32 %v9101_v11, %v8329_v21  ;;  %v8330_v44 = vadd.f32 %v8109_v16, %v24010_v5  ;;  %v8111_v18 = vpop.f32.mrb[131].mxu1  ;;  %v9106_v50 = vpop.f32.mrb[131].mxu0  ;;  %v15457_v11 = vcombine.high %v22139_v52, %v22152_v63  ;;  %v9975_v28 = vor.u32 %v9974_v30, %v9971_v19  ;;  %v15267_v35 = vld [vmem:[%s23714_s0 + $0x268] sm:$0x11] }
 0x418   :  { %v9985_v34 = vrot.slane %v9983_v23, 4  ;;  %v9988_v7 = vrot.slane %v9986_v17, 5  ;;  %v9992_v15 = vshll.u32 %v15029_v57, 16  ;;  %v15153_v1 = vcombine.high %v22135_v56, %v22160_v54  ;;  %v22216_v23 = vld [vmem:[%s23714_s0 + $0x270] sm:$0xee] }
 0x419   :  { %24009 = vst [vmem:[#allocation45_spill] sm:$0xff] %v22166_v49  ;;  %v22175_v27 = vadd.f32 %v9104_v8, %v8330_v44  ;;  %10950 = vmatmul.mubr.bf16.gmra.mrb[236].mxu1 %v15148_v55  ;;  %12328 = vmatmul.mubr.bf16.gmra.mrb[236].mxu0 %v24012_v12  ;;  %v15266_v55 = vld [vmem:[%s23714_s0 + $0x260] sm:$0xee]  ;;  %v22192_v46 = vrot.slane %v9978_v40, 5  ;;  %v22199_v16 = vsel %vm16227_vm2, %v9948_v22, %v9952_v9  ;;  %v22221_v9 = vld [vmem:[%s23714_s0 + $0x278] sm:$0x11] }
 0x41a   :  { %10957 = vmatprep.mubr.bf16.mxu1 %v15151_v47  ;;  %12335 = vmatprep.mubr.bf16.mxu0 %v15455_v41  ;;  %v9997_v47 = vshrl.u32 %v15030_v14, 16  ;;  %v10000_v41 = vshll.u32 %v15030_v14, 16  ;;  %v22203_v8 = vsel %vm16227_vm2, %v9962_v53, %v9966_v59  ;;  %v22207_v19 = vsel %vm16533_vm5, %v15362_v24, %v11680_v42  ;;  %v24013_v22 = vld [vmem:[#allocation47_spill] sm:$0xff]  ;;  %v24015_v14 = vld [vmem:[#allocation22_spill] sm:$0xff] }
 0x41b   :  { %24011 = vst [vmem:[#allocation46_spill] sm:$0xff] %v22175_v27  ;;  %v22211_v30 = vsel %vm16533_vm5, %v15363_v38, %v11684_v48  ;;  %v15364_v24 = vrot.slane %v15266_v55, 9  ;;  %v10011_v18 = vshrl.u32 %v15032_v3, 16  ;;  %v10014_v50 = vshll.u32 %v15032_v3, 16 }
 0x41c   :  { %v8114_v21 = vpop.f32.mrb[132].mxu1  ;;  %v9109_v36 = vpop.f32.mrb[132].mxu0  ;;  %v9976_v57 = vrot.slane %v9975_v28, 4  ;;  %v9989_v40 = vor.u32 %v9988_v7, %v9985_v34  ;;  %v9994_v53 = vrot.slane %v9992_v15, 5  ;;  %v11688_v59 = vrot.slane %v15267_v35, 5 }
 0x41d   :  { %v8331_v17 = vadd.f32 %v8114_v21, %v24013_v22  ;;  %v8116_v5 = vpop.f32.mrb[133].mxu1  ;;  %v9111_v44 = vpop.f32.mrb[133].mxu0  ;;  %v15031_v21 = vld [vmem:[%s23714_s0 + $0x2a8] sm:$0x11]  ;;  %v9999_v22 = vrot.slane %v9997_v47, 4  ;;  %v10002_v55 = vrot.slane %v10000_v41, 5  ;;  %v15152_v3 = vcombine.low %v22135_v56, %v22160_v54 }
 0x41e   :  { %v8117_v42 = vpop.f32.mrb[134].mxu1  ;;  %v9112_v48 = vpop.f32.mrb[134].mxu0  ;;  %v15456_v28 = vcombine.low %v22139_v52, %v22152_v63  ;;  %v15365_v7 = vrot.slane %v22216_v23, 9  ;;  %v15034_v56 = vld [vmem:[%s23714_s0 + $0x2c0] sm:$0xff]  ;;  %v24017_v52 = vcombine.low %v22076_v58, %v22090_v45  ;;  %v11692_v63 = vrot.slane %v22221_v9, 5  ;;  %v15036_v41 = vld [vmem:[%s23714_s0 + $0x2d0] sm:$0xff] }
 0x41f   :  { %v22224_v38 = vadd.f32 %v9109_v36, %v8331_v17  ;;  %v8332_v12 = vadd.f32 %v8117_v42, %v24015_v14  ;;  %v8119_v27 = vpop.f32.mrb[135].mxu1  ;;  %v9114_v49 = vpop.f32.mrb[135].mxu0  ;;  %v10013_v15 = vrot.slane %v10011_v18, 4  ;;  %v10016_v35 = vrot.slane %v10014_v50, 5  ;;  %v15271_v47 = vld [vmem:[%s23714_s0 + $0x2a8] sm:$0x11] }
 0x420   :  { %v15033_v49 = vld [vmem:[%s23714_s0 + $0x2b8] sm:$0x11]  ;;  %v15270_v27 = vld [vmem:[%s23714_s0 + $0x2a0] sm:$0xee]  ;;  %v9990_v36 = vrot.slane %v9989_v40, 4  ;;  %v22262_v58 = vsel %vm16533_vm5, %v15364_v24, %v11688_v59  ;;  %v10006_v45 = vshll.u32 %v15031_v21, 16  ;;  %v10003_v17 = vor.u32 %v10002_v55, %v9999_v22 }
 0x421   :  { %24014 = vst [vmem:[#allocation47_spill] sm:$0xff] %v22224_v38  ;;  %v22246_v54 = vadd.f32 %v9112_v48, %v8332_v12  ;;  %10958 = vmatmul.mubr.bf16.gmra.mrb[240].mxu1 %v15150_v31  ;;  %12336 = vmatmul.mubr.bf16.gmra.mrb[240].mxu0 %v24017_v52  ;;  %v15155_v31 = vcombine.high %v22199_v16, %v22203_v8  ;;  %v15272_v23 = vld [vmem:[%s23714_s0 + $0x2b0] sm:$0xee]  ;;  %v15273_v9 = vld [vmem:[%s23714_s0 + $0x2b8] sm:$0x11]  ;;  %v10028_v5 = vshll.u32 %v15034_v56, 16 }
 0x422   :  { %10965 = vmatprep.mubr.bf16.mxu1 %v15153_v1  ;;  %12343 = vmatprep.mubr.bf16.mxu0 %v15457_v11  ;;  %v10020_v1 = vshll.u32 %v15033_v49, 16  ;;  %v10025_v11 = vshrl.u32 %v15034_v56, 16  ;;  %v15366_v50 = vrot.slane %v15270_v27, 9  ;;  %v11696_v42 = vrot.slane %v15271_v47, 5  ;;  %v24018_v40 = vld [vmem:[#allocation24_spill] sm:$0xff] }
 0x423   :  { %24016 = vst [vmem:[#allocation22_spill] sm:$0xff] %v22246_v54  ;;  %v10039_v48 = vshrl.u32 %v15036_v41, 16  ;;  %v10042_v24 = vshll.u32 %v15036_v41, 16  ;;  %v10017_v21 = vor.u32 %v10016_v35, %v10013_v15  ;;  %v15367_v52 = vrot.slane %v15272_v23, 9  ;;  %v24020_v15 = vld [vmem:[#allocation26_spill] sm:$0xff] }
 0x424   :  { %v8122_v44 = vpop.f32.mrb[136].mxu1  ;;  %v9117_v18 = vpop.f32.mrb[136].mxu0  ;;  %v11700_v34 = vrot.slane %v15273_v9, 5  ;;  %v22274_v22 = vsel %vm16227_vm2, %v9976_v57, %v22192_v46  ;;  %v22278_v55 = vsel %vm16227_vm2, %v9990_v36, %v9994_v53  ;;  %v22282_v49 = vsel %vm16533_vm5, %v15365_v7, %v11692_v63  ;;  %v15035_v46 = vld [vmem:[%s23714_s0 + $0x2c8] sm:$0x11] }
 0x425   :  { %v8333_v59 = vadd.f32 %v8122_v44, %v24018_v40  ;;  %v8124_v14 = vpop.f32.mrb[137].mxu1  ;;  %v9119_v12 = vpop.f32.mrb[137].mxu0  ;;  %v10008_v27 = vrot.slane %v10006_v45, 5  ;;  %v10027_v57 = vrot.slane %v10025_v11, 4  ;;  %v10030_v23 = vrot.slane %v10028_v5, 5 }
 0x426   :  { %v8125_v54 = vpop.f32.mrb[138].mxu1  ;;  %v9120_v38 = vpop.f32.mrb[138].mxu0  ;;  %v10004_v9 = vrot.slane %v10003_v17, 4  ;;  %v10022_v53 = vrot.slane %v10020_v1, 5  ;;  %v15037_v7 = vld [vmem:[%s23714_s0 + $0x2d8] sm:$0x11]  ;;  %v22297_v44 = vsel %vm16533_vm5, %v15366_v50, %v11696_v42  ;;  %v22301_v11 = vsel %vm16533_vm5, %v15367_v52, %v11700_v34 }
 0x427   :  { %v22284_v56 = vadd.f32 %v9117_v18, %v8333_v59  ;;  %v8334_v35 = vadd.f32 %v8125_v54, %v24020_v15  ;;  %v8127_v47 = vpop.f32.mrb[139].mxu1  ;;  %v9122_v41 = vpop.f32.mrb[139].mxu0  ;;  %v10041_v63 = vrot.slane %v10039_v48, 4  ;;  %v10044_v36 = vrot.slane %v10042_v24, 5  ;;  %v15038_v34 = vld [vmem:[%s23714_s0 + $0x2e0] sm:$0xff] }
 0x428   :  { %v10018_v54 = vrot.slane %v10017_v21, 4  ;;  %v15154_v17 = vcombine.low %v22199_v16, %v22203_v8  ;;  %v15458_v1 = vcombine.low %v22207_v19, %v22211_v30  ;;  %v15461_v16 = vcombine.high %v22262_v58, %v22282_v49  ;;  %v15275_v59 = vld [vmem:[%s23714_s0 + $0x2c8] sm:$0x11]  ;;  %v15276_v14 = vld [vmem:[%s23714_s0 + $0x2d0] sm:$0xee] }
 0x429   :  { %24019 = vst [vmem:[#allocation24_spill] sm:$0xff] %v22284_v56  ;;  %v22293_v45 = vadd.f32 %v9120_v38, %v8334_v35  ;;  %10966 = vmatmul.mubr.bf16.gmra.mrb[244].mxu1 %v15152_v3  ;;  %12344 = vmatmul.mubr.bf16.gmra.mrb[244].mxu0 %v15456_v28  ;;  %v24022_v38 = vcombine.high %v22207_v19, %v22211_v30  ;;  %v10034_v28 = vshll.u32 %v15035_v46, 16  ;;  %v15274_v19 = vld [vmem:[%s23714_s0 + $0x2c0] sm:$0xee]  ;;  %v15040_v30 = vld [vmem:[%s23714_s0 + $0x2f0] sm:$0xff]  ;;  %v10053_v47 = vshrl.u32 %v15038_v34, 16 }
 0x42a   :  { %10973 = vmatprep.mubr.bf16.mxu1 %v15155_v31  ;;  %v10031_v8 = vor.u32 %v10030_v23, %v10027_v57  ;;  %v10048_v31 = vshll.u32 %v15037_v7, 16  ;;  %v15157_v42 = vcombine.high %v22274_v22, %v22278_v55  ;;  %v22329_v48 = vsel %vm16227_vm2, %v10004_v9, %v10008_v27  ;;  %v24023_v12 = vld [vmem:[#allocation28_spill] sm:$0xff]  ;;  %v15277_v35 = vld [vmem:[%s23714_s0 + $0x2d8] sm:$0x11] }
 0x42b   :  { %24021 = vst [vmem:[#allocation26_spill] sm:$0xff] %v22293_v45  ;;  %12351 = vmatprep.mubr.bf16.mxu0 %v24022_v38  ;;  %v10045_v40 = vor.u32 %v10044_v36, %v10041_v63  ;;  %v22342_v27 = vsel %vm16227_vm2, %v10018_v54, %v10022_v53  ;;  %v10056_v41 = vshll.u32 %v15038_v34, 16  ;;  %v10036_v23 = vrot.slane %v10034_v28, 5  ;;  %v24025_v38 = vld [vmem:[#allocation37_spill] sm:$0xff] }
 0x42c   :  { %v8130_v18 = vpop.f32.mrb[140].mxu1  ;;  %v9125_v50 = vpop.f32.mrb[140].mxu0  ;;  %v15368_v9 = vrot.slane %v15274_v19, 9  ;;  %v10067_v7 = vshrl.u32 %v15040_v30, 16  ;;  %v10070_v63 = vshll.u32 %v15040_v30, 16  ;;  %v10032_v53 = vrot.slane %v10031_v8, 4 }
 0x42d   :  { %v8335_v21 = vadd.f32 %v8130_v18, %v24023_v12  ;;  %v8132_v52 = vpop.f32.mrb[141].mxu1  ;;  %v9127_v15 = vpop.f32.mrb[141].mxu0  ;;  %v11704_v54 = vrot.slane %v15275_v59, 5  ;;  %v10046_v24 = vrot.slane %v10045_v40, 4  ;;  %v10050_v34 = vrot.slane %v10048_v31, 5  ;;  %v15044_v31 = vld [vmem:[%s23714_s0 + $0x310] sm:$0xff] }
 0x42e   :  { %v8133_v46 = vpop.f32.mrb[142].mxu1  ;;  %v9128_v57 = vpop.f32.mrb[142].mxu0  ;;  %v15042_v15 = vld [vmem:[%s23714_s0 + $0x300] sm:$0xff]  ;;  %v15369_v3 = vrot.slane %v15276_v14, 9  ;;  %v11708_v5 = vrot.slane %v15277_v35, 5  ;;  %v15463_v8 = vcombine.high %v22297_v44, %v22301_v11  ;;  %v10058_v40 = vrot.slane %v10056_v41, 5 }
 0x42f   :  { %v22347_v36 = vadd.f32 %v9125_v50, %v8335_v21  ;;  %v8336_v18 = vadd.f32 %v8133_v46, %v24025_v38  ;;  %v8135_v12 = vpop.f32.mrb[143].mxu1  ;;  %v9130_v52 = vpop.f32.mrb[143].mxu0  ;;  %v15039_v28 = vld [vmem:[%s23714_s0 + $0x2e8] sm:$0x11]  ;;  %v15041_v30 = vld [vmem:[%s23714_s0 + $0x2f8] sm:$0x11]  ;;  %v22373_v35 = vsel %vm16227_vm2, %v10032_v53, %v10036_v23 }
 0x430   :  { %v10055_v50 = vrot.slane %v10053_v47, 4  ;;  %v15278_v14 = vld [vmem:[%s23714_s0 + $0x2e0] sm:$0xee]  ;;  %v10081_v21 = vshrl.u32 %v15042_v15, 16  ;;  %v22377_v47 = vsel %vm16533_vm5, %v15368_v9, %v11704_v54  ;;  %v10084_v41 = vshll.u32 %v15042_v15, 16 }
 0x431   :  { %24024 = vst [vmem:[#allocation28_spill] sm:$0xff] %v22347_v36  ;;  %v22356_v19 = vadd.f32 %v9128_v57, %v8336_v18  ;;  %10974 = vmatmul.mubr.bf16.gmra.mrb[248].mxu1 %v15154_v17  ;;  %12352 = vmatmul.mubr.bf16.gmra.mrb[248].mxu0 %v15458_v1  ;;  %v10069_v17 = vrot.slane %v10067_v7, 4  ;;  %v10072_v1 = vrot.slane %v10070_v63, 5  ;;  %v22384_v7 = vsel %vm16227_vm2, %v10046_v24, %v10050_v34  ;;  %v15043_v9 = vld [vmem:[%s23714_s0 + $0x308] sm:$0x11] }
 0x432   :  { %10981 = vmatprep.mubr.bf16.mxu1 %v15157_v42  ;;  %12359 = vmatprep.mubr.bf16.mxu0 %v15461_v16  ;;  %v10062_v42 = vshll.u32 %v15039_v28, 16  ;;  %v15279_v16 = vld [vmem:[%s23714_s0 + $0x2e8] sm:$0x11]  ;;  %v22388_v23 = vsel %vm16533_vm5, %v15369_v3, %v11708_v5  ;;  %v10095_v63 = vshrl.u32 %v15044_v31, 16  ;;  %v10098_v38 = vshll.u32 %v15044_v31, 16 }
 0x433   :  { %24026 = vst [vmem:[#allocation37_spill] sm:$0xff] %v22356_v19  ;;  %v24027_v18 = vld [vmem:[#allocation40_spill] sm:$0xff]  ;;  %v10059_v54 = vor.u32 %v10058_v40, %v10055_v50  ;;  %v10076_v15 = vshll.u32 %v15041_v30, 16  ;;  %v15280_v24 = vld [vmem:[%s23714_s0 + $0x2f0] sm:$0xee]  ;;  %v15370_v34 = vrot.slane %v15278_v14, 9  ;;  %v15159_v5 = vcombine.high %v22329_v48, %v22342_v27 }
 0x434   :  { %v8138_v46 = vpop.f32.mrb[144].mxu1  ;;  %v9133_v57 = vpop.f32.mrb[144].mxu0  ;;  %v10073_v59 = vor.u32 %v10072_v1, %v10069_v17  ;;  %v11712_v19 = vrot.slane %v15279_v16, 5  ;;  %v15045_v31 = vld [vmem:[%s23714_s0 + $0x318] sm:$0x11]  ;;  %v24029_v30 = vld [vmem:[#allocation4_spill] sm:$0xff]  ;;  %v15161_v17 = vcombine.high %v22373_v35, %v22384_v7  ;;  %v15465_v1 = vcombine.high %v22377_v47, %v22388_v23 }
 0x435   :  { %v8337_v12 = vadd.f32 %v8138_v46, %v24027_v18  ;;  %v8140_v52 = vpop.f32.mrb[145].mxu1  ;;  %v9135_v53 = vpop.f32.mrb[145].mxu0  ;;  %v10083_v46 = vrot.slane %v10081_v21, 4  ;;  %v15281_v14 = vld [vmem:[%s23714_s0 + $0x2f8] sm:$0x11]  ;;  %v10090_v36 = vshll.u32 %v15043_v9, 16 }
 0x436   :  { %v8141_v28 = vpop.f32.mrb[146].mxu1  ;;  %v9136_v3 = vpop.f32.mrb[146].mxu0  ;;  %v10086_v53 = vrot.slane %v10084_v41, 5  ;;  %v10097_v16 = vrot.slane %v10095_v63, 4  ;;  %v10100_v21 = vrot.slane %v10098_v38, 5  ;;  %v24032_v41 = vcombine.low %v22262_v58, %v22282_v49  ;;  %v15046_v38 = vld [vmem:[%s23714_s0 + $0x340] sm:$0xff] }
 0x437   :  { %v22402_v18 = vadd.f32 %v9133_v57, %v8337_v12  ;;  %v8338_v50 = vadd.f32 %v8141_v28, %v24029_v30  ;;  %v8143_v40 = vpop.f32.mrb[147].mxu1  ;;  %v9138_v52 = vpop.f32.mrb[147].mxu0  ;;  %v22415_v57 = vld [vmem:[%s23714_s0 + $0x300] sm:$0xee]  ;;  %v24031_v28 = vcombine.low %v22274_v22, %v22278_v55  ;;  %v10060_v9 = vrot.slane %v10059_v54, 4 }
 0x438   :  { %v10064_v30 = vrot.slane %v10062_v42, 5  ;;  %v10104_v40 = vshll.u32 %v15045_v31, 16  ;;  %v22428_v63 = vld [vmem:[%s23714_s0 + $0x308] sm:$0x11]  ;;  %v10074_v22 = vrot.slane %v10073_v59, 4  ;;  %v10078_v55 = vrot.slane %v10076_v15, 5 }
 0x439   :  { %24028 = vst [vmem:[#allocation40_spill] sm:$0xff] %v22402_v18  ;;  %v22417_v12 = vadd.f32 %v9136_v3, %v8338_v50  ;;  %10982 = vmatmul.mubr.bf16.gmra.mrb[252].mxu1 %v24031_v28  ;;  %12360 = vmatmul.mubr.bf16.gmra.mrb[252].mxu0 %v24032_v41  ;;  %v15371_v3 = vrot.slane %v15280_v24, 9  ;;  %v11716_v50 = vrot.slane %v15281_v14, 5  ;;  %v22436_v58 = vld [vmem:[%s23714_s0 + $0x310] sm:$0xee]  ;;  %v22440_v49 = vsel %vm16533_vm5, %v15370_v34, %v11712_v19  ;;  %v24033_v34 = vld [vmem:[#allocation5_spill] sm:$0xff] }
 0x43a   :  { %10989 = vmatprep.mubr.bf16.mxu1 %v15159_v5  ;;  %12367 = vmatprep.mubr.bf16.mxu0 %v15463_v8  ;;  %v10087_v42 = vor.u32 %v10086_v53, %v10083_v46  ;;  %v10092_v54 = vrot.slane %v10090_v36, 5  ;;  %v15285_v5 = vld [vmem:[%s23714_s0 + $0x318] sm:$0x11]  ;;  %v15372_v8 = vrot.slane %v22415_v57, 9  ;;  %v15048_v59 = vld [vmem:[%s23714_s0 + $0x350] sm:$0xff]  ;;  %v10101_v31 = vor.u32 %v10100_v21, %v10097_v16 }
 0x43b   :  { %24030 = vst [vmem:[#allocation4_spill] sm:$0xff] %v22417_v12  ;;  %v11720_v52 = vrot.slane %v22428_v63, 5  ;;  %v10109_v14 = vshrl.u32 %v15046_v38, 16  ;;  %v10112_v19 = vshll.u32 %v15046_v38, 16  ;;  %v22453_v28 = vsel %vm16227_vm2, %v10060_v9, %v10064_v30  ;;  %v15047_v12 = vld [vmem:[%s23714_s0 + $0x348] sm:$0x11] }
 0x43c   :  { %v8146_v15 = vpop.f32.mrb[148].mxu1  ;;  %v9141_v24 = vpop.f32.mrb[148].mxu0  ;;  %v10106_v57 = vrot.slane %v10104_v40, 5  ;;  %v15373_v41 = vrot.slane %v22436_v58, 9  ;;  %v22461_v63 = vsel %vm16227_vm2, %v10074_v22, %v10078_v55  ;;  %v22465_v38 = vsel %vm16533_vm5, %v15371_v3, %v11716_v50  ;;  %v15049_v9 = vld [vmem:[%s23714_s0 + $0x358] sm:$0x11] }
 0x43d   :  { %v8339_v46 = vadd.f32 %v8146_v15, %v24033_v34  ;;  %v8148_v36 = vpop.f32.mrb[149].mxu1  ;;  %v9143_v53 = vpop.f32.mrb[149].mxu0  ;;  %v10123_v30 = vshrl.u32 %v15048_v59, 16  ;;  %v10126_v40 = vshll.u32 %v15048_v59, 16  ;;  %v24035_v15 = vld [vmem:[#allocation6_spill] sm:$0xff]  ;;  %v10088_v18 = vrot.slane %v10087_v42, 4 }
 0x43e   :  { %v8149_v16 = vpop.f32.mrb[150].mxu1  ;;  %v9144_v21 = vpop.f32.mrb[150].mxu0  ;;  %v11724_v45 = vrot.slane %v15285_v5, 5  ;;  %v10102_v22 = vrot.slane %v10101_v31, 4  ;;  %v22473_v55 = vrot.slane %v10109_v14, 4  ;;  %v22475_v56 = vrot.slane %v10112_v19, 5 }
 0x43f   :  { %v22470_v58 = vadd.f32 %v9141_v24, %v8339_v46  ;;  %v8340_v34 = vadd.f32 %v8149_v16, %v24035_v15  ;;  %v8151_v36 = vpop.f32.mrb[151].mxu1  ;;  %v9146_v53 = vpop.f32.mrb[151].mxu0  ;;  %v10118_v3 = vshll.u32 %v15047_v12, 16  ;;  %v15050_v50 = vld [vmem:[%s23714_s0 + $0x360] sm:$0xff]  ;;  %v24037_v59 = vcombine.low %v22329_v48, %v22342_v27  ;;  %v15289_v15 = vld [vmem:[%s23714_s0 + $0x358] sm:$0x11] }
 0x440   :  { %v24038_v42 = vcombine.low %v22297_v44, %v22301_v11  ;;  %v15160_v5 = vcombine.low %v22373_v35, %v22384_v7  ;;  %v15464_v12 = vcombine.low %v22377_v47, %v22388_v23  ;;  %v10132_v24 = vshll.u32 %v15049_v9, 16  ;;  %v15286_v44 = vld [vmem:[%s23714_s0 + $0x340] sm:$0xee]  ;;  %v15052_v11 = vld [vmem:[%s23714_s0 + $0x370] sm:$0xff]  ;;  %v15287_v7 = vld [vmem:[%s23714_s0 + $0x348] sm:$0x11] }
 0x441   :  { %24034 = vst [vmem:[#allocation5_spill] sm:$0xff] %v22470_v58  ;;  %v22480_v13 = vadd.f32 %v9144_v21, %v8340_v34  ;;  %10990 = vmatmul.mubr.bf16.gmra.mrb[0].mxu1 %v24037_v59  ;;  %v15163_v31 = vcombine.high %v22453_v28, %v22461_v63  ;;  %v15467_v48 = vcombine.high %v22440_v49, %v22465_v38  ;;  %v10125_v27 = vrot.slane %v10123_v30, 4  ;;  %v22516_v23 = vld [vmem:[%s23714_s0 + $0x350] sm:$0xee]  ;;  %v24039_v16 = vld [vmem:[#allocation7_spill] sm:$0xff] }
 0x442   :  { %12368 = vmatmul.mubr.bf16.gmra.mrb[0].mxu0 %v24038_v42  ;;  %10997 = vmatprep.mubr.bf16.mxu1 %v15161_v17  ;;  %v10128_v14 = vrot.slane %v10126_v40, 5  ;;  %v22504_v35 = vsel %vm16227_vm2, %v10088_v18, %v10092_v54  ;;  %v22508_v47 = vsel %vm16533_vm5, %v15372_v8, %v11720_v52  ;;  %v10137_v17 = vshrl.u32 %v15050_v50, 16 }
 0x443   :  { %24036 = vst [vmem:[#allocation6_spill] sm:$0xff] %v22480_v13  ;;  %12375 = vmatprep.mubr.bf16.mxu0 %v15465_v1  ;;  %v10140_v1 = vshll.u32 %v15050_v50, 16  ;;  %v22520_v18 = vsel %vm16227_vm2, %v10102_v22, %v10106_v57  ;;  %v22524_v54 = vsel %vm16533_vm5, %v15373_v41, %v11724_v45  ;;  %v10115_v8 = vor.u32 %v22475_v56, %v22473_v55  ;;  %v24041_v55 = vld [vmem:[#allocation8_spill] sm:$0xff] }
 0x444   :  { %v8154_v19 = vpop.f32.mrb[152].mxu1  ;;  %v9149_v46 = vpop.f32.mrb[152].mxu0  ;;  %v10120_v52 = vrot.slane %v10118_v3, 5  ;;  %v10134_v40 = vrot.slane %v10132_v24, 5  ;;  %v10151_v34 = vshrl.u32 %v15052_v11, 16  ;;  %v10154_v57 = vshll.u32 %v15052_v11, 16 }
 0x445   :  { %v8341_v21 = vadd.f32 %v8154_v19, %v24039_v16  ;;  %v8156_v9 = vpop.f32.mrb[153].mxu1  ;;  %v9151_v30 = vpop.f32.mrb[153].mxu0  ;;  %v10129_v22 = vor.u32 %v10128_v14, %v10125_v27  ;;  %v15374_v45 = vrot.slane %v15286_v44, 9  ;;  %v11728_v41 = vrot.slane %v15287_v7, 5  ;;  %v15051_v24 = vld [vmem:[%s23714_s0 + $0x368] sm:$0x11] }
 0x446   :  { %v8157_v36 = vpop.f32.mrb[154].mxu1  ;;  %v9152_v53 = vpop.f32.mrb[154].mxu0  ;;  %v15375_v50 = vrot.slane %v22516_v23, 9  ;;  %v10139_v19 = vrot.slane %v10137_v17, 4  ;;  %v10142_v16 = vrot.slane %v10140_v1, 5  ;;  %v15162_v11 = vcombine.low %v22453_v28, %v22461_v63  ;;  %v15056_v14 = vld [vmem:[%s23714_s0 + $0x390] sm:$0xff] }
 0x447   :  { %v22533_v56 = vadd.f32 %v9149_v46, %v8341_v21  ;;  %v8342_v3 = vadd.f32 %v8157_v36, %v24041_v55  ;;  %v8159_v59 = vpop.f32.mrb[155].mxu1  ;;  %v9154_v42 = vpop.f32.mrb[155].mxu0  ;;  %v15466_v27 = vcombine.low %v22440_v49, %v22465_v38  ;;  %v15053_v44 = vld [vmem:[%s23714_s0 + $0x378] sm:$0x11]  ;;  %v15290_v7 = vld [vmem:[%s23714_s0 + $0x360] sm:$0xee]  ;;  %v15165_v49 = vcombine.high %v22504_v35, %v22520_v18 }
 0x448   :  { %v15291_v23 = vld [vmem:[%s23714_s0 + $0x368] sm:$0x11]  ;;  %v10153_v28 = vrot.slane %v10151_v34, 4  ;;  %v10156_v63 = vrot.slane %v10154_v57, 5  ;;  %v15292_v38 = vld [vmem:[%s23714_s0 + $0x370] sm:$0xee]  ;;  %v15469_v30 = vcombine.high %v22508_v47, %v22524_v54  ;;  %v22571_v34 = vsel %vm16533_vm5, %v15374_v45, %v11728_v41 }
 0x449   :  { %24040 = vst [vmem:[#allocation7_spill] sm:$0xff] %v22533_v56  ;;  %v22554_v17 = vadd.f32 %v9152_v53, %v8342_v3  ;;  %10998 = vmatmul.mubr.bf16.gmra.mrb[4].mxu1 %v15160_v5  ;;  %v15293_v1 = vld [vmem:[%s23714_s0 + $0x378] sm:$0x11]  ;;  %v10116_v46 = vrot.slane %v10115_v8, 4  ;;  %v10130_v21 = vrot.slane %v10129_v22, 4  ;;  %v11732_v9 = vrot.slane %v15289_v15, 5 }
 0x44a   :  { %12376 = vmatmul.mubr.bf16.gmra.mrb[4].mxu0 %v15464_v12  ;;  %11005 = vmatprep.mubr.bf16.mxu1 %v15163_v31  ;;  %v10146_v5 = vshll.u32 %v15051_v24, 16  ;;  %v15054_v12 = vld [vmem:[%s23714_s0 + $0x380] sm:$0xff]  ;;  %v10143_v57 = vor.u32 %v10142_v16, %v10139_v19  ;;  %v10160_v36 = vshll.u32 %v15053_v44, 16  ;;  %v11736_v8 = vrot.slane %v15291_v23, 5  ;;  %v24043_v55 = vld [vmem:[#allocation9_spill] sm:$0xff] }
 0x44b   :  { %24042 = vst [vmem:[#allocation8_spill] sm:$0xff] %v22554_v17  ;;  %12383 = vmatprep.mubr.bf16.mxu0 %v15467_v48  ;;  %v15376_v48 = vrot.slane %v15290_v7, 9  ;;  %v15377_v22 = vrot.slane %v15292_v38, 9  ;;  %v11740_v15 = vrot.slane %v15293_v1, 5  ;;  %v10157_v24 = vor.u32 %v10156_v63, %v10153_v28  ;;  %v24045_v63 = vld [vmem:[#allocation10_spill] sm:$0xff] }
 0x44c   :  { %v8162_v53 = vpop.f32.mrb[156].mxu1  ;;  %v9157_v31 = vpop.f32.mrb[156].mxu0  ;;  %v10165_v17 = vshrl.u32 %v15054_v12, 16  ;;  %v10168_v45 = vshll.u32 %v15054_v12, 16  ;;  %v22579_v16 = vsel %vm16227_vm2, %v10116_v46, %v10120_v52  ;;  %v22583_v44 = vsel %vm16227_vm2, %v10130_v21, %v10134_v40  ;;  %v15058_v52 = vld [vmem:[%s23714_s0 + $0x3a0] sm:$0xff] }
 0x44d   :  { %v8343_v3 = vadd.f32 %v8162_v53, %v24043_v55  ;;  %v8164_v59 = vpop.f32.mrb[157].mxu1  ;;  %v9159_v42 = vpop.f32.mrb[157].mxu0  ;;  %v22587_v7 = vsel %vm16533_vm5, %v15375_v50, %v11732_v9  ;;  %v10148_v23 = vrot.slane %v10146_v5, 5  ;;  %v10144_v53 = vrot.slane %v10143_v57, 4  ;;  %v15055_v46 = vld [vmem:[%s23714_s0 + $0x388] sm:$0x11] }
 0x44e   :  { %v8165_v41 = vpop.f32.mrb[158].mxu1  ;;  %v9160_v19 = vpop.f32.mrb[158].mxu0  ;;  %v10162_v55 = vrot.slane %v10160_v36, 5  ;;  %v22597_v40 = vsel %vm16533_vm5, %v15376_v48, %v11736_v8  ;;  %v22601_v50 = vsel %vm16533_vm5, %v15377_v22, %v11740_v15  ;;  %v10179_v21 = vshrl.u32 %v15056_v14, 16  ;;  %v15057_v22 = vld [vmem:[%s23714_s0 + $0x398] sm:$0x11] }
 0x44f   :  { %v22589_v28 = vadd.f32 %v9157_v31, %v8343_v3  ;;  %v8344_v38 = vadd.f32 %v8165_v41, %v24045_v63  ;;  %v8167_v1 = vpop.f32.mrb[159].mxu1  ;;  %v9162_v12 = vpop.f32.mrb[159].mxu0  ;;  %v10182_v9 = vshll.u32 %v15056_v14, 16  ;;  %v10158_v57 = vrot.slane %v10157_v24, 4  ;;  %v15296_v15 = vld [vmem:[%s23714_s0 + $0x390] sm:$0xee] }
 0x450   :  { %v10167_v36 = vrot.slane %v10165_v17, 4  ;;  %v10170_v31 = vrot.slane %v10168_v45, 5  ;;  %v15164_v48 = vcombine.low %v22504_v35, %v22520_v18  ;;  %v10196_v14 = vshll.u32 %v15058_v52, 16  ;;  %v15060_v3 = vld [vmem:[%s23714_s0 + $0x3b0] sm:$0xff]  ;;  %v15297_v63 = vld [vmem:[%s23714_s0 + $0x398] sm:$0x11] }
 0x451   :  { %24044 = vst [vmem:[#allocation9_spill] sm:$0xff] %v22589_v28  ;;  %v22606_v5 = vadd.f32 %v9160_v19, %v8344_v38  ;;  %11006 = vmatmul.mubr.bf16.gmra.mrb[8].mxu1 %v15162_v11  ;;  %v22618_v11 = vld [vmem:[%s23714_s0 + $0x380] sm:$0xee]  ;;  %v15167_v35 = vcombine.high %v22579_v16, %v22583_v44  ;;  %v15471_v18 = vcombine.high %v22571_v34, %v22587_v7  ;;  %v10181_v41 = vrot.slane %v10179_v21, 4  ;;  %v24047_v38 = vld [vmem:[#allocation11_spill] sm:$0xff] }
 0x452   :  { %12384 = vmatmul.mubr.bf16.gmra.mrb[8].mxu0 %v15466_v27  ;;  %11013 = vmatprep.mubr.bf16.mxu1 %v15165_v49  ;;  %v10193_v27 = vshrl.u32 %v15058_v52, 16  ;;  %v10174_v49 = vshll.u32 %v15055_v46, 16  ;;  %v22637_v24 = vsel %vm16227_vm2, %v10144_v53, %v10148_v23  ;;  %v10184_v19 = vrot.slane %v10182_v9, 5  ;;  %v15059_v53 = vld [vmem:[%s23714_s0 + $0x3a8] sm:$0x11] }
 0x453   :  { %24046 = vst [vmem:[#allocation10_spill] sm:$0xff] %v22606_v5  ;;  %12391 = vmatprep.mubr.bf16.mxu0 %v15469_v30  ;;  %v15295_v30 = vld [vmem:[%s23714_s0 + $0x388] sm:$0x11]  ;;  %v22647_v46 = vsel %vm16227_vm2, %v10158_v57, %v10162_v55  ;;  %v10171_v8 = vor.u32 %v10170_v31, %v10167_v36  ;;  %v10188_v23 = vshll.u32 %v15057_v22, 16  ;;  %v10198_v17 = vrot.slane %v10196_v14, 5 }
 0x454   :  { %v8170_v59 = vpop.f32.mrb[160].mxu1  ;;  %v9165_v42 = vpop.f32.mrb[160].mxu0  ;;  %v10195_v45 = vrot.slane %v10193_v27, 4  ;;  %v10207_v5 = vshrl.u32 %v15060_v3, 16  ;;  %v10210_v28 = vshll.u32 %v15060_v3, 16  ;;  %v15378_v55 = vrot.slane %v22618_v11, 9 }
 0x455   :  { %v8345_v1 = vadd.f32 %v8170_v59, %v24047_v38  ;;  %v8172_v12 = vpop.f32.mrb[161].mxu1  ;;  %v9167_v52 = vpop.f32.mrb[161].mxu0  ;;  %v24049_v59 = vld [vmem:[#allocation12_spill] sm:$0xff]  ;;  %v11744_v57 = vrot.slane %v15295_v30, 5  ;;  %v10185_v36 = vor.u32 %v10184_v19, %v10181_v41  ;;  %v15379_v31 = vrot.slane %v15296_v15, 9 }
 0x456   :  { %v8173_v21 = vpop.f32.mrb[162].mxu1  ;;  %v9168_v9 = vpop.f32.mrb[162].mxu0  ;;  %v11748_v22 = vrot.slane %v15297_v63, 5  ;;  %v10202_v13 = vshll.u32 %v15059_v53, 16  ;;  %v15062_v27 = vld [vmem:[%s23714_s0 + $0x3e0] sm:$0xff]  ;;  %v24051_v3 = vcombine.low %v22508_v47, %v22524_v54  ;;  %v10176_v11 = vrot.slane %v10174_v49, 5 }
 0x457   :  { %v22652_v56 = vadd.f32 %v9165_v42, %v8345_v1  ;;  %v8346_v38 = vadd.f32 %v8173_v21, %v24049_v59  ;;  %v8175_v12 = vpop.f32.mrb[163].mxu1  ;;  %v9170_v52 = vpop.f32.mrb[163].mxu0  ;;  %v15473_v42 = vcombine.high %v22597_v40, %v22601_v50  ;;  %v10190_v30 = vrot.slane %v10188_v23, 5  ;;  %v15061_v15 = vld [vmem:[%s23714_s0 + $0x3b8] sm:$0x11]  ;;  %v15064_v54 = vld [vmem:[%s23714_s0 + $0x3f0] sm:$0xff] }
 0x458   :  { %v10172_v41 = vrot.slane %v10171_v8, 4  ;;  %v10199_v19 = vor.u32 %v10198_v17, %v10195_v45  ;;  %v10209_v63 = vrot.slane %v10207_v5, 4  ;;  %v10212_v1 = vrot.slane %v10210_v28, 5  ;;  %v15298_v47 = vld [vmem:[%s23714_s0 + $0x3a0] sm:$0xee]  ;;  %v24052_v59 = vld [vmem:[#allocation13_spill] sm:$0xff] }
 0x459   :  { %24048 = vst [vmem:[#allocation11_spill] sm:$0xff] %v22652_v56  ;;  %v22659_v14 = vadd.f32 %v9168_v9, %v8346_v38  ;;  %11014 = vmatmul.mubr.bf16.gmra.mrb[12].mxu1 %v15164_v48  ;;  %v15169_v49 = vcombine.high %v22637_v24, %v22647_v46  ;;  %v15299_v8 = vld [vmem:[%s23714_s0 + $0x3a8] sm:$0x11]  ;;  %v15300_v28 = vld [vmem:[%s23714_s0 + $0x3b0] sm:$0xee]  ;;  %v10221_v5 = vshrl.u32 %v15062_v27, 16  ;;  %v22687_v23 = vsel %vm16533_vm5, %v15378_v55, %v11744_v57 }
 0x45a   :  { %12392 = vmatmul.mubr.bf16.gmra.mrb[12].mxu0 %v24051_v3  ;;  %11021 = vmatprep.mubr.bf16.mxu1 %v15167_v35  ;;  %v10224_v17 = vshll.u32 %v15062_v27, 16  ;;  %v10186_v45 = vrot.slane %v10185_v36, 4  ;;  %v22691_v53 = vsel %vm16533_vm5, %v15379_v31, %v11748_v22  ;;  %v10204_v21 = vrot.slane %v10202_v13, 5  ;;  %v15301_v9 = vld [vmem:[%s23714_s0 + $0x3b8] sm:$0x11] }
 0x45b   :  { %24050 = vst [vmem:[#allocation12_spill] sm:$0xff] %v22659_v14  ;;  %12399 = vmatprep.mubr.bf16.mxu0 %v15471_v18  ;;  %v10216_v27 = vshll.u32 %v15061_v15, 16  ;;  %v10235_v3 = vshrl.u32 %v15064_v54, 16  ;;  %v10238_v36 = vshll.u32 %v15064_v54, 16  ;;  %v10200_v55 = vrot.slane %v10199_v19, 4  ;;  %v24053_v13 = vld [vmem:[#allocation14_spill] sm:$0xff] }
 0x45c   :  { %v8178_v35 = vpop.f32.mrb[164].mxu1  ;;  %v9173_v18 = vpop.f32.mrb[164].mxu0  ;;  %v10213_v57 = vor.u32 %v10212_v1, %v10209_v63  ;;  %v15380_v56 = vrot.slane %v15298_v47, 9  ;;  %v11752_v58 = vrot.slane %v15299_v8, 5  ;;  %v10226_v15 = vrot.slane %v10224_v17, 5  ;;  %v15068_v8 = vld [vmem:[%s23714_s0 + $0x410] sm:$0xff] }
 0x45d   :  { %v8347_v38 = vadd.f32 %v8178_v35, %v24052_v59  ;;  %v8180_v12 = vpop.f32.mrb[165].mxu1  ;;  %v9175_v52 = vpop.f32.mrb[165].mxu0  ;;  %v15063_v35 = vld [vmem:[%s23714_s0 + $0x3e8] sm:$0x11]  ;;  %v10223_v59 = vrot.slane %v10221_v5, 4  ;;  %v22705_v54 = vsel %vm16227_vm2, %v10172_v41, %v10176_v11  ;;  %v22709_v19 = vsel %vm16227_vm2, %v10186_v45, %v10190_v30 }
 0x45e   :  { %v8181_v48 = vpop.f32.mrb[166].mxu1  ;;  %v9176_v14 = vpop.f32.mrb[166].mxu0  ;;  %v15381_v63 = vrot.slane %v15300_v28, 9  ;;  %v11756_v1 = vrot.slane %v15301_v9, 5  ;;  %v15065_v30 = vld [vmem:[%s23714_s0 + $0x3f8] sm:$0x11]  ;;  %v15171_v28 = vcombine.high %v22705_v54, %v22709_v19  ;;  %v22736_v5 = vsel %vm16227_vm2, %v10200_v55, %v10204_v21 }
 0x45f   :  { %v22697_v31 = vadd.f32 %v9173_v18, %v8347_v38  ;;  %v8348_v22 = vadd.f32 %v8181_v48, %v24053_v13  ;;  %v8183_v39 = vpop.f32.mrb[167].mxu1  ;;  %v9178_v60 = vpop.f32.mrb[167].mxu0  ;;  %v10237_v41 = vrot.slane %v10235_v3, 4  ;;  %v10240_v48 = vrot.slane %v10238_v36, 5  ;;  %v15302_v17 = vld [vmem:[%s23714_s0 + $0x3e0] sm:$0xee] }
 0x460   :  { %v24055_v60 = vcombine.low %v22579_v16, %v22583_v44  ;;  %v24056_v39 = vcombine.low %v22571_v34, %v22587_v7  ;;  %v15475_v16 = vcombine.high %v22687_v23, %v22691_v53  ;;  %v10214_v34 = vrot.slane %v10213_v57, 4  ;;  %v15303_v18 = vld [vmem:[%s23714_s0 + $0x3e8] sm:$0x11]  ;;  %v22751_v45 = vld [vmem:[%s23714_s0 + $0x3f0] sm:$0xee]  ;;  %v24057_v52 = vld [vmem:[#allocation15_spill] sm:$0xff] }
 0x461   :  { %v22711_v47 = vadd.f32 %v9176_v14, %v8348_v22  ;;  %v15066_v14 = vld [vmem:[%s23714_s0 + $0x400] sm:$0xff]  ;;  %v10218_v44 = vrot.slane %v10216_v27, 5  ;;  %v10230_v7 = vshll.u32 %v15063_v35, 16  ;;  %v10241_v55 = vor.u32 %v10240_v48, %v10237_v41  ;;  %v15305_v57 = vld [vmem:[%s23714_s0 + $0x3f8] sm:$0x11] }
 0x462   :  { %11022 = vmatmul.mubr.bf16.gmra.mrb[16].mxu1 %v24055_v60  ;;  %12400 = vmatmul.mubr.bf16.gmra.mrb[16].mxu0 %v24056_v39  ;;  %v10249_v38 = vshrl.u32 %v15066_v14, 16  ;;  %v10252_v12 = vshll.u32 %v15066_v14, 16  ;;  %v10263_v13 = vshrl.u32 %v15068_v8, 16  ;;  %v10266_v22 = vshll.u32 %v15068_v8, 16  ;;  %v15070_v8 = vld [vmem:[%s23714_s0 + $0x420] sm:$0xff] }
 0x463   :  { %24054 = vst [vmem:[#allocation13_spill] sm:$0xff] %v22711_v47  ;;  %11029 = vmatprep.mubr.bf16.mxu1 %v15169_v49  ;;  %12407 = vmatprep.mubr.bf16.mxu0 %v15473_v42  ;;  %v22740_v42 = vsel %vm16533_vm5, %v15380_v56, %v11752_v58  ;;  %v10227_v49 = vor.u32 %v10226_v15, %v10223_v59  ;;  %v10244_v56 = vshll.u32 %v15065_v30, 16  ;;  %v11760_v60 = vrot.slane %v15303_v18, 5  ;;  %v24059_v30 = vld [vmem:[#allocation16_spill] sm:$0xff] }
 0x464   :  { %v8186_v21 = vpop.f32.mrb[168].mxu1  ;;  %v9181_v9 = vpop.f32.mrb[168].mxu0  ;;  %v22755_v58 = vsel %vm16533_vm5, %v15381_v63, %v11756_v1  ;;  %v22763_v15 = vsel %vm16227_vm2, %v10214_v34, %v10218_v44  ;;  %v10232_v63 = vrot.slane %v10230_v7, 5  ;;  %v15382_v1 = vrot.slane %v15302_v17, 9  ;;  %v15067_v34 = vld [vmem:[%s23714_s0 + $0x408] sm:$0x11] }
 0x465   :  { %v8349_v27 = vadd.f32 %v8186_v21, %v24057_v52  ;;  %v8188_v3 = vpop.f32.mrb[169].mxu1  ;;  %v9183_v36 = vpop.f32.mrb[169].mxu0  ;;  %v10228_v21 = vrot.slane %v10227_v49, 4  ;;  %v15383_v52 = vrot.slane %v22751_v45, 9  ;;  %v10251_v44 = vrot.slane %v10249_v38, 4 }
 0x466   :  { %v8189_v35 = vpop.f32.mrb[170].mxu1  ;;  %v9184_v59 = vpop.f32.mrb[170].mxu0  ;;  %v10246_v3 = vrot.slane %v10244_v56, 5  ;;  %v11764_v36 = vrot.slane %v15305_v57, 5  ;;  %v10254_v7 = vrot.slane %v10252_v12, 5  ;;  %v24061_v18 = vcombine.low %v22637_v24, %v22647_v46 }
 0x467   :  { %v22765_v39 = vadd.f32 %v9181_v9, %v8349_v27  ;;  %v8350_v14 = vadd.f32 %v8189_v35, %v24059_v30  ;;  %v8191_v41 = vpop.f32.mrb[171].mxu1  ;;  %v9186_v48 = vpop.f32.mrb[171].mxu0  ;;  %v24062_v49 = vcombine.low %v22597_v40, %v22601_v50  ;;  %v10242_v45 = vrot.slane %v10241_v55, 4  ;;  %v15069_v9 = vld [vmem:[%s23714_s0 + $0x418] sm:$0x11] }
 0x468   :  { %v10265_v56 = vrot.slane %v10263_v13, 4  ;;  %v10268_v27 = vrot.slane %v10266_v22, 5  ;;  %v15170_v38 = vcombine.low %v22705_v54, %v22709_v19  ;;  %v10277_v46 = vshrl.u32 %v15070_v8, 16  ;;  %v15306_v54 = vld [vmem:[%s23714_s0 + $0x400] sm:$0xee]  ;;  %v24063_v41 = vld [vmem:[#allocation17_spill] sm:$0xff] }
 0x469   :  { %24058 = vst [vmem:[#allocation14_spill] sm:$0xff] %v22765_v39  ;;  %v22775_v17 = vadd.f32 %v9184_v59, %v8350_v14  ;;  %v10280_v12 = vshll.u32 %v15070_v8, 16  ;;  %v15173_v50 = vcombine.high %v22736_v5, %v22763_v15  ;;  %v15477_v55 = vcombine.high %v22740_v42, %v22755_v58  ;;  %v15307_v19 = vld [vmem:[%s23714_s0 + $0x408] sm:$0x11] }
 0x46a   :  { %11030 = vmatmul.mubr.bf16.gmra.mrb[20].mxu1 %v24061_v18  ;;  %12408 = vmatmul.mubr.bf16.gmra.mrb[20].mxu0 %v24062_v49  ;;  %v10258_v57 = vshll.u32 %v15067_v34, 16  ;;  %v22807_v22 = vsel %vm16227_vm2, %v10228_v21, %v10232_v63  ;;  %v22811_v35 = vsel %vm16533_vm5, %v15382_v1, %v11760_v60  ;;  %v10255_v59 = vor.u32 %v10254_v7, %v10251_v44  ;;  %v15071_v14 = vld [vmem:[%s23714_s0 + $0x428] sm:$0x11]  ;;  %v15308_v60 = vld [vmem:[%s23714_s0 + $0x410] sm:$0xee] }
 0x46b   :  { %24060 = vst [vmem:[#allocation15_spill] sm:$0xff] %v22775_v17  ;;  %11037 = vmatprep.mubr.bf16.mxu1 %v15171_v28  ;;  %12415 = vmatprep.mubr.bf16.mxu0 %v15475_v16  ;;  %v15072_v16 = vld [vmem:[%s23714_s0 + $0x430] sm:$0xff]  ;;  %v10272_v30 = vshll.u32 %v15069_v9, 16  ;;  %v22819_v18 = vsel %vm16227_vm2, %v10242_v45, %v10246_v3  ;;  %v22823_v63 = vsel %vm16533_vm5, %v15383_v52, %v11764_v36  ;;  %v15309_v21 = vld [vmem:[%s23714_s0 + $0x418] sm:$0x11]  ;;  %v10279_v49 = vrot.slane %v10277_v46, 4 }
 0x46c   :  { %v8194_v28 = vpop.f32.mrb[172].mxu1  ;;  %v9189_v13 = vpop.f32.mrb[172].mxu0  ;;  %v10269_v1 = vor.u32 %v10268_v27, %v10265_v56  ;;  %v10282_v9 = vrot.slane %v10280_v12, 5  ;;  %v10294_v3 = vshll.u32 %v15072_v16, 16  ;;  %v10260_v27 = vrot.slane %v10258_v57, 5  ;;  %v15074_v17 = vld [vmem:[%s23714_s0 + $0x440] sm:$0xff] }
 0x46d   :  { %v8351_v48 = vadd.f32 %v8194_v28, %v24063_v41  ;;  %v8196_v8 = vpop.f32.mrb[173].mxu1  ;;  %v9191_v34 = vpop.f32.mrb[173].mxu0  ;;  %v10291_v28 = vshrl.u32 %v15072_v16, 16  ;;  %v24065_v41 = vld [vmem:[#allocation18_spill] sm:$0xff]  ;;  %v10274_v24 = vrot.slane %v10272_v30, 5  ;;  %v15384_v40 = vrot.slane %v15306_v54, 9 }
 0x46e   :  { %v8197_v44 = vpop.f32.mrb[174].mxu1  ;;  %v9192_v7 = vpop.f32.mrb[174].mxu0  ;;  %v10286_v8 = vshll.u32 %v15071_v14, 16  ;;  %v10256_v34 = vrot.slane %v10255_v59, 4  ;;  %v11768_v11 = vrot.slane %v15307_v19, 5  ;;  %v24067_v12 = vcombine.low %v22687_v23, %v22691_v53  ;;  %v15076_v57 = vld [vmem:[%s23714_s0 + $0x450] sm:$0xff] }
 0x46f   :  { %v22831_v45 = vadd.f32 %v9189_v13, %v8351_v48  ;;  %v8352_v52 = vadd.f32 %v8197_v44, %v24065_v41  ;;  %v8199_v36 = vpop.f32.mrb[175].mxu1  ;;  %v9194_v56 = vpop.f32.mrb[175].mxu0  ;;  %v10270_v16 = vrot.slane %v10269_v1, 4  ;;  %v15385_v13 = vrot.slane %v15308_v60, 9  ;;  %v15310_v53 = vld [vmem:[%s23714_s0 + $0x420] sm:$0xee] }
 0x470   :  { %v11772_v48 = vrot.slane %v15309_v21, 5  ;;  %v15479_v54 = vcombine.high %v22811_v35, %v22823_v63  ;;  %v10283_v19 = vor.u32 %v10282_v9, %v10279_v49  ;;  %v10293_v59 = vrot.slane %v10291_v28, 4  ;;  %v15312_v49 = vld [vmem:[%s23714_s0 + $0x430] sm:$0xee] }
 0x471   :  { %24064 = vst [vmem:[#allocation16_spill] sm:$0xff] %v22831_v45  ;;  %v22837_v46 = vadd.f32 %v9192_v7, %v8352_v52  ;;  %v10296_v23 = vrot.slane %v10294_v3, 5  ;;  %v15175_v30 = vcombine.high %v22807_v22, %v22819_v18  ;;  %v10288_v14 = vrot.slane %v10286_v8, 5  ;;  %v24068_v3 = vld [vmem:[#allocation19_spill] sm:$0xff] }
 0x472   :  { %11038 = vmatmul.mubr.bf16.gmra.mrb[24].mxu1 %v15170_v38  ;;  %12416 = vmatmul.mubr.bf16.gmra.mrb[24].mxu0 %v24067_v12  ;;  %v15073_v38 = vld [vmem:[%s23714_s0 + $0x438] sm:$0x11]  ;;  %v10308_v1 = vshll.u32 %v15074_v17, 16  ;;  %v22860_v44 = vsel %vm16227_vm2, %v10256_v34, %v10260_v27  ;;  %v22864_v7 = vsel %vm16533_vm5, %v15384_v40, %v11768_v11  ;;  %v10319_v9 = vshrl.u32 %v15076_v57, 16 }
 0x473   :  { %24066 = vst [vmem:[#allocation17_spill] sm:$0xff] %v22837_v46  ;;  %11045 = vmatprep.mubr.bf16.mxu1 %v15173_v50  ;;  %12423 = vmatprep.mubr.bf16.mxu0 %v15477_v55  ;;  %v15311_v50 = vld [vmem:[%s23714_s0 + $0x428] sm:$0x11]  ;;  %v10305_v55 = vshrl.u32 %v15074_v17, 16  ;;  %v10322_v28 = vshll.u32 %v15076_v57, 16  ;;  %v22872_v36 = vsel %vm16533_vm5, %v15385_v13, %v11772_v48  ;;  %v10300_v56 = vshll.u32 %v15073_v38, 16 }
 0x474   :  { %v8202_v60 = vpop.f32.mrb[176].mxu1  ;;  %v9197_v21 = vpop.f32.mrb[176].mxu0  ;;  %v15313_v11 = vld [vmem:[%s23714_s0 + $0x438] sm:$0x11]  ;;  %v15386_v40 = vrot.slane %v15310_v53, 9  ;;  %v22879_v34 = vsel %vm16227_vm2, %v10270_v16, %v10274_v24  ;;  %v10284_v12 = vrot.slane %v10283_v19, 4  ;;  %v10297_v57 = vor.u32 %v10296_v23, %v10293_v59 }
 0x475   :  { %v8353_v41 = vadd.f32 %v8202_v60, %v24068_v3  ;;  %v8204_v52 = vpop.f32.mrb[177].mxu1  ;;  %v9199_v17 = vpop.f32.mrb[177].mxu0  ;;  %v11776_v60 = vrot.slane %v15311_v50, 5  ;;  %v15075_v13 = vld [vmem:[%s23714_s0 + $0x448] sm:$0x11]  ;;  %v10307_v53 = vrot.slane %v10305_v55, 4  ;;  %v24070_v19 = vcombine.low %v22736_v5, %v22763_v15 }
 0x476   :  { %v8205_v27 = vpop.f32.mrb[178].mxu1  ;;  %v9200_v8 = vpop.f32.mrb[178].mxu0  ;;  %v24069_v38 = vld [vmem:[#allocation20_spill] sm:$0xff]  ;;  %v10310_v46 = vrot.slane %v10308_v1, 5  ;;  %v15387_v45 = vrot.slane %v15312_v49, 9  ;;  %v11780_v39 = vrot.slane %v15313_v11, 5  ;;  %v24071_v59 = vcombine.low %v22740_v42, %v22755_v58 }
 0x477   :  { %v22884_v48 = vadd.f32 %v9197_v21, %v8353_v41  ;;  %v8354_v3 = vadd.f32 %v8205_v27, %v24069_v38  ;;  %v8207_v52 = vpop.f32.mrb[179].mxu1  ;;  %v9202_v17 = vpop.f32.mrb[179].mxu0  ;;  %v10321_v47 = vrot.slane %v10319_v9, 4  ;;  %v10324_v24 = vrot.slane %v10322_v28, 5  ;;  %v15077_v23 = vld [vmem:[%s23714_s0 + $0x458] sm:$0x11] }
 0x478   :  { %v10314_v50 = vshll.u32 %v15075_v13, 16  ;;  %v15174_v55 = vcombine.low %v22807_v22, %v22819_v18  ;;  %v15478_v1 = vcombine.low %v22811_v35, %v22823_v63  ;;  %v10298_v21 = vrot.slane %v10297_v57, 4  ;;  %v15314_v42 = vld [vmem:[%s23714_s0 + $0x440] sm:$0xee]  ;;  %v15315_v58 = vld [vmem:[%s23714_s0 + $0x448] sm:$0x11] }
 0x479   :  { %v22887_v16 = vadd.f32 %v9200_v8, %v8354_v3  ;;  %v10302_v5 = vrot.slane %v10300_v56, 5  ;;  %v15177_v15 = vcombine.high %v22860_v44, %v22879_v34  ;;  %v15481_v22 = vcombine.high %v22864_v7, %v22872_v36  ;;  %v15316_v63 = vld [vmem:[%s23714_s0 + $0x450] sm:$0xee]  ;;  %v15317_v56 = vld [vmem:[%s23714_s0 + $0x458] sm:$0x11]  ;;  %v24072_v11 = vld [vmem:[#allocation21_spill] sm:$0xff] }
 0x47a   :  { %11046 = vmatmul.mubr.bf16.gmra.mrb[28].mxu1 %v24070_v19  ;;  %12424 = vmatmul.mubr.bf16.gmra.mrb[28].mxu0 %v24071_v59  ;;  %v22914_v35 = vsel %vm16533_vm5, %v15386_v40, %v11776_v60  ;;  %v10311_v18 = vor.u32 %v10310_v46, %v10307_v53  ;;  %v22924_v9 = vsel %vm16227_vm2, %v10284_v12, %v10288_v14  ;;  %v10328_v46 = vshll.u32 %v15077_v23, 16  ;;  %v24073_v17 = vld [vmem:[#allocation23_spill] sm:$0xff] }
 0x47b   :  { %11053 = vmatprep.mubr.bf16.mxu1 %v15175_v30  ;;  %12431 = vmatprep.mubr.bf16.mxu0 %v15479_v54  ;;  %v15078_v54 = vld [vmem:[%s23714_s0 + $0x480] sm:$0xff]  ;;  %v22928_v28 = vsel %vm16533_vm5, %v15387_v45, %v11780_v39  ;;  %v10325_v41 = vor.u32 %v10324_v24, %v10321_v47  ;;  %v10316_v57 = vrot.slane %v10314_v50, 5  ;;  %v15388_v60 = vrot.slane %v15314_v42, 9  ;;  %v15080_v47 = vld [vmem:[%s23714_s0 + $0x490] sm:$0xff]  ;;  %v22949_v42 = vld [vmem:[%s23714_s0 + $0x488] sm:$0x11] }
 0x47c   :  { %v8210_v30 = vpop.f32.mrb[180].mxu1  ;;  %v9205_v49 = vpop.f32.mrb[180].mxu0  ;;  %v11784_v13 = vrot.slane %v15315_v58, 5  ;;  %v22936_v12 = vsel %vm16227_vm2, %v10298_v21, %v10302_v5  ;;  %v15389_v39 = vrot.slane %v15316_v63, 9  ;;  %v10333_v45 = vshrl.u32 %v15078_v54, 16 }
 0x47d   :  { %v8355_v40 = vadd.f32 %v8210_v30, %v24072_v11  ;;  %v8212_v27 = vpop.f32.mrb[181].mxu1  ;;  %v9207_v8 = vpop.f32.mrb[181].mxu0  ;;  %v10336_v3 = vshll.u32 %v15078_v54, 16  ;;  %v10312_v59 = vrot.slane %v10311_v18, 4  ;;  %v11788_v23 = vrot.slane %v15317_v56, 5  ;;  %v15082_v54 = vld [vmem:[%s23714_s0 + $0x4a0] sm:$0xff] }
 0x47e   :  { %v8213_v38 = vpop.f32.mrb[182].mxu1  ;;  %v9208_v14 = vpop.f32.mrb[182].mxu0  ;;  %v15480_v50 = vcombine.low %v22864_v7, %v22872_v36  ;;  %v10326_v21 = vrot.slane %v10325_v41, 4  ;;  %v10330_v5 = vrot.slane %v10328_v46, 5  ;;  %v15176_v63 = vcombine.low %v22860_v44, %v22879_v34  ;;  %v22958_v18 = vld [vmem:[%s23714_s0 + $0x498] sm:$0x11] }
 0x47f   :  { %v22941_v52 = vadd.f32 %v9205_v49, %v8355_v40  ;;  %v8356_v53 = vadd.f32 %v8213_v38, %v24073_v17  ;;  %v8215_v24 = vpop.f32.mrb[183].mxu1  ;;  %v9210_v19 = vpop.f32.mrb[183].mxu0  ;;  %v10347_v7 = vshrl.u32 %v15080_v47, 16  ;;  %v10350_v36 = vshll.u32 %v15080_v47, 16  ;;  %v15084_v30 = vld [vmem:[%s23714_s0 + $0x4b0] sm:$0xff] }
 0x480   :  { %v15179_v44 = vcombine.high %v22924_v9, %v22936_v12  ;;  %v15483_v34 = vcombine.high %v22914_v35, %v22928_v28  ;;  %v15318_v49 = vld [vmem:[%s23714_s0 + $0x480] sm:$0xee]  ;;  %v15319_v41 = vld [vmem:[%s23714_s0 + $0x488] sm:$0x11]  ;;  %v22986_v46 = vsel %vm16533_vm5, %v15389_v39, %v11788_v23  ;;  %v10342_v56 = vshll.u32 %v22949_v42, 16 }
 0x481   :  { %v22951_v58 = vadd.f32 %v9208_v14, %v8356_v53  ;;  %v15320_v11 = vld [vmem:[%s23714_s0 + $0x490] sm:$0xee]  ;;  %v15321_v40 = vld [vmem:[%s23714_s0 + $0x498] sm:$0x11]  ;;  %v10364_v38 = vshll.u32 %v15082_v54, 16  ;;  %v24075_v14 = vld [vmem:[#allocation25_spill] sm:$0xff] }
 0x482   :  { %11054 = vmatmul.mubr.bf16.gmra.mrb[32].mxu1 %v15174_v55  ;;  %12432 = vmatmul.mubr.bf16.gmra.mrb[32].mxu0 %v15478_v1  ;;  %v10335_v55 = vrot.slane %v10333_v45, 4  ;;  %v10338_v1 = vrot.slane %v10336_v3, 5  ;;  %v10349_v3 = vrot.slane %v10347_v7, 4  ;;  %v10352_v17 = vrot.slane %v10350_v36, 5 }
 0x483   :  { %24074 = vst [vmem:[#allocation18_spill] sm:$0xff] %v22951_v58  ;;  %11061 = vmatprep.mubr.bf16.mxu1 %v15177_v15  ;;  %12439 = vmatprep.mubr.bf16.mxu0 %v15481_v22  ;;  %v22978_v15 = vsel %vm16227_vm2, %v10312_v59, %v10316_v57  ;;  %v22982_v22 = vsel %vm16533_vm5, %v15388_v60, %v11784_v13  ;;  %v10361_v57 = vshrl.u32 %v15082_v54, 16  ;;  %v10375_v60 = vshrl.u32 %v15084_v30, 16  ;;  %v15083_v54 = vld [vmem:[%s23714_s0 + $0x4a8] sm:$0x11] }
 0x484   :  { %v8218_v27 = vpop.f32.mrb[184].mxu1  ;;  %v9213_v8 = vpop.f32.mrb[184].mxu0  ;;  %v10378_v13 = vshll.u32 %v15084_v30, 16  ;;  %v10356_v53 = vshll.u32 %v22958_v18, 16  ;;  %v22999_v59 = vsel %vm16227_vm2, %v10326_v21, %v10330_v5  ;;  %v10339_v23 = vor.u32 %v10338_v1, %v10335_v55  ;;  %v15085_v21 = vld [vmem:[%s23714_s0 + $0x4b8] sm:$0x11] }
 0x485   :  { %v8357_v47 = vadd.f32 %v8218_v27, %v24075_v14  ;;  %v8220_v39 = vpop.f32.mrb[185].mxu1  ;;  %v9215_v45 = vpop.f32.mrb[185].mxu0  ;;  %v15390_v42 = vrot.slane %v15318_v49, 9  ;;  %v11792_v58 = vrot.slane %v15319_v41, 5  ;;  %v24077_v27 = vld [vmem:[#allocation27_spill] sm:$0xff]  ;;  %v15391_v18 = vrot.slane %v15320_v11, 9 }
 0x486   :  { %v8221_v24 = vpop.f32.mrb[186].mxu1  ;;  %v9216_v19 = vpop.f32.mrb[186].mxu0  ;;  %v11796_v39 = vrot.slane %v15321_v40, 5  ;;  %v10363_v5 = vrot.slane %v10361_v57, 4  ;;  %v10366_v55 = vrot.slane %v10364_v38, 5  ;;  %v10377_v1 = vrot.slane %v10375_v60, 4 }
 0x487   :  { %v23004_v30 = vadd.f32 %v9213_v8, %v8357_v47  ;;  %v8358_v7 = vadd.f32 %v8221_v24, %v24077_v27  ;;  %v8223_v36 = vpop.f32.mrb[187].mxu1  ;;  %v9218_v14 = vpop.f32.mrb[187].mxu0  ;;  %v10380_v49 = vrot.slane %v10378_v13, 5  ;;  %v10353_v8 = vor.u32 %v10352_v17, %v10349_v3  ;;  %v15322_v38 = vld [vmem:[%s23714_s0 + $0x4a0] sm:$0xee]  ;;  %v24079_v24 = vld [vmem:[#allocation31_spill] sm:$0xff] }
 0x488   :  { %v10370_v47 = vshll.u32 %v15083_v54, 16  ;;  %v15178_v45 = vcombine.low %v22924_v9, %v22936_v12  ;;  %v15482_v11 = vcombine.low %v22914_v35, %v22928_v28  ;;  %v15485_v40 = vcombine.high %v22982_v22, %v22986_v46  ;;  %v15323_v9 = vld [vmem:[%s23714_s0 + $0x4a8] sm:$0x11]  ;;  %v15086_v35 = vld [vmem:[%s23714_s0 + $0x4c0] sm:$0xff]  ;;  %v15324_v17 = vld [vmem:[%s23714_s0 + $0x4b0] sm:$0xee] }
 0x489   :  { %24076 = vst [vmem:[#allocation19_spill] sm:$0xff] %v23004_v30  ;;  %v23010_v41 = vadd.f32 %v9216_v19, %v8358_v7  ;;  %v10384_v57 = vshll.u32 %v15085_v21, 16  ;;  %v10344_v60 = vrot.slane %v10342_v56, 5  ;;  %v10358_v13 = vrot.slane %v10356_v53, 5  ;;  %v15325_v53 = vld [vmem:[%s23714_s0 + $0x4b8] sm:$0x11] }
 0x48a   :  { %11062 = vmatmul.mubr.bf16.gmra.mrb[36].mxu1 %v15176_v63  ;;  %12440 = vmatmul.mubr.bf16.gmra.mrb[36].mxu0 %v15480_v50  ;;  %v15181_v50 = vcombine.high %v22978_v15, %v22999_v59  ;;  %v10340_v63 = vrot.slane %v10339_v23, 4  ;;  %v10367_v56 = vor.u32 %v10366_v55, %v10363_v5  ;;  %v10381_v3 = vor.u32 %v10380_v49, %v10377_v1  ;;  %v15088_v7 = vld [vmem:[%s23714_s0 + $0x4d0] sm:$0xff] }
 0x48b   :  { %24078 = vst [vmem:[#allocation20_spill] sm:$0xff] %v23010_v41  ;;  %11069 = vmatprep.mubr.bf16.mxu1 %v15179_v44  ;;  %12447 = vmatprep.mubr.bf16.mxu0 %v15483_v34  ;;  %v23031_v44 = vsel %vm16533_vm5, %v15390_v42, %v11792_v58  ;;  %v23035_v34 = vsel %vm16533_vm5, %v15391_v18, %v11796_v39  ;;  %v10354_v58 = vrot.slane %v10353_v8, 4  ;;  %v10372_v42 = vrot.slane %v10370_v47, 5 }
 0x48c   :  { %v8226_v28 = vpop.f32.mrb[188].mxu1  ;;  %v9221_v12 = vpop.f32.mrb[188].mxu0  ;;  %v15392_v27 = vrot.slane %v15322_v38, 9  ;;  %v10386_v18 = vrot.slane %v10384_v57, 5  ;;  %v11800_v39 = vrot.slane %v15323_v9, 5  ;;  %v10389_v21 = vshrl.u32 %v15086_v35, 16 }
 0x48d   :  { %v8359_v19 = vadd.f32 %v8226_v28, %v24079_v24  ;;  %v8228_v23 = vpop.f32.mrb[189].mxu1  ;;  %v9223_v54 = vpop.f32.mrb[189].mxu0  ;;  %v10392_v5 = vshll.u32 %v15086_v35, 16  ;;  %v15393_v24 = vrot.slane %v15324_v17, 9  ;;  %v11804_v8 = vrot.slane %v15325_v53, 5 }
 0x48e   :  { %v8229_v36 = vpop.f32.mrb[190].mxu1  ;;  %v9224_v14 = vpop.f32.mrb[190].mxu0  ;;  %v10368_v47 = vrot.slane %v10367_v56, 4  ;;  %v10382_v38 = vrot.slane %v10381_v3, 4  ;;  %v10403_v23 = vshrl.u32 %v15088_v7, 16  ;;  %v10406_v54 = vshll.u32 %v15088_v7, 16 }
 0x48f   :  { %v23047_v55 = vadd.f32 %v9221_v12, %v8359_v19  ;;  %v8360_v1 = vadd.f32 %v8229_v36, %v21278_v43  ;;  %v8231_v49 = vpop.f32.mrb[191].mxu1  ;;  %v9226_v28 = vpop.f32.mrb[191].mxu0  ;;  %v15484_v57 = vcombine.low %v22982_v22, %v22986_v46  ;;  %v15180_v9 = vcombine.low %v22978_v15, %v22999_v59  ;;  %v15087_v35 = vld [vmem:[%s23714_s0 + $0x4c8] sm:$0x11]  ;;  %v15328_v53 = vld [vmem:[%s23714_s0 + $0x4d0] sm:$0xee] }
 0x490   :  { %v23058_v43 = vsel %vm16227_vm2, %v10340_v63, %v10344_v60  ;;  %v10394_v12 = vrot.slane %v10392_v5, 5  ;;  %v23068_v22 = vsel %vm16227_vm2, %v10354_v58, %v10358_v13  ;;  %v23074_v46 = vsel %vm16533_vm5, %v15392_v27, %v11800_v39  ;;  %v24082_v19 = vld [vmem:[#allocation29_spill] sm:$0xff]  ;;  %v23106_v39 = vld [vmem:[%s23715_s2] ss:$0 sm:$0xff] }
 0x491   :  { %24080 = vst [vmem:[#allocation21_spill] sm:$0xff] %v23047_v55  ;;  %v23050_v41 = vadd.f32 %v9224_v14, %v8360_v1  ;;  %v23078_v59 = vsel %vm16533_vm5, %v15393_v24, %v11804_v8  ;;  %v23088_v13 = vsel %vm16227_vm2, %v10368_v47, %v10372_v42  ;;  %v23092_v56 = vsel %vm16227_vm2, %v10382_v38, %v10386_v18  ;;  %v15329_v18 = vld [vmem:[%s23714_s0 + $0x4d8] sm:$0x11] }
 0x492   :  { %11070 = vmatmul.mubr.bf16.gmra.mrb[40].mxu1 %v15178_v45  ;;  %12448 = vmatmul.mubr.bf16.gmra.mrb[40].mxu0 %v15482_v11  ;;  %v15089_v45 = vld [vmem:[%s23714_s0 + $0x4d8] sm:$0x11]  ;;  %v10391_v11 = vrot.slane %v10389_v21, 4  ;;  %v10405_v3 = vrot.slane %v10403_v23, 4  ;;  %v10408_v17 = vrot.slane %v10406_v54, 5  ;;  %v15487_v36 = vcombine.high %v23031_v44, %v23035_v34 }
 0x493   :  { %24081 = vst [vmem:[#allocation23_spill] sm:$0xff] %v23050_v41  ;;  %11077 = vmatprep.mubr.bf16.mxu1 %v15181_v50  ;;  %12455 = vmatprep.mubr.bf16.mxu0 %v15485_v40  ;;  %v15326_v40 = vld [vmem:[%s23714_s0 + $0x4c0] sm:$0xee]  ;;  %v15327_v50 = vld [vmem:[%s23714_s0 + $0x4c8] sm:$0x11]  ;;  %v10398_v14 = vshll.u32 %v15087_v35, 16  ;;  %v15183_v49 = vcombine.high %v23058_v43, %v23068_v22 }
 0x494   :  { %v10863_v63 = vpop.f32.mrb[192].mxu1  ;;  %v12241_v60 = vpop.f32.mrb[192].mxu0  ;;  %v10412_v42 = vshll.u32 %v15089_v45, 16  ;;  %v10395_v24 = vor.u32 %v10394_v12, %v10391_v11  ;;  %v24083_v47 = vld [vmem:[#allocation30_spill] sm:$0xff]  ;;  %v15394_v45 = vrot.slane %v15326_v40, 9  ;;  %v15395_v11 = vrot.slane %v15328_v53, 9 }
 0x495   :  { %v11182_v58 = vadd.f32 %v10863_v63, %v24082_v19  ;;  %v10865_v27 = vpop.f32.mrb[193].mxu1  ;;  %v12243_v7 = vpop.f32.mrb[193].mxu0  ;;  %v15090_v63 = vld [vmem:[%s23714_s0 + $0x4e0] sm:$0xff]  ;;  %v15092_v19 = vld [vmem:[%s23714_s0 + $0x4f0] sm:$0xff]  ;;  %v11812_v12 = vrot.slane %v15329_v18, 5 }
 0x496   :  { %v10866_v21 = vpop.f32.mrb[194].mxu1  ;;  %v12244_v5 = vpop.f32.mrb[194].mxu0  ;;  %v10409_v27 = vor.u32 %v10408_v17, %v10405_v3  ;;  %v11808_v7 = vrot.slane %v15327_v50, 5  ;;  %v15091_v40 = vld [vmem:[%s23714_s0 + $0x4e8] sm:$0x11]  ;;  %v10420_v28 = vshll.u32 %v15090_v63, 16 }
 0x497   :  { %v12560_v8 = vadd.f32 %v12241_v60, %v11182_v58  ;;  %v11183_v38 = vadd.f32 %v10866_v21, %v24083_v47  ;;  %v10868_v23 = vpop.f32.mrb[195].mxu1  ;;  %v12246_v54 = vpop.f32.mrb[195].mxu0  ;;  %v10400_v21 = vrot.slane %v10398_v14, 5  ;;  %v10414_v47 = vrot.slane %v10412_v42, 5 }
 0x498   :  { %v10396_v23 = vrot.slane %v10395_v24, 4  ;;  %v10417_v54 = vshrl.u32 %v15090_v63, 16  ;;  %v10431_v3 = vshrl.u32 %v15092_v19, 16  ;;  %v10410_v42 = vrot.slane %v10409_v27, 4 }
 0x499   :  { %v12759_v60 = vadd.f32 %v23106_v39, %v12560_v8  ;;  %v12561_v58 = vadd.f32 %v12244_v5, %v11183_v38  ;;  %v23133_v18 = vsel %vm16533_vm5, %v15394_v45, %v11808_v7  ;;  %v10426_v5 = vshll.u32 %v15091_v40, 16  ;;  %v24085_v7 = vld [vmem:[#allocation33_spill] sm:$0xff] }
 0x49a   :  { %11078 = vmatmul.mubr.bf16.gmra.mrb[44].mxu1 %v15180_v9  ;;  %12456 = vmatmul.mubr.bf16.gmra.mrb[44].mxu0 %v15484_v57  ;;  %v13015_v57 = vld [vmem:[%s23716_s3] sm:$0xff]  ;;  %v10434_v9 = vshll.u32 %v15092_v19, 16  ;;  %v10419_v27 = vrot.slane %v10417_v54, 4  ;;  %v10422_v1 = vrot.slane %v10420_v28, 5  ;;  %v10433_v41 = vrot.slane %v10431_v3, 4  ;;  %v13016_v40 = vld [vmem:[%s23716_s3 + $0x8] sm:$0xff] }
 0x49b   :  { %11085 = vmatprep.mubr.bf16.mxu1 %v15183_v49  ;;  %12463 = vmatprep.mubr.bf16.mxu0 %v15487_v36  ;;  %v12760_v50 = vadd.f32 %v23106_v39, %v12561_v58  ;;  %vm12823_vm6 = vcmp.gt.f32.partialorder %v12759_v60, 0.0  ;;  %v12887_v17 = vmul.f32 0.2, %v12759_v60  ;;  %v23137_v36 = vsel %vm16533_vm5, %v15395_v11, %v11812_v12  ;;  %v24084_v49 = vld [vmem:[#allocation32_spill] sm:$0xff] }
 0x49c   :  { %v10871_v53 = vpop.f32.mrb[196].mxu1  ;;  %v12249_v14 = vpop.f32.mrb[196].mxu0  ;;  %v15184_v28 = vcombine.low %v23088_v13, %v23092_v56  ;;  %v15488_v54 = vcombine.low %v23074_v46, %v23078_v59  ;;  %v15491_v3 = vcombine.high %v23133_v18, %v23137_v36  ;;  %v15490_v4 = vcombine.low %v23133_v18, %v23137_v36 }
 0x49d   :  { %v11184_v24 = vadd.f32 %v10871_v53, %v24084_v49  ;;  %v10873_v8 = vpop.f32.mrb[197].mxu1  ;;  %v12251_v38 = vpop.f32.mrb[197].mxu0  ;;  %v12951_v63 = vsel %vm12823_vm6, %v12759_v60, %v12887_v17  ;;  %vm12824_vm7 = vcmp.gt.f32.partialorder %v12760_v50, 0.0  ;;  %v12888_v58 = vmul.f32 0.2, %v12760_v50  ;;  %v13017_v49 = vld [vmem:[%s23716_s3 + $0x10] sm:$0xff] }
 0x49e   :  { %v10874_v19 = vpop.f32.mrb[198].mxu1  ;;  %v12252_v35 = vpop.f32.mrb[198].mxu0  ;;  %v13079_v15 = vmul.f32 %v13015_v57, %v12951_v63  ;;  %v15093_v60 = vld [vmem:[%s23714_s0 + $0x4f8] sm:$0x11]  ;;  %v10436_v17 = vrot.slane %v10434_v9, 5  ;;  %v24086_v9 = vcombine.low %v23058_v43, %v23068_v22  ;;  %v23166_v53 = vsel %vm16227_vm2, %v10410_v42, %v10414_v47 }
 0x49f   :  { %v12562_v45 = vadd.f32 %v12249_v14, %v11184_v24  ;;  %v11185_v55 = vadd.f32 %v10874_v19, %v24085_v7  ;;  %v10876_v30 = vpop.f32.mrb[199].mxu1  ;;  %v12254_v11 = vpop.f32.mrb[199].mxu0  ;;  %v12952_v12 = vsel %vm12824_vm7, %v12760_v50, %v12888_v58  ;;  %v15332_v43 = vld [vmem:[%s23714_s0 + $0x4f0] sm:$0xee]  ;;  %v10428_v47 = vrot.slane %v10426_v5, 5 }
 0x4a0   :  { %13143 = vadd.xlane.f32.xlu0 %v13079_v15  ;;  %v23153_v30 = vsel %vm16227_vm2, %v10396_v23, %v10400_v21  ;;  %v24087_v15 = vcombine.low %v23031_v44, %v23035_v34  ;;  %v15330_v21 = vld [vmem:[%s23714_s0 + $0x4e0] sm:$0xee]  ;;  %v13080_v22 = vmul.f32 %v13016_v40, %v12952_v12  ;;  %v24088_v44 = vcombine.high %v23088_v13, %v23092_v56  ;;  %v15333_v13 = vld [vmem:[%s23714_s0 + $0x4f8] sm:$0x11] }
 0x4a1   :  { %v12761_v50 = vadd.f32 %v23106_v39, %v12562_v45  ;;  %v12563_v57 = vadd.f32 %v12252_v35, %v11185_v55  ;;  %v15331_v55 = vld [vmem:[%s23714_s0 + $0x4e8] sm:$0x11]  ;;  %v24089_v34 = vcombine.high %v23074_v46, %v23078_v59  ;;  %v10423_v35 = vor.u32 %v10422_v1, %v10419_v27  ;;  %v24090_v38 = vld [vmem:[#allocation34_spill] sm:$0xff] }
 0x4a2   :  { %11086 = vmatmul.mubr.bf16.gmra.mrb[48].mxu1 %v24086_v9  ;;  %12464 = vmatmul.mubr.bf16.gmra.mrb[48].mxu0 %v24087_v15  ;;  %v10440_v23 = vshll.u32 %v15093_v60, 16  ;;  %v10437_v24 = vor.u32 %v10436_v17, %v10433_v41  ;;  %v15187_v59 = vcombine.high %v23153_v30, %v23166_v53  ;;  %v15396_v1 = vrot.slane %v15330_v21, 9 }
 0x4a3   :  { %11093 = vmatprep.mubr.bf16.mxu1 %v24088_v44  ;;  %12471 = vmatprep.mubr.bf16.mxu0 %v24089_v34  ;;  %v12762_v14 = vadd.f32 %v23106_v39, %v12563_v57  ;;  %vm12825_vm8 = vcmp.gt.f32.partialorder %v12761_v50, 0.0  ;;  %v12889_v42 = vmul.f32 0.2, %v12761_v50  ;;  %v11816_v5 = vrot.slane %v15331_v55, 5  ;;  %v24091_v57 = vld [vmem:[#allocation35_spill] sm:$0xff] }
 0x4a4   :  { %v10879_v56 = vpop.f32.mrb[200].mxu1  ;;  %13145 = vadd.xlane.f32.xlu0 %v13080_v22  ;;  %v12257_v46 = vpop.f32.mrb[200].mxu0  ;;  %v15397_v8 = vrot.slane %v15332_v43, 9  ;;  %v10424_v12 = vrot.slane %v10423_v35, 4  ;;  %v10442_v40 = vrot.slane %v10440_v23, 5  ;;  %v11820_v60 = vrot.slane %v15333_v13, 5 }
 0x4a5   :  { %v11186_v63 = vadd.f32 %v10879_v56, %v24090_v38  ;;  %v10881_v58 = vpop.f32.mrb[201].mxu1  ;;  %v12259_v19 = vpop.f32.mrb[201].mxu0  ;;  %v12953_v27 = vsel %vm12825_vm8, %v12761_v50, %v12889_v42  ;;  %vm12826_vm9 = vcmp.gt.f32.partialorder %v12762_v14, 0.0  ;;  %v12890_v41 = vmul.f32 0.2, %v12762_v14  ;;  %v13018_v43 = vld [vmem:[%s23716_s3 + $0x18] sm:$0xff] }
 0x4a6   :  { %v10882_v45 = vpop.f32.mrb[202].mxu1  ;;  %v12260_v7 = vpop.f32.mrb[202].mxu0  ;;  %v13081_v11 = vmul.f32 %v13017_v49, %v12953_v27  ;;  %v10438_v22 = vrot.slane %v10437_v24, 4  ;;  %v23200_v34 = vsel %vm16533_vm5, %v15396_v1, %v11816_v5  ;;  %v23204_v23 = vsel %vm16227_vm2, %v10424_v12, %v10428_v47  ;;  %v24092_v13 = vld [vmem:[#allocation36_spill] sm:$0xff] }
 0x4a7   :  { %v12564_v17 = vadd.f32 %v12257_v46, %v11186_v63  ;;  %v11187_v9 = vadd.f32 %v10882_v45, %v24091_v57  ;;  %v10884_v15 = vpop.f32.mrb[203].mxu1  ;;  %v12262_v21 = vpop.f32.mrb[203].mxu0  ;;  %v12954_v55 = vsel %vm12826_vm9, %v12762_v14, %v12890_v41  ;;  %v23208_v14 = vsel %vm16533_vm5, %v15397_v8, %v11820_v60  ;;  %v13020_v41 = vld [vmem:[%s23716_s3 + $0x28] sm:$0xff]  ;;  %v13021_v60 = vld [vmem:[%s23716_s3 + $0x30] sm:$0xff] }
 0x4a8   :  { %13147 = vadd.xlane.f32.xlu0 %v13081_v11  ;;  %v13082_v35 = vmul.f32 %v13018_v43, %v12954_v55  ;;  %v10443_v49 = vsel %vm16227_vm2, %v10438_v22, %v10442_v40  ;;  %v15186_v47 = vcombine.low %v23153_v30, %v23166_v53  ;;  %v15493_v58 = vcombine.high %v23200_v34, %v23208_v14  ;;  %v24093_v30 = vld [vmem:[#allocation48_spill] sm:$0xff] }
 0x4a9   :  { %v12763_v50 = vadd.f32 %v23106_v39, %v12564_v17  ;;  %v12565_v44 = vadd.f32 %v12260_v7, %v11187_v9  ;;  %v15189_v63 = vcombine.high %v23204_v23, %v10443_v49  ;;  %v15188_v9 = vcombine.low %v23204_v23, %v10443_v49 }
 0x4aa   :  { %11094 = vmatmul.mubr.bf16.gmra.mrb[52].mxu1 %v15184_v28  ;;  %12472 = vmatmul.mubr.bf16.gmra.mrb[52].mxu0 %v15488_v54  ;;  %v13019_v54 = vld [vmem:[%s23716_s3 + $0x20] sm:$0xff]  ;;  %v15492_v15 = vcombine.low %v23200_v34, %v23208_v14  ;;  %v13022_v34 = vld [vmem:[%s23716_s3 + $0x38] sm:$0xff] }
 0x4ab   :  { %11101 = vmatprep.mubr.bf16.mxu1 %v15187_v59  ;;  %12479 = vmatprep.mubr.bf16.mxu0 %v15491_v3  ;;  %v12764_v42 = vadd.f32 %v23106_v39, %v12565_v44  ;;  %vm12827_vm10 = vcmp.gt.f32.partialorder %v12763_v50, 0.0  ;;  %v12891_v28 = vmul.f32 0.2, %v12763_v50 }
 0x4ac   :  { %v10887_v3 = vpop.f32.mrb[204].mxu1  ;;  %13149 = vadd.xlane.f32.xlu0 %v13082_v35  ;;  %v12265_v24 = vpop.f32.mrb[204].mxu0 }
 0x4ad   :  { %v11188_v56 = vadd.f32 %v10887_v3, %v24092_v13  ;;  %v10889_v46 = vpop.f32.mrb[205].mxu1  ;;  %v12267_v59 = vpop.f32.mrb[205].mxu0  ;;  %v12955_v1 = vsel %vm12827_vm10, %v12763_v50, %v12891_v28  ;;  %vm12828_vm11 = vcmp.gt.f32.partialorder %v12764_v42, 0.0  ;;  %v12892_v5 = vmul.f32 0.2, %v12764_v42 }
 0x4ae   :  { %v10890_v8 = vpop.f32.mrb[206].mxu1  ;;  %v12268_v38 = vpop.f32.mrb[206].mxu0  ;;  %v13083_v29 = vmul.f32 %v13019_v54, %v12955_v1  ;;  %v24094_v54 = vld [vmem:[#allocation49_spill] sm:$0xff] }
 0x4af   :  { %v12566_v19 = vadd.f32 %v12265_v24, %v11188_v56  ;;  %v11189_v53 = vadd.f32 %v10890_v8, %v24093_v30  ;;  %v10892_v27 = vpop.f32.mrb[207].mxu1  ;;  %v12270_v18 = vpop.f32.mrb[207].mxu0  ;;  %v12956_v36 = vsel %vm12828_vm11, %v12764_v42, %v12892_v5  ;;  %v13023_v56 = vld [vmem:[%s23716_s3 + $0x40] sm:$0xff] }
 0x4b0   :  { %13151 = vadd.xlane.f32.xlu1 %v13083_v29  ;;  %v13084_v11 = vmul.f32 %v13020_v41, %v12956_v36  ;;  %v13024_v41 = vld [vmem:[%s23716_s3 + $0x48] sm:$0xff] }
 0x4b1   :  { %v12765_v45 = vadd.f32 %v23106_v39, %v12566_v19  ;;  %v12567_v7 = vadd.f32 %v12268_v38, %v11189_v53 }
 0x4b2   :  { %11102 = vmatmul.mubr.bf16.gmra.mrb[56].mxu1 %v15186_v47  ;;  %12480 = vmatmul.mubr.bf16.gmra.mrb[56].mxu0 %v15490_v4 }
 0x4b3   :  { %11109 = vmatprep.mubr.bf16.mxu1 %v15189_v63  ;;  %12487 = vmatprep.mubr.bf16.mxu0 %v15493_v58  ;;  %v12766_v12 = vadd.f32 %v23106_v39, %v12567_v7  ;;  %vm12829_vm12 = vcmp.gt.f32.partialorder %v12765_v45, 0.0  ;;  %v12893_v40 = vmul.f32 0.2, %v12765_v45 }
 0x4b4   :  { %v10895_v17 = vpop.f32.mrb[208].mxu1  ;;  %13153 = vadd.xlane.f32.xlu1 %v13084_v11  ;;  %v12273_v57 = vpop.f32.mrb[208].mxu0 }
 0x4b5   :  { %v11190_v21 = vadd.f32 %v10895_v17, %v21415_v62  ;;  %v10897_v55 = vpop.f32.mrb[209].mxu1  ;;  %v12275_v43 = vpop.f32.mrb[209].mxu0  ;;  %v12957_v22 = vsel %vm12829_vm12, %v12765_v45, %v12893_v40  ;;  %vm12830_vm13 = vcmp.gt.f32.partialorder %v12766_v12, 0.0  ;;  %v12894_v50 = vmul.f32 0.2, %v12766_v12 }
 0x4b6   :  { %v10898_v44 = vpop.f32.mrb[210].mxu1  ;;  %v12276_v35 = vpop.f32.mrb[210].mxu0  ;;  %v13085_v42 = vmul.f32 %v13021_v60, %v12957_v22 }
 0x4b7   :  { %v12568_v28 = vadd.f32 %v12273_v57, %v11190_v21  ;;  %v11191_v3 = vadd.f32 %v10898_v44, %v24094_v54  ;;  %v10900_v24 = vpop.f32.mrb[211].mxu1  ;;  %v12278_v47 = vpop.f32.mrb[211].mxu0  ;;  %v12958_v4 = vsel %vm12830_vm13, %v12766_v12, %v12894_v50  ;;  %v13026_v54 = vld [vmem:[%s23716_s3 + $0x58] sm:$0xff] }
 0x4b8   :  { %13155 = vadd.xlane.f32.xlu0 %v13085_v42  ;;  %v13086_v14 = vmul.f32 %v13022_v34, %v12958_v4 }
 0x4b9   :  { %v12767_v62 = vadd.f32 %v23106_v39, %v12568_v28  ;;  %v12569_v23 = vadd.f32 %v12276_v35, %v11191_v3 }
 0x4ba   :  { %11110 = vmatmul.mubr.bf16.gmra.mrb[60].mxu1 %v15188_v9  ;;  %12488 = vmatmul.mubr.bf16.gmra.mrb[60].mxu0 %v15492_v15 }
 0x4bb   :  { %v12768_v49 = vadd.f32 %v23106_v39, %v12569_v23  ;;  %vm12831_vm14 = vcmp.gt.f32.partialorder %v12767_v62, 0.0  ;;  %v12895_v13 = vmul.f32 0.2, %v12767_v62 }
 0x4bc   :  { %v10903_v46 = vpop.f32.mrb[212].mxu1  ;;  %13157 = vadd.xlane.f32.xlu0 %v13086_v14  ;;  %v12281_v59 = vpop.f32.mrb[212].mxu0 }
 0x4bd   :  { %v11192_v1 = vadd.f32 %v10903_v46, %v21473_v20  ;;  %v10905_v5 = vpop.f32.mrb[213].mxu1  ;;  %v12283_v8 = vpop.f32.mrb[213].mxu0  ;;  %v12959_v38 = vsel %vm12831_vm14, %v12767_v62, %v12895_v13  ;;  %vm12832_vm15 = vcmp.gt.f32.partialorder %v12768_v49, 0.0  ;;  %v12896_v29 = vmul.f32 0.2, %v12768_v49 }
 0x4be   :  { %v10906_v63 = vpop.f32.mrb[214].mxu1  ;;  %v12284_v58 = vpop.f32.mrb[214].mxu0  ;;  %v13087_v19 = vmul.f32 %v13023_v56, %v12959_v38  ;;  %v24095_v8 = vld [vmem:[#allocation50_spill] sm:$0xff] }
 0x4bf   :  { %v12570_v30 = vadd.f32 %v12281_v59, %v11192_v1  ;;  %v11193_v53 = vadd.f32 %v10906_v63, %v21482_v51  ;;  %v10908_v27 = vpop.f32.mrb[215].mxu1  ;;  %v12286_v18 = vpop.f32.mrb[215].mxu0  ;;  %v12960_v36 = vsel %vm12832_vm15, %v12768_v49, %v12896_v29  ;;  %v13025_v51 = vld [vmem:[%s23716_s3 + $0x50] sm:$0xff] }
 0x4c0   :  { %13159 = vadd.xlane.f32.xlu1 %v13087_v19  ;;  %v13088_v7 = vmul.f32 %v13024_v41, %v12960_v36  ;;  %v13028_v19 = vld [vmem:[%s23716_s3 + $0x68] sm:$0xff]  ;;  %v13029_v36 = vld [vmem:[%s23716_s3 + $0x70] sm:$0xff] }
 0x4c1   :  { %v12769_v20 = vadd.f32 %v23106_v39, %v12570_v30  ;;  %v12571_v45 = vadd.f32 %v12284_v58, %v11193_v53 }
 0x4c3   :  { %v12770_v11 = vadd.f32 %v23106_v39, %v12571_v45  ;;  %vm12833_vm0 = vcmp.gt.f32.partialorder %v12769_v20, 0.0  ;;  %v12897_v12 = vmul.f32 0.2, %v12769_v20 }
 0x4c4   :  { %v10911_v40 = vpop.f32.mrb[216].mxu1  ;;  %13161 = vadd.xlane.f32.xlu1 %v13088_v7  ;;  %v12289_v60 = vpop.f32.mrb[216].mxu0 }
 0x4c5   :  { %v11194_v17 = vadd.f32 %v10911_v40, %v21532_v25  ;;  %v10913_v57 = vpop.f32.mrb[217].mxu1  ;;  %v12291_v9 = vpop.f32.mrb[217].mxu0  ;;  %v12961_v15 = vsel %vm12833_vm0, %v12769_v20, %v12897_v12  ;;  %vm12834_vm1 = vcmp.gt.f32.partialorder %v12770_v11, 0.0  ;;  %v12898_v21 = vmul.f32 0.2, %v12770_v11 }
 0x4c6   :  { %v10914_v55 = vpop.f32.mrb[218].mxu1  ;;  %v12292_v43 = vpop.f32.mrb[218].mxu0  ;;  %v13089_v22 = vmul.f32 %v13025_v51, %v12961_v15 }
 0x4c7   :  { %v12572_v50 = vadd.f32 %v12289_v60, %v11194_v17  ;;  %v11195_v44 = vadd.f32 %v10914_v55, %v21548_v33  ;;  %v10916_v35 = vpop.f32.mrb[219].mxu1  ;;  %v12294_v42 = vpop.f32.mrb[219].mxu0  ;;  %v12962_v28 = vsel %vm12834_vm1, %v12770_v11, %v12898_v21  ;;  %v13027_v33 = vld [vmem:[%s23716_s3 + $0x60] sm:$0xff] }
 0x4c8   :  { %13163 = vadd.xlane.f32.xlu1 %v13089_v22  ;;  %v13090_v24 = vmul.f32 %v13026_v54, %v12962_v28 }
 0x4c9   :  { %v12771_v25 = vadd.f32 %v23106_v39, %v12572_v50  ;;  %v12573_v3 = vadd.f32 %v12292_v43, %v11195_v44  ;;  %v13030_v43 = vld [vmem:[%s23716_s3 + $0x78] sm:$0xff] }
 0x4cb   :  { %v12772_v47 = vadd.f32 %v23106_v39, %v12573_v3  ;;  %vm12835_vm2 = vcmp.gt.f32.partialorder %v12771_v25, 0.0  ;;  %v12899_v4 = vmul.f32 0.2, %v12771_v25 }
 0x4cc   :  { %v10919_v34 = vpop.f32.mrb[220].mxu1  ;;  %13165 = vadd.xlane.f32.xlu1 %v13090_v24  ;;  %v12297_v62 = vpop.f32.mrb[220].mxu0 }
 0x4cd   :  { %v11196_v23 = vadd.f32 %v10919_v34, %v21592_v6  ;;  %v10921_v14 = vpop.f32.mrb[221].mxu1  ;;  %v12299_v49 = vpop.f32.mrb[221].mxu0  ;;  %v12963_v13 = vsel %vm12835_vm2, %v12771_v25, %v12899_v4  ;;  %vm12836_vm3 = vcmp.gt.f32.partialorder %v12772_v47, 0.0  ;;  %v12900_v56 = vmul.f32 0.2, %v12772_v47  ;;  %v13032_v4 = vld [vmem:[%s23716_s3 + $0x88] sm:$0xff] }
 0x4ce   :  { %v10922_v46 = vpop.f32.mrb[222].mxu1  ;;  %v12300_v59 = vpop.f32.mrb[222].mxu0  ;;  %v13091_v1 = vmul.f32 %v13027_v33, %v12963_v13 }
 0x4cf   :  { %v12574_v5 = vadd.f32 %v12297_v62, %v11196_v23  ;;  %v11197_v38 = vadd.f32 %v10922_v46, %v24095_v8  ;;  %v10924_v29 = vpop.f32.mrb[223].mxu1  ;;  %v12302_v63 = vpop.f32.mrb[223].mxu0  ;;  %v12964_v58 = vsel %vm12836_vm3, %v12772_v47, %v12900_v56  ;;  %v13033_v8 = vld [vmem:[%s23716_s3 + $0x90] sm:$0xff] }
 0x4d0   :  { %13167 = vadd.xlane.f32.xlu0 %v13091_v1  ;;  %v13092_v53 = vmul.f32 %v13028_v19, %v12964_v58 }
 0x4d1   :  { %v12773_v6 = vadd.f32 %v23106_v39, %v12574_v5  ;;  %v12575_v30 = vadd.f32 %v12300_v59, %v11197_v38 }
 0x4d3   :  { %v12774_v27 = vadd.f32 %v23106_v39, %v12575_v30  ;;  %vm12837_vm4 = vcmp.gt.f32.partialorder %v12773_v6, 0.0  ;;  %v12901_v18 = vmul.f32 0.2, %v12773_v6  ;;  %v13034_v30 = vld [vmem:[%s23716_s3 + $0x98] sm:$0xff] }
 0x4d4   :  { %v10927_v41 = vpop.f32.mrb[224].mxu1  ;;  %13169 = vadd.xlane.f32.xlu0 %v13092_v53  ;;  %v12305_v20 = vpop.f32.mrb[224].mxu0 }
 0x4d5   :  { %v11198_v45 = vadd.f32 %v10927_v41, %v21672_v37  ;;  %v10929_v7 = vpop.f32.mrb[225].mxu1  ;;  %v12307_v11 = vpop.f32.mrb[225].mxu0  ;;  %v12965_v12 = vsel %vm12837_vm4, %v12773_v6, %v12901_v18  ;;  %vm12838_vm5 = vcmp.gt.f32.partialorder %v12774_v27, 0.0  ;;  %v12902_v51 = vmul.f32 0.2, %v12774_v27 }
 0x4d6   :  { %v10930_v40 = vpop.f32.mrb[226].mxu1  ;;  %v12308_v60 = vpop.f32.mrb[226].mxu0  ;;  %v13093_v17 = vmul.f32 %v13029_v36, %v12965_v12 }
 0x4d7   :  { %v12576_v57 = vadd.f32 %v12305_v20, %v11198_v45  ;;  %v11199_v9 = vadd.f32 %v10930_v40, %v21694_v61  ;;  %v10932_v15 = vpop.f32.mrb[227].mxu1  ;;  %v12310_v21 = vpop.f32.mrb[227].mxu0  ;;  %v12966_v55 = vsel %vm12838_vm5, %v12774_v27, %v12902_v51  ;;  %v13031_v61 = vld [vmem:[%s23716_s3 + $0x80] sm:$0xff] }
 0x4d8   :  { %13171 = vadd.xlane.f32.xlu1 %v13093_v17  ;;  %v13094_v50 = vmul.f32 %v13030_v43, %v12966_v55  ;;  %v13036_v43 = vld [vmem:[%s23716_s3 + $0xa8] sm:$0xff] }
 0x4d9   :  { %v12775_v37 = vadd.f32 %v23106_v39, %v12576_v57  ;;  %v12577_v22 = vadd.f32 %v12308_v60, %v11199_v9  ;;  %v13035_v60 = vld [vmem:[%s23716_s3 + $0xa0] sm:$0xff] }
 0x4db   :  { %v12776_v44 = vadd.f32 %v23106_v39, %v12577_v22  ;;  %vm12839_vm6 = vcmp.gt.f32.partialorder %v12775_v37, 0.0  ;;  %v12903_v35 = vmul.f32 0.2, %v12775_v37 }
 0x4dc   :  { %v10935_v42 = vpop.f32.mrb[228].mxu1  ;;  %13173 = vadd.xlane.f32.xlu1 %v13094_v50  ;;  %v12313_v28 = vpop.f32.mrb[228].mxu0 }
 0x4dd   :  { %v11200_v54 = vadd.f32 %v10935_v42, %v21739_v32  ;;  %v10937_v25 = vpop.f32.mrb[229].mxu1  ;;  %v12315_v3 = vpop.f32.mrb[229].mxu0  ;;  %v12967_v24 = vsel %vm12839_vm6, %v12775_v37, %v12903_v35  ;;  %vm12840_vm7 = vcmp.gt.f32.partialorder %v12776_v44, 0.0  ;;  %v12904_v47 = vmul.f32 0.2, %v12776_v44  ;;  %v24096_v35 = vld [vmem:[#allocation51_spill] sm:$0xff] }
 0x4de   :  { %v10938_v33 = vpop.f32.mrb[230].mxu1  ;;  %v12316_v34 = vpop.f32.mrb[230].mxu0  ;;  %v13095_v62 = vmul.f32 %v13031_v61, %v12967_v24 }
 0x4df   :  { %v12578_v23 = vadd.f32 %v12313_v28, %v11200_v54  ;;  %v11201_v14 = vadd.f32 %v10938_v33, %v21749_v26  ;;  %v10940_v49 = vpop.f32.mrb[231].mxu1  ;;  %v12318_v13 = vpop.f32.mrb[231].mxu0  ;;  %v12968_v56 = vsel %vm12840_vm7, %v12776_v44, %v12904_v47 }
 0x4e0   :  { %13175 = vadd.xlane.f32.xlu0 %v13095_v62  ;;  %v13096_v32 = vmul.f32 %v13032_v4, %v12968_v56  ;;  %v13037_v4 = vld [vmem:[%s23716_s3 + $0xb0] sm:$0xff]  ;;  %v24097_v62 = vld [vmem:[#allocation52_spill] sm:$0xff] }
 0x4e1   :  { %v12777_v46 = vadd.f32 %v23106_v39, %v12578_v23  ;;  %v12579_v59 = vadd.f32 %v12316_v34, %v11201_v14 }
 0x4e2   :  { %13177 = vadd.xlane.f32.xlu1 %v13096_v32  ;;  %v13038_v32 = vld [vmem:[%s23716_s3 + $0xb8] sm:$0xff] }
 0x4e3   :  { %v12778_v1 = vadd.f32 %v23106_v39, %v12579_v59  ;;  %vm12841_vm8 = vcmp.gt.f32.partialorder %v12777_v46, 0.0  ;;  %v12905_v5 = vmul.f32 0.2, %v12777_v46 }
 0x4e4   :  { %v10943_v38 = vpop.f32.mrb[232].mxu1  ;;  %v12321_v29 = vpop.f32.mrb[232].mxu0 }
 0x4e5   :  { %v11202_v26 = vadd.f32 %v10943_v38, %v21791_v0  ;;  %v10945_v63 = vpop.f32.mrb[233].mxu1  ;;  %v12323_v58 = vpop.f32.mrb[233].mxu0  ;;  %v12969_v19 = vsel %vm12841_vm8, %v12777_v46, %v12905_v5  ;;  %vm12842_vm9 = vcmp.gt.f32.partialorder %v12778_v1, 0.0  ;;  %v12906_v6 = vmul.f32 0.2, %v12778_v1 }
 0x4e6   :  { %v10946_v53 = vpop.f32.mrb[234].mxu1  ;;  %v12324_v27 = vpop.f32.mrb[234].mxu0  ;;  %v13097_v18 = vmul.f32 %v13033_v8, %v12969_v19  ;;  %v24098_v8 = vld [vmem:[#allocation53_spill] sm:$0xff] }
 0x4e7   :  { %v12580_v36 = vadd.f32 %v12321_v29, %v11202_v26  ;;  %v11203_v41 = vadd.f32 %v10946_v53, %v21804_v2  ;;  %v10948_v20 = vpop.f32.mrb[235].mxu1  ;;  %v12326_v45 = vpop.f32.mrb[235].mxu0  ;;  %v12970_v7 = vsel %vm12842_vm9, %v12778_v1, %v12906_v6 }
 0x4e8   :  { %13179 = vadd.xlane.f32.xlu0 %v13097_v18  ;;  %v13098_v0 = vmul.f32 %v13034_v30, %v12970_v7 }
 0x4e9   :  { %v12779_v11 = vadd.f32 %v23106_v39, %v12580_v36  ;;  %v12581_v12 = vadd.f32 %v12324_v27, %v11203_v41  ;;  %v13039_v27 = vld [vmem:[%s23716_s3 + $0xc0] sm:$0xff]  ;;  %v24099_v41 = vld [vmem:[#allocation38_spill] sm:$0xff] }
 0x4ea   :  { %13181 = vadd.xlane.f32.xlu1 %v13098_v0 }
 0x4eb   :  { %v12780_v51 = vadd.f32 %v23106_v39, %v12581_v12  ;;  %vm12843_vm10 = vcmp.gt.f32.partialorder %v12779_v11, 0.0  ;;  %v12907_v40 = vmul.f32 0.2, %v12779_v11  ;;  %v13040_v12 = vld [vmem:[%s23716_s3 + $0xc8] sm:$0xff] }
 0x4ec   :  { %v10951_v17 = vpop.f32.mrb[236].mxu1  ;;  %v12329_v57 = vpop.f32.mrb[236].mxu0 }
 0x4ed   :  { %v11204_v2 = vadd.f32 %v10951_v17, %v21858_v10  ;;  %v10953_v9 = vpop.f32.mrb[237].mxu1  ;;  %v12331_v15 = vpop.f32.mrb[237].mxu0  ;;  %v12971_v21 = vsel %vm12843_vm10, %v12779_v11, %v12907_v40  ;;  %vm12844_vm11 = vcmp.gt.f32.partialorder %v12780_v51, 0.0  ;;  %v12908_v55 = vmul.f32 0.2, %v12780_v51 }
 0x4ee   :  { %v10954_v37 = vpop.f32.mrb[238].mxu1  ;;  %v12332_v22 = vpop.f32.mrb[238].mxu0  ;;  %v13099_v50 = vmul.f32 %v13035_v60, %v12971_v21 }
 0x4ef   :  { %v12582_v44 = vadd.f32 %v12329_v57, %v11204_v2  ;;  %v11205_v61 = vadd.f32 %v10954_v37, %v24096_v35  ;;  %v10956_v42 = vpop.f32.mrb[239].mxu1  ;;  %v12334_v28 = vpop.f32.mrb[239].mxu0  ;;  %v12972_v54 = vsel %vm12844_vm11, %v12780_v51, %v12908_v55  ;;  %v24100_v57 = vld [vmem:[#allocation39_spill] sm:$0xff] }
 0x4f0   :  { %13183 = vadd.xlane.f32.xlu1 %v13099_v50  ;;  %v13100_v10 = vmul.f32 %v13036_v43, %v12972_v54  ;;  %v24101_v42 = vld [vmem:[#allocation41_spill] sm:$0xff] }
 0x4f1   :  { %v12781_v25 = vadd.f32 %v23106_v39, %v12582_v44  ;;  %v12583_v3 = vadd.f32 %v12332_v22, %v11205_v61  ;;  %v13041_v44 = vld [vmem:[%s23716_s3 + $0xd0] sm:$0xff] }
 0x4f2   :  { %13185 = vadd.xlane.f32.xlu0 %v13100_v10 }
 0x4f3   :  { %v12782_v24 = vadd.f32 %v23106_v39, %v12583_v3  ;;  %vm12845_vm12 = vcmp.gt.f32.partialorder %v12781_v25, 0.0  ;;  %v12909_v47 = vmul.f32 0.2, %v12781_v25 }
 0x4f4   :  { %v10959_v33 = vpop.f32.mrb[240].mxu1  ;;  %v12337_v34 = vpop.f32.mrb[240].mxu0 }
 0x4f5   :  { %v11206_v23 = vadd.f32 %v10959_v33, %v24097_v62  ;;  %v10961_v14 = vpop.f32.mrb[241].mxu1  ;;  %v12339_v49 = vpop.f32.mrb[241].mxu0  ;;  %v12973_v13 = vsel %vm12845_vm12, %v12781_v25, %v12909_v47  ;;  %vm12846_vm13 = vcmp.gt.f32.partialorder %v12782_v24, 0.0  ;;  %v12910_v56 = vmul.f32 0.2, %v12782_v24 }
 0x4f6   :  { %v10962_v46 = vpop.f32.mrb[242].mxu1  ;;  %v12340_v59 = vpop.f32.mrb[242].mxu0  ;;  %v13101_v1 = vmul.f32 %v13037_v4, %v12973_v13  ;;  %v13042_v13 = vld [vmem:[%s23716_s3 + $0xd8] sm:$0xff]  ;;  %vm13346_vm12 = vcmask 130112  }
 0x4f7   :  { %v12584_v5 = vadd.f32 %v12337_v34, %v11206_v23  ;;  %v11207_v38 = vadd.f32 %v10962_v46, %v24098_v8  ;;  %v10964_v29 = vpop.f32.mrb[243].mxu1  ;;  %v12342_v26 = vpop.f32.mrb[243].mxu0  ;;  %v12974_v63 = vsel %vm12846_vm13, %v12782_v24, %v12910_v56  ;;  %v24102_v34 = vld [vmem:[#allocation42_spill] sm:$0xff] }
 0x4f8   :  { %13187 = vadd.xlane.f32.xlu0 %v13101_v1  ;;  %v13102_v58 = vmul.f32 %v13038_v32, %v12974_v63  ;;  %v24103_v29 = vld [vmem:[#allocation43_spill] sm:$0xff] }
 0x4f9   :  { %v12783_v19 = vadd.f32 %v23106_v39, %v12584_v5  ;;  %v12585_v6 = vadd.f32 %v12340_v59, %v11207_v38  ;;  %v13043_v5 = vld [vmem:[%s23716_s3 + $0xe0] sm:$0xff] }
 0x4fa   :  { %13189 = vadd.xlane.f32.xlu1 %v13102_v58 }
 0x4fb   :  { %v12784_v30 = vadd.f32 %v23106_v39, %v12585_v6  ;;  %vm12847_vm14 = vcmp.gt.f32.partialorder %v12783_v19, 0.0  ;;  %v12911_v53 = vmul.f32 0.2, %v12783_v19 }
 0x4fc   :  { %v10967_v18 = vpop.f32.mrb[244].mxu1  ;;  %v12345_v36 = vpop.f32.mrb[244].mxu0 }
 0x4fd   :  { %v11208_v20 = vadd.f32 %v10967_v18, %v24099_v41  ;;  %v10969_v45 = vpop.f32.mrb[245].mxu1  ;;  %v12347_v7 = vpop.f32.mrb[245].mxu0  ;;  %v12975_v0 = vsel %vm12847_vm14, %v12783_v19, %v12911_v53  ;;  %vm12848_vm15 = vcmp.gt.f32.partialorder %v12784_v30, 0.0  ;;  %v12912_v11 = vmul.f32 0.2, %v12784_v30 }
 0x4fe   :  { %v10970_v51 = vpop.f32.mrb[246].mxu1  ;;  %v12348_v40 = vpop.f32.mrb[246].mxu0  ;;  %v13103_v60 = vmul.f32 %v13039_v27, %v12975_v0  ;;  %v13044_v0 = vld [vmem:[%s23716_s3 + $0xe8] sm:$0xff]  ;;  %vm13353_vm14 = vcmask 195712  }
 0x4ff   :  { %v12586_v17 = vadd.f32 %v12345_v36, %v11208_v20  ;;  %v11209_v2 = vadd.f32 %v10970_v51, %v24100_v57  ;;  %v10972_v9 = vpop.f32.mrb[247].mxu1  ;;  %v12350_v15 = vpop.f32.mrb[247].mxu0  ;;  %v12976_v21 = vsel %vm12848_vm15, %v12784_v30, %v12912_v11  ;;  %v24104_v36 = vld [vmem:[#allocation44_spill] sm:$0xff] }
 0x500   :  { %13191 = vadd.xlane.f32.xlu1 %v13103_v60  ;;  %v13104_v55 = vmul.f32 %v13040_v12, %v12976_v21  ;;  %v24105_v9 = vld [vmem:[#allocation45_spill] sm:$0xff] }
 0x501   :  { %v12785_v43 = vadd.f32 %v23106_v39, %v12586_v17  ;;  %v12587_v37 = vadd.f32 %v12348_v40, %v11209_v2  ;;  %v13045_v17 = vld [vmem:[%s23716_s3 + $0xf0] sm:$0xff] }
 0x502   :  { %13193 = vadd.xlane.f32.xlu0 %v13104_v55 }
 0x503   :  { %v12786_v22 = vadd.f32 %v23106_v39, %v12587_v37  ;;  %vm12849_vm0 = vcmp.gt.f32.partialorder %v12785_v43, 0.0  ;;  %v12913_v50 = vmul.f32 0.2, %v12785_v43 }
 0x504   :  { %v10975_v35 = vpop.f32.mrb[248].mxu1  ;;  %v12353_v61 = vpop.f32.mrb[248].mxu0 }
 0x505   :  { %v11210_v28 = vadd.f32 %v10975_v35, %v24101_v42  ;;  %v10977_v54 = vpop.f32.mrb[249].mxu1  ;;  %v12355_v10 = vpop.f32.mrb[249].mxu0  ;;  %v12977_v25 = vsel %vm12849_vm0, %v12785_v43, %v12913_v50  ;;  %vm12850_vm1 = vcmp.gt.f32.partialorder %v12786_v22, 0.0  ;;  %v12914_v3 = vmul.f32 0.2, %v12786_v22  ;;  %v24106_v42 = vld [vmem:[#allocation46_spill] sm:$0xff] }
 0x506   :  { %v10978_v24 = vpop.f32.mrb[250].mxu1  ;;  %v12356_v47 = vpop.f32.mrb[250].mxu0  ;;  %v13105_v4 = vmul.f32 %v13041_v44, %v12977_v25  ;;  %vm13360_vm0 = vcmask 261312  }
 0x507   :  { %v12588_v33 = vadd.f32 %v12353_v61, %v11210_v28  ;;  %v11211_v62 = vadd.f32 %v10978_v24, %v24102_v34  ;;  %v10980_v23 = vpop.f32.mrb[251].mxu1  ;;  %v12358_v14 = vpop.f32.mrb[251].mxu0  ;;  %v12978_v49 = vsel %vm12850_vm1, %v12786_v22, %v12914_v3  ;;  %v13046_v22 = vld [vmem:[%s23716_s3 + $0xf8] sm:$0xff]  ;;  %v13047_v34 = vld [vmem:[%s23716_s3 + $0x100] sm:$0xff] }
 0x508   :  { %13195 = vadd.xlane.f32.xlu0 %v13105_v4  ;;  %v13106_v46 = vmul.f32 %v13042_v13, %v12978_v49  ;;  %v24107_v14 = vld [vmem:[#allocation47_spill] sm:$0xff] }
 0x509   :  { %v12787_v56 = vadd.f32 %v23106_v39, %v12588_v33  ;;  %v12589_v32 = vadd.f32 %v12356_v47, %v11211_v62 }
 0x50b   :  { %v12788_v59 = vadd.f32 %v23106_v39, %v12589_v32  ;;  %vm12851_vm2 = vcmp.gt.f32.partialorder %v12787_v56, 0.0  ;;  %v12915_v1 = vmul.f32 0.2, %v12787_v56 }
 0x50c   :  { %v10983_v8 = vpop.f32.mrb[252].mxu1  ;;  %13197 = vadd.xlane.f32.xlu0 %v13106_v46  ;;  %v12361_v38 = vpop.f32.mrb[252].mxu0 }
 0x50d   :  { %v11212_v26 = vadd.f32 %v10983_v8, %v24103_v29  ;;  %v10985_v63 = vpop.f32.mrb[253].mxu1  ;;  %v12363_v58 = vpop.f32.mrb[253].mxu0  ;;  %v12979_v19 = vsel %vm12851_vm2, %v12787_v56, %v12915_v1  ;;  %vm12852_vm3 = vcmp.gt.f32.partialorder %v12788_v59, 0.0  ;;  %v12916_v6 = vmul.f32 0.2, %v12788_v59 }
 0x50e   :  { %v10986_v30 = vpop.f32.mrb[254].mxu1  ;;  %v12364_v53 = vpop.f32.mrb[254].mxu0  ;;  %v13107_v27 = vmul.f32 %v13043_v5, %v12979_v19  ;;  %vm13367_vm2 = vcmask 326912  }
 0x50f   :  { %v12590_v18 = vadd.f32 %v12361_v38, %v11212_v26  ;;  %v11213_v41 = vadd.f32 %v10986_v30, %v24104_v36  ;;  %v10988_v20 = vpop.f32.mrb[255].mxu1  ;;  %v12366_v45 = vpop.f32.mrb[255].mxu0  ;;  %v12980_v7 = vsel %vm12852_vm3, %v12788_v59, %v12916_v6  ;;  %v13048_v59 = vld [vmem:[%s23716_s3 + $0x108] sm:$0xff]  ;;  %v24108_v38 = vld [vmem:[#allocation22_spill] sm:$0xff]  ;;  %v23374_v6 = vld [vmem:[%s23715_s2] ss:$0 sm:$0xff] }
 0x510   :  { %13199 = vadd.xlane.f32.xlu1 %v13107_v27  ;;  %v13108_v51 = vmul.f32 %v13044_v0, %v12980_v7  ;;  %v13049_v36 = vld [vmem:[%s23716_s3 + $0x110] sm:$0xff]  ;;  %v13335_v45 = vlaneseq  ;;  %v24109_v7 = vld [vmem:[#allocation24_spill] sm:$0xff] }
 0x511   :  { %v12789_v11 = vadd.f32 %v23106_v39, %v12590_v18  ;;  %v12591_v12 = vadd.f32 %v12364_v53, %v11213_v41 }
 0x513   :  { %v12790_v40 = vadd.f32 %v23106_v39, %v12591_v12  ;;  %vm12853_vm4 = vcmp.gt.f32.partialorder %v12789_v11, 0.0  ;;  %v12917_v60 = vmul.f32 0.2, %v12789_v11 }
 0x514   :  { %v10991_v57 = vpop.f32.mrb[0].mxu1  ;;  %13201 = vadd.xlane.f32.xlu1 %v13108_v51 }
 0x515   :  { %v12369_v2 = vpop.f32.mrb[0].mxu0  ;;  %v11214_v15 = vadd.f32 %v10991_v57, %v24105_v9  ;;  %v10993_v21 = vpop.f32.mrb[1].mxu1  ;;  %v12981_v43 = vsel %vm12853_vm4, %v12789_v11, %v12917_v60  ;;  %vm12854_vm5 = vcmp.gt.f32.partialorder %v12790_v40, 0.0  ;;  %v12918_v37 = vmul.f32 0.2, %v12790_v40  ;;  %v13050_v60 = vld [vmem:[%s23716_s3 + $0x118] sm:$0xff] }
 0x516   :  { %v12371_v55 = vpop.f32.mrb[1].mxu0  ;;  %v10994_v50 = vpop.f32.mrb[2].mxu1  ;;  %v13109_v35 = vmul.f32 %v13045_v17, %v12981_v43  ;;  %vm13374_vm4 = vcmask 392512  }
 0x517   :  { %v12372_v44 = vpop.f32.mrb[2].mxu0  ;;  %v12592_v61 = vadd.f32 %v12369_v2, %v11214_v15  ;;  %v11215_v28 = vadd.f32 %v10994_v50, %v24106_v42  ;;  %v10996_v54 = vpop.f32.mrb[3].mxu1  ;;  %v12982_v25 = vsel %vm12854_vm5, %v12790_v40, %v12918_v37  ;;  %v24110_v15 = vld [vmem:[#allocation26_spill] sm:$0xff]  ;;  %v23386_v50 = vand.u32 127, %v13335_v45 }
 0x518   :  { %v12374_v10 = vpop.f32.mrb[3].mxu0  ;;  %13203 = vadd.xlane.f32.xlu0 %v13109_v35  ;;  %v13110_v3 = vmul.f32 %v13046_v22, %v12982_v25 }
 0x519   :  { %v12791_v24 = vadd.f32 %v23106_v39, %v12592_v61  ;;  %v12593_v47 = vadd.f32 %v12372_v44, %v11215_v28  ;;  %v23389_v61 = vshrl.u32 %v13335_v45, 7  ;;  %v13341_v42 = vadd.s32 4294967288, %v23386_v50  ;;  %v13051_v10 = vld [vmem:[%s23716_s3 + $0x120] sm:$0xff] }
 0x51a   :  { %13205 = vadd.xlane.f32.xlu1 %v13110_v3 }
 0x51b   :  { %v12792_v4 = vadd.f32 %v23106_v39, %v12593_v47  ;;  %vm12855_vm6 = vcmp.gt.f32.partialorder %v12791_v24, 0.0  ;;  %v12919_v33 = vmul.f32 0.2, %v12791_v24 }
 0x51c   :  { %v10999_v62 = vpop.f32.mrb[4].mxu1 }
 0x51d   :  { %v12377_v23 = vpop.f32.mrb[4].mxu0  ;;  %v11216_v49 = vadd.f32 %v10999_v62, %v24107_v14  ;;  %v11001_v13 = vpop.f32.mrb[5].mxu1  ;;  %v12983_v32 = vsel %vm12855_vm6, %v12791_v24, %v12919_v33  ;;  %vm12856_vm7 = vcmp.gt.f32.partialorder %v12792_v4, 0.0  ;;  %v12920_v46 = vmul.f32 0.2, %v12792_v4  ;;  %v24111_v24 = vld [vmem:[#allocation28_spill] sm:$0xff] }
 0x51e   :  { %v12379_v56 = vpop.f32.mrb[5].mxu0  ;;  %v11002_v39 = vpop.f32.mrb[6].mxu1  ;;  %v13111_v5 = vmul.f32 %v13047_v34, %v12983_v32  ;;  %v23402_v14 = vsub.s32 %v23386_v50, %v23389_v61  ;;  %v23405_v32 = vsub.s32 %v13341_v42, %v23389_v61  ;;  %vm13381_vm6 = vcmask 458112  }
 0x51f   :  { %v12380_v1 = vpop.f32.mrb[6].mxu0  ;;  %v12594_v8 = vadd.f32 %v12377_v23, %v11216_v49  ;;  %v11217_v29 = vadd.f32 %v11002_v39, %v24108_v38  ;;  %v11004_v26 = vpop.f32.mrb[7].mxu1  ;;  %v12984_v58 = vsel %vm12856_vm7, %v12792_v4, %v12920_v46  ;;  %v13052_v23 = vld [vmem:[%s23716_s3 + $0x128] sm:$0xff]  ;;  %v13348_v46 = vadd.s32 4294967280, %v23386_v50 }
 0x520   :  { %v12382_v63 = vpop.f32.mrb[7].mxu0  ;;  %13207 = vadd.xlane.f32.xlu1 %v13111_v5  ;;  %v13112_v19 = vmul.f32 %v13048_v59, %v12984_v58  ;;  %v24112_v39 = vld [vmem:[#allocation37_spill] sm:$0xff] }
 0x521   :  { %v12793_v30 = vadd.f32 %v23374_v6, %v12594_v8  ;;  %v12595_v53 = vadd.f32 %v12380_v1, %v11217_v29 }
 0x522   :  { %13209 = vadd.xlane.f32.xlu0 %v13112_v19 }
 0x523   :  { %v12794_v27 = vadd.f32 %v23374_v6, %v12595_v53  ;;  %vm12857_vm8 = vcmp.gt.f32.partialorder %v12793_v30, 0.0  ;;  %v12921_v18 = vmul.f32 0.2, %v12793_v30 }
 0x524   :  { %v11007_v41 = vpop.f32.mrb[8].mxu1 }
 0x525   :  { %v12385_v20 = vpop.f32.mrb[8].mxu0  ;;  %v11218_v0 = vadd.f32 %v11007_v41, %v24109_v7  ;;  %v11009_v11 = vpop.f32.mrb[9].mxu1  ;;  %v12985_v51 = vsel %vm12857_vm8, %v12793_v30, %v12921_v18  ;;  %vm12858_vm9 = vcmp.gt.f32.partialorder %v12794_v27, 0.0  ;;  %v12922_v40 = vmul.f32 0.2, %v12794_v27 }
 0x526   :  { %v12387_v12 = vpop.f32.mrb[9].mxu0  ;;  %v11010_v17 = vpop.f32.mrb[10].mxu1  ;;  %v13113_v2 = vmul.f32 %v13049_v36, %v12985_v51  ;;  %v13355_v18 = vadd.s32 4294967272, %v23386_v50  ;;  %v24113_v11 = vld [vmem:[#allocation40_spill] sm:$0xff]  ;;  %vm13388_vm8 = vcmask 523712  }
 0x527   :  { %v12388_v57 = vpop.f32.mrb[10].mxu0  ;;  %v12596_v9 = vadd.f32 %v12385_v20, %v11218_v0  ;;  %v11219_v21 = vadd.f32 %v11010_v17, %v24110_v15  ;;  %v11012_v55 = vpop.f32.mrb[11].mxu1  ;;  %v12986_v37 = vsel %vm12858_vm9, %v12794_v27, %v12922_v40  ;;  %v23413_v27 = vsub.s32 %v13348_v46, %v23389_v61  ;;  %v13053_v20 = vld [vmem:[%s23716_s3 + $0x130] sm:$0xff] }
 0x528   :  { %v12390_v43 = vpop.f32.mrb[11].mxu0  ;;  %13211 = vadd.xlane.f32.xlu1 %v13113_v2  ;;  %v13114_v22 = vmul.f32 %v13050_v60, %v12986_v37  ;;  %v13362_v55 = vadd.s32 4294967264, %v23386_v50  ;;  %v24114_v37 = vld [vmem:[#allocation4_spill] sm:$0xff] }
 0x529   :  { %v12795_v44 = vadd.f32 %v23374_v6, %v12596_v9  ;;  %v12597_v35 = vadd.f32 %v12388_v57, %v11219_v21  ;;  %v23424_v21 = vsub.s32 %v13355_v18, %v23389_v61 }
 0x52a   :  { %13213 = vadd.xlane.f32.xlu0 %v13114_v22 }
 0x52b   :  { %v12796_v28 = vadd.f32 %v23374_v6, %v12597_v35  ;;  %vm12859_vm10 = vcmp.gt.f32.partialorder %v12795_v44, 0.0  ;;  %v12923_v54 = vmul.f32 0.2, %v12795_v44 }
 0x52c   :  { %v11015_v25 = vpop.f32.mrb[12].mxu1 }
 0x52d   :  { %v12393_v3 = vpop.f32.mrb[12].mxu0  ;;  %v11220_v47 = vadd.f32 %v11015_v25, %v24111_v24  ;;  %v11017_v4 = vpop.f32.mrb[13].mxu1  ;;  %v12987_v34 = vsel %vm12859_vm10, %v12795_v44, %v12923_v54  ;;  %vm12860_vm11 = vcmp.gt.f32.partialorder %v12796_v28, 0.0  ;;  %v12924_v62 = vmul.f32 0.2, %v12796_v28 }
 0x52e   :  { %v13144_v33 = vpop.xlane.xlu0 %13143  ;;  %v12395_v49 = vpop.f32.mrb[13].mxu0  ;;  %v13115_v56 = vmul.f32 %v13051_v10, %v12987_v34  ;;  %v13369_v34 = vadd.s32 4294967256, %v23386_v50 }
 0x52f   :  { %v11018_v13 = vpop.f32.mrb[14].mxu1  ;;  %v12598_v59 = vadd.f32 %v12393_v3, %v11220_v47  ;;  %v12396_v5 = vpop.f32.mrb[14].mxu0  ;;  %v12988_v38 = vsel %vm12860_vm11, %v12796_v28, %v12924_v62  ;;  %v13340_v30 = vrot.slane %v13144_v33, %v23402_v14  ;;  %v13054_v28 = vld [vmem:[%s23716_s3 + $0x138] sm:$0xff]  ;;  %v23435_v33 = vsub.s32 %v13362_v55, %v23389_v61  ;;  %v13055_v49 = vld [vmem:[%s23716_s3 + $0x140] sm:$0xff]  ;;  %v13057_v55 = vld [vmem:[%s23716_s3 + $0x150] sm:$0xff] }
 0x530   :  { %v11221_v1 = vadd.f32 %v11018_v13, %v24112_v39  ;;  %v11020_v8 = vpop.f32.mrb[15].mxu1  ;;  %v12398_v29 = vpop.f32.mrb[15].mxu0  ;;  %13215 = vadd.xlane.f32.xlu0 %v13115_v56  ;;  %v13116_v26 = vmul.f32 %v13052_v23, %v12988_v38 }
 0x531   :  { %v12797_v63 = vadd.f32 %v23374_v6, %v12598_v59  ;;  %v24115_v59 = vld [vmem:[#allocation5_spill] sm:$0xff] }
 0x532   :  { %v12599_v58 = vadd.f32 %v12396_v5, %v11221_v1  ;;  %v13146_v19 = vpop.xlane.xlu0 %13145  ;;  %13217 = vadd.xlane.f32.xlu1 %v13116_v26  ;;  %v13056_v29 = vld [vmem:[%s23716_s3 + $0x148] sm:$0xff] }
 0x533   :  { %v13345_v53 = vrot.slane %v13146_v19, %v23405_v32  ;;  %vm12861_vm13 = vcmp.gt.f32.partialorder %v12797_v63, 0.0  ;;  %v12925_v41 = vmul.f32 0.2, %v12797_v63 }
 0x534   :  { %v12798_v36 = vadd.f32 %v23374_v6, %v12599_v58 }
 0x535   :  { %v13347_v45 = vsel %vm13346_vm12, %v13345_v53, %v13340_v30  ;;  %v11023_v7 = vpop.f32.mrb[16].mxu1  ;;  %v12401_v0 = vpop.f32.mrb[16].mxu0  ;;  %v12989_v60 = vsel %vm12861_vm13, %v12797_v63, %v12925_v41  ;;  %v23449_v30 = vsub.s32 %v13369_v34, %v23389_v61  ;;  %v13376_v53 = vadd.s32 4294967248, %v23386_v50  ;;  %v24118_v34 = vld [vmem:[#allocation8_spill] sm:$0xff] }
 0x536   :  { %v11222_v12 = vadd.f32 %v11023_v7, %v24113_v11  ;;  %v11025_v51 = vpop.f32.mrb[17].mxu1  ;;  %v13148_v40 = vpop.xlane.xlu0 %13147  ;;  %vm12862_vm15 = vcmp.gt.f32.partialorder %v12798_v36, 0.0  ;;  %v12926_v17 = vmul.f32 0.2, %v12798_v36  ;;  %v13117_v15 = vmul.f32 %v13053_v20, %v12989_v60 }
 0x537   :  { %v13352_v57 = vrot.slane %v13148_v40, %v23413_v27  ;;  %v12403_v2 = vpop.f32.mrb[17].mxu0  ;;  %v11026_v9 = vpop.f32.mrb[18].mxu1 }
 0x538   :  { %v12600_v43 = vadd.f32 %v12401_v0, %v11222_v12  ;;  %v11223_v22 = vadd.f32 %v11026_v9, %v24114_v37  ;;  %v12404_v44 = vpop.f32.mrb[18].mxu0  ;;  %v11028_v35 = vpop.f32.mrb[19].mxu1  ;;  %v12990_v42 = vsel %vm12862_vm15, %v12798_v36, %v12926_v17  ;;  %13219 = vadd.xlane.f32.xlu0 %v13117_v15  ;;  %v24116_v36 = vld [vmem:[#allocation6_spill] sm:$0xff]  ;;  %v13383_v2 = vadd.s32 4294967240, %v23386_v50 }
 0x539   :  { %v13354_v54 = vsel %vm13353_vm14, %v13352_v57, %v13347_v45  ;;  %v12406_v10 = vpop.f32.mrb[19].mxu0  ;;  %v13118_v4 = vmul.f32 %v13054_v28, %v12990_v42  ;;  %v23457_v57 = vsub.s32 %v13376_v53, %v23389_v61  ;;  %v24119_v53 = vld [vmem:[#allocation9_spill] sm:$0xff] }
 0x53a   :  { %v12799_v25 = vadd.f32 %v23374_v6, %v12600_v43  ;;  %v12601_v3 = vadd.f32 %v12404_v44, %v11223_v22  ;;  %v13150_v24 = vpop.xlane.xlu0 %13149  ;;  %v24117_v44 = vld [vmem:[#allocation7_spill] sm:$0xff] }
 0x53b   :  { %v13359_v47 = vrot.slane %v13150_v24, %v23424_v21 }
 0x53c   :  { %v12800_v62 = vadd.f32 %v23374_v6, %v12601_v3  ;;  %vm12863_vm1 = vcmp.gt.f32.partialorder %v12799_v25, 0.0  ;;  %v12927_v23 = vmul.f32 0.2, %v12799_v25  ;;  %13221 = vadd.xlane.f32.xlu0 %v13118_v4 }
 0x53d   :  { %v13361_v13 = vsel %vm13360_vm0, %v13359_v47, %v13354_v54  ;;  %v11031_v56 = vpop.f32.mrb[20].mxu1  ;;  %v12409_v46 = vpop.f32.mrb[20].mxu0  ;;  %v23468_v47 = vsub.s32 %v13383_v2, %v23389_v61 }
 0x53e   :  { %v11224_v39 = vadd.f32 %v11031_v56, %v24115_v59  ;;  %v11033_v1 = vpop.f32.mrb[21].mxu1  ;;  %v13152_v5 = vpop.xlane.xlu1 %13151  ;;  %v12991_v8 = vsel %vm12863_vm1, %v12799_v25, %v12927_v23  ;;  %vm12864_vm3 = vcmp.gt.f32.partialorder %v12800_v62, 0.0  ;;  %v12928_v38 = vmul.f32 0.2, %v12800_v62  ;;  %v13058_v56 = vld [vmem:[%s23716_s3 + $0x158] sm:$0xff] }
 0x53f   :  { %v13366_v26 = vrot.slane %v13152_v5, %v23435_v33  ;;  %v12411_v63 = vpop.f32.mrb[21].mxu0  ;;  %v11034_v58 = vpop.f32.mrb[22].mxu1  ;;  %v13119_v19 = vmul.f32 %v13055_v49, %v12991_v8 }
 0x540   :  { %v12602_v18 = vadd.f32 %v12409_v46, %v11224_v39  ;;  %v11225_v41 = vadd.f32 %v11034_v58, %v24116_v36  ;;  %v12412_v20 = vpop.f32.mrb[22].mxu0  ;;  %v11036_v45 = vpop.f32.mrb[23].mxu1  ;;  %v12992_v7 = vsel %vm12864_vm3, %v12800_v62, %v12928_v38 }
 0x541   :  { %v13368_v0 = vsel %vm13367_vm2, %v13366_v26, %v13361_v13  ;;  %v12414_v11 = vpop.f32.mrb[23].mxu0  ;;  %13223 = vadd.xlane.f32.xlu0 %v13119_v19  ;;  %v13120_v12 = vmul.f32 %v13056_v29, %v12992_v7  ;;  %v13059_v26 = vld [vmem:[%s23716_s3 + $0x160] sm:$0xff]  ;;  %v13060_v7 = vld [vmem:[%s23716_s3 + $0x168] sm:$0xff] }
 0x542   :  { %v12801_v51 = vadd.f32 %v23374_v6, %v12602_v18  ;;  %v12603_v40 = vadd.f32 %v12412_v20, %v11225_v41  ;;  %v13154_v60 = vpop.xlane.xlu1 %13153 }
 0x543   :  { %v13373_v17 = vrot.slane %v13154_v60, %v23449_v30  ;;  %13225 = vadd.xlane.f32.xlu1 %v13120_v12 }
 0x544   :  { %v12802_v9 = vadd.f32 %v23374_v6, %v12603_v40  ;;  %vm12865_vm5 = vcmp.gt.f32.partialorder %v12801_v51, 0.0  ;;  %v12929_v15 = vmul.f32 0.2, %v12801_v51  ;;  %v24120_v40 = vld [vmem:[#allocation10_spill] sm:$0xff] }
 0x545   :  { %v13375_v43 = vsel %vm13374_vm4, %v13373_v17, %v13368_v0  ;;  %v11039_v37 = vpop.f32.mrb[24].mxu1  ;;  %v12417_v22 = vpop.f32.mrb[24].mxu0 }
 0x546   :  { %v11226_v35 = vadd.f32 %v11039_v37, %v24117_v44  ;;  %v11041_v42 = vpop.f32.mrb[25].mxu1  ;;  %v13156_v28 = vpop.xlane.xlu0 %13155  ;;  %v12993_v54 = vsel %vm12865_vm5, %v12801_v51, %v12929_v15  ;;  %vm12866_vm7 = vcmp.gt.f32.partialorder %v12802_v9, 0.0  ;;  %v12930_v50 = vmul.f32 0.2, %v12802_v9 }
 0x547   :  { %v13380_v10 = vrot.slane %v13156_v28, %v23457_v57  ;;  %v12419_v25 = vpop.f32.mrb[25].mxu0  ;;  %v11042_v3 = vpop.f32.mrb[26].mxu1  ;;  %v13121_v24 = vmul.f32 %v13057_v55, %v12993_v54  ;;  %v13061_v54 = vld [vmem:[%s23716_s3 + $0x170] sm:$0xff] }
 0x548   :  { %v12604_v4 = vadd.f32 %v12417_v22, %v11226_v35  ;;  %v11227_v62 = vadd.f32 %v11042_v3, %v24118_v34  ;;  %v12420_v23 = vpop.f32.mrb[26].mxu0  ;;  %v11044_v49 = vpop.f32.mrb[27].mxu1  ;;  %v12994_v13 = vsel %vm12866_vm7, %v12802_v9, %v12930_v50  ;;  %v24121_v3 = vld [vmem:[#allocation11_spill] sm:$0xff]  ;;  %vm13663_vm7 = vcmask 1041409  }
 0x549   :  { %v13382_v46 = vsel %vm13381_vm6, %v13380_v10, %v13375_v43  ;;  %v12422_v59 = vpop.f32.mrb[27].mxu0  ;;  %13227 = vadd.xlane.f32.xlu1 %v13121_v24  ;;  %v13122_v8 = vmul.f32 %v13058_v56, %v12994_v13  ;;  %v13062_v49 = vld [vmem:[%s23716_s3 + $0x178] sm:$0xff] }
 0x54a   :  { %v12803_v39 = vadd.f32 %v23374_v6, %v12604_v4  ;;  %v12605_v1 = vadd.f32 %v12420_v23, %v11227_v62  ;;  %v13158_v61 = vpop.xlane.xlu0 %13157 }
 0x54b   :  { %v13387_v5 = vrot.slane %v13158_v61, %v23468_v47 }
 0x54c   :  { %v12804_v38 = vadd.f32 %v23374_v6, %v12605_v1  ;;  %vm12867_vm9 = vcmp.gt.f32.partialorder %v12803_v39, 0.0  ;;  %v12931_v29 = vmul.f32 0.2, %v12803_v39  ;;  %v24122_v1 = vld [vmem:[#allocation12_spill] sm:$0xff] }
 0x54d   :  { %v23482_v63 = vsel %vm13388_vm8, %v13387_v5, %v13382_v46  ;;  %v11047_v58 = vpop.f32.mrb[28].mxu1  ;;  %13229 = vadd.xlane.f32.xlu1 %v13122_v8  ;;  %v12425_v19 = vpop.f32.mrb[28].mxu0 }
 0x54e   :  { %v11228_v18 = vadd.f32 %v11047_v58, %v24119_v53  ;;  %v11049_v36 = vpop.f32.mrb[29].mxu1  ;;  %v13160_v41 = vpop.xlane.xlu1 %13159  ;;  %v12995_v20 = vsel %vm12867_vm9, %v12803_v39, %v12931_v29  ;;  %vm12868_vm10 = vcmp.gt.f32.partialorder %v12804_v38, 0.0  ;;  %v12932_v45 = vmul.f32 0.2, %v12804_v38 }
 0x54f   :  { %v12427_v0 = vpop.f32.mrb[29].mxu0  ;;  %v11050_v11 = vpop.f32.mrb[30].mxu1  ;;  %v13123_v12 = vmul.f32 %v13059_v26, %v12995_v20  ;;  %v13393_v44 = vrot.slane %v13160_v41, %v23402_v14 }
 0x550   :  { %v12606_v51 = vadd.f32 %v12425_v19, %v11228_v18  ;;  %v11229_v60 = vadd.f32 %v11050_v11, %v24120_v40  ;;  %v12428_v17 = vpop.f32.mrb[30].mxu0  ;;  %v11052_v2 = vpop.f32.mrb[31].mxu1  ;;  %v12996_v9 = vsel %vm12868_vm10, %v12804_v38, %v12932_v45  ;;  %v13063_v45 = vld [vmem:[%s23716_s3 + $0x180] sm:$0xff] }
 0x551   :  { %v12430_v15 = vpop.f32.mrb[31].mxu0  ;;  %13231 = vadd.xlane.f32.xlu0 %v13123_v12  ;;  %v13124_v55 = vmul.f32 %v13060_v7, %v12996_v9  ;;  %v13064_v2 = vld [vmem:[%s23716_s3 + $0x188] sm:$0xff] }
 0x552   :  { %v12805_v43 = vadd.f32 %v23374_v6, %v12606_v51  ;;  %v12607_v37 = vadd.f32 %v12428_v17, %v11229_v60  ;;  %v13162_v22 = vpop.xlane.xlu1 %13161 }
 0x553   :  { %v13397_v35 = vrot.slane %v13162_v22, %v23405_v32  ;;  %13233 = vadd.xlane.f32.xlu1 %v13124_v55  ;;  %v24123_v22 = vld [vmem:[#allocation13_spill] sm:$0xff] }
 0x554   :  { %v12806_v42 = vadd.f32 %v23374_v6, %v12607_v37  ;;  %vm12869_vm11 = vcmp.gt.f32.partialorder %v12805_v43, 0.0  ;;  %v12933_v28 = vmul.f32 0.2, %v12805_v43 }
 0x555   :  { %v13398_v50 = vsel %vm13346_vm12, %v13397_v35, %v13393_v44  ;;  %v11055_v10 = vpop.f32.mrb[32].mxu1  ;;  %v12433_v25 = vpop.f32.mrb[32].mxu0 }
 0x556   :  { %v11230_v24 = vadd.f32 %v11055_v10, %v24121_v3  ;;  %v11057_v4 = vpop.f32.mrb[33].mxu1  ;;  %v13164_v34 = vpop.xlane.xlu1 %13163  ;;  %v12997_v62 = vsel %vm12869_vm11, %v12805_v43, %v12933_v28  ;;  %vm12870_vm13 = vcmp.gt.f32.partialorder %v12806_v42, 0.0  ;;  %v12934_v23 = vmul.f32 0.2, %v12806_v42 }
 0x557   :  { %v13402_v13 = vrot.slane %v13164_v34, %v23413_v27  ;;  %v12435_v56 = vpop.f32.mrb[33].mxu0  ;;  %v11058_v46 = vpop.f32.mrb[34].mxu1  ;;  %v13125_v59 = vmul.f32 %v13061_v54, %v12997_v62  ;;  %v13065_v62 = vld [vmem:[%s23716_s3 + $0x190] sm:$0xff] }
 0x558   :  { %v12608_v39 = vadd.f32 %v12433_v25, %v11230_v24  ;;  %v11231_v61 = vadd.f32 %v11058_v46, %v24122_v1  ;;  %v12436_v5 = vpop.f32.mrb[34].mxu0  ;;  %v11060_v8 = vpop.f32.mrb[35].mxu1  ;;  %v12998_v38 = vsel %vm12870_vm13, %v12806_v42, %v12934_v23  ;;  %v24124_v56 = vld [vmem:[#allocation14_spill] sm:$0xff] }
 0x559   :  { %v13403_v29 = vsel %vm13353_vm14, %v13402_v13, %v13398_v50  ;;  %v12438_v26 = vpop.f32.mrb[35].mxu0  ;;  %13235 = vadd.xlane.f32.xlu1 %v13125_v59  ;;  %v13126_v58 = vmul.f32 %v13062_v49, %v12998_v38 }
 0x55a   :  { %v12807_v19 = vadd.f32 %v23374_v6, %v12608_v39  ;;  %v12609_v53 = vadd.f32 %v12436_v5, %v11231_v61  ;;  %v13166_v18 = vpop.xlane.xlu1 %13165  ;;  %v13066_v5 = vld [vmem:[%s23716_s3 + $0x198] sm:$0xff] }
 0x55b   :  { %v13407_v36 = vrot.slane %v13166_v18, %v23424_v21  ;;  %13237 = vadd.xlane.f32.xlu0 %v13126_v58 }
 0x55c   :  { %v12808_v41 = vadd.f32 %v23374_v6, %v12609_v53  ;;  %vm12871_vm15 = vcmp.gt.f32.partialorder %v12807_v19, 0.0  ;;  %v12935_v20 = vmul.f32 0.2, %v12807_v19 }
 0x55d   :  { %v13408_v7 = vsel %vm13360_vm0, %v13407_v36, %v13403_v29  ;;  %v11063_v0 = vpop.f32.mrb[36].mxu1  ;;  %v12441_v11 = vpop.f32.mrb[36].mxu0 }
 0x55e   :  { %v11232_v12 = vadd.f32 %v11063_v0, %v22697_v31  ;;  %v11065_v51 = vpop.f32.mrb[37].mxu1  ;;  %v13168_v40 = vpop.xlane.xlu0 %13167  ;;  %v12999_v60 = vsel %vm12871_vm15, %v12807_v19, %v12935_v20  ;;  %vm12872_vm1 = vcmp.gt.f32.partialorder %v12808_v41, 0.0  ;;  %v12936_v17 = vmul.f32 0.2, %v12808_v41  ;;  %v24125_v19 = vld [vmem:[#allocation15_spill] sm:$0xff] }
 0x55f   :  { %v13412_v9 = vrot.slane %v13168_v40, %v23435_v33  ;;  %v12443_v15 = vpop.f32.mrb[37].mxu0  ;;  %v11066_v55 = vpop.f32.mrb[38].mxu1  ;;  %v13127_v43 = vmul.f32 %v13063_v45, %v12999_v60 }
 0x560   :  { %v12610_v37 = vadd.f32 %v12441_v11, %v11232_v12  ;;  %v11233_v44 = vadd.f32 %v11066_v55, %v24123_v22  ;;  %v12444_v35 = vpop.f32.mrb[38].mxu0  ;;  %v11068_v42 = vpop.f32.mrb[39].mxu1  ;;  %v13000_v31 = vsel %vm12872_vm1, %v12808_v41, %v12936_v17  ;;  %v13067_v17 = vld [vmem:[%s23716_s3 + $0x1a0] sm:$0xff] }
 0x561   :  { %v13413_v28 = vsel %vm13367_vm2, %v13412_v9, %v13408_v7  ;;  %v12446_v54 = vpop.f32.mrb[39].mxu0  ;;  %13239 = vadd.xlane.f32.xlu0 %v13127_v43  ;;  %v13128_v50 = vmul.f32 %v13064_v2, %v13000_v31  ;;  %v24126_v43 = vld [vmem:[#allocation16_spill] sm:$0xff] }
 0x562   :  { %v12809_v10 = vadd.f32 %v23374_v6, %v12610_v37  ;;  %v12611_v25 = vadd.f32 %v12444_v35, %v11233_v44  ;;  %v13170_v3 = vpop.xlane.xlu0 %13169 }
 0x563   :  { %v13417_v24 = vrot.slane %v13170_v3, %v23449_v30  ;;  %13241 = vadd.xlane.f32.xlu1 %v13128_v50 }
 0x564   :  { %v12810_v4 = vadd.f32 %v23374_v6, %v12611_v25  ;;  %vm12873_vm3 = vcmp.gt.f32.partialorder %v12809_v10, 0.0  ;;  %v12937_v34 = vmul.f32 0.2, %v12809_v10 }
 0x565   :  { %v13418_v23 = vsel %vm13374_vm4, %v13417_v24, %v13413_v28  ;;  %v11071_v49 = vpop.f32.mrb[40].mxu1  ;;  %v12449_v13 = vpop.f32.mrb[40].mxu0 }
 0x566   :  { %v11234_v46 = vadd.f32 %v11071_v49, %v24124_v56  ;;  %v11073_v59 = vpop.f32.mrb[41].mxu1  ;;  %v13172_v39 = vpop.xlane.xlu1 %13171  ;;  %v13001_v1 = vsel %vm12873_vm3, %v12809_v10, %v12937_v34  ;;  %vm12874_vm5 = vcmp.gt.f32.partialorder %v12810_v4, 0.0  ;;  %v12938_v61 = vmul.f32 0.2, %v12810_v4  ;;  %v24127_v10 = vld [vmem:[#allocation17_spill] sm:$0xff] }
 0x567   :  { %v13422_v8 = vrot.slane %v13172_v39, %v23457_v57  ;;  %v12451_v38 = vpop.f32.mrb[41].mxu0  ;;  %v11074_v29 = vpop.f32.mrb[42].mxu1  ;;  %v13129_v26 = vmul.f32 %v13065_v62, %v13001_v1 }
 0x568   :  { %v12612_v58 = vadd.f32 %v12449_v13, %v11234_v46  ;;  %v11235_v53 = vadd.f32 %v11074_v29, %v24125_v19  ;;  %v12452_v18 = vpop.f32.mrb[42].mxu0  ;;  %v11076_v36 = vpop.f32.mrb[43].mxu1  ;;  %v13002_v41 = vsel %vm12874_vm5, %v12810_v4, %v12938_v61  ;;  %v13069_v61 = vld [vmem:[%s23716_s3 + $0x1b0] sm:$0xff] }
 0x569   :  { %v13423_v20 = vsel %vm13381_vm6, %v13422_v8, %v13418_v23  ;;  %v12454_v45 = vpop.f32.mrb[43].mxu0  ;;  %13243 = vadd.xlane.f32.xlu0 %v13129_v26  ;;  %v13130_v7 = vmul.f32 %v13066_v5, %v13002_v41 }
 0x56a   :  { %v12811_v0 = vadd.f32 %v23374_v6, %v12612_v58  ;;  %v12613_v11 = vadd.f32 %v12452_v18, %v11235_v53  ;;  %v13174_v12 = vpop.xlane.xlu1 %13173 }
 0x56b   :  { %v13427_v51 = vrot.slane %v13174_v12, %v23468_v47  ;;  %13245 = vadd.xlane.f32.xlu1 %v13130_v7 }
 0x56c   :  { %v12812_v40 = vadd.f32 %v23374_v6, %v12613_v11  ;;  %vm12875_vm9 = vcmp.gt.f32.partialorder %v12811_v0, 0.0  ;;  %v12939_v60 = vmul.f32 0.2, %v12811_v0 }
 0x56d   :  { %v13428_v2 = vsel %vm13388_vm8, %v13427_v51, %v13423_v20  ;;  %v11079_v9 = vpop.f32.mrb[44].mxu1  ;;  %v12457_v15 = vpop.f32.mrb[44].mxu0 }
 0x56e   :  { %v23540_v55 = vsel %vm13663_vm7, %v13428_v2, %v23482_v63  ;;  %v11236_v37 = vadd.f32 %v11079_v9, %v24126_v43  ;;  %v11081_v22 = vpop.f32.mrb[45].mxu1  ;;  %v13176_v44 = vpop.xlane.xlu0 %13175  ;;  %v13003_v35 = vsel %vm12875_vm9, %v12811_v0, %v12939_v60  ;;  %vm12876_vm10 = vcmp.gt.f32.partialorder %v12812_v40, 0.0  ;;  %v13068_v63 = vld [vmem:[%s23716_s3 + $0x1a8] sm:$0xff] }
 0x56f   :  { %v12459_v42 = vpop.f32.mrb[45].mxu0  ;;  %v11082_v31 = vpop.f32.mrb[46].mxu1  ;;  %v13131_v28 = vmul.f32 %v13067_v17, %v13003_v35  ;;  %v12940_v54 = vmul.f32 0.2, %v12812_v40  ;;  %v13432_v49 = vrot.slane %v13176_v44, %v23402_v14  ;;  %vm13665_vm7 = vcmask 1042434  }
 0x570   :  { %v12614_v50 = vadd.f32 %v12457_v15, %v11236_v37  ;;  %v11237_v25 = vadd.f32 %v11082_v31, %v24127_v10  ;;  %v12460_v3 = vpop.f32.mrb[46].mxu0  ;;  %v11084_v24 = vpop.f32.mrb[47].mxu1  ;;  %v13071_v37 = vld [vmem:[%s23716_s3 + $0x1c0] sm:$0xff] }
 0x571   :  { %v13178_v4 = vpop.xlane.xlu1 %13177  ;;  %v12462_v34 = vpop.f32.mrb[47].mxu0  ;;  %13247 = vadd.xlane.f32.xlu0 %v13131_v28  ;;  %v13004_v62 = vsel %vm12876_vm10, %v12812_v40, %v12940_v54 }
 0x572   :  { %v12813_v23 = vadd.f32 %v23374_v6, %v12614_v50  ;;  %v12615_v13 = vadd.f32 %v12460_v3, %v11237_v25  ;;  %v13436_v56 = vrot.slane %v13178_v4, %v23405_v32  ;;  %v13132_v46 = vmul.f32 %v13068_v63, %v13004_v62  ;;  %v13072_v50 = vld [vmem:[%s23716_s3 + $0x1c8] sm:$0xff]  ;;  %v24128_v4 = vld [vmem:[#allocation18_spill] sm:$0xff] }
 0x574   :  { %v12814_v59 = vadd.f32 %v23374_v6, %v12615_v13  ;;  %v13437_v39 = vsel %vm13346_vm12, %v13436_v56, %v13432_v49  ;;  %vm12877_vm11 = vcmp.gt.f32.partialorder %v12813_v23, 0.0  ;;  %v12941_v1 = vmul.f32 0.2, %v12813_v23 }
 0x575   :  { %v11087_v5 = vpop.f32.mrb[48].mxu1  ;;  %13249 = vadd.xlane.f32.xlu0 %v13132_v46  ;;  %v12465_v8 = vpop.f32.mrb[48].mxu0 }
 0x576   :  { %v11238_v38 = vadd.f32 %v11087_v5, %v22884_v48  ;;  %v11089_v29 = vpop.f32.mrb[49].mxu1  ;;  %v13180_v26 = vpop.xlane.xlu0 %13179  ;;  %v13005_v58 = vsel %vm12877_vm11, %v12813_v23, %v12941_v1  ;;  %vm12878_vm13 = vcmp.gt.f32.partialorder %v12814_v59, 0.0  ;;  %v12942_v19 = vmul.f32 0.2, %v12814_v59  ;;  %v13070_v48 = vld [vmem:[%s23716_s3 + $0x1b8] sm:$0xff] }
 0x577   :  { %v13441_v53 = vrot.slane %v13180_v26, %v23413_v27  ;;  %v12467_v18 = vpop.f32.mrb[49].mxu0  ;;  %v11090_v36 = vpop.f32.mrb[50].mxu1  ;;  %v13133_v41 = vmul.f32 %v13069_v61, %v13005_v58  ;;  %v24129_v58 = vld [vmem:[#allocation19_spill] sm:$0xff] }
 0x578   :  { %v12616_v20 = vadd.f32 %v12465_v8, %v11238_v38  ;;  %v11239_v45 = vadd.f32 %v11090_v36, %v22887_v16  ;;  %v12468_v7 = vpop.f32.mrb[50].mxu0  ;;  %v11092_v0 = vpop.f32.mrb[51].mxu1  ;;  %v13006_v11 = vsel %vm12878_vm13, %v12814_v59, %v12942_v19  ;;  %v13073_v38 = vld [vmem:[%s23716_s3 + $0x1d0] sm:$0xff] }
 0x579   :  { %v13442_v12 = vsel %vm13353_vm14, %v13441_v53, %v13437_v39  ;;  %v13182_v51 = vpop.xlane.xlu1 %13181  ;;  %v12470_v40 = vpop.f32.mrb[51].mxu0  ;;  %13251 = vadd.xlane.f32.xlu1 %v13133_v41  ;;  %v13134_v9 = vmul.f32 %v13070_v48, %v13006_v11 }
 0x57a   :  { %v12815_v60 = vadd.f32 %v23374_v6, %v12616_v20  ;;  %v12617_v17 = vadd.f32 %v12468_v7, %v11239_v45  ;;  %v13446_v2 = vrot.slane %v13182_v51, %v23424_v21  ;;  %v13074_v20 = vld [vmem:[%s23716_s3 + $0x1d8] sm:$0xff] }
 0x57c   :  { %v12816_v16 = vadd.f32 %v23374_v6, %v12617_v17  ;;  %v13447_v15 = vsel %vm13360_vm0, %v13446_v2, %v13442_v12  ;;  %vm12879_vm15 = vcmp.gt.f32.partialorder %v12815_v60, 0.0  ;;  %v12943_v43 = vmul.f32 0.2, %v12815_v60  ;;  %v24130_v12 = vld [vmem:[#allocation20_spill] sm:$0xff] }
 0x57d   :  { %v11095_v22 = vpop.f32.mrb[52].mxu1  ;;  %13253 = vadd.xlane.f32.xlu1 %v13134_v9  ;;  %v12473_v44 = vpop.f32.mrb[52].mxu0 }
 0x57e   :  { %v11240_v35 = vadd.f32 %v11095_v22, %v22941_v52  ;;  %v11097_v42 = vpop.f32.mrb[53].mxu1  ;;  %v13184_v31 = vpop.xlane.xlu1 %13183  ;;  %v13007_v28 = vsel %vm12879_vm15, %v12815_v60, %v12943_v43  ;;  %vm12880_vm1 = vcmp.gt.f32.partialorder %v12816_v16, 0.0  ;;  %v12944_v54 = vmul.f32 0.2, %v12816_v16 }
 0x57f   :  { %v13451_v10 = vrot.slane %v13184_v31, %v23435_v33  ;;  %v12475_v25 = vpop.f32.mrb[53].mxu0  ;;  %v11098_v3 = vpop.f32.mrb[54].mxu1  ;;  %v13135_v24 = vmul.f32 %v13071_v37, %v13007_v28  ;;  %v13075_v31 = vld [vmem:[%s23716_s3 + $0x1e0] sm:$0xff]  ;;  %vm13667_vm15 = vcmask 1043459  }
 0x580   :  { %v12618_v63 = vadd.f32 %v12473_v44, %v11240_v35  ;;  %v11241_v34 = vadd.f32 %v11098_v3, %v24128_v4  ;;  %v12476_v62 = vpop.f32.mrb[54].mxu0  ;;  %v11100_v23 = vpop.f32.mrb[55].mxu1  ;;  %v13008_v52 = vsel %vm12880_vm1, %v12816_v16, %v12944_v54  ;;  %vm13678_vm1 = vcmask 523264  }
 0x581   :  { %v13452_v49 = vsel %vm13367_vm2, %v13451_v10, %v13447_v15  ;;  %v13186_v13 = vpop.xlane.xlu0 %13185  ;;  %v12478_v56 = vpop.f32.mrb[55].mxu0  ;;  %13255 = vadd.xlane.f32.xlu1 %v13135_v24  ;;  %v13136_v46 = vmul.f32 %v13072_v50, %v13008_v52  ;;  %v24131_v10 = vld [vmem:[#allocation21_spill] sm:$0xff] }
 0x582   :  { %v12817_v59 = vadd.f32 %v23374_v6, %v12618_v63  ;;  %v12619_v39 = vadd.f32 %v12476_v62, %v11241_v34  ;;  %v13456_v1 = vrot.slane %v13186_v13, %v23449_v30  ;;  %v13076_v34 = vld [vmem:[%s23716_s3 + $0x1e8] sm:$0xff]  ;;  %v24132_v13 = vld [vmem:[#allocation23_spill] sm:$0xff] }
 0x583   :  { %13257 = vadd.xlane.f32.xlu0 %v13136_v46 }
 0x584   :  { %v12818_v61 = vadd.f32 %v23374_v6, %v12619_v39  ;;  %v13457_v5 = vsel %vm13374_vm4, %v13456_v1, %v13452_v49  ;;  %vm12881_vm3 = vcmp.gt.f32.partialorder %v12817_v59, 0.0  ;;  %v12945_v8 = vmul.f32 0.2, %v12817_v59 }
 0x585   :  { %v11103_v29 = vpop.f32.mrb[56].mxu1  ;;  %v12481_v26 = vpop.f32.mrb[56].mxu0 }
 0x586   :  { %v11242_v19 = vadd.f32 %v11103_v29, %v24129_v58  ;;  %v11105_v53 = vpop.f32.mrb[57].mxu1  ;;  %v13188_v18 = vpop.xlane.xlu0 %13187  ;;  %v13009_v36 = vsel %vm12881_vm3, %v12817_v59, %v12945_v8  ;;  %vm12882_vm5 = vcmp.gt.f32.partialorder %v12818_v61, 0.0  ;;  %v12946_v41 = vmul.f32 0.2, %v12818_v61 }
 0x587   :  { %v13461_v45 = vrot.slane %v13188_v18, %v23457_v57  ;;  %v12483_v7 = vpop.f32.mrb[57].mxu0  ;;  %v11106_v0 = vpop.f32.mrb[58].mxu1  ;;  %v13137_v11 = vmul.f32 %v13073_v38, %v13009_v36  ;;  %v13077_v53 = vld [vmem:[%s23716_s3 + $0x1f0] sm:$0xff] }
 0x588   :  { %v12620_v48 = vadd.f32 %v12481_v26, %v11242_v19  ;;  %v11243_v51 = vadd.f32 %v11106_v0, %v24130_v12  ;;  %v12484_v40 = vpop.f32.mrb[58].mxu0  ;;  %v11108_v60 = vpop.f32.mrb[59].mxu1  ;;  %v13010_v17 = vsel %vm12882_vm5, %v12818_v61, %v12946_v41 }
 0x589   :  { %v13462_v2 = vsel %vm13381_vm6, %v13461_v45, %v13457_v5  ;;  %v13190_v9 = vpop.xlane.xlu1 %13189  ;;  %v12486_v16 = vpop.f32.mrb[59].mxu0  ;;  %13259 = vadd.xlane.f32.xlu0 %v13137_v11  ;;  %v13138_v15 = vmul.f32 %v13074_v20, %v13010_v17  ;;  %v13078_v20 = vld [vmem:[%s23716_s3 + $0x1f8] sm:$0xff] }
 0x58a   :  { %v12819_v43 = vadd.f32 %v23374_v6, %v12620_v48  ;;  %v12621_v37 = vadd.f32 %v12484_v40, %v11243_v51  ;;  %v13466_v22 = vrot.slane %v13190_v9, %v23468_v47 }
 0x58b   :  { %13261 = vadd.xlane.f32.xlu1 %v13138_v15 }
 0x58c   :  { %v12820_v44 = vadd.f32 %v23374_v6, %v12621_v37  ;;  %v13467_v35 = vsel %vm13388_vm8, %v13466_v22, %v13462_v2  ;;  %vm12883_vm9 = vcmp.gt.f32.partialorder %v12819_v43, 0.0  ;;  %v12947_v42 = vmul.f32 0.2, %v12819_v43 }
 0x58d   :  { %v13666_v28 = vsel %vm13665_vm7, %v13467_v35, %v23540_v55  ;;  %v11111_v54 = vpop.f32.mrb[60].mxu1  ;;  %v12489_v50 = vpop.f32.mrb[60].mxu0 }
 0x58e   :  { %v11244_v25 = vadd.f32 %v11111_v54, %v24131_v10  ;;  %v11113_v3 = vpop.f32.mrb[61].mxu1  ;;  %v13192_v24 = vpop.xlane.xlu1 %13191  ;;  %v13011_v63 = vsel %vm12883_vm9, %v12819_v43, %v12947_v42  ;;  %vm12884_vm10 = vcmp.gt.f32.partialorder %v12820_v44, 0.0  ;;  %v12948_v4 = vmul.f32 0.2, %v12820_v44 }
 0x58f   :  { %v12491_v62 = vpop.f32.mrb[61].mxu0  ;;  %v11114_v23 = vpop.f32.mrb[62].mxu1  ;;  %v13139_v52 = vmul.f32 %v13075_v31, %v13011_v63  ;;  %v13471_v8 = vrot.slane %v13192_v24, %v23402_v14  ;;  %v10_v31 = vstv %s23717_s4 }
 0x590   :  { %v12622_v49 = vadd.f32 %v12489_v50, %v11244_v25  ;;  %v11245_v56 = vadd.f32 %v11114_v23, %v24132_v13  ;;  %v12492_v55 = vpop.f32.mrb[62].mxu0  ;;  %v11116_v46 = vpop.f32.mrb[63].mxu1  ;;  %v13012_v59 = vsel %vm12884_vm10, %v12820_v44, %v12948_v4  ;;  %11 = vst [vmem:[#allocation3] sm:$0x1] %v10_v31 }
 0x591   :  { %v13194_v39 = vpop.xlane.xlu0 %13193  ;;  %v12494_v1 = vpop.f32.mrb[63].mxu0  ;;  %13263 = vadd.xlane.f32.xlu1 %v13139_v52  ;;  %v13140_v61 = vmul.f32 %v13076_v34, %v13012_v59 }
 0x592   :  { %v12821_v5 = vadd.f32 %v23374_v6, %v12622_v49  ;;  %v12623_v38 = vadd.f32 %v12492_v55, %v11245_v56  ;;  %v13475_v29 = vrot.slane %v13194_v39, %v23405_v32 }
 0x593   :  { %13265 = vadd.xlane.f32.xlu0 %v13140_v61 }
 0x594   :  { %v12822_v26 = vadd.f32 %v23374_v6, %v12623_v38  ;;  %v13476_v58 = vsel %vm13346_vm12, %v13475_v29, %v13471_v8  ;;  %vm12885_vm11 = vcmp.gt.f32.partialorder %v12821_v5, 0.0  ;;  %v12949_v19 = vmul.f32 0.2, %v12821_v5 }
 0x595   :  { %v13196_v18 = vpop.xlane.xlu0 %13195 }
 0x596   :  { %v13013_v36 = vsel %vm12885_vm11, %v12821_v5, %v12949_v19  ;;  %vm12886_vm13 = vcmp.gt.f32.partialorder %v12822_v26, 0.0  ;;  %v12950_v41 = vmul.f32 0.2, %v12822_v26  ;;  %v13480_v45 = vrot.slane %v13196_v18, %v23413_v27 }
 0x597   :  { %v13141_v7 = vmul.f32 %v13077_v53, %v13013_v36 }
 0x598   :  { %v13014_v6 = vsel %vm12886_vm13, %v12822_v26, %v12950_v41  ;;  %v13481_v0 = vsel %vm13353_vm14, %v13480_v45, %v13476_v58 }
 0x599   :  { %13267 = vadd.xlane.f32.xlu0 %v13141_v7  ;;  %v13142_v11 = vmul.f32 %v13078_v20, %v13014_v6  ;;  %v13198_v48 = vpop.xlane.xlu0 %13197 }
 0x59a   :  { %v13485_v12 = vrot.slane %v13198_v48, %v23424_v21 }
 0x59b   :  { %13269 = vadd.xlane.f32.xlu1 %v13142_v11 }
 0x59c   :  { %v13486_v60 = vsel %vm13360_vm0, %v13485_v12, %v13481_v0 }
 0x59d   :  { %v13200_v51 = vpop.xlane.xlu1 %13199 }
 0x59e   :  { %v13490_v40 = vrot.slane %v13200_v51, %v23435_v33 }
 0x5a0   :  { %v13491_v17 = vsel %vm13367_vm2, %v13490_v40, %v13486_v60 }
 0x5a1   :  { %v13202_v2 = vpop.xlane.xlu1 %13201 }
 0x5a2   :  { %v13495_v9 = vrot.slane %v13202_v2, %v23449_v30 }
 0x5a4   :  { %v13496_v43 = vsel %vm13374_vm4, %v13495_v9, %v13491_v17 }
 0x5a5   :  { %v13204_v16 = vpop.xlane.xlu0 %13203 }
 0x5a6   :  { %v13500_v15 = vrot.slane %v13204_v16, %v23457_v57 }
 0x5a7   :  { %v13206_v37 = vpop.xlane.xlu1 %13205 }
 0x5a8   :  { %v13501_v22 = vsel %vm13381_vm6, %v13500_v15, %v13496_v43  ;;  %v13505_v44 = vrot.slane %v13206_v37, %v23468_v47 }
 0x5aa   :  { %v13506_v35 = vsel %vm13388_vm8, %v13505_v44, %v13501_v22 }
 0x5ab   :  { %v23626_v42 = vsel %vm13667_vm15, %v13506_v35, %v13666_v28 }
 0x5ad   :  { %v13208_v54 = vpop.xlane.xlu1 %13207 }
 0x5ae   :  { %v13510_v26 = vrot.slane %v13208_v54, %v23402_v14 }
 0x5af   :  { %v13210_v50 = vpop.xlane.xlu0 %13209 }
 0x5b0   :  { %v13514_v38 = vrot.slane %v13210_v50, %v23405_v32 }
 0x5b2   :  { %v13515_v53 = vsel %vm13346_vm12, %v13514_v38, %v13510_v26 }
 0x5b5   :  { %v13212_v10 = vpop.xlane.xlu1 %13211 }
 0x5b6   :  { %v13519_v29 = vrot.slane %v13212_v10, %v23413_v27 }
 0x5b7   :  { %v13214_v25 = vpop.xlane.xlu0 %13213 }
 0x5b8   :  { %v13524_v18 = vrot.slane %v13214_v25, %v23424_v21  ;;  %v13520_v41 = vsel %vm13353_vm14, %v13519_v29, %v13515_v53 }
 0x5ba   :  { %v13525_v12 = vsel %vm13360_vm0, %v13524_v18, %v13520_v41 }
 0x5bd   :  { %v13216_v3 = vpop.xlane.xlu0 %13215 }
 0x5be   :  { %v13529_v20 = vrot.slane %v13216_v3, %v23435_v33 }
 0x5bf   :  { %v23631_v24 = vpop.xlane.xlu1 %13217 }
 0x5c0   :  { %v13530_v17 = vsel %vm13367_vm2, %v13529_v20, %v13525_v12 }
 0x5c5   :  { %v23633_v63 = vpop.xlane.xlu0 %13219 }
 0x5c6   :  { %v13539_v35 = vrot.slane %v23633_v63, %v23457_v57 }
 0x5c9   :  { %v23635_v62 = vpop.xlane.xlu0 %13221 }
 0x5ce   :  { %v13224_v23 = vpop.xlane.xlu0 %13223 }
 0x5cf   :  { %v13549_v7 = vrot.slane %v13224_v23, %v23402_v14 }
 0x5d0   :  { %v13226_v4 = vpop.xlane.xlu1 %13225 }
 0x5d1   :  { %v13553_v36 = vrot.slane %v13226_v4, %v23405_v32 }
 0x5d3   :  { %v13554_v51 = vsel %vm13346_vm12, %v13553_v36, %v13549_v7  ;;  %v15511_v7 = vld [vmem:[#allocation3] ss:$0 sm:$0xff] }
 0x5d6   :  { %v13228_v34 = vpop.xlane.xlu1 %13227 }
 0x5d7   :  { %v13558_v45 = vrot.slane %v13228_v34, %v23413_v27  ;;  %v13544_v34 = vrot.slane %v23635_v62, %v23468_v47 }
 0x5d9   :  { %v13559_v2 = vsel %vm13353_vm14, %v13558_v45, %v13554_v51 }
 0x5da   :  { %v13230_v28 = vpop.xlane.xlu1 %13229 }
 0x5db   :  { %v13563_v6 = vrot.slane %v13230_v28, %v23424_v21 }
 0x5dd   :  { %v13564_v15 = vsel %vm13360_vm0, %v13563_v6, %v13559_v2 }
 0x5de   :  { %v13232_v49 = vpop.xlane.xlu0 %13231 }
 0x5df   :  { %v13568_v48 = vrot.slane %v13232_v49, %v23435_v33 }
 0x5e0   :  { %v13234_v52 = vpop.xlane.xlu1 %13233 }
 0x5e1   :  { %v13573_v43 = vrot.slane %v13234_v52, %v23449_v30  ;;  %v13569_v31 = vsel %vm13367_vm2, %v13568_v48, %v13564_v15 }
 0x5e3   :  { %v13574_v28 = vsel %vm13374_vm4, %v13573_v43, %v13569_v31 }
 0x5e6   :  { %v13236_v13 = vpop.xlane.xlu1 %13235 }
 0x5e7   :  { %v13578_v54 = vrot.slane %v13236_v13, %v23457_v57 }
 0x5e8   :  { %v23637_v56 = vpop.xlane.xlu0 %13237 }
 0x5e9   :  { %v13583_v49 = vrot.slane %v23637_v56, %v23468_v47 }
 0x5ee   :  { %v13240_v46 = vpop.xlane.xlu0 %13239 }
 0x5ef   :  { %v13588_v37 = vrot.slane %v13240_v46, %v23402_v14 }
 0x5f0   :  { %v13242_v55 = vpop.xlane.xlu1 %13241 }
 0x5f1   :  { %v13592_v40 = vrot.slane %v13242_v55, %v23405_v32 }
 0x5f6   :  { %v13244_v39 = vpop.xlane.xlu0 %13243 }
 0x5f7   :  { %v13597_v9 = vrot.slane %v13244_v39, %v23413_v27 }
 0x5f8   :  { %v13246_v59 = vpop.xlane.xlu1 %13245 }
 0x5f9   :  { %v13602_v50 = vrot.slane %v13246_v59, %v23424_v21 }
 0x5fe   :  { %v13248_v61 = vpop.xlane.xlu0 %13247 }
 0x5ff   :  { %v13607_v3 = vrot.slane %v13248_v61, %v23435_v33 }
 0x602   :  { %v13250_v8 = vpop.xlane.xlu0 %13249 }
 0x603   :  { %v13612_v23 = vrot.slane %v13250_v8, %v23449_v30 }
 0x606   :  { %v23639_v1 = vpop.xlane.xlu1 %13251 }
 0x607   :  { %v13617_v13 = vrot.slane %v23639_v1, %v23457_v57 }
 0x60a   :  { %v23641_v5 = vpop.xlane.xlu1 %13253 }
 0x60b   :  { %v13622_v55 = vrot.slane %v23641_v5, %v23468_v47 }
 0x60e   :  { %v13256_v58 = vpop.xlane.xlu1 %13255 }
 0x60f   :  { %v13627_v22 = vrot.slane %v13256_v58, %v23402_v14 }
 0x610   :  { %v13258_v19 = vpop.xlane.xlu0 %13257 }
 0x611   :  { %v13631_v60 = vrot.slane %v13258_v19, %v23405_v32  ;;  %v13534_v32 = vrot.slane %v23631_v24, %v23449_v30 }
 0x613   :  { %v13632_v10 = vsel %vm13346_vm12, %v13631_v60, %v13627_v22  ;;  %v13535_v52 = vsel %vm13374_vm4, %v13534_v32, %v13530_v17 }
 0x614   :  { %v13540_v59 = vsel %vm13381_vm6, %v13539_v35, %v13535_v52 }
 0x615   :  { %v13545_v56 = vsel %vm13388_vm8, %v13544_v34, %v13540_v59 }
 0x616   :  { %v13260_v0 = vpop.xlane.xlu0 %13259 }
 0x617   :  { %v13636_v16 = vrot.slane %v13260_v0, %v23413_v27  ;;  %v13593_v27 = vsel %vm13346_vm12, %v13592_v40, %v13588_v37  ;;  %vm13669_vm12 = vcmask 1044484  }
 0x618   :  { %v13262_v11 = vpop.xlane.xlu1 %13261  ;;  %v13598_v14 = vsel %vm13353_vm14, %v13597_v9, %v13593_v27  ;;  %v13670_v19 = vsel %vm13669_vm12, %v13545_v56, %v23626_v42 }
 0x619   :  { %v13641_v25 = vrot.slane %v13262_v11, %v23424_v21  ;;  %v13637_v24 = vsel %vm13353_vm14, %v13636_v16, %v13632_v10  ;;  %v13579_v21 = vsel %vm13381_vm6, %v13578_v54, %v13574_v28  ;;  %vm13671_vm14 = vcmask 1045509  }
 0x61a   :  { %v13584_v38 = vsel %vm13388_vm8, %v13583_v49, %v13579_v21 }
 0x61b   :  { %v13642_v62 = vsel %vm13360_vm0, %v13641_v25, %v13637_v24  ;;  %v13672_v36 = vsel %vm13671_vm14, %v13584_v38, %v13670_v19 }
 0x61e   :  { %v13264_v44 = vpop.xlane.xlu1 %13263 }
 0x61f   :  { %v13646_v63 = vrot.slane %v13264_v44, %v23435_v33  ;;  %v13603_v33 = vsel %vm13360_vm0, %v13602_v50, %v13598_v14  ;;  %vm13673_vm0 = vcmask 1046534  }
 0x620   :  { %v13266_v4 = vpop.xlane.xlu0 %13265  ;;  %v13608_v39 = vsel %vm13367_vm2, %v13607_v3, %v13603_v33 }
 0x621   :  { %v13651_v46 = vrot.slane %v13266_v4, %v23449_v30  ;;  %v13647_v61 = vsel %vm13367_vm2, %v13646_v63, %v13642_v62  ;;  %v13613_v1 = vsel %vm13374_vm4, %v13612_v23, %v13608_v39  ;;  %vm13675_vm2 = vcmask 1047559  }
 0x622   :  { %v13618_v5 = vsel %vm13381_vm6, %v13617_v13, %v13613_v1 }
 0x623   :  { %v13623_v30 = vsel %vm13388_vm8, %v13622_v55, %v13618_v5  ;;  %v13652_v26 = vsel %vm13374_vm4, %v13651_v46, %v13647_v61  ;;  %vm13696_vm4 = vcmask 7168  }
 0x624   :  { %v13674_v20 = vsel %vm13673_vm0, %v13623_v30, %v13672_v36 }
 0x626   :  { %v13268_v8 = vpop.xlane.xlu0 %13267 }
 0x627   :  { %v13656_v29 = vrot.slane %v13268_v8, %v23457_v57 }
 0x628   :  { %v13270_v58 = vpop.xlane.xlu1 %13269 }
 0x629   :  { %v13657_v53 = vsel %vm13381_vm6, %v13656_v29, %v13652_v26  ;;  %v13661_v18 = vrot.slane %v13270_v58, %v23468_v47 }
 0x62b   :  { %v13662_v41 = vsel %vm13388_vm8, %v13661_v18, %v13657_v53 }
 0x62c   :  { %v13676_v57 = vsel %vm13675_vm2, %v13662_v41, %v13674_v20 }
 0x62d   :  { %v13679_v45 = vsel %vm13678_vm1, %v13676_v57, 0.0 }
 0x62e   :  { %13680 = vadd.xlane.f32.xlu0 %v13679_v45 }
 0x6bb   :  { %v13681_v6 = vpop.xlane.xlu0 %13680 }
 0x6bc   :  { %v13689_v0 = vadd.f32 %v15511_v7, %v13681_v6 }
 0x6be   :  { %v15512_v11 = vmul.f32 -1.442695, %v13689_v0 }
 0x6c0   :  { %15939 = vpow2.f32 %v15512_v11 }
 0x6ca   :  { %v15940_v48 = vpop.eup %15939 }
 0x6cb   :  { %v13693_v42 = vadd.f32 1.0, %v15940_v48 }
 0x6cd   :  { %15941 = vrcp.f32 %v13693_v42 }
 0x6d7   :  { %v15942_v12 = vpop.eup %15941 }
 0x6d8   :  { %13697 = vst.msk [vmem:[%s23718_s5] sm:$0xff] %vm13696_vm4, %v15942_v12 }

</bundles_post_ra>
